<compile_context>
chip_gen: v6e
topology: v6e:2x2x1
jax: 0.10.0
libtpu: 0.0.40
codegen_flags: <defaults>
</compile_context>

<pallas_src>
import functools

import jax
import jax.numpy as jnp
import numpy as np
from jax.experimental import pallas as pl
from jax.experimental.pallas import tpu as pltpu


def _round_up(x: int, m: int) -> int:
    return ((x + m - 1) // m) * m


def _pick_tk(kp: int, tk_max: int) -> int:
    """Largest multiple of 128 that divides kp and is <= tk_max."""
    best = 128
    t = 128
    while t <= tk_max:
        if kp % t == 0:
            best = t
        t += 128
    return best


def _select_tiles():
    """Per-generation tile table (VMEM budget re-derived per chip)."""
    vmem_bytes = 64 << 20  # conservative (v7x-sized) fallback
    try:
        info = pltpu.get_tpu_info()
        vmem_bytes = int(getattr(info, "vmem_capacity_bytes", vmem_bytes))
    except Exception:
        pass
    if vmem_bytes >= (100 << 20):
        # v5e / v6e: 128 MiB VMEM, 1 TensorCore.  Full-N weight tiles give
        # fully contiguous 8 KB weight DMA rows and ~14 grid steps on the
        # K=25088 layer.  v5e's scoped-VMEM default is only 16 MiB, so raise
        # the limit explicitly (double-buffered weights peak at ~34 MiB).
        return dict(tm=128, tn=4096, tk_max=2048, vmem_limit=64 << 20)
    # v7x: 64 MiB VMEM, 2 TensorCores.  Keep >= 2 blocks on the parallel N
    # axis so both cores get work, and keep double-buffered weight tiles
    # (<= 2 x ~8.4 MiB) well under the smaller VMEM.
    return dict(tm=128, tn=2048, tk_max=2048, vmem_limit=40 << 20)


# ----------------------------------------------------------------------------
# One-time weight packing (model-load time, NOT per forward call).
# ----------------------------------------------------------------------------
def prepack_vgg_head_params(params, *, matmul_dtype=jnp.bfloat16, cfg=None):
    """Transpose PyTorch-layout (out,in) weights to (K,N), cast to bf16 and
    zero-pad to the per-layer tile grid.  Done once; reused by every forward."""
    if cfg is None:
        cfg = _select_tiles()
    layers = []
    for i in (1, 2, 3):
        w = jnp.asarray(params[f"w{i}"])     # (out_features, in_features)
        b = jnp.asarray(params[f"b{i}"])
        out_f, in_f = w.shape
        kp = _round_up(in_f, 128)
        tn = min(cfg["tn"], _round_up(out_f, 128))
        np_ = _round_up(out_f, tn)
        tk = _pick_tk(kp, cfg["tk_max"])     # divides kp exactly (1792 | 25088, 2048 | 4096)
        w_p = jnp.zeros((kp, np_), matmul_dtype).at[:in_f, :out_f].set(
            w.T.astype(matmul_dtype))
        b_p = jnp.zeros((1, np_), jnp.float32).at[0, :out_f].set(
            b.astype(jnp.float32))
        layers.append(dict(w=w_p, b=b_p, tk=tk, tn=tn,
                           in_features=in_f, out_features=out_f))
    return dict(cfg=cfg, layers=layers, matmul_dtype=matmul_dtype,
                num_classes=params["w3"].shape[0])


# ----------------------------------------------------------------------------
# Fused Linear(+bias)(+ReLU) kernel: tiled (M, N, K) grid, K innermost,
# f32 VMEM accumulator, bf16 MXU inputs, epilogue fuses bias + ReLU + cast.
# ----------------------------------------------------------------------------
def _linear_kernel(x_ref, w_ref, b_ref, o_ref, acc_ref, *, apply_relu):
    @pl.when(pl.program_id(2) == 0)
    def _():
        acc_ref[...] = jnp.zeros_like(acc_ref)

    acc_ref[...] += jnp.dot(x_ref[...], w_ref[...],
                            preferred_element_type=jnp.float32)

    @pl.when(pl.program_id(2) == pl.num_programs(2) - 1)
    def _():
        y = acc_ref[...] + b_ref[...]          # bias add in f32
        if apply_relu:
            y = jnp.maximum(y, 0.0)
        o_ref[...] = y.astype(o_ref.dtype)


def _linear_packed(x_p, w_p, b_p, *, apply_relu, out_dtype, tm, tn, tk,
                   vmem_limit):
    """y = relu?(x_p @ w_p + b_p) on pre-padded operands; returns padded out."""
    mp, kp = x_p.shape
    kw, np_ = w_p.shape
    assert kw == kp and b_p.shape == (1, np_)
    assert mp % tm == 0 and np_ % tn == 0 and kp % tk == 0

    grid = (mp // tm, np_ // tn, kp // tk)
    kernel = functools.partial(_linear_kernel, apply_relu=apply_relu)

    return pl.pallas_call(
        kernel,
        out_shape=jax.ShapeDtypeStruct((mp, np_), out_dtype),
        grid_spec=pltpu.PrefetchScalarGridSpec(
            num_scalar_prefetch=0,
            grid=grid,
            in_specs=[
                pl.BlockSpec((tm, tk), lambda i, j, k: (i, k)),   # activations
                pl.BlockSpec((tk, tn), lambda i, j, k: (k, j)),   # packed weights
                pl.BlockSpec((1, tn), lambda i, j, k: (0, j)),    # packed bias
            ],
            out_specs=pl.BlockSpec((tm, tn), lambda i, j, k: (i, j)),
            scratch_shapes=[pltpu.VMEM((tm, tn), jnp.float32)],
        ),
        compiler_params=pltpu.CompilerParams(
            dimension_semantics=("parallel", "parallel", "arbitrary"),
            vmem_limit_bytes=vmem_limit),
    )(x_p, w_p, b_p)


# ----------------------------------------------------------------------------
# Forward: flatten -> Linear+ReLU -> (Dropout) -> Linear+ReLU -> (Dropout)
#          -> Linear (fc_action).  Chained activations stay padded/bf16.
# ----------------------------------------------------------------------------
def vgg_head_forward(feat, packed):
    cfg = packed["cfg"]
    mdt = packed["matmul_dtype"]

    n = feat.shape[0]
    x = feat.reshape(n, -1)                       # x.view(x.size(0), -1)
    m, k = x.shape
    first = packed["layers"][0]
    assert k == first["in_features"]

    tm = min(cfg["tm"], _round_up(m, 16))         # bf16 sublane pack = 16 rows
    mp = _round_up(m, tm)
    kp0 = first["w"].shape[0]
    x_p = jnp.zeros((mp, kp0), mdt).at[:m, :k].set(x.astype(mdt))

    n_layers = len(packed["layers"])
    for li, layer in enumerate(packed["layers"]):
        last = li == n_layers - 1
        assert x_p.shape[1] == layer["w"].shape[0]   # padded N_i == padded K_{i+1}
        x_p = _linear_packed(
            x_p, layer["w"], layer["b"],
            apply_relu=not last,
            out_dtype=jnp.float32 if last else mdt,  # hidden layers stay bf16
            tm=tm, tn=layer["tn"], tk=layer["tk"],
            vmem_limit=cfg["vmem_limit"])
        # classifier Dropout(p=0.9) / Dropout(p=0.8): identity in eval-mode forward.
        # TODO(synk): training-mode dropout (pltpu.prng_seed / prng_random_bits mask
        # fused into the epilogue) not implemented.

    return x_p[:m, :packed["num_classes"]]


def vgg_head_reference(feat, params, *, matmul_dtype=jnp.bfloat16):
    """Pure-JAX reference with the same bf16-input / f32-accumulate math."""
    def lin(x, w, b):
        return jnp.dot(x.astype(matmul_dtype), w.T.astype(matmul_dtype),
                       preferred_element_type=jnp.float32) + b.astype(jnp.float32)

    x = feat.reshape(feat.shape[0], -1)
    x = jnp.maximum(lin(x, params["w1"], params["b1"]), 0.0).astype(matmul_dtype)
    x = jnp.maximum(lin(x, params["w2"], params["b2"]), 0.0).astype(matmul_dtype)
    return lin(x, params["w3"], params["b3"])


if __name__ == "__main__":
    # Shapes implied by the module: the classifier expects a (N, 512, 7, 7)
    # feature map (flattened to 512*7*7 = 25088), hidden width 4096, 2 classes.
    N, C, Hf, Wf = 2, 512, 7, 7
    hidden, num_classes = 4096, 2
    in_features = C * Hf * Wf

    key = jax.random.PRNGKey(0)
    kx, kw1, kb1, kw2, kb2, kw3, kb3 = jax.random.split(key, 7)

    # Feature map (post-ReLU activations) and PyTorch-layout Linear parameters.
    feat = jnp.maximum(jax.random.normal(kx, (N, C, Hf, Wf), jnp.float32), 0.0)
    params = {
        "w1": 0.01 * jax.random.normal(kw1, (hidden, in_features), jnp.float32),
        "b1": 0.01 * jax.random.normal(kb1, (hidden,), jnp.float32),
        "w2": 0.01 * jax.random.normal(kw2, (hidden, hidden), jnp.float32),
        "b2": 0.01 * jax.random.normal(kb2, (hidden,), jnp.float32),
        "w3": 0.01 * jax.random.normal(kw3, (num_classes, hidden), jnp.float32),
        "b3": 0.01 * jax.random.normal(kb3, (num_classes,), jnp.float32),
    }

    # One-time weight packing (model-load time); reused by every forward call.
    packed = jax.tree_util.tree_map(
        lambda a: jax.block_until_ready(a) if isinstance(a, jax.Array) else a,
        prepack_vgg_head_params(params))

    out = jax.block_until_ready(vgg_head_forward(feat, packed))
    ref = jax.block_until_ready(vgg_head_reference(feat, params))

    assert out.shape == (N, num_classes)
    np.testing.assert_allclose(np.asarray(out), np.asarray(ref),
                               rtol=1e-2, atol=1e-2)
    print("KERNEL_OK")
</pallas_src>

<mosaic_0001>
module attributes {stable_mosaic.version = 11 : i64} {
  func.func @_linear_kernel(%arg0: i32, %arg1: i32, %arg2: i32, %arg3: memref<16x1792xbf16, #tpu.memory_space<vmem>>, %arg4: memref<1792x2048xbf16, #tpu.memory_space<vmem>>, %arg5: memref<1x2048xf32, #tpu.memory_space<vmem>>, %arg6: memref<16x2048xbf16, #tpu.memory_space<vmem>>, %arg7: memref<16x2048xf32, #tpu.memory_space<vmem>>) attributes {dimension_semantics = [#tpu.dimension_semantics<parallel>, #tpu.dimension_semantics<parallel>, #tpu.dimension_semantics<arbitrary>], iteration_bounds = array<i64: 1, 2, 14>, scalar_prefetch = 0 : i64, scratch_operands = 1 : i64, tpu.core_type = #tpu.core_type<tc>, window_params = [{transform_indices = @transform_0, window_bounds = array<i64: 16, 1792>}, {transform_indices = @transform_1, window_bounds = array<i64: 1792, 2048>}, {transform_indices = @transform_2, window_bounds = array<i64: 1, 2048>}, {transform_indices = @transform_3, window_bounds = array<i64: 16, 2048>}]} {
    %c0_i32 = arith.constant 0 : i32
    %0 = arith.cmpi eq, %arg2, %c0_i32 : i32
    %1 = arith.extui %0 : i1 to i32
    %c0_i32_0 = arith.constant 0 : i32
    %2 = arith.cmpi ne, %1, %c0_i32_0 : i32
    scf.if %2 {
      %cst_9 = arith.constant 0.000000e+00 : f32
      %12 = vector.broadcast %cst_9 : f32 to vector<16x2048xf32>
      %c0_10 = arith.constant 0 : index
      %c0_11 = arith.constant 0 : index
      %13 = vector.load %arg7[%c0_10, %c0_11] : memref<16x2048xf32, #tpu.memory_space<vmem>>, vector<16x2048xf32>
      tpu.vector_store %arg7[%c0_10, %c0_11], %12 {strides = array<i32>} : memref<16x2048xf32, #tpu.memory_space<vmem>>, vector<16x2048xf32>,
    } else {
    }
    %c0 = arith.constant 0 : index
    %c0_1 = arith.constant 0 : index
    %3 = vector.load %arg7[%c0, %c0_1] : memref<16x2048xf32, #tpu.memory_space<vmem>>, vector<16x2048xf32>
    %c0_2 = arith.constant 0 : index
    %c0_3 = arith.constant 0 : index
    %4 = vector.load %arg3[%c0_2, %c0_3] : memref<16x1792xbf16, #tpu.memory_space<vmem>>, vector<16x1792xbf16>
    %c0_4 = arith.constant 0 : index
    %c0_5 = arith.constant 0 : index
    %5 = vector.load %arg4[%c0_4, %c0_5] : memref<1792x2048xbf16, #tpu.memory_space<vmem>>, vector<1792x2048xbf16>
    %cst = arith.constant dense<0.000000e+00> : vector<16x2048xf32>
    %6 = tpu.matmul %4, %5, %cst {dimension_numbers = #tpu.dot_dimension_numbers<[1], [0], [0], [1], [0, 0, 1, 1], [], []>} : vector<16x1792xbf16>, vector<1792x2048xbf16>, vector<16x2048xf32> -> vector<16x2048xf32>
    %7 = arith.addf %3, %6 : vector<16x2048xf32>
    %c0_6 = arith.constant 0 : index
    %c0_7 = arith.constant 0 : index
    %8 = vector.load %arg7[%c0_6, %c0_7] : memref<16x2048xf32, #tpu.memory_space<vmem>>, vector<16x2048xf32>
    tpu.vector_store %arg7[%c0_6, %c0_7], %7 {strides = array<i32>} : memref<16x2048xf32, #tpu.memory_space<vmem>>, vector<16x2048xf32>,
    %c13_i32 = arith.constant 13 : i32
    %9 = arith.cmpi eq, %arg2, %c13_i32 : i32
    %10 = arith.extui %9 : i1 to i32
    %c0_i32_8 = arith.constant 0 : i32
    %11 = arith.cmpi ne, %10, %c0_i32_8 : i32
    scf.if %11 {
      %c0_9 = arith.constant 0 : index
      %c0_10 = arith.constant 0 : index
      %12 = vector.load %arg7[%c0_9, %c0_10] : memref<16x2048xf32, #tpu.memory_space<vmem>>, vector<16x2048xf32>
      %c0_11 = arith.constant 0 : index
      %c0_12 = arith.constant 0 : index
      %13 = vector.load %arg5[%c0_11, %c0_12] : memref<1x2048xf32, #tpu.memory_space<vmem>>, vector<1x2048xf32>
      %14 = vector.broadcast %13 : vector<1x2048xf32> to vector<16x2048xf32>
      %15 = arith.addf %12, %14 : vector<16x2048xf32>
      %cst_13 = arith.constant 0.000000e+00 : f32
      %16 = vector.broadcast %cst_13 : f32 to vector<16x2048xf32>
      %17 = arith.maximumf %15, %16 : vector<16x2048xf32>
      %18 = arith.truncf %17 : vector<16x2048xf32> to vector<16x2048xbf16>
      %c0_14 = arith.constant 0 : index
      %c0_15 = arith.constant 0 : index
      %19 = vector.load %arg6[%c0_14, %c0_15] : memref<16x2048xbf16, #tpu.memory_space<vmem>>, vector<16x2048xbf16>
      tpu.vector_store %arg6[%c0_14, %c0_15], %18 {strides = array<i32>} : memref<16x2048xbf16, #tpu.memory_space<vmem>>, vector<16x2048xbf16>,
    } else {
    }
    return
  }
  func.func @transform_0(%arg0: i32, %arg1: i32, %arg2: i32) -> (i32, i32) {
    %c0_i32 = arith.constant 0 : i32
    return %arg0, %arg2 : i32, i32
  }
  func.func @transform_1(%arg0: i32, %arg1: i32, %arg2: i32) -> (i32, i32) {
    %c0_i32 = arith.constant 0 : i32
    return %arg2, %arg1 : i32, i32
  }
  func.func @transform_2(%arg0: i32, %arg1: i32, %arg2: i32) -> (i32, i32) {
    %c0_i32 = arith.constant 0 : i32
    %c0_i32_0 = arith.constant 0 : i32
    return %c0_i32, %arg1 : i32, i32
  }
  func.func @transform_3(%arg0: i32, %arg1: i32, %arg2: i32) -> (i32, i32) {
    %c0_i32 = arith.constant 0 : i32
    return %arg0, %arg1 : i32, i32
  }
}

</mosaic_0001>

<bundles_post_ra>
// kernel: tpu_custom_call.1
= control target key start
LH: loop header
LB: loop body
LE: loop exit
PB: predicated region body
PF: predicated region fallthrough
CT: control target
= control target key end

     0   :  { %s19096_s0 = inlined_call_operand.hbm [shape: bf16[16,25088], index: 0, kind: input, shape index: {}]   ;;  %s19097_s1 = inlined_call_operand.hbm [shape: bf16[25088,4096], index: 1, kind: input, shape index: {}]   ;;  %s19098_s2 = inlined_call_operand.hbm [shape: f32[1,4096], index: 2, kind: input, shape index: {}]   ;;  %s19099_s3 = inlined_call_operand.hbm [shape: bf16[16,4096], index: 3, kind: output, shape index: {}]  }
   0x1   :  { %19108 = sst [smem:[#allocation21_spill]] %s19096_s0 }
   0x2   :  { %19109 = sst [smem:[#allocation22_spill]] %s19097_s1 }
   0x3   :  { %19110 = sst [smem:[#allocation23_spill]] %s19098_s2 }
   0x4   :  { %19111 = sst [smem:[#allocation24_spill]] %s19099_s3 }
   0x5   :  { %8 = vsyncpa [#allocation4], 0 }
   0x6   :  { %10 = vsyncpa [#allocation4 + $0x1], 0 }
   0x7   :  { %11 = vsyncpa [#allocation7], 0 }
   0x8   :  { %13 = vsyncpa [#allocation7 + $0x1], 0 }
   0x9   :  { %14 = vsyncpa [#allocation5], 0 }
   0xa   :  { %16 = vsyncpa [#allocation5 + $0x1], 0  ;;  %s16534_s12 = smov 0   ;;  %s16536_s13 = smov 0  }
   0xb   :  { %s16538_s14 = smov 0   ;;  %s16540_s15 = smov 0  }
   0xc   :  { %s16542_s16 = smov 0   ;;  %s16544_s17 = smov 0  }
   0xd   :  { %s16546_s18 = smov 0   ;;  %s16548_s19 = smov 0  }
   0xe   :  { %s16550_s20 = smov 0   ;;  %s16552_s21 = smov 0  }
   0xf   :  { %s16554_s22 = smov 0   ;;  %s16556_s23 = smov 0  }
  0x10   :  { %s16558_s24 = smov 0   ;;  %s16560_s25 = smov 0  }
  0x11 LB: > { %19112 = sst [smem:[#allocation14_spill]] %s16466_s17  ;;  %s34_s26 = sadd.s32 1, %s16490_s23  ;;  %s16498_s25 = sphi %s16560_s25, %s22_s25   ;;  %s16494_s24 = sphi %s16558_s24, %s19161_s24   ;;  %s16490_s23 = sphi %s16556_s23, %s19149_s23   ;;  %s16486_s22 = sphi %s16554_s22, %s19160_s22   ;;  %s16482_s21 = sphi %s16552_s21, %s19148_s21   ;;  %s16478_s20 = sphi %s16550_s20, %s19159_s20   ;;  %s16474_s19 = sphi %s16548_s19, %s19158_s19   ;;  %s16470_s18 = sphi %s16546_s18, %s19157_s18   ;;  %s16466_s17 = sphi %s16544_s17, %s19156_s17   ;;  %s16462_s16 = sphi %s16542_s16, %s19155_s16   ;;  %s16458_s15 = sphi %s16540_s15, %s19154_s15   ;;  %s16454_s14 = sphi %s16538_s14, %s19153_s14   ;;  %s16450_s13 = sphi %s16536_s13, %s19152_s13   ;;  %s16446_s12 = sphi %s16534_s12, %s19151_s12  }
  0x12   : > { %19113 = sst [smem:[#allocation15_spill]] %s16482_s21  ;;  %p16606_p0 = scmp.ge.s32.totalorder %s34_s26, 14 }
  0x13   : > { %19114 = sst [smem:[#allocation16_spill]] %s16486_s22  ;;  %p58_p1 = scmp.eq.s32.totalorder %s16498_s25, 0 }
  0x14   : > { %19115 = sst [smem:[#allocation17_spill]] %s16490_s23  ;;  %p85_p2 = scmp.ne.s32.totalorder %s16466_s17, %s16462_s16 }
  0x15   : > { %s19163_s26 = smov (%p16606_p0, %s34_s26), 0  ;;  %p16019_p6 = scmp.lt.s32.totalorder %s16498_s25, 28 }
  0x16   : > { %19117 = sst [smem:[#allocation18_spill]] %s19163_s26  ;;  %p87_p3 = por %p85_p2, %p58_p1 }
  0x17   : > { %s16624_s30 = ssub.s32 %s16490_s23, %s19163_s26  ;;  %s193_s4 = sand.u32 1, %s16498_s25  }
  0x18   : > { %p48_p5 = scmp.eq.s32.totalorder %s16624_s30, 0  ;;  %s195_s5 = sand.u32 1, %s16466_s17  }
  0x19   : > { %s15994_s6 = smul.u32 14336, %s195_s5  ;;  %s14135_s7 = sshll.u32 %s16494_s24, 4 }
  0x1a   : > { %s15974_s8 = smul.u32 7168, %s16490_s23  ;;  %p16634_p7 = pnand %p16019_p6, %p87_p3 }
  0x1b   : > { %s197_s11 = scalar_lea.vmem [#allocation6], %s15994_s6  ;;  %s19119_s1 = sld [smem:[#allocation22_spill]] }
  0x1c   : > { %s204_s10 = sadd.s32 %s15974_s8, %s14135_s7  ;;  %s207_s29 = sshll.u32 %s197_s11, 4  ;;  %s208_s29 = int_to_ptr.vmem [resolvable:$true] %s207_s29 }
  0x1d   : > { %s14137_s27 = sshll.u32 %s204_s10, 6  ;;  %p14141_p8 = scmp.ge.s32.totalorder %s16498_s25, 1 }
  0x1e   : > { %s16642_s21 = scalar_lea.sflag [#allocation7], %s193_s4  ;;  %p16264_p9 = pneg %p16634_p7 }
  0x1f   : > { %s16275_s5 = scalar_lea.vmem %s208_s29, 229376  ;;  %s16500_s2 = smov [#allocation6]  }
  0x20   : > { %p16276_p10 = scmp.ne.s32.totalorder %s208_s29, %s16275_s5  ;;  %s16280_s17 = sshll.u32 %s16500_s2, 4  ;;  %s16281_s17 = int_to_ptr.vmem [resolvable:$false] %s16280_s17 }
  0x21   : > { %s206_s22 = scalar_lea.hbm %s19119_s1, %s14137_s27  ;;  %s16282_s6 = scalar_lea.vmem %s16281_s17, 458752 }
  0x22   : > { %p16278_p11 = pnand %p16276_p10, %p16264_p9  ;;  %p16283_p13 = scmp.lt.s32.totalorder %s208_s29, %s16281_s17 }
  0x23   : > { %p16284_p2 = scmp.lt.s32.totalorder %s16282_s6, %s16275_s5 }
  0x24   : > { %p16279_p12 = pneg %p16278_p11 }
  0x25   : > { %p16285_p3 = por %p16284_p2, %p16283_p13 }
  0x27   : > { %p16286_p4 = pnand %p16285_p3, %p16279_p12 }
  0x29   : > { %16289 = shalt.err (!%p16286_p4)
}
  0x2a   : > { %s16501_s3 = smov 2048   ;;  %s16502_s2 = smov 1024  }
  0x2b   : > { %s16503_s17 = smov 64   ;;  %p234_p4 = scmp.lt.s32.totalorder %s16498_s25, 29 }
  0x2c   : > { %16011 = dma.hbm_to_vmem [thread:$0]  (!%p16634_p7), %s206_s22, 229376, %s208_s29, %s16642_s21, %s16501_s3, %s16502_s2, %s16503_s17  }
  0x2d   : > { %p16652_p9 = pnand %p14141_p8, %p234_p4  ;;  %s50_s27 = sadd.s32 1, %s16478_s20 }
  0x2e   : > { %p57_p10 = scmp.ne.s32.totalorder %s16478_s20, %s16474_s19  ;;  %p63_p12 = scmp.ne.s32.totalorder %s16474_s19, %s16470_s18 }
  0x2f   : > { %s16662_s4 = scalar_select %p48_p5, %s16478_s20, %s50_s27  }
  0x30   : > { %p59_p11 = por %p58_p1, %p57_p10  ;;  %s169_s7 = sand.u32 1, %s16478_s20  }
  0x31   : > { %19121 = sst [smem:[#allocation19_spill]] %s16662_s4  ;;  %s15973_s8 = smul.u32 896, %s16490_s23 }
  0x32   : > { %s15993_s10 = smul.u32 112, %s169_s7  ;;  %s19122_s0 = sld [smem:[#allocation21_spill]] }
  0x33   : > { %p16675_p7 = pnand %p16019_p6, %p59_p11  ;;  %s170_s3 = scalar_lea.sflag [#allocation4], %s169_s7 }
  0x34   : > { %s173_s5 = scalar_lea.vmem [#allocation3], %s15993_s10  ;;  %s16504_s17 = smov [#allocation3]  }
  0x35   : > { %s183_s6 = sshll.u32 %s173_s5, 4  ;;  %p16292_p5 = pneg %p16675_p7  ;;  %s184_s6 = int_to_ptr.vmem [resolvable:$true] %s183_s6 }
  0x36   : > { %s16303_s2 = scalar_lea.vmem %s184_s6, 1792  ;;  %s16308_s27 = sshll.u32 %s16504_s17, 4  ;;  %s16309_s27 = int_to_ptr.vmem [resolvable:$false] %s16308_s27 }
  0x37   : > { %p16304_p8 = scmp.ne.s32.totalorder %s184_s6, %s16303_s2  ;;  %p16311_p3 = scmp.lt.s32.totalorder %s184_s6, %s16309_s27 }
  0x38   : > { %s182_s22 = scalar_lea.hbm %s19122_s0, %s15973_s8  ;;  %s16310_s8 = scalar_lea.vmem %s16309_s27, 3584 }
  0x39   : > { %p16306_p13 = pnand %p16304_p8, %p16292_p5  ;;  %p16312_p4 = scmp.lt.s32.totalorder %s16310_s8, %s16303_s2 }
  0x3b   : > { %p16307_p2 = pneg %p16306_p13  ;;  %p16313_p10 = por %p16312_p4, %p16311_p3 }
  0x3d   : > { %p16314_p11 = pnand %p16313_p10, %p16307_p2 }
  0x3f   : > { %16317 = shalt.err (!%p16314_p11)
}
  0x40   : > { %s16505_s11 = smov 12544   ;;  %s16506_s7 = smov 896  }
  0x41   : > { %s16507_s10 = smov 56   ;;  %s16684_s9 = sadd.s32 4294967295, %s16498_s25  }
  0x42   : > { %16008 = dma.hbm_to_vmem [thread:$0]  (!%p16675_p7), %s182_s22, 1792, %s184_s6, %s170_s3, %s16505_s11, %s16506_s7, %s16507_s10  }
  0x43   : > { %s14131_s5 = sadd.s32 4294967294, %s16498_s25   ;;  %p64_p5 = scmp.eq.s32.totalorder %s16684_s9, 0 }
  0x44   : > { %s19124_s2 = sadd.s32 1, %s16494_s24  ;;  %p19126_p13 = scmp.ne.s32.totalorder %s16462_s16, %s16458_s15 }
  0x45   : > { %s19165_s2 = smov (!%p16606_p0, %s19124_s2), %s16494_s24  ;;  %p16696_p8 = por %p64_p5, %p63_p12 }
  0x46   : > { %s19127_s27 = sld [smem:[#allocation14_spill]]  ;;  %p16703_p7 = por %p19126_p13, %p64_p5 }
  0x47   : > { %p39_p2 = scmp.ge.s32.totalorder %s19165_s2, 2  ;;  %s104_s29 = sadd.s32 1, %s16454_s14 }
  0x48   : > { %p111_p3 = scmp.ne.s32.totalorder %s16454_s14, %s16450_s13  ;;  %p117_p4 = scmp.ne.s32.totalorder %s16450_s13, %s16446_s12 }
  0x49   : > { %s19167_s2 = smov (%p39_p2, %s19165_s2), 0  ;;  %p143_p10 = scmp.eq.s32.totalorder %s16684_s9, 27 }
  0x4a   : > { %19129 = sst [smem:[#allocation20_spill]] %s19167_s2  ;;  %p16716_p0 = por %p111_p3, %p58_p1 }
  0x4b   : > { %p16723_p12 = por %p117_p4, %p64_p5  ;;  %s74_s28 = ssub.s32 %s16494_s24, %s19167_s2 }
  0x4c   : > { %s75_s6 = sor.u32 %s74_s28, %s16624_s30  ;;  %p102_p11 = scmp.eq.s32.totalorder %s74_s28, 0 }
  0x4d   : > { %s19131_s18 = scalar_select %p16723_p12, 1, 0 }
  0x4e   : > { %p76_p13 = scmp.eq.s32.totalorder %s75_s6, 0  ;;  %p16731_p2 = por %p143_p10, %p111_p3 }
  0x4f   : > { %s16736_s8 = scalar_select %p102_p11, %s16454_s14, %s104_s29  }
  0x50   : > { %s19132_s3 = scalar_select %p16731_p2, 1, 0 }
  0x51   : > { %s19133_s11 = sadd.s32 1, %s19127_s27  ;;  %p149_p1 = scmp.eq.s32.totalorder %s14131_s5, 27 }
  0x52   : > { %s19169_s27 = smov (!%p76_p13, %s19127_s27), %s19133_s11  ;;  %s219_s7 = sand.u32 1, %s16454_s14  }
  0x53   : > { %s14138_s10 = sshll.u32 %s219_s7, 4  ;;  %s15975_s0 = sshll.u32 %s16494_s24, 8 }
  0x54   : > { %p16748_p5 = por %p149_p1, %p117_p4  ;;  %s19135_s6 = sld [smem:[#allocation23_spill]] }
  0x55   : > { %s221_s23 = scalar_lea.vmem [#allocation8], %s14138_s10  ;;  %p16759_p3 = pnand %p16019_p6, %p16716_p0 }
  0x56   : > { %s19134_s1 = scalar_select %p16748_p5, 1, 0 }
  0x57   : > { %s229_s4 = sshll.u32 %s221_s23, 4  ;;  %p16320_p10 = pneg %p16759_p3  ;;  %s230_s4 = int_to_ptr.vmem [resolvable:$true] %s229_s4 }
  0x58   : > { %s16331_s5 = scalar_lea.vmem %s230_s4, 256  ;;  %s16508_s11 = smov [#allocation8]  }
  0x59   : > { %p16332_p4 = scmp.ne.s32.totalorder %s230_s4, %s16331_s5  ;;  %s16336_s7 = sshll.u32 %s16508_s11, 4  ;;  %s16337_s7 = int_to_ptr.vmem [resolvable:$false] %s16336_s7 }
  0x5a   : > { %s227_s2 = scalar_lea.hbm %s19135_s6, %s15975_s0  ;;  %s16338_s0 = scalar_lea.vmem %s16337_s7, 512 }
  0x5b   : > { %p16334_p11 = pnand %p16332_p4, %p16320_p10  ;;  %p16339_p1 = scmp.lt.s32.totalorder %s230_s4, %s16337_s7 }
  0x5c   : > { %p16340_p5 = scmp.lt.s32.totalorder %s16338_s0, %s16331_s5 }
  0x5d   : > { %p16335_p13 = pneg %p16334_p11 }
  0x5e   : > { %p16341_p2 = por %p16340_p5, %p16339_p1 }
  0x60   : > { %p16342_p12 = pnand %p16341_p2, %p16335_p13 }
  0x62   : > { %16345 = shalt.err (!%p16342_p12)
}
  0x63   : > { %16014 = dma.hbm_to_vmem [thread:$0]  (!%p16759_p3), %s227_s2, 256, %s230_s4, %s16642_s21  }
  0x64   : > { %238 = sbr.rel (%p16652_p9) target bundleno = 2218 (0x8aa), region = 32  ;;  %s240_s23 = sand.u32 (!%p16652_p9), 1, %s16474_s19  }
  0x65   : > { %s15995_s15 = smul.u32 (!%p16652_p9), 112, %s240_s23  ;;  %s241_s10 = scalar_lea.sflag (!%p16652_p9), [#allocation4], %s240_s23 }
  0x67   : > { %s16771_s30 = scalar_lea.vmem (!%p16652_p9), [#allocation3], %s15995_s15 }
  0x69   : > { %16429 = dma.done.wait (%p16696_p8), %s241_s10, 1792  }
  0x6a   : > { %16431 = vsyncadd (%p16696_p8), %s241_s10, 4294965504  ;;  %s249_s28 = sand.u32 1, %s16684_s9   ;;  %s251_s21 = sand.u32 1, %s16462_s16  }
  0x6b   : > { %s15996_s4 = smul.u32 14336, %s251_s21  ;;  %s250_s26 = scalar_lea.sflag [#allocation7], %s249_s28 }
  0x6d   : > { %s16779_s2 = scalar_lea.vmem [#allocation6], %s15996_s4 }
  0x6e   : > { %16433 = dma.done.wait (%p16703_p7), %s250_s26, 229376  }
  0x6f   : > { %16435 = vsyncadd (%p16703_p7), %s250_s26, 4294737920  ;;  %s16786_s6 = sand.u32 1, %s16450_s13   ;;  %p19137_p6 = scmp.ne.s32.totalorder %s19131_s18, 0 }
  0x70   : > { %s14142_s17 = sshll.u32 %s16786_s6, 4 }
  0x71   : > { %s16789_s29 = scalar_lea.vmem [#allocation8], %s14142_s17 }
  0x72   : > { %16437 = dma.done.wait (%p19137_p6), %s250_s26, 256  }
  0x73   : > { %16439 = vsyncadd (%p19137_p6), %s250_s26, 4294967040  ;;  %s14143_s9 = sshll.u32 %s16786_s6, 7  ;;  %s19138_s11 = sld [smem:[#allocation15_spill]] }
  0x74   : > { %s16796_s5 = scalar_lea.vmem [#allocation9], %s14143_s9 }
  0x79   : > { %p14144_p9 = scmp.ne.s32.totalorder %s19138_s11, 0 }
  0x7b   : > { %305 = sbr.rel (%p14144_p9) target bundleno = 145 (0x91), region = 48 }
  0x80   : > { %v16509_v0 = vmov 0.0  }
  0x81   : > { %306 = vst [vmem:[#allocation2 + $0xb0] sm:$0xff] %v16509_v0  ;;  %307 = vst [vmem:[#allocation2] sm:$0xff] %v16509_v0 }
  0x82   : > { %308 = vst [vmem:[#allocation2 + $0xd8] sm:$0xff] %v16509_v0  ;;  %309 = vst [vmem:[#allocation2 + $0x18] sm:$0xff] %v16509_v0 }
  0x83   : > { %310 = vst [vmem:[#allocation2 + $0x50] sm:$0xff] %v16509_v0  ;;  %311 = vst [vmem:[#allocation2 + $0x68] sm:$0xff] %v16509_v0 }
  0x84   : > { %312 = vst [vmem:[#allocation2 + $0x30] sm:$0xff] %v16509_v0  ;;  %313 = vst [vmem:[#allocation2 + $0x48] sm:$0xff] %v16509_v0 }
  0x85   : > { %314 = vst [vmem:[#allocation2 + $0x80] sm:$0xff] %v16509_v0  ;;  %315 = vst [vmem:[#allocation2 + $0x88] sm:$0xff] %v16509_v0 }
  0x86   : > { %316 = vst [vmem:[#allocation2 + $0xe8] sm:$0xff] %v16509_v0  ;;  %317 = vst [vmem:[#allocation2 + $0xb8] sm:$0xff] %v16509_v0 }
  0x87   : > { %318 = vst [vmem:[#allocation2 + $0x60] sm:$0xff] %v16509_v0  ;;  %319 = vst [vmem:[#allocation2 + $0xf0] sm:$0xff] %v16509_v0 }
  0x88   : > { %320 = vst [vmem:[#allocation2 + $0x8] sm:$0xff] %v16509_v0  ;;  %321 = vst [vmem:[#allocation2 + $0x78] sm:$0xff] %v16509_v0 }
  0x89   : > { %322 = vst [vmem:[#allocation2 + $0x38] sm:$0xff] %v16509_v0  ;;  %323 = vst [vmem:[#allocation2 + $0x58] sm:$0xff] %v16509_v0 }
  0x8a   : > { %324 = vst [vmem:[#allocation2 + $0x40] sm:$0xff] %v16509_v0  ;;  %325 = vst [vmem:[#allocation2 + $0xc8] sm:$0xff] %v16509_v0 }
  0x8b   : > { %326 = vst [vmem:[#allocation2 + $0xe0] sm:$0xff] %v16509_v0  ;;  %327 = vst [vmem:[#allocation2 + $0x90] sm:$0xff] %v16509_v0 }
  0x8c   : > { %328 = vst [vmem:[#allocation2 + $0x70] sm:$0xff] %v16509_v0  ;;  %329 = vst [vmem:[#allocation2 + $0xc0] sm:$0xff] %v16509_v0 }
  0x8d   : > { %330 = vst [vmem:[#allocation2 + $0xa8] sm:$0xff] %v16509_v0  ;;  %331 = vst [vmem:[#allocation2 + $0xd0] sm:$0xff] %v16509_v0 }
  0x8e   : > { %332 = vst [vmem:[#allocation2 + $0x10] sm:$0xff] %v16509_v0  ;;  %333 = vst [vmem:[#allocation2 + $0x28] sm:$0xff] %v16509_v0 }
  0x8f   : > { %334 = vst [vmem:[#allocation2 + $0xa0] sm:$0xff] %v16509_v0  ;;  %335 = vst [vmem:[#allocation2 + $0xf8] sm:$0xff] %v16509_v0 }
  0x90   : > { %336 = vst [vmem:[#allocation2 + $0x20] sm:$0xff] %v16509_v0  ;;  %337 = vst [vmem:[#allocation2 + $0x98] sm:$0xff] %v16509_v0 }
  0x91 PF: > { %v496_v1 = vld [vmem:[%s16779_s2 + $0x380] sm:$0xff]  ;;  %s19139_s22 = sld [smem:[#allocation15_spill]] }
  0x92   : > { %v504_v2 = vld [vmem:[%s16779_s2 + $0x3c0] sm:$0xff] }
  0x93   : > { %v752_v3 = vld [vmem:[%s16779_s2 + $0xb80] sm:$0xff]  ;;  %v14272_v4 = vcombine.high %v496_v1, %v504_v2  ;;  %v14271_v6 = vcombine.low %v496_v1, %v504_v2 }
  0x94   : > { %v760_v5 = vld [vmem:[%s16779_s2 + $0xbc0] sm:$0xff] }
  0x95   : > { %v480_v7 = vld [vmem:[%s16779_s2 + $0x300] sm:$0xff]  ;;  %v14528_v9 = vcombine.high %v752_v3, %v760_v5  ;;  %v14527_v10 = vcombine.low %v752_v3, %v760_v5  ;;  %11206 = vmatprep.subr.bf16.mxu0 %v14272_v4 }
  0x96   : > { %v488_v8 = vld [vmem:[%s16779_s2 + $0x340] sm:$0xff]  ;;  %11207 = vmatpush1.bf16.msra.mxu0 %v14271_v6 }
  0x97   : > { %v14256_v11 = vcombine.high %v480_v7, %v488_v8  ;;  %v736_v12 = vld [vmem:[%s16779_s2 + $0xb00] sm:$0xff]  ;;  %11249 = vmatprep.subr.bf16.mxu1 %v14528_v9  ;;  %v14255_v19 = vcombine.low %v480_v7, %v488_v8  ;;  %p15951_p8 = scmp.ne.s32.totalorder %s19139_s22, 13 }
  0x98   : > { %v744_v13 = vld [vmem:[%s16779_s2 + $0xb40] sm:$0xff]  ;;  %11250 = vmatpush1.bf16.msra.mxu1 %v14527_v10 }
  0x99   : > { %v464_v14 = vld [vmem:[%s16779_s2 + $0x280] sm:$0xff]  ;;  %v14512_v15 = vcombine.high %v736_v12, %v744_v13  ;;  %11208 = vmatprep.subr.bf16.mxu0 %v14256_v11  ;;  %v14511_v20 = vcombine.low %v736_v12, %v744_v13 }
  0x9a   : > { %v472_v16 = vld [vmem:[%s16779_s2 + $0x2c0] sm:$0xff]  ;;  %11209 = vmatpush1.bf16.msra.mxu0 %v14255_v19 }
  0x9b   : > { %v720_v17 = vld [vmem:[%s16779_s2 + $0xa80] sm:$0xff]  ;;  %v14240_v21 = vcombine.high %v464_v14, %v472_v16  ;;  %11251 = vmatprep.subr.bf16.mxu1 %v14512_v15  ;;  %v14239_v27 = vcombine.low %v464_v14, %v472_v16 }
  0x9c   : > { %v728_v18 = vld [vmem:[%s16779_s2 + $0xac0] sm:$0xff]  ;;  %11252 = vmatpush1.bf16.msra.mxu1 %v14511_v20 }
  0x9d   : > { %v14496_v22 = vcombine.high %v720_v17, %v728_v18  ;;  %v448_v23 = vld [vmem:[%s16779_s2 + $0x200] sm:$0xff]  ;;  %11210 = vmatprep.subr.bf16.mxu0 %v14240_v21  ;;  %v14495_v28 = vcombine.low %v720_v17, %v728_v18 }
  0x9e   : > { %v456_v24 = vld [vmem:[%s16779_s2 + $0x240] sm:$0xff]  ;;  %11211 = vmatpush1.bf16.msra.mxu0 %v14239_v27 }
  0x9f   : > { %v704_v25 = vld [vmem:[%s16779_s2 + $0xa00] sm:$0xff]  ;;  %v14224_v29 = vcombine.high %v448_v23, %v456_v24  ;;  %11253 = vmatprep.subr.bf16.mxu1 %v14496_v22  ;;  %v14223_v35 = vcombine.low %v448_v23, %v456_v24 }
  0xa0   : > { %v712_v26 = vld [vmem:[%s16779_s2 + $0xa40] sm:$0xff]  ;;  %11254 = vmatpush1.bf16.msra.mxu1 %v14495_v28 }
  0xa1   : > { %v14480_v30 = vcombine.high %v704_v25, %v712_v26  ;;  %v432_v31 = vld [vmem:[%s16779_s2 + $0x180] sm:$0xff]  ;;  %11212 = vmatprep.subr.bf16.mxu0 %v14224_v29  ;;  %v14479_v36 = vcombine.low %v704_v25, %v712_v26 }
  0xa2   : > { %v440_v32 = vld [vmem:[%s16779_s2 + $0x1c0] sm:$0xff]  ;;  %11213 = vmatpush1.bf16.msra.mxu0 %v14223_v35 }
  0xa3   : > { %v688_v33 = vld [vmem:[%s16779_s2 + $0x980] sm:$0xff]  ;;  %v14208_v37 = vcombine.high %v432_v31, %v440_v32  ;;  %11255 = vmatprep.subr.bf16.mxu1 %v14480_v30  ;;  %v14207_v43 = vcombine.low %v432_v31, %v440_v32 }
  0xa4   : > { %v696_v34 = vld [vmem:[%s16779_s2 + $0x9c0] sm:$0xff]  ;;  %11256 = vmatpush1.bf16.msra.mxu1 %v14479_v36 }
  0xa5   : > { %v14464_v38 = vcombine.high %v688_v33, %v696_v34  ;;  %v416_v39 = vld [vmem:[%s16779_s2 + $0x100] sm:$0xff]  ;;  %11214 = vmatprep.subr.bf16.mxu0 %v14208_v37  ;;  %v14463_v44 = vcombine.low %v688_v33, %v696_v34 }
  0xa6   : > { %v424_v40 = vld [vmem:[%s16779_s2 + $0x140] sm:$0xff]  ;;  %11215 = vmatpush1.bf16.msra.mxu0 %v14207_v43 }
  0xa7   : > { %v672_v41 = vld [vmem:[%s16779_s2 + $0x900] sm:$0xff]  ;;  %v14192_v45 = vcombine.high %v416_v39, %v424_v40  ;;  %11257 = vmatprep.subr.bf16.mxu1 %v14464_v38  ;;  %v14191_v51 = vcombine.low %v416_v39, %v424_v40 }
  0xa8   : > { %v680_v42 = vld [vmem:[%s16779_s2 + $0x940] sm:$0xff]  ;;  %11258 = vmatpush1.bf16.msra.mxu1 %v14463_v44 }
  0xa9   : > { %v14448_v46 = vcombine.high %v672_v41, %v680_v42  ;;  %v400_v47 = vld [vmem:[%s16779_s2 + $0x80] sm:$0xff]  ;;  %11216 = vmatprep.subr.bf16.mxu0 %v14192_v45  ;;  %v14447_v53 = vcombine.low %v672_v41, %v680_v42 }
  0xaa   : > { %v408_v48 = vld [vmem:[%s16779_s2 + $0xc0] sm:$0xff]  ;;  %11217 = vmatpush1.bf16.msra.mxu0 %v14191_v51 }
  0xab   : > { %v656_v49 = vld [vmem:[%s16779_s2 + $0x880] sm:$0xff]  ;;  %v14176_v54 = vcombine.high %v400_v47, %v408_v48  ;;  %11259 = vmatprep.subr.bf16.mxu1 %v14448_v46  ;;  %v14175_v61 = vcombine.low %v400_v47, %v408_v48 }
  0xac   : > { %v664_v50 = vld [vmem:[%s16779_s2 + $0x8c0] sm:$0xff]  ;;  %11260 = vmatpush1.bf16.msra.mxu1 %v14447_v53 }
  0xad   : > { %v384_v52 = vld [vmem:[%s16779_s2] sm:$0xff]  ;;  %v14432_v56 = vcombine.high %v656_v49, %v664_v50  ;;  %11218 = vmatprep.subr.bf16.mxu0 %v14176_v54  ;;  %v14431_v62 = vcombine.low %v656_v49, %v664_v50 }
  0xae   : > { %v392_v55 = vld [vmem:[%s16779_s2 + $0x40] sm:$0xff]  ;;  %11219 = vmatpush1.bf16.msra.mxu0 %v14175_v61 }
  0xaf   : > { %v16143_v57 = vld [vmem:[%s16771_s30 + $0x4] ss:$56 sps:$4 sm:$0xff]   ;;  %v14160_v63 = vcombine.high %v384_v52, %v392_v55  ;;  %11261 = vmatprep.subr.bf16.mxu1 %v14432_v56  ;;  %v14159_v5 = vcombine.low %v384_v52, %v392_v55 }
  0xb0   : > { %v640_v58 = vld [vmem:[%s16779_s2 + $0x800] sm:$0xff]  ;;  %11238 = vmatprep.mubr.bf16.mxu0 %v16143_v57  ;;  %11262 = vmatpush1.bf16.msra.mxu1 %v14431_v62 }
  0xb1   : > { %v648_v59 = vld [vmem:[%s16779_s2 + $0x840] sm:$0xff]  ;;  %11220 = vmatprep.subr.bf16.mxu0 %v14160_v63 }
  0xb2   : > { %v16145_v60 = vld [vmem:[%s16771_s30 + $0xc] ss:$56 sps:$4 sm:$0xff]   ;;  %v14416_v0 = vcombine.high %v640_v58, %v648_v59  ;;  %v14415_v6 = vcombine.low %v640_v58, %v648_v59  ;;  %11221 = vmatpush1.bf16.msra.mxu0 %v14159_v5 }
  0xb3   : > { %v624_v1 = vld [vmem:[%s16779_s2 + $0x780] sm:$0xff]  ;;  %11281 = vmatprep.mubr.bf16.mxu1 %v16145_v60 }
  0xb4   : > { %v632_v2 = vld [vmem:[%s16779_s2 + $0x7c0] sm:$0xff]  ;;  %11263 = vmatprep.subr.bf16.mxu1 %v14416_v0 }
  0xb5   : > { %v880_v3 = vld [vmem:[%s16779_s2 + $0xf80] sm:$0xff]  ;;  %v14400_v7 = vcombine.high %v624_v1, %v632_v2  ;;  %v14399_v13 = vcombine.low %v624_v1, %v632_v2  ;;  %11264 = vmatpush1.bf16.msra.mxu1 %v14415_v6 }
  0xb6   : > { %v888_v4 = vld [vmem:[%s16779_s2 + $0xfc0] sm:$0xff] }
  0xb7   : > { %v14656_v8 = vcombine.high %v880_v3, %v888_v4  ;;  %v608_v9 = vld [vmem:[%s16779_s2 + $0x700] sm:$0xff]  ;;  %11222 = vmatprep.subr.bf16.mxu0 %v14400_v7  ;;  %v14655_v14 = vcombine.low %v880_v3, %v888_v4 }
  0xb8   : > { %v616_v10 = vld [vmem:[%s16779_s2 + $0x740] sm:$0xff]  ;;  %11223 = vmatpush2.bf16.msra.mxu0 %v14399_v13 }
  0xb9   : > { %v864_v11 = vld [vmem:[%s16779_s2 + $0xf00] sm:$0xff]  ;;  %v14384_v15 = vcombine.high %v608_v9, %v616_v10  ;;  %11265 = vmatprep.subr.bf16.mxu1 %v14656_v8  ;;  %v14383_v21 = vcombine.low %v608_v9, %v616_v10 }
  0xba   : > { %v872_v12 = vld [vmem:[%s16779_s2 + $0xf40] sm:$0xff]  ;;  %11266 = vmatpush2.bf16.msra.mxu1 %v14655_v14 }
  0xbb   : > { %v14640_v16 = vcombine.high %v864_v11, %v872_v12  ;;  %v592_v17 = vld [vmem:[%s16779_s2 + $0x680] sm:$0xff]  ;;  %11224 = vmatprep.subr.bf16.mxu0 %v14384_v15  ;;  %v14639_v22 = vcombine.low %v864_v11, %v872_v12 }
  0xbc   : > { %v600_v18 = vld [vmem:[%s16779_s2 + $0x6c0] sm:$0xff]  ;;  %11225 = vmatpush2.bf16.msra.mxu0 %v14383_v21 }
  0xbd   : > { %v848_v19 = vld [vmem:[%s16779_s2 + $0xe80] sm:$0xff]  ;;  %v14368_v23 = vcombine.high %v592_v17, %v600_v18  ;;  %11267 = vmatprep.subr.bf16.mxu1 %v14640_v16  ;;  %v14367_v29 = vcombine.low %v592_v17, %v600_v18 }
  0xbe   : > { %v856_v20 = vld [vmem:[%s16779_s2 + $0xec0] sm:$0xff]  ;;  %11268 = vmatpush2.bf16.msra.mxu1 %v14639_v22 }
  0xbf   : > { %v14624_v24 = vcombine.high %v848_v19, %v856_v20  ;;  %v576_v25 = vld [vmem:[%s16779_s2 + $0x600] sm:$0xff]  ;;  %11226 = vmatprep.subr.bf16.mxu0 %v14368_v23  ;;  %v14623_v30 = vcombine.low %v848_v19, %v856_v20 }
  0xc0   : > { %v584_v26 = vld [vmem:[%s16779_s2 + $0x640] sm:$0xff]  ;;  %11227 = vmatpush2.bf16.msra.mxu0 %v14367_v29 }
  0xc1   : > { %v832_v27 = vld [vmem:[%s16779_s2 + $0xe00] sm:$0xff]  ;;  %v14352_v31 = vcombine.high %v576_v25, %v584_v26  ;;  %11269 = vmatprep.subr.bf16.mxu1 %v14624_v24  ;;  %v14351_v37 = vcombine.low %v576_v25, %v584_v26 }
  0xc2   : > { %v840_v28 = vld [vmem:[%s16779_s2 + $0xe40] sm:$0xff]  ;;  %11270 = vmatpush2.bf16.msra.mxu1 %v14623_v30 }
  0xc3   : > { %v14608_v32 = vcombine.high %v832_v27, %v840_v28  ;;  %v560_v33 = vld [vmem:[%s16779_s2 + $0x580] sm:$0xff]  ;;  %11228 = vmatprep.subr.bf16.mxu0 %v14352_v31  ;;  %v14607_v38 = vcombine.low %v832_v27, %v840_v28 }
  0xc4   : > { %v568_v34 = vld [vmem:[%s16779_s2 + $0x5c0] sm:$0xff]  ;;  %11229 = vmatpush2.bf16.msra.mxu0 %v14351_v37 }
  0xc5   : > { %v816_v35 = vld [vmem:[%s16779_s2 + $0xd80] sm:$0xff]  ;;  %v14336_v39 = vcombine.high %v560_v33, %v568_v34  ;;  %11271 = vmatprep.subr.bf16.mxu1 %v14608_v32  ;;  %v14335_v45 = vcombine.low %v560_v33, %v568_v34 }
  0xc6   : > { %v824_v36 = vld [vmem:[%s16779_s2 + $0xdc0] sm:$0xff]  ;;  %11272 = vmatpush2.bf16.msra.mxu1 %v14607_v38 }
  0xc7   : > { %v544_v40 = vld [vmem:[%s16779_s2 + $0x500] sm:$0xff]  ;;  %v14592_v41 = vcombine.high %v816_v35, %v824_v36  ;;  %11230 = vmatprep.subr.bf16.mxu0 %v14336_v39  ;;  %v14591_v46 = vcombine.low %v816_v35, %v824_v36 }
  0xc8   : > { %v552_v42 = vld [vmem:[%s16779_s2 + $0x540] sm:$0xff]  ;;  %11231 = vmatpush2.bf16.msra.mxu0 %v14335_v45 }
  0xc9   : > { %v800_v43 = vld [vmem:[%s16779_s2 + $0xd00] sm:$0xff]  ;;  %v14320_v47 = vcombine.high %v544_v40, %v552_v42  ;;  %11273 = vmatprep.subr.bf16.mxu1 %v14592_v41  ;;  %v14319_v53 = vcombine.low %v544_v40, %v552_v42 }
  0xca   : > { %v808_v44 = vld [vmem:[%s16779_s2 + $0xd40] sm:$0xff]  ;;  %11274 = vmatpush2.bf16.msra.mxu1 %v14591_v46 }
  0xcb   : > { %v14576_v48 = vcombine.high %v800_v43, %v808_v44  ;;  %v528_v49 = vld [vmem:[%s16779_s2 + $0x480] sm:$0xff]  ;;  %11232 = vmatprep.subr.bf16.mxu0 %v14320_v47  ;;  %v14575_v54 = vcombine.low %v800_v43, %v808_v44 }
  0xcc   : > { %v536_v50 = vld [vmem:[%s16779_s2 + $0x4c0] sm:$0xff]  ;;  %11233 = vmatpush2.bf16.msra.mxu0 %v14319_v53 }
  0xcd   : > { %v784_v51 = vld [vmem:[%s16779_s2 + $0xc80] sm:$0xff]  ;;  %v14304_v55 = vcombine.high %v528_v49, %v536_v50  ;;  %11275 = vmatprep.subr.bf16.mxu1 %v14576_v48  ;;  %v14303_v61 = vcombine.low %v528_v49, %v536_v50 }
  0xce   : > { %v792_v52 = vld [vmem:[%s16779_s2 + $0xcc0] sm:$0xff]  ;;  %11276 = vmatpush2.bf16.msra.mxu1 %v14575_v54 }
  0xcf   : > { %v14560_v56 = vcombine.high %v784_v51, %v792_v52  ;;  %v512_v57 = vld [vmem:[%s16779_s2 + $0x400] sm:$0xff]  ;;  %11234 = vmatprep.subr.bf16.mxu0 %v14304_v55  ;;  %v14559_v62 = vcombine.low %v784_v51, %v792_v52 }
  0xd0   : > { %v520_v58 = vld [vmem:[%s16779_s2 + $0x440] sm:$0xff]  ;;  %11235 = vmatpush2.bf16.msra.mxu0 %v14303_v61 }
  0xd1   : > { %v768_v59 = vld [vmem:[%s16779_s2 + $0xc00] sm:$0xff]  ;;  %v14288_v63 = vcombine.high %v512_v57, %v520_v58  ;;  %11277 = vmatprep.subr.bf16.mxu1 %v14560_v56  ;;  %v14287_v5 = vcombine.low %v512_v57, %v520_v58 }
  0xd2   : > { %v776_v60 = vld [vmem:[%s16779_s2 + $0xc40] sm:$0xff]  ;;  %11278 = vmatpush2.bf16.msra.mxu1 %v14559_v62 }
  0xd3   : > { %v14544_v0 = vcombine.high %v768_v59, %v776_v60  ;;  %v1008_v1 = vld [vmem:[%s16779_s2 + $0x1380] sm:$0xff]  ;;  %11236 = vmatprep.subr.bf16.mxu0 %v14288_v63  ;;  %v14543_v6 = vcombine.low %v768_v59, %v776_v60 }
  0xd4   : > { %v1016_v2 = vld [vmem:[%s16779_s2 + $0x13c0] sm:$0xff]  ;;  %11237 = vmatpush2.bf16.msra.mxu0 %v14287_v5 }
  0xd5   : > { %v1264_v3 = vld [vmem:[%s16779_s2 + $0x1b80] sm:$0xff]  ;;  %v14784_v7 = vcombine.high %v1008_v1, %v1016_v2  ;;  %11279 = vmatprep.subr.bf16.mxu1 %v14544_v0  ;;  %v14783_v15 = vcombine.low %v1008_v1, %v1016_v2 }
  0xd6   : > { %v1272_v4 = vld [vmem:[%s16779_s2 + $0x1bc0] sm:$0xff]  ;;  %11280 = vmatpush2.bf16.msra.mxu1 %v14543_v6 }
  0xd7   : > { %v15040_v8 = vcombine.high %v1264_v3, %v1272_v4  ;;  %v992_v9 = vld [vmem:[%s16779_s2 + $0x1300] sm:$0xff]  ;;  %11292 = vmatprep.subr.bf16.mxu0 %v14784_v7  ;;  %v15039_v16 = vcombine.low %v1264_v3, %v1272_v4 }
  0xd8   : > { %v1000_v10 = vld [vmem:[%s16779_s2 + $0x1340] sm:$0xff] }
  0xd9   : > { %v16147_v11 = vld [vmem:[%s16771_s30] ss:$56 sps:$4 sm:$0xff]   ;;  %v14768_v17 = vcombine.high %v992_v9, %v1000_v10  ;;  %11335 = vmatprep.subr.bf16.mxu1 %v15040_v8  ;;  %v16149_v21 = vld [vmem:[%s16771_s30 + $0x14] ss:$56 sps:$4 sm:$0xff]   ;;  %v14767_v25 = vcombine.low %v992_v9, %v1000_v10 }
  0xda   : > { %v1248_v12 = vld [vmem:[%s16779_s2 + $0x1b00] sm:$0xff]  ;;  %11239 = vmatmul.mubr.bf16.vlgmr.msra.gmra.mxu0 %v16147_v11 }
  0xdb   : > { %v1256_v13 = vld [vmem:[%s16779_s2 + $0x1b40] sm:$0xff]  ;;  %11293 = vmatpush1.bf16.msra.mxu0 %v14783_v15  ;;  %11324 = vmatprep.mubr.bf16.mxu0 %v16149_v21 }
  0xdc   : > { %v16148_v14 = vld [vmem:[%s16771_s30 + $0x8] ss:$56 sps:$4 sm:$0xff]   ;;  %v15024_v18 = vcombine.high %v1248_v12, %v1256_v13  ;;  %v16151_v24 = vld [vmem:[%s16771_s30 + $0x1c] ss:$56 sps:$4 sm:$0xff]   ;;  %11294 = vmatprep.subr.bf16.mxu0 %v14768_v17  ;;  %v15023_v26 = vcombine.low %v1248_v12, %v1256_v13 }
  0xdd   : > { %v976_v19 = vld [vmem:[%s16779_s2 + $0x1280] sm:$0xff]  ;;  %11282 = vmatmul.mubr.bf16.vlgmr.msra.gmra.mxu1 %v16148_v14 }
  0xde   : > { %v984_v20 = vld [vmem:[%s16779_s2 + $0x12c0] sm:$0xff]  ;;  %11336 = vmatpush1.bf16.msra.mxu1 %v15039_v16  ;;  %11367 = vmatprep.mubr.bf16.mxu1 %v16151_v24 }
  0xdf   : > { %v1232_v22 = vld [vmem:[%s16779_s2 + $0x1a80] sm:$0xff]  ;;  %v14752_v27 = vcombine.high %v976_v19, %v984_v20  ;;  %11337 = vmatprep.subr.bf16.mxu1 %v15024_v18  ;;  %11295 = vmatpush1.bf16.msra.mxu0 %v14767_v25  ;;  %v14751_v33 = vcombine.low %v976_v19, %v984_v20 }
  0xe0   : > { %v1240_v23 = vld [vmem:[%s16779_s2 + $0x1ac0] sm:$0xff] }
  0xe1   : > { %v960_v28 = vld [vmem:[%s16779_s2 + $0x1200] sm:$0xff]  ;;  %v15008_v29 = vcombine.high %v1232_v22, %v1240_v23  ;;  %11296 = vmatprep.subr.bf16.mxu0 %v14752_v27  ;;  %v15007_v34 = vcombine.low %v1232_v22, %v1240_v23 }
  0xe2   : > { %v968_v30 = vld [vmem:[%s16779_s2 + $0x1240] sm:$0xff]  ;;  %11338 = vmatpush1.bf16.msra.mxu1 %v15023_v26 }
  0xe3   : > { %v1216_v31 = vld [vmem:[%s16779_s2 + $0x1a00] sm:$0xff]  ;;  %v14736_v35 = vcombine.high %v960_v28, %v968_v30  ;;  %11339 = vmatprep.subr.bf16.mxu1 %v15008_v29  ;;  %11297 = vmatpush1.bf16.msra.mxu0 %v14751_v33  ;;  %v14735_v41 = vcombine.low %v960_v28, %v968_v30 }
  0xe4   : > { %v1224_v32 = vld [vmem:[%s16779_s2 + $0x1a40] sm:$0xff] }
  0xe5   : > { %v14992_v36 = vcombine.high %v1216_v31, %v1224_v32  ;;  %v944_v37 = vld [vmem:[%s16779_s2 + $0x1180] sm:$0xff]  ;;  %11298 = vmatprep.subr.bf16.mxu0 %v14736_v35  ;;  %v14991_v42 = vcombine.low %v1216_v31, %v1224_v32 }
  0xe6   : > { %v952_v38 = vld [vmem:[%s16779_s2 + $0x11c0] sm:$0xff]  ;;  %11340 = vmatpush1.bf16.msra.mxu1 %v15007_v34 }
  0xe7   : > { %v1200_v39 = vld [vmem:[%s16779_s2 + $0x1980] sm:$0xff]  ;;  %v14720_v43 = vcombine.high %v944_v37, %v952_v38  ;;  %11341 = vmatprep.subr.bf16.mxu1 %v14992_v36  ;;  %11299 = vmatpush1.bf16.msra.mxu0 %v14735_v41  ;;  %v14719_v49 = vcombine.low %v944_v37, %v952_v38 }
  0xe8   : > { %v1208_v40 = vld [vmem:[%s16779_s2 + $0x19c0] sm:$0xff] }
  0xe9   : > { %v14976_v44 = vcombine.high %v1200_v39, %v1208_v40  ;;  %v928_v45 = vld [vmem:[%s16779_s2 + $0x1100] sm:$0xff]  ;;  %11300 = vmatprep.subr.bf16.mxu0 %v14720_v43  ;;  %v14975_v50 = vcombine.low %v1200_v39, %v1208_v40 }
  0xea   : > { %v936_v46 = vld [vmem:[%s16779_s2 + $0x1140] sm:$0xff]  ;;  %11342 = vmatpush1.bf16.msra.mxu1 %v14991_v42 }
  0xeb   : > { %v1184_v47 = vld [vmem:[%s16779_s2 + $0x1900] sm:$0xff]  ;;  %v14704_v51 = vcombine.high %v928_v45, %v936_v46  ;;  %11343 = vmatprep.subr.bf16.mxu1 %v14976_v44  ;;  %11301 = vmatpush1.bf16.msra.mxu0 %v14719_v49  ;;  %v14703_v57 = vcombine.low %v928_v45, %v936_v46 }
  0xec   : > { %v1192_v48 = vld [vmem:[%s16779_s2 + $0x1940] sm:$0xff] }
  0xed   : > { %v14960_v52 = vcombine.high %v1184_v47, %v1192_v48  ;;  %v912_v53 = vld [vmem:[%s16779_s2 + $0x1080] sm:$0xff]  ;;  %11302 = vmatprep.subr.bf16.mxu0 %v14704_v51  ;;  %v14959_v58 = vcombine.low %v1184_v47, %v1192_v48 }
  0xee   : > { %v920_v54 = vld [vmem:[%s16779_s2 + $0x10c0] sm:$0xff]  ;;  %11344 = vmatpush1.bf16.msra.mxu1 %v14975_v50 }
  0xef   : > { %v1168_v55 = vld [vmem:[%s16779_s2 + $0x1880] sm:$0xff]  ;;  %v14688_v59 = vcombine.high %v912_v53, %v920_v54  ;;  %11345 = vmatprep.subr.bf16.mxu1 %v14960_v52  ;;  %11303 = vmatpush1.bf16.msra.mxu0 %v14703_v57  ;;  %v14687_v1 = vcombine.low %v912_v53, %v920_v54 }
  0xf0   : > { %v1176_v56 = vld [vmem:[%s16779_s2 + $0x18c0] sm:$0xff] }
  0xf1   : > { %v14944_v60 = vcombine.high %v1168_v55, %v1176_v56  ;;  %v896_v61 = vld [vmem:[%s16779_s2 + $0x1000] sm:$0xff]  ;;  %11304 = vmatprep.subr.bf16.mxu0 %v14688_v59  ;;  %v14943_v2 = vcombine.low %v1168_v55, %v1176_v56 }
  0xf2   : > { %v904_v62 = vld [vmem:[%s16779_s2 + $0x1040] sm:$0xff]  ;;  %11346 = vmatpush1.bf16.msra.mxu1 %v14959_v58 }
  0xf3   : > { %v1152_v63 = vld [vmem:[%s16779_s2 + $0x1800] sm:$0xff]  ;;  %v14672_v3 = vcombine.high %v896_v61, %v904_v62  ;;  %11347 = vmatprep.subr.bf16.mxu1 %v14944_v60  ;;  %11305 = vmatpush1.bf16.msra.mxu0 %v14687_v1  ;;  %v14671_v9 = vcombine.low %v896_v61, %v904_v62 }
  0xf4   : > { %v1160_v0 = vld [vmem:[%s16779_s2 + $0x1840] sm:$0xff] }
  0xf5   : > { %v14928_v4 = vcombine.high %v1152_v63, %v1160_v0  ;;  %v1136_v5 = vld [vmem:[%s16779_s2 + $0x1780] sm:$0xff]  ;;  %11306 = vmatprep.subr.bf16.mxu0 %v14672_v3  ;;  %v14927_v10 = vcombine.low %v1152_v63, %v1160_v0 }
  0xf6   : > { %v1144_v6 = vld [vmem:[%s16779_s2 + $0x17c0] sm:$0xff]  ;;  %11348 = vmatpush1.bf16.msra.mxu1 %v14943_v2 }
  0xf7   : > { %v1392_v7 = vld [vmem:[%s16779_s2 + $0x1f80] sm:$0xff]  ;;  %v14912_v11 = vcombine.high %v1136_v5, %v1144_v6  ;;  %11349 = vmatprep.subr.bf16.mxu1 %v14928_v4  ;;  %11307 = vmatpush1.bf16.msra.mxu0 %v14671_v9  ;;  %v14911_v17 = vcombine.low %v1136_v5, %v1144_v6 }
  0xf8   : > { %v1400_v8 = vld [vmem:[%s16779_s2 + $0x1fc0] sm:$0xff] }
  0xf9   : > { %v15168_v12 = vcombine.high %v1392_v7, %v1400_v8  ;;  %v1120_v13 = vld [vmem:[%s16779_s2 + $0x1700] sm:$0xff]  ;;  %11308 = vmatprep.subr.bf16.mxu0 %v14912_v11  ;;  %v15167_v18 = vcombine.low %v1392_v7, %v1400_v8 }
  0xfa   : > { %v1128_v14 = vld [vmem:[%s16779_s2 + $0x1740] sm:$0xff]  ;;  %11350 = vmatpush1.bf16.msra.mxu1 %v14927_v10 }
  0xfb   : > { %v1376_v15 = vld [vmem:[%s16779_s2 + $0x1f00] sm:$0xff]  ;;  %v14896_v19 = vcombine.high %v1120_v13, %v1128_v14  ;;  %11351 = vmatprep.subr.bf16.mxu1 %v15168_v12  ;;  %11309 = vmatpush2.bf16.msra.mxu0 %v14911_v17  ;;  %v14895_v25 = vcombine.low %v1120_v13, %v1128_v14 }
  0xfc   : > { %v1384_v16 = vld [vmem:[%s16779_s2 + $0x1f40] sm:$0xff] }
  0xfd   : > { %v15152_v20 = vcombine.high %v1376_v15, %v1384_v16  ;;  %v1104_v21 = vld [vmem:[%s16779_s2 + $0x1680] sm:$0xff]  ;;  %11310 = vmatprep.subr.bf16.mxu0 %v14896_v19  ;;  %v15151_v26 = vcombine.low %v1376_v15, %v1384_v16 }
  0xfe   : > { %v1112_v22 = vld [vmem:[%s16779_s2 + $0x16c0] sm:$0xff]  ;;  %11352 = vmatpush2.bf16.msra.mxu1 %v15167_v18 }
  0xff   : > { %v1360_v23 = vld [vmem:[%s16779_s2 + $0x1e80] sm:$0xff]  ;;  %v14880_v27 = vcombine.high %v1104_v21, %v1112_v22  ;;  %11353 = vmatprep.subr.bf16.mxu1 %v15152_v20  ;;  %11311 = vmatpush2.bf16.msra.mxu0 %v14895_v25  ;;  %v14879_v33 = vcombine.low %v1104_v21, %v1112_v22 }
 0x100   : > { %v1368_v24 = vld [vmem:[%s16779_s2 + $0x1ec0] sm:$0xff] }
 0x101   : > { %v15136_v28 = vcombine.high %v1360_v23, %v1368_v24  ;;  %v1088_v29 = vld [vmem:[%s16779_s2 + $0x1600] sm:$0xff]  ;;  %11312 = vmatprep.subr.bf16.mxu0 %v14880_v27  ;;  %v15135_v34 = vcombine.low %v1360_v23, %v1368_v24 }
 0x102   : > { %v1096_v30 = vld [vmem:[%s16779_s2 + $0x1640] sm:$0xff]  ;;  %11354 = vmatpush2.bf16.msra.mxu1 %v15151_v26 }
 0x103   : > { %v1344_v31 = vld [vmem:[%s16779_s2 + $0x1e00] sm:$0xff]  ;;  %v14864_v35 = vcombine.high %v1088_v29, %v1096_v30  ;;  %11355 = vmatprep.subr.bf16.mxu1 %v15136_v28  ;;  %11313 = vmatpush2.bf16.msra.mxu0 %v14879_v33  ;;  %v14863_v41 = vcombine.low %v1088_v29, %v1096_v30 }
 0x104   : > { %v1352_v32 = vld [vmem:[%s16779_s2 + $0x1e40] sm:$0xff] }
 0x105   : > { %v15120_v36 = vcombine.high %v1344_v31, %v1352_v32  ;;  %v1072_v37 = vld [vmem:[%s16779_s2 + $0x1580] sm:$0xff]  ;;  %11314 = vmatprep.subr.bf16.mxu0 %v14864_v35  ;;  %v15119_v42 = vcombine.low %v1344_v31, %v1352_v32 }
 0x106   : > { %v1080_v38 = vld [vmem:[%s16779_s2 + $0x15c0] sm:$0xff]  ;;  %11356 = vmatpush2.bf16.msra.mxu1 %v15135_v34 }
 0x107   : > { %v1328_v39 = vld [vmem:[%s16779_s2 + $0x1d80] sm:$0xff]  ;;  %v14848_v43 = vcombine.high %v1072_v37, %v1080_v38  ;;  %11357 = vmatprep.subr.bf16.mxu1 %v15120_v36  ;;  %11315 = vmatpush2.bf16.msra.mxu0 %v14863_v41  ;;  %v14847_v49 = vcombine.low %v1072_v37, %v1080_v38 }
 0x108   : > { %v1336_v40 = vld [vmem:[%s16779_s2 + $0x1dc0] sm:$0xff] }
 0x109   : > { %v15104_v44 = vcombine.high %v1328_v39, %v1336_v40  ;;  %v1056_v45 = vld [vmem:[%s16779_s2 + $0x1500] sm:$0xff]  ;;  %11316 = vmatprep.subr.bf16.mxu0 %v14848_v43  ;;  %v15103_v50 = vcombine.low %v1328_v39, %v1336_v40 }
 0x10a   : > { %v1064_v46 = vld [vmem:[%s16779_s2 + $0x1540] sm:$0xff]  ;;  %11358 = vmatpush2.bf16.msra.mxu1 %v15119_v42 }
 0x10b   : > { %v1312_v47 = vld [vmem:[%s16779_s2 + $0x1d00] sm:$0xff]  ;;  %v14832_v51 = vcombine.high %v1056_v45, %v1064_v46  ;;  %11359 = vmatprep.subr.bf16.mxu1 %v15104_v44  ;;  %11317 = vmatpush2.bf16.msra.mxu0 %v14847_v49  ;;  %v14831_v57 = vcombine.low %v1056_v45, %v1064_v46 }
 0x10c   : > { %v1320_v48 = vld [vmem:[%s16779_s2 + $0x1d40] sm:$0xff] }
 0x10d   : > { %v15088_v52 = vcombine.high %v1312_v47, %v1320_v48  ;;  %v1040_v53 = vld [vmem:[%s16779_s2 + $0x1480] sm:$0xff]  ;;  %11318 = vmatprep.subr.bf16.mxu0 %v14832_v51  ;;  %v15087_v58 = vcombine.low %v1312_v47, %v1320_v48 }
 0x10e   : > { %v1048_v54 = vld [vmem:[%s16779_s2 + $0x14c0] sm:$0xff]  ;;  %11360 = vmatpush2.bf16.msra.mxu1 %v15103_v50 }
 0x10f   : > { %v1296_v55 = vld [vmem:[%s16779_s2 + $0x1c80] sm:$0xff]  ;;  %v14816_v59 = vcombine.high %v1040_v53, %v1048_v54  ;;  %11361 = vmatprep.subr.bf16.mxu1 %v15088_v52  ;;  %11319 = vmatpush2.bf16.msra.mxu0 %v14831_v57  ;;  %v14815_v1 = vcombine.low %v1040_v53, %v1048_v54 }
 0x110   : > { %v1304_v56 = vld [vmem:[%s16779_s2 + $0x1cc0] sm:$0xff] }
 0x111   : > { %v15072_v60 = vcombine.high %v1296_v55, %v1304_v56  ;;  %v1024_v61 = vld [vmem:[%s16779_s2 + $0x1400] sm:$0xff]  ;;  %11320 = vmatprep.subr.bf16.mxu0 %v14816_v59  ;;  %v15071_v2 = vcombine.low %v1296_v55, %v1304_v56 }
 0x112   : > { %v1032_v62 = vld [vmem:[%s16779_s2 + $0x1440] sm:$0xff]  ;;  %11362 = vmatpush2.bf16.msra.mxu1 %v15087_v58 }
 0x113   : > { %v1280_v63 = vld [vmem:[%s16779_s2 + $0x1c00] sm:$0xff]  ;;  %v14800_v3 = vcombine.high %v1024_v61, %v1032_v62  ;;  %11363 = vmatprep.subr.bf16.mxu1 %v15072_v60  ;;  %11321 = vmatpush2.bf16.msra.mxu0 %v14815_v1  ;;  %v14799_v9 = vcombine.low %v1024_v61, %v1032_v62 }
 0x114   : > { %v1288_v0 = vld [vmem:[%s16779_s2 + $0x1c40] sm:$0xff] }
 0x115   : > { %v15056_v4 = vcombine.high %v1280_v63, %v1288_v0  ;;  %v1520_v5 = vld [vmem:[%s16779_s2 + $0x2380] sm:$0xff]  ;;  %11322 = vmatprep.subr.bf16.mxu0 %v14800_v3  ;;  %v15055_v10 = vcombine.low %v1280_v63, %v1288_v0 }
 0x116   : > { %v1528_v6 = vld [vmem:[%s16779_s2 + $0x23c0] sm:$0xff]  ;;  %11364 = vmatpush2.bf16.msra.mxu1 %v15071_v2 }
 0x117   : > { %v1776_v7 = vld [vmem:[%s16779_s2 + $0x2b80] sm:$0xff]  ;;  %v15296_v11 = vcombine.high %v1520_v5, %v1528_v6  ;;  %11365 = vmatprep.subr.bf16.mxu1 %v15056_v4  ;;  %11323 = vmatpush2.bf16.msra.mxu0 %v14799_v9  ;;  %v15295_v19 = vcombine.low %v1520_v5, %v1528_v6 }
 0x118   : > { %v1784_v8 = vld [vmem:[%s16779_s2 + $0x2bc0] sm:$0xff] }
 0x119   : > { %v15552_v12 = vcombine.high %v1776_v7, %v1784_v8  ;;  %v1504_v13 = vld [vmem:[%s16779_s2 + $0x2300] sm:$0xff]  ;;  %11378 = vmatprep.subr.bf16.mxu0 %v15296_v11  ;;  %v15551_v20 = vcombine.low %v1776_v7, %v1784_v8 }
 0x11a   : > { %v1512_v14 = vld [vmem:[%s16779_s2 + $0x2340] sm:$0xff]  ;;  %11366 = vmatpush2.bf16.msra.mxu1 %v15055_v10 }
 0x11b   : > { %v16153_v15 = vld [vmem:[%s16771_s30 + $0x10] ss:$56 sps:$4 sm:$0xff]   ;;  %v15280_v21 = vcombine.high %v1504_v13, %v1512_v14  ;;  %11421 = vmatprep.subr.bf16.mxu1 %v15552_v12  ;;  %v16155_v25 = vld [vmem:[%s16771_s30 + $0x24] ss:$56 sps:$4 sm:$0xff]   ;;  %v15279_v29 = vcombine.low %v1504_v13, %v1512_v14 }
 0x11c   : > { %v1760_v16 = vld [vmem:[%s16779_s2 + $0x2b00] sm:$0xff]  ;;  %11325 = vmatmul.mubr.bf16.vlgmr.msra.gmra.mxu0 %v16153_v15 }
 0x11d   : > { %v1768_v17 = vld [vmem:[%s16779_s2 + $0x2b40] sm:$0xff]  ;;  %11379 = vmatpush1.bf16.msra.mxu0 %v15295_v19  ;;  %11410 = vmatprep.mubr.bf16.mxu0 %v16155_v25 }
 0x11e   : > { %v16154_v18 = vld [vmem:[%s16771_s30 + $0x18] ss:$56 sps:$4 sm:$0xff]   ;;  %v15536_v22 = vcombine.high %v1760_v16, %v1768_v17  ;;  %v16157_v28 = vld [vmem:[%s16771_s30 + $0x2c] ss:$56 sps:$4 sm:$0xff]   ;;  %11380 = vmatprep.subr.bf16.mxu0 %v15280_v21  ;;  %v15535_v30 = vcombine.low %v1760_v16, %v1768_v17 }
 0x11f   : > { %v1488_v23 = vld [vmem:[%s16779_s2 + $0x2280] sm:$0xff]  ;;  %11368 = vmatmul.mubr.bf16.vlgmr.msra.gmra.mxu1 %v16154_v18 }
 0x120   : > { %v1496_v24 = vld [vmem:[%s16779_s2 + $0x22c0] sm:$0xff]  ;;  %11422 = vmatpush1.bf16.msra.mxu1 %v15551_v20  ;;  %11453 = vmatprep.mubr.bf16.mxu1 %v16157_v28 }
 0x121   : > { %v1744_v26 = vld [vmem:[%s16779_s2 + $0x2a80] sm:$0xff]  ;;  %v15264_v31 = vcombine.high %v1488_v23, %v1496_v24  ;;  %11423 = vmatprep.subr.bf16.mxu1 %v15536_v22  ;;  %11381 = vmatpush1.bf16.msra.mxu0 %v15279_v29  ;;  %v15263_v37 = vcombine.low %v1488_v23, %v1496_v24 }
 0x122   : > { %v1752_v27 = vld [vmem:[%s16779_s2 + $0x2ac0] sm:$0xff] }
 0x123   : > { %v15520_v32 = vcombine.high %v1744_v26, %v1752_v27  ;;  %v1472_v33 = vld [vmem:[%s16779_s2 + $0x2200] sm:$0xff]  ;;  %11382 = vmatprep.subr.bf16.mxu0 %v15264_v31  ;;  %v15519_v38 = vcombine.low %v1744_v26, %v1752_v27 }
 0x124   : > { %v1480_v34 = vld [vmem:[%s16779_s2 + $0x2240] sm:$0xff]  ;;  %11424 = vmatpush1.bf16.msra.mxu1 %v15535_v30 }
 0x125   : > { %v1728_v35 = vld [vmem:[%s16779_s2 + $0x2a00] sm:$0xff]  ;;  %v15248_v39 = vcombine.high %v1472_v33, %v1480_v34  ;;  %11425 = vmatprep.subr.bf16.mxu1 %v15520_v32  ;;  %11383 = vmatpush1.bf16.msra.mxu0 %v15263_v37  ;;  %v15247_v45 = vcombine.low %v1472_v33, %v1480_v34 }
 0x126   : > { %v1736_v36 = vld [vmem:[%s16779_s2 + $0x2a40] sm:$0xff] }
 0x127   : > { %v15504_v40 = vcombine.high %v1728_v35, %v1736_v36  ;;  %v1456_v41 = vld [vmem:[%s16779_s2 + $0x2180] sm:$0xff]  ;;  %11384 = vmatprep.subr.bf16.mxu0 %v15248_v39  ;;  %v15503_v46 = vcombine.low %v1728_v35, %v1736_v36 }
 0x128   : > { %v1464_v42 = vld [vmem:[%s16779_s2 + $0x21c0] sm:$0xff]  ;;  %11426 = vmatpush1.bf16.msra.mxu1 %v15519_v38 }
 0x129   : > { %v1712_v43 = vld [vmem:[%s16779_s2 + $0x2980] sm:$0xff]  ;;  %v15232_v47 = vcombine.high %v1456_v41, %v1464_v42  ;;  %11427 = vmatprep.subr.bf16.mxu1 %v15504_v40  ;;  %11385 = vmatpush1.bf16.msra.mxu0 %v15247_v45  ;;  %v15231_v53 = vcombine.low %v1456_v41, %v1464_v42 }
 0x12a   : > { %v1720_v44 = vld [vmem:[%s16779_s2 + $0x29c0] sm:$0xff] }
 0x12b   : > { %v15488_v48 = vcombine.high %v1712_v43, %v1720_v44  ;;  %v1440_v49 = vld [vmem:[%s16779_s2 + $0x2100] sm:$0xff]  ;;  %11386 = vmatprep.subr.bf16.mxu0 %v15232_v47  ;;  %v15487_v54 = vcombine.low %v1712_v43, %v1720_v44 }
 0x12c   : > { %v1448_v50 = vld [vmem:[%s16779_s2 + $0x2140] sm:$0xff]  ;;  %11428 = vmatpush1.bf16.msra.mxu1 %v15503_v46 }
 0x12d   : > { %v1696_v51 = vld [vmem:[%s16779_s2 + $0x2900] sm:$0xff]  ;;  %v15216_v55 = vcombine.high %v1440_v49, %v1448_v50  ;;  %11429 = vmatprep.subr.bf16.mxu1 %v15488_v48  ;;  %11387 = vmatpush1.bf16.msra.mxu0 %v15231_v53  ;;  %v15215_v61 = vcombine.low %v1440_v49, %v1448_v50 }
 0x12e   : > { %v1704_v52 = vld [vmem:[%s16779_s2 + $0x2940] sm:$0xff] }
 0x12f   : > { %v15472_v56 = vcombine.high %v1696_v51, %v1704_v52  ;;  %v1424_v57 = vld [vmem:[%s16779_s2 + $0x2080] sm:$0xff]  ;;  %11388 = vmatprep.subr.bf16.mxu0 %v15216_v55  ;;  %v15471_v62 = vcombine.low %v1696_v51, %v1704_v52 }
 0x130   : > { %v1432_v58 = vld [vmem:[%s16779_s2 + $0x20c0] sm:$0xff]  ;;  %11430 = vmatpush1.bf16.msra.mxu1 %v15487_v54 }
 0x131   : > { %v1680_v59 = vld [vmem:[%s16779_s2 + $0x2880] sm:$0xff]  ;;  %v15200_v63 = vcombine.high %v1424_v57, %v1432_v58  ;;  %11431 = vmatprep.subr.bf16.mxu1 %v15472_v56  ;;  %11389 = vmatpush1.bf16.msra.mxu0 %v15215_v61  ;;  %v15199_v5 = vcombine.low %v1424_v57, %v1432_v58 }
 0x132   : > { %v1688_v60 = vld [vmem:[%s16779_s2 + $0x28c0] sm:$0xff] }
 0x133   : > { %v15456_v0 = vcombine.high %v1680_v59, %v1688_v60  ;;  %v1408_v1 = vld [vmem:[%s16779_s2 + $0x2000] sm:$0xff]  ;;  %11390 = vmatprep.subr.bf16.mxu0 %v15200_v63  ;;  %v15455_v6 = vcombine.low %v1680_v59, %v1688_v60 }
 0x134   : > { %v1416_v2 = vld [vmem:[%s16779_s2 + $0x2040] sm:$0xff]  ;;  %11432 = vmatpush1.bf16.msra.mxu1 %v15471_v62 }
 0x135   : > { %v1664_v3 = vld [vmem:[%s16779_s2 + $0x2800] sm:$0xff]  ;;  %v15184_v7 = vcombine.high %v1408_v1, %v1416_v2  ;;  %11433 = vmatprep.subr.bf16.mxu1 %v15456_v0  ;;  %11391 = vmatpush1.bf16.msra.mxu0 %v15199_v5  ;;  %v15183_v13 = vcombine.low %v1408_v1, %v1416_v2 }
 0x136   : > { %v1672_v4 = vld [vmem:[%s16779_s2 + $0x2840] sm:$0xff] }
 0x137   : > { %v15440_v8 = vcombine.high %v1664_v3, %v1672_v4  ;;  %v1648_v9 = vld [vmem:[%s16779_s2 + $0x2780] sm:$0xff]  ;;  %11392 = vmatprep.subr.bf16.mxu0 %v15184_v7  ;;  %v15439_v14 = vcombine.low %v1664_v3, %v1672_v4 }
 0x138   : > { %v1656_v10 = vld [vmem:[%s16779_s2 + $0x27c0] sm:$0xff]  ;;  %11434 = vmatpush1.bf16.msra.mxu1 %v15455_v6 }
 0x139   : > { %v1904_v11 = vld [vmem:[%s16779_s2 + $0x2f80] sm:$0xff]  ;;  %v15424_v15 = vcombine.high %v1648_v9, %v1656_v10  ;;  %11435 = vmatprep.subr.bf16.mxu1 %v15440_v8  ;;  %11393 = vmatpush1.bf16.msra.mxu0 %v15183_v13  ;;  %v15423_v21 = vcombine.low %v1648_v9, %v1656_v10 }
 0x13a   : > { %v1912_v12 = vld [vmem:[%s16779_s2 + $0x2fc0] sm:$0xff] }
 0x13b   : > { %v15680_v16 = vcombine.high %v1904_v11, %v1912_v12  ;;  %v1632_v17 = vld [vmem:[%s16779_s2 + $0x2700] sm:$0xff]  ;;  %11394 = vmatprep.subr.bf16.mxu0 %v15424_v15  ;;  %v15679_v22 = vcombine.low %v1904_v11, %v1912_v12  ;;  %v497_v11 = vld [vmem:[%s16779_s2 + $0x388] sm:$0xff] }
 0x13c   : > { %v1640_v18 = vld [vmem:[%s16779_s2 + $0x2740] sm:$0xff]  ;;  %11436 = vmatpush1.bf16.msra.mxu1 %v15439_v14  ;;  %v505_v12 = vld [vmem:[%s16779_s2 + $0x3c8] sm:$0xff] }
 0x13d   : > { %v1888_v19 = vld [vmem:[%s16779_s2 + $0x2f00] sm:$0xff]  ;;  %v15408_v23 = vcombine.high %v1632_v17, %v1640_v18  ;;  %11437 = vmatprep.subr.bf16.mxu1 %v15680_v16  ;;  %11395 = vmatpush2.bf16.msra.mxu0 %v15423_v21  ;;  %v15407_v29 = vcombine.low %v1632_v17, %v1640_v18  ;;  %v14274_v16 = vcombine.high %v497_v11, %v505_v12  ;;  %v489_v21 = vld [vmem:[%s16779_s2 + $0x348] sm:$0xff] }
 0x13e   : > { %v1896_v20 = vld [vmem:[%s16779_s2 + $0x2f40] sm:$0xff] }
 0x13f   : > { %v15664_v24 = vcombine.high %v1888_v19, %v1896_v20  ;;  %v1616_v25 = vld [vmem:[%s16779_s2 + $0x2680] sm:$0xff]  ;;  %11396 = vmatprep.subr.bf16.mxu0 %v15408_v23  ;;  %v15663_v30 = vcombine.low %v1888_v19, %v1896_v20  ;;  %v481_v20 = vld [vmem:[%s16779_s2 + $0x308] sm:$0xff] }
 0x140   : > { %v1624_v26 = vld [vmem:[%s16779_s2 + $0x26c0] sm:$0xff]  ;;  %11438 = vmatpush2.bf16.msra.mxu1 %v15679_v22 }
 0x141   : > { %v1872_v27 = vld [vmem:[%s16779_s2 + $0x2e80] sm:$0xff]  ;;  %v15392_v31 = vcombine.high %v1616_v25, %v1624_v26  ;;  %11439 = vmatprep.subr.bf16.mxu1 %v15664_v24  ;;  %11397 = vmatpush2.bf16.msra.mxu0 %v15407_v29  ;;  %v15391_v37 = vcombine.low %v1616_v25, %v1624_v26  ;;  %v14273_v24 = vcombine.low %v497_v11, %v505_v12 }
 0x142   : > { %v1880_v28 = vld [vmem:[%s16779_s2 + $0x2ec0] sm:$0xff]  ;;  %v14258_v26 = vcombine.high %v481_v20, %v489_v21 }
 0x143   : > { %v15648_v32 = vcombine.high %v1872_v27, %v1880_v28  ;;  %v1600_v33 = vld [vmem:[%s16779_s2 + $0x2600] sm:$0xff]  ;;  %11398 = vmatprep.subr.bf16.mxu0 %v15392_v31  ;;  %v15647_v38 = vcombine.low %v1872_v27, %v1880_v28  ;;  %v473_v31 = vld [vmem:[%s16779_s2 + $0x2c8] sm:$0xff] }
 0x144   : > { %v1608_v34 = vld [vmem:[%s16779_s2 + $0x2640] sm:$0xff]  ;;  %11440 = vmatpush2.bf16.msra.mxu1 %v15663_v30  ;;  %v465_v30 = vld [vmem:[%s16779_s2 + $0x288] sm:$0xff] }
 0x145   : > { %v1856_v35 = vld [vmem:[%s16779_s2 + $0x2e00] sm:$0xff]  ;;  %v15376_v39 = vcombine.high %v1600_v33, %v1608_v34  ;;  %11441 = vmatprep.subr.bf16.mxu1 %v15648_v32  ;;  %11399 = vmatpush2.bf16.msra.mxu0 %v15391_v37  ;;  %v15375_v45 = vcombine.low %v1600_v33, %v1608_v34  ;;  %v14257_v33 = vcombine.low %v481_v20, %v489_v21 }
 0x146   : > { %v1864_v36 = vld [vmem:[%s16779_s2 + $0x2e40] sm:$0xff] }
 0x147   : > { %v15632_v40 = vcombine.high %v1856_v35, %v1864_v36  ;;  %v1584_v41 = vld [vmem:[%s16779_s2 + $0x2580] sm:$0xff]  ;;  %11400 = vmatprep.subr.bf16.mxu0 %v15376_v39  ;;  %v15631_v46 = vcombine.low %v1856_v35, %v1864_v36  ;;  %v14242_v35 = vcombine.high %v465_v30, %v473_v31  ;;  %v457_v39 = vld [vmem:[%s16779_s2 + $0x248] sm:$0xff] }
 0x148   : > { %v1592_v42 = vld [vmem:[%s16779_s2 + $0x25c0] sm:$0xff]  ;;  %11442 = vmatpush2.bf16.msra.mxu1 %v15647_v38  ;;  %v449_v38 = vld [vmem:[%s16779_s2 + $0x208] sm:$0xff] }
 0x149   : > { %v1840_v43 = vld [vmem:[%s16779_s2 + $0x2d80] sm:$0xff]  ;;  %v15360_v47 = vcombine.high %v1584_v41, %v1592_v42  ;;  %11443 = vmatprep.subr.bf16.mxu1 %v15632_v40  ;;  %11401 = vmatpush2.bf16.msra.mxu0 %v15375_v45  ;;  %v15359_v53 = vcombine.low %v1584_v41, %v1592_v42  ;;  %v14241_v42 = vcombine.low %v465_v30, %v473_v31  ;;  %v593_v31 = vld [vmem:[%s16779_s2 + $0x688] sm:$0xff] }
 0x14a   : > { %v1848_v44 = vld [vmem:[%s16779_s2 + $0x2dc0] sm:$0xff] }
 0x14b   : > { %v15616_v48 = vcombine.high %v1840_v43, %v1848_v44  ;;  %v1568_v49 = vld [vmem:[%s16779_s2 + $0x2500] sm:$0xff]  ;;  %11402 = vmatprep.subr.bf16.mxu0 %v15360_v47  ;;  %v15615_v54 = vcombine.low %v1840_v43, %v1848_v44  ;;  %v14226_v44 = vcombine.high %v449_v38, %v457_v39  ;;  %v433_v47 = vld [vmem:[%s16779_s2 + $0x188] sm:$0xff] }
 0x14c   : > { %v1576_v50 = vld [vmem:[%s16779_s2 + $0x2540] sm:$0xff]  ;;  %11444 = vmatpush2.bf16.msra.mxu1 %v15631_v46 }
 0x14d   : > { %v1824_v51 = vld [vmem:[%s16779_s2 + $0x2d00] sm:$0xff]  ;;  %v15344_v55 = vcombine.high %v1568_v49, %v1576_v50  ;;  %11445 = vmatprep.subr.bf16.mxu1 %v15616_v48  ;;  %11403 = vmatpush2.bf16.msra.mxu0 %v15359_v53  ;;  %v15343_v61 = vcombine.low %v1568_v49, %v1576_v50  ;;  %v441_v48 = vld [vmem:[%s16779_s2 + $0x1c8] sm:$0xff]  ;;  %v14225_v50 = vcombine.low %v449_v38, %v457_v39 }
 0x14e   : > { %v1832_v52 = vld [vmem:[%s16779_s2 + $0x2d40] sm:$0xff]  ;;  %v577_v39 = vld [vmem:[%s16779_s2 + $0x608] sm:$0xff] }
 0x14f   : > { %v15600_v56 = vcombine.high %v1824_v51, %v1832_v52  ;;  %v1552_v57 = vld [vmem:[%s16779_s2 + $0x2480] sm:$0xff]  ;;  %11404 = vmatprep.subr.bf16.mxu0 %v15344_v55  ;;  %v15599_v62 = vcombine.low %v1824_v51, %v1832_v52  ;;  %v14210_v52 = vcombine.high %v433_v47, %v441_v48  ;;  %v417_v55 = vld [vmem:[%s16779_s2 + $0x108] sm:$0xff] }
 0x150   : > { %v1560_v58 = vld [vmem:[%s16779_s2 + $0x24c0] sm:$0xff]  ;;  %11446 = vmatpush2.bf16.msra.mxu1 %v15615_v54 }
 0x151   : > { %v1808_v59 = vld [vmem:[%s16779_s2 + $0x2c80] sm:$0xff]  ;;  %v15328_v63 = vcombine.high %v1552_v57, %v1560_v58  ;;  %11447 = vmatprep.subr.bf16.mxu1 %v15600_v56  ;;  %11405 = vmatpush2.bf16.msra.mxu0 %v15343_v61  ;;  %v15327_v5 = vcombine.low %v1552_v57, %v1560_v58  ;;  %v425_v56 = vld [vmem:[%s16779_s2 + $0x148] sm:$0xff]  ;;  %v14209_v58 = vcombine.low %v433_v47, %v441_v48 }
 0x152   : > { %v1816_v60 = vld [vmem:[%s16779_s2 + $0x2cc0] sm:$0xff]  ;;  %v561_v47 = vld [vmem:[%s16779_s2 + $0x588] sm:$0xff] }
 0x153   : > { %v15584_v0 = vcombine.high %v1808_v59, %v1816_v60  ;;  %v1536_v1 = vld [vmem:[%s16779_s2 + $0x2400] sm:$0xff]  ;;  %11406 = vmatprep.subr.bf16.mxu0 %v15328_v63  ;;  %v15583_v6 = vcombine.low %v1808_v59, %v1816_v60  ;;  %v14194_v60 = vcombine.high %v417_v55, %v425_v56  ;;  %v401_v63 = vld [vmem:[%s16779_s2 + $0x88] sm:$0xff] }
 0x154   : > { %v1544_v2 = vld [vmem:[%s16779_s2 + $0x2440] sm:$0xff]  ;;  %11448 = vmatpush2.bf16.msra.mxu1 %v15599_v62  ;;  %v569_v48 = vld [vmem:[%s16779_s2 + $0x5c8] sm:$0xff] }
 0x155   : > { %v1792_v3 = vld [vmem:[%s16779_s2 + $0x2c00] sm:$0xff]  ;;  %v15312_v7 = vcombine.high %v1536_v1, %v1544_v2  ;;  %11449 = vmatprep.subr.bf16.mxu1 %v15584_v0  ;;  %11407 = vmatpush2.bf16.msra.mxu0 %v15327_v5  ;;  %v15311_v13 = vcombine.low %v1536_v1, %v1544_v2  ;;  %v409_v0 = vld [vmem:[%s16779_s2 + $0xc8] sm:$0xff]  ;;  %v14193_v2 = vcombine.low %v417_v55, %v425_v56 }
 0x156   : > { %v1800_v4 = vld [vmem:[%s16779_s2 + $0x2c40] sm:$0xff]  ;;  %v545_v55 = vld [vmem:[%s16779_s2 + $0x508] sm:$0xff] }
 0x157   : > { %v15568_v8 = vcombine.high %v1792_v3, %v1800_v4  ;;  %v2032_v9 = vld [vmem:[%s16779_s2 + $0x3380] sm:$0xff]  ;;  %11408 = vmatprep.subr.bf16.mxu0 %v15312_v7  ;;  %v15567_v14 = vcombine.low %v1792_v3, %v1800_v4  ;;  %v14178_v4 = vcombine.high %v401_v63, %v409_v0  ;;  %v385_v7 = vld [vmem:[%s16779_s2 + $0x8] sm:$0xff] }
 0x158   : > { %v2040_v10 = vld [vmem:[%s16779_s2 + $0x33c0] sm:$0xff]  ;;  %11450 = vmatpush2.bf16.msra.mxu1 %v15583_v6  ;;  %v553_v56 = vld [vmem:[%s16779_s2 + $0x548] sm:$0xff] }
 0x159   : > { %v15808_v15 = vcombine.high %v2032_v9, %v2040_v10  ;;  %11451 = vmatprep.subr.bf16.mxu1 %v15568_v8  ;;  %v2016_v17 = vld [vmem:[%s16779_s2 + $0x3300] sm:$0xff]  ;;  %11409 = vmatpush2.bf16.msra.mxu0 %v15311_v13  ;;  %v15807_v23 = vcombine.low %v2032_v9, %v2040_v10  ;;  %v393_v8 = vld [vmem:[%s16779_s2 + $0x48] sm:$0xff]  ;;  %v14177_v10 = vcombine.low %v401_v63, %v409_v0 }
 0x15a   : > { %v2024_v18 = vld [vmem:[%s16779_s2 + $0x3340] sm:$0xff]  ;;  %v14162_v12 = vcombine.high %v385_v7, %v393_v8  ;;  %v529_v63 = vld [vmem:[%s16779_s2 + $0x488] sm:$0xff] }
 0x15b   : > { %v16159_v19 = vld [vmem:[%s16771_s30 + $0x20] ss:$56 sps:$4 sm:$0xff]   ;;  %11464 = vmatprep.subr.bf16.mxu0 %v15808_v15  ;;  %v15792_v25 = vcombine.high %v2016_v17, %v2024_v18  ;;  %v16161_v29 = vld [vmem:[%s16771_s30 + $0x34] ss:$56 sps:$4 sm:$0xff]   ;;  %v15791_v32 = vcombine.low %v2016_v17, %v2024_v18  ;;  %v16164_v40 = vld [vmem:[%s16771_s30 + $0x4] ss:$56 sps:$4 sm:$0xff]   ;;  %v14161_v18 = vcombine.low %v385_v7, %v393_v8 }
 0x15c   : > { %v16160_v22 = vld [vmem:[%s16771_s30 + $0x28] ss:$56 sps:$4 sm:$0xff]   ;;  %11452 = vmatpush2.bf16.msra.mxu1 %v15567_v14  ;;  %11411 = vmatmul.mubr.bf16.vlgmr.msra.gmra.mxu0 %v16159_v19 }
 0x15d   : > { %11507 = vmatprep.subr.bf16.mxu1 %v14274_v16  ;;  %v2000_v27 = vld [vmem:[%s16779_s2 + $0x3280] sm:$0xff]  ;;  %11465 = vmatpush1.bf16.msra.mxu0 %v15807_v23  ;;  %v625_v15 = vld [vmem:[%s16779_s2 + $0x788] sm:$0xff] }
 0x15e   : > { %v2008_v28 = vld [vmem:[%s16779_s2 + $0x32c0] sm:$0xff]  ;;  %11466 = vmatprep.subr.bf16.mxu0 %v15792_v25  ;;  %11496 = vmatprep.mubr.bf16.mxu0 %v16161_v29  ;;  %v633_v16 = vld [vmem:[%s16779_s2 + $0x7c8] sm:$0xff] }
 0x15f   : > { %11454 = vmatmul.mubr.bf16.vlgmr.msra.gmra.mxu1 %v16160_v22  ;;  %v15776_v34 = vcombine.high %v2000_v27, %v2008_v28  ;;  %v1984_v36 = vld [vmem:[%s16779_s2 + $0x3200] sm:$0xff]  ;;  %v15775_v41 = vcombine.low %v2000_v27, %v2008_v28  ;;  %v14402_v20 = vcombine.high %v625_v15, %v633_v16  ;;  %v609_v23 = vld [vmem:[%s16779_s2 + $0x708] sm:$0xff] }
 0x160   : > { %11508 = vmatpush1.bf16.msra.mxu1 %v14273_v24  ;;  %v1992_v37 = vld [vmem:[%s16779_s2 + $0x3240] sm:$0xff]  ;;  %11539 = vmatprep.mubr.bf16.mxu1 %v16164_v40  ;;  %v617_v24 = vld [vmem:[%s16779_s2 + $0x748] sm:$0xff] }
 0x161   : > { %11509 = vmatprep.subr.bf16.mxu1 %v14258_v26  ;;  %11467 = vmatpush1.bf16.msra.mxu0 %v15791_v32  ;;  %v15760_v43 = vcombine.high %v1984_v36, %v1992_v37  ;;  %v1968_v45 = vld [vmem:[%s16779_s2 + $0x3180] sm:$0xff]  ;;  %v15759_v49 = vcombine.low %v1984_v36, %v1992_v37  ;;  %v14401_v26 = vcombine.low %v625_v15, %v633_v16  ;;  %v601_v32 = vld [vmem:[%s16779_s2 + $0x6c8] sm:$0xff] }
 0x162   : > { %11468 = vmatprep.subr.bf16.mxu0 %v15776_v34  ;;  %v1976_v46 = vld [vmem:[%s16779_s2 + $0x31c0] sm:$0xff]  ;;  %v14386_v28 = vcombine.high %v609_v23, %v617_v24  ;;  %v14385_v34 = vcombine.low %v609_v23, %v617_v24  ;;  %v14370_v36 = vcombine.high %v593_v31, %v601_v32  ;;  %v585_v40 = vld [vmem:[%s16779_s2 + $0x648] sm:$0xff] }
 0x163   : > { %v15744_v51 = vcombine.high %v1968_v45, %v1976_v46  ;;  %v1952_v53 = vld [vmem:[%s16779_s2 + $0x3100] sm:$0xff]  ;;  %v15743_v57 = vcombine.low %v1968_v45, %v1976_v46  ;;  %v537_v0 = vld [vmem:[%s16779_s2 + $0x4c8] sm:$0xff] }
 0x164   : > { %11510 = vmatpush1.bf16.msra.mxu1 %v14257_v33  ;;  %v1960_v54 = vld [vmem:[%s16779_s2 + $0x3140] sm:$0xff]  ;;  %v513_v7 = vld [vmem:[%s16779_s2 + $0x408] sm:$0xff] }
 0x165   : > { %11511 = vmatprep.subr.bf16.mxu1 %v14242_v35  ;;  %11469 = vmatpush1.bf16.msra.mxu0 %v15775_v41  ;;  %v15728_v59 = vcombine.high %v1952_v53, %v1960_v54  ;;  %v1936_v61 = vld [vmem:[%s16779_s2 + $0x3080] sm:$0xff]  ;;  %v15727_v1 = vcombine.low %v1952_v53, %v1960_v54  ;;  %v521_v8 = vld [vmem:[%s16779_s2 + $0x448] sm:$0xff] }
 0x166   : > { %11470 = vmatprep.subr.bf16.mxu0 %v15760_v43  ;;  %v1944_v62 = vld [vmem:[%s16779_s2 + $0x30c0] sm:$0xff]  ;;  %v1009_v15 = vld [vmem:[%s16779_s2 + $0x1388] sm:$0xff] }
 0x167   : > { %v15712_v3 = vcombine.high %v1936_v61, %v1944_v62  ;;  %v1920_v5 = vld [vmem:[%s16779_s2 + $0x3000] sm:$0xff]  ;;  %v15711_v9 = vcombine.low %v1936_v61, %v1944_v62  ;;  %v1017_v16 = vld [vmem:[%s16779_s2 + $0x13c8] sm:$0xff] }
 0x168   : > { %11512 = vmatpush1.bf16.msra.mxu1 %v14241_v42  ;;  %v1928_v6 = vld [vmem:[%s16779_s2 + $0x3040] sm:$0xff]  ;;  %v14369_v42 = vcombine.low %v593_v31, %v601_v32  ;;  %v993_v24 = vld [vmem:[%s16779_s2 + $0x1308] sm:$0xff] }
 0x169   : > { %11513 = vmatprep.subr.bf16.mxu1 %v14226_v44  ;;  %11471 = vmatpush1.bf16.msra.mxu0 %v15759_v49  ;;  %v15696_v11 = vcombine.high %v1920_v5, %v1928_v6  ;;  %v2160_v13 = vld [vmem:[%s16779_s2 + $0x3780] sm:$0xff]  ;;  %v15695_v17 = vcombine.low %v1920_v5, %v1928_v6  ;;  %v14354_v44 = vcombine.high %v577_v39, %v585_v40  ;;  %v729_v31 = vld [vmem:[%s16779_s2 + $0xac8] sm:$0xff] }
 0x16a   : > { %11472 = vmatprep.subr.bf16.mxu0 %v15744_v51  ;;  %v2168_v14 = vld [vmem:[%s16779_s2 + $0x37c0] sm:$0xff]  ;;  %v977_v32 = vld [vmem:[%s16779_s2 + $0x1288] sm:$0xff] }
 0x16b   : > { %v15936_v19 = vcombine.high %v2160_v13, %v2168_v14  ;;  %v2144_v21 = vld [vmem:[%s16779_s2 + $0x3700] sm:$0xff]  ;;  %v15935_v25 = vcombine.low %v2160_v13, %v2168_v14  ;;  %v753_v13 = vld [vmem:[%s16779_s2 + $0xb88] sm:$0xff] }
 0x16c   : > { %11514 = vmatpush1.bf16.msra.mxu1 %v14225_v50  ;;  %v2152_v22 = vld [vmem:[%s16779_s2 + $0x3740] sm:$0xff]  ;;  %v14353_v50 = vcombine.low %v577_v39, %v585_v40  ;;  %v761_v14 = vld [vmem:[%s16779_s2 + $0xbc8] sm:$0xff] }
 0x16d   : > { %11515 = vmatprep.subr.bf16.mxu1 %v14210_v52  ;;  %11473 = vmatpush1.bf16.msra.mxu0 %v15743_v57  ;;  %v15920_v27 = vcombine.high %v2144_v21, %v2152_v22  ;;  %v2128_v29 = vld [vmem:[%s16779_s2 + $0x3680] sm:$0xff]  ;;  %v15919_v33 = vcombine.low %v2144_v21, %v2152_v22  ;;  %v14338_v52 = vcombine.high %v561_v47, %v569_v48  ;;  %v737_v21 = vld [vmem:[%s16779_s2 + $0xb08] sm:$0xff] }
 0x16e   : > { %11474 = vmatprep.subr.bf16.mxu0 %v15728_v59  ;;  %v2136_v30 = vld [vmem:[%s16779_s2 + $0x36c0] sm:$0xff]  ;;  %v745_v22 = vld [vmem:[%s16779_s2 + $0xb48] sm:$0xff] }
 0x16f   : > { %v15904_v35 = vcombine.high %v2128_v29, %v2136_v30  ;;  %v2112_v37 = vld [vmem:[%s16779_s2 + $0x3600] sm:$0xff]  ;;  %v15903_v41 = vcombine.low %v2128_v29, %v2136_v30  ;;  %v721_v30 = vld [vmem:[%s16779_s2 + $0xa88] sm:$0xff] }
 0x170   : > { %11516 = vmatpush1.bf16.msra.mxu1 %v14209_v58  ;;  %v2120_v38 = vld [vmem:[%s16779_s2 + $0x3640] sm:$0xff]  ;;  %v14337_v58 = vcombine.low %v561_v47, %v569_v48  ;;  %v705_v39 = vld [vmem:[%s16779_s2 + $0xa08] sm:$0xff] }
 0x171   : > { %11517 = vmatprep.subr.bf16.mxu1 %v14194_v60  ;;  %11475 = vmatpush1.bf16.msra.mxu0 %v15727_v1  ;;  %v15888_v43 = vcombine.high %v2112_v37, %v2120_v38  ;;  %v2096_v45 = vld [vmem:[%s16779_s2 + $0x3580] sm:$0xff]  ;;  %v15887_v49 = vcombine.low %v2112_v37, %v2120_v38  ;;  %v14322_v60 = vcombine.high %v545_v55, %v553_v56  ;;  %v713_v40 = vld [vmem:[%s16779_s2 + $0xa48] sm:$0xff] }
 0x172   : > { %11476 = vmatprep.subr.bf16.mxu0 %v15712_v3  ;;  %v2104_v46 = vld [vmem:[%s16779_s2 + $0x35c0] sm:$0xff]  ;;  %v14498_v37 = vcombine.high %v721_v30, %v729_v31  ;;  %v14482_v47 = vcombine.high %v705_v39, %v713_v40 }
 0x173   : > { %v15872_v51 = vcombine.high %v2096_v45, %v2104_v46  ;;  %v2080_v53 = vld [vmem:[%s16779_s2 + $0x3500] sm:$0xff]  ;;  %v15871_v57 = vcombine.low %v2096_v45, %v2104_v46  ;;  %v14497_v45 = vcombine.low %v721_v30, %v729_v31 }
 0x174   : > { %11518 = vmatpush1.bf16.msra.mxu1 %v14193_v2  ;;  %v2088_v54 = vld [vmem:[%s16779_s2 + $0x3540] sm:$0xff]  ;;  %v14321_v2 = vcombine.low %v545_v55, %v553_v56 }
 0x175   : > { %11519 = vmatprep.subr.bf16.mxu1 %v14178_v4  ;;  %11477 = vmatpush1.bf16.msra.mxu0 %v15711_v9  ;;  %v15856_v59 = vcombine.high %v2080_v53, %v2088_v54  ;;  %v2064_v61 = vld [vmem:[%s16779_s2 + $0x3480] sm:$0xff]  ;;  %v15855_v1 = vcombine.low %v2080_v53, %v2088_v54  ;;  %v14306_v4 = vcombine.high %v529_v63, %v537_v0 }
 0x176   : > { %11478 = vmatprep.subr.bf16.mxu0 %v15696_v11  ;;  %v2072_v62 = vld [vmem:[%s16779_s2 + $0x34c0] sm:$0xff]  ;;  %v14481_v53 = vcombine.low %v705_v39, %v713_v40 }
 0x177   : > { %v15840_v3 = vcombine.high %v2064_v61, %v2072_v62  ;;  %v2048_v5 = vld [vmem:[%s16779_s2 + $0x3400] sm:$0xff]  ;;  %v15839_v9 = vcombine.low %v2064_v61, %v2072_v62 }
 0x178   : > { %11520 = vmatpush1.bf16.msra.mxu1 %v14177_v10  ;;  %v2056_v6 = vld [vmem:[%s16779_s2 + $0x3440] sm:$0xff]  ;;  %v14305_v10 = vcombine.low %v529_v63, %v537_v0 }
 0x179   : > { %11521 = vmatprep.subr.bf16.mxu1 %v14162_v12  ;;  %11479 = vmatpush1.bf16.msra.mxu0 %v15695_v17  ;;  %v15824_v11 = vcombine.high %v2048_v5, %v2056_v6  ;;  %v14290_v12 = vcombine.high %v513_v7, %v521_v8  ;;  %v15823_v17 = vcombine.low %v2048_v5, %v2056_v6  ;;  %v16163_v23 = vld [vmem:[%s16771_s30 + $0x30] ss:$56 sps:$4 sm:$0xff]  }
 0x17a   : > { %11480 = vmatprep.subr.bf16.mxu0 %v15936_v19  ;;  %v14530_v19 = vcombine.high %v753_v13, %v761_v14 }
 0x17c   : > { %11522 = vmatpush1.bf16.msra.mxu1 %v14161_v18  ;;  %v14289_v18 = vcombine.low %v513_v7, %v521_v8 }
 0x17d   : > { %11523 = vmatprep.subr.bf16.mxu1 %v14402_v20  ;;  %11481 = vmatpush2.bf16.msra.mxu0 %v15935_v25  ;;  %v14786_v20 = vcombine.high %v1009_v15, %v1017_v16  ;;  %v1001_v25 = vld [vmem:[%s16779_s2 + $0x1348] sm:$0xff] }
 0x17e   : > { %11482 = vmatprep.subr.bf16.mxu0 %v15920_v27  ;;  %v14785_v27 = vcombine.low %v1009_v15, %v1017_v16  ;;  %v14770_v29 = vcombine.high %v993_v24, %v1001_v25 }
 0x180   : > { %11524 = vmatpush2.bf16.msra.mxu1 %v14401_v26  ;;  %v14529_v26 = vcombine.low %v753_v13, %v761_v14 }
 0x181   : > { %11525 = vmatprep.subr.bf16.mxu1 %v14386_v28  ;;  %11483 = vmatpush2.bf16.msra.mxu0 %v15919_v33  ;;  %v14514_v28 = vcombine.high %v737_v21, %v745_v22  ;;  %v985_v33 = vld [vmem:[%s16779_s2 + $0x12c8] sm:$0xff] }
 0x182   : > { %11484 = vmatprep.subr.bf16.mxu0 %v15904_v35  ;;  %v14513_v35 = vcombine.low %v737_v21, %v745_v22  ;;  %v14754_v38 = vcombine.high %v977_v32, %v985_v33  ;;  %v14753_v46 = vcombine.low %v977_v32, %v985_v33  ;;  %v849_v33 = vld [vmem:[%s16779_s2 + $0xe88] sm:$0xff] }
 0x184   : > { %11526 = vmatpush2.bf16.msra.mxu1 %v14385_v34  ;;  %v16165_v34 = vld [vmem:[%s16771_s30] ss:$56 sps:$4 sm:$0xff]  }
 0x185   : > { %11527 = vmatprep.subr.bf16.mxu1 %v14370_v36  ;;  %11485 = vmatpush2.bf16.msra.mxu0 %v15903_v41  ;;  %v14769_v36 = vcombine.low %v993_v24, %v1001_v25  ;;  %v16166_v41 = vld [vmem:[%s16771_s30 + $0xc] ss:$56 sps:$4 sm:$0xff]  }
 0x186   : > { %11486 = vmatprep.subr.bf16.mxu0 %v15888_v43  ;;  %v969_v43 = vld [vmem:[%s16779_s2 + $0x1248] sm:$0xff] }
 0x187   : > { %v865_v25 = vld [vmem:[%s16779_s2 + $0xf08] sm:$0xff] }
 0x188   : > { %11528 = vmatpush2.bf16.msra.mxu1 %v14369_v42  ;;  %v961_v42 = vld [vmem:[%s16779_s2 + $0x1208] sm:$0xff] }
 0x189   : > { %11529 = vmatprep.subr.bf16.mxu1 %v14354_v44  ;;  %11487 = vmatpush2.bf16.msra.mxu0 %v15887_v49  ;;  %v16167_v44 = vld [vmem:[%s16771_s30 + $0x14] ss:$56 sps:$4 sm:$0xff]   ;;  %v14738_v48 = vcombine.high %v961_v42, %v969_v43  ;;  %v14737_v54 = vcombine.low %v961_v42, %v969_v43 }
 0x18a   : > { %11488 = vmatprep.subr.bf16.mxu0 %v15872_v51  ;;  %v689_v49 = vld [vmem:[%s16779_s2 + $0x988] sm:$0xff] }
 0x18b   : > { %v945_v51 = vld [vmem:[%s16779_s2 + $0x1188] sm:$0xff] }
 0x18c   : > { %11530 = vmatpush2.bf16.msra.mxu1 %v14353_v50  ;;  %v697_v50 = vld [vmem:[%s16779_s2 + $0x9c8] sm:$0xff] }
 0x18d   : > { %11531 = vmatprep.subr.bf16.mxu1 %v14338_v52  ;;  %11489 = vmatpush2.bf16.msra.mxu0 %v15871_v57  ;;  %v953_v52 = vld [vmem:[%s16779_s2 + $0x11c8] sm:$0xff]  ;;  %v14466_v55 = vcombine.high %v689_v49, %v697_v50  ;;  %v14465_v61 = vcombine.low %v689_v49, %v697_v50 }
 0x18e   : > { %11490 = vmatprep.subr.bf16.mxu0 %v15856_v59  ;;  %v14722_v56 = vcombine.high %v945_v51, %v953_v52  ;;  %v673_v57 = vld [vmem:[%s16779_s2 + $0x908] sm:$0xff]  ;;  %v14721_v62 = vcombine.low %v945_v51, %v953_v52 }
 0x18f   : > { %v929_v59 = vld [vmem:[%s16779_s2 + $0x1108] sm:$0xff] }
 0x190   : > { %11532 = vmatpush2.bf16.msra.mxu1 %v14337_v58  ;;  %v681_v58 = vld [vmem:[%s16779_s2 + $0x948] sm:$0xff] }
 0x191   : > { %11533 = vmatprep.subr.bf16.mxu1 %v14322_v60  ;;  %11491 = vmatpush2.bf16.msra.mxu0 %v15855_v1  ;;  %v937_v60 = vld [vmem:[%s16779_s2 + $0x1148] sm:$0xff]  ;;  %v14450_v63 = vcombine.high %v673_v57, %v681_v58  ;;  %v14449_v5 = vcombine.low %v673_v57, %v681_v58 }
 0x192   : > { %11492 = vmatprep.subr.bf16.mxu0 %v15840_v3  ;;  %v14706_v0 = vcombine.high %v929_v59, %v937_v60  ;;  %v657_v1 = vld [vmem:[%s16779_s2 + $0x888] sm:$0xff]  ;;  %v14705_v6 = vcombine.low %v929_v59, %v937_v60 }
 0x193   : > { %v913_v3 = vld [vmem:[%s16779_s2 + $0x1088] sm:$0xff] }
 0x194   : > { %11534 = vmatpush2.bf16.msra.mxu1 %v14321_v2  ;;  %v665_v2 = vld [vmem:[%s16779_s2 + $0x8c8] sm:$0xff] }
 0x195   : > { %11535 = vmatprep.subr.bf16.mxu1 %v14306_v4  ;;  %11493 = vmatpush2.bf16.msra.mxu0 %v15839_v9  ;;  %v921_v4 = vld [vmem:[%s16779_s2 + $0x10c8] sm:$0xff]  ;;  %v14434_v7 = vcombine.high %v657_v1, %v665_v2  ;;  %v14433_v13 = vcombine.low %v657_v1, %v665_v2 }
 0x196   : > { %11494 = vmatprep.subr.bf16.mxu0 %v15824_v11  ;;  %v14690_v8 = vcombine.high %v913_v3, %v921_v4  ;;  %v641_v9 = vld [vmem:[%s16779_s2 + $0x808] sm:$0xff]  ;;  %v14689_v14 = vcombine.low %v913_v3, %v921_v4 }
 0x197   : > { %v897_v11 = vld [vmem:[%s16779_s2 + $0x1008] sm:$0xff] }
 0x198   : > { %11536 = vmatpush2.bf16.msra.mxu1 %v14305_v10  ;;  %v649_v10 = vld [vmem:[%s16779_s2 + $0x848] sm:$0xff] }
 0x199   : > { %11537 = vmatprep.subr.bf16.mxu1 %v14290_v12  ;;  %11495 = vmatpush2.bf16.msra.mxu0 %v15823_v17  ;;  %v905_v12 = vld [vmem:[%s16779_s2 + $0x1048] sm:$0xff]  ;;  %v14418_v15 = vcombine.high %v641_v9, %v649_v10  ;;  %v14417_v21 = vcombine.low %v641_v9, %v649_v10 }
 0x19a   : > { %11550 = vmatprep.subr.bf16.mxu0 %v14530_v19  ;;  %v14674_v16 = vcombine.high %v897_v11, %v905_v12  ;;  %v881_v17 = vld [vmem:[%s16779_s2 + $0xf88] sm:$0xff]  ;;  %v14673_v22 = vcombine.low %v897_v11, %v905_v12 }
 0x19b   : > { %v1137_v19 = vld [vmem:[%s16779_s2 + $0x1788] sm:$0xff] }
 0x19c   : > { %11538 = vmatpush2.bf16.msra.mxu1 %v14289_v18  ;;  %11497 = vmatmul.mubr.bf16.vlgmr.msra.gmra.mxu0 %v16163_v23  ;;  %v889_v18 = vld [vmem:[%s16779_s2 + $0xfc8] sm:$0xff] }
 0x19d   : > { %11593 = vmatprep.subr.bf16.mxu1 %v14786_v20  ;;  %11551 = vmatpush1.bf16.msra.mxu0 %v14529_v26  ;;  %v1145_v20 = vld [vmem:[%s16779_s2 + $0x17c8] sm:$0xff]  ;;  %v14658_v23 = vcombine.high %v881_v17, %v889_v18 }
 0x19e   : > { %11552 = vmatprep.subr.bf16.mxu0 %v14514_v28  ;;  %11582 = vmatprep.mubr.bf16.mxu0 %v16166_v41  ;;  %v14914_v24 = vcombine.high %v1137_v19, %v1145_v20  ;;  %v873_v26 = vld [vmem:[%s16779_s2 + $0xf48] sm:$0xff]  ;;  %v14913_v30 = vcombine.low %v1137_v19, %v1145_v20 }
 0x19f   : > { %11540 = vmatmul.mubr.bf16.vlgmr.msra.gmra.mxu1 %v16165_v34  ;;  %v1129_v28 = vld [vmem:[%s16779_s2 + $0x1748] sm:$0xff]  ;;  %v14642_v31 = vcombine.high %v865_v25, %v873_v26 }
 0x1a0   : > { %11594 = vmatpush1.bf16.msra.mxu1 %v14785_v27  ;;  %11625 = vmatprep.mubr.bf16.mxu1 %v16167_v44  ;;  %v1121_v27 = vld [vmem:[%s16779_s2 + $0x1708] sm:$0xff] }
 0x1a1   : > { %11595 = vmatprep.subr.bf16.mxu1 %v14770_v29  ;;  %11553 = vmatpush1.bf16.msra.mxu0 %v14513_v35  ;;  %v14657_v29 = vcombine.low %v881_v17, %v889_v18  ;;  %v14898_v32 = vcombine.high %v1121_v27, %v1129_v28  ;;  %v857_v34 = vld [vmem:[%s16779_s2 + $0xec8] sm:$0xff] }
 0x1a2   : > { %11554 = vmatprep.subr.bf16.mxu0 %v14498_v37  ;;  %v1105_v35 = vld [vmem:[%s16779_s2 + $0x1688] sm:$0xff]  ;;  %v14641_v37 = vcombine.low %v865_v25, %v873_v26  ;;  %v14626_v39 = vcombine.high %v849_v33, %v857_v34 }
 0x1a3   : > { %v833_v41 = vld [vmem:[%s16779_s2 + $0xe08] sm:$0xff] }
 0x1a4   : > { %11596 = vmatpush1.bf16.msra.mxu1 %v14769_v36  ;;  %v1113_v36 = vld [vmem:[%s16779_s2 + $0x16c8] sm:$0xff] }
 0x1a5   : > { %11597 = vmatprep.subr.bf16.mxu1 %v14754_v38  ;;  %11555 = vmatpush1.bf16.msra.mxu0 %v14497_v45  ;;  %v14897_v38 = vcombine.low %v1121_v27, %v1129_v28  ;;  %v14882_v40 = vcombine.high %v1105_v35, %v1113_v36  ;;  %v841_v42 = vld [vmem:[%s16779_s2 + $0xe48] sm:$0xff]  ;;  %v14625_v45 = vcombine.low %v849_v33, %v857_v34 }
 0x1a6   : > { %11556 = vmatprep.subr.bf16.mxu0 %v14482_v47  ;;  %v1089_v43 = vld [vmem:[%s16779_s2 + $0x1608] sm:$0xff]  ;;  %v14610_v47 = vcombine.high %v833_v41, %v841_v42 }
 0x1a7   : > { %v1097_v44 = vld [vmem:[%s16779_s2 + $0x1648] sm:$0xff] }
 0x1a8   : > { %11598 = vmatpush1.bf16.msra.mxu1 %v14753_v46  ;;  %v14881_v46 = vcombine.low %v1105_v35, %v1113_v36  ;;  %v817_v49 = vld [vmem:[%s16779_s2 + $0xd88] sm:$0xff] }
 0x1a9   : > { %11599 = vmatprep.subr.bf16.mxu1 %v14738_v48  ;;  %11557 = vmatpush1.bf16.msra.mxu0 %v14481_v53  ;;  %v14866_v48 = vcombine.high %v1089_v43, %v1097_v44  ;;  %v825_v50 = vld [vmem:[%s16779_s2 + $0xdc8] sm:$0xff]  ;;  %v14609_v53 = vcombine.low %v833_v41, %v841_v42 }
 0x1aa   : > { %11558 = vmatprep.subr.bf16.mxu0 %v14466_v55  ;;  %v1073_v51 = vld [vmem:[%s16779_s2 + $0x1588] sm:$0xff]  ;;  %v14594_v55 = vcombine.high %v817_v49, %v825_v50 }
 0x1ab   : > { %v1081_v52 = vld [vmem:[%s16779_s2 + $0x15c8] sm:$0xff] }
 0x1ac   : > { %11600 = vmatpush1.bf16.msra.mxu1 %v14737_v54  ;;  %v14865_v54 = vcombine.low %v1089_v43, %v1097_v44  ;;  %v801_v57 = vld [vmem:[%s16779_s2 + $0xd08] sm:$0xff] }
 0x1ad   : > { %11601 = vmatprep.subr.bf16.mxu1 %v14722_v56  ;;  %11559 = vmatpush1.bf16.msra.mxu0 %v14465_v61  ;;  %v14850_v56 = vcombine.high %v1073_v51, %v1081_v52  ;;  %v809_v58 = vld [vmem:[%s16779_s2 + $0xd48] sm:$0xff]  ;;  %v14593_v61 = vcombine.low %v817_v49, %v825_v50 }
 0x1ae   : > { %11560 = vmatprep.subr.bf16.mxu0 %v14450_v63  ;;  %v1057_v59 = vld [vmem:[%s16779_s2 + $0x1508] sm:$0xff]  ;;  %v14578_v63 = vcombine.high %v801_v57, %v809_v58 }
 0x1af   : > { %v1065_v60 = vld [vmem:[%s16779_s2 + $0x1548] sm:$0xff] }
 0x1b0   : > { %11602 = vmatpush1.bf16.msra.mxu1 %v14721_v62  ;;  %v14849_v62 = vcombine.low %v1073_v51, %v1081_v52  ;;  %v785_v1 = vld [vmem:[%s16779_s2 + $0xc88] sm:$0xff] }
 0x1b1   : > { %11603 = vmatprep.subr.bf16.mxu1 %v14706_v0  ;;  %11561 = vmatpush1.bf16.msra.mxu0 %v14449_v5  ;;  %v14834_v0 = vcombine.high %v1057_v59, %v1065_v60  ;;  %v793_v2 = vld [vmem:[%s16779_s2 + $0xcc8] sm:$0xff]  ;;  %v14577_v5 = vcombine.low %v801_v57, %v809_v58 }
 0x1b2   : > { %11562 = vmatprep.subr.bf16.mxu0 %v14434_v7  ;;  %v1041_v3 = vld [vmem:[%s16779_s2 + $0x1488] sm:$0xff]  ;;  %v14562_v7 = vcombine.high %v785_v1, %v793_v2 }
 0x1b3   : > { %v1049_v4 = vld [vmem:[%s16779_s2 + $0x14c8] sm:$0xff] }
 0x1b4   : > { %11604 = vmatpush1.bf16.msra.mxu1 %v14705_v6  ;;  %v14833_v6 = vcombine.low %v1057_v59, %v1065_v60  ;;  %v769_v9 = vld [vmem:[%s16779_s2 + $0xc08] sm:$0xff] }
 0x1b5   : > { %11605 = vmatprep.subr.bf16.mxu1 %v14690_v8  ;;  %11563 = vmatpush1.bf16.msra.mxu0 %v14433_v13  ;;  %v14818_v8 = vcombine.high %v1041_v3, %v1049_v4  ;;  %v777_v10 = vld [vmem:[%s16779_s2 + $0xc48] sm:$0xff]  ;;  %v14561_v13 = vcombine.low %v785_v1, %v793_v2 }
 0x1b6   : > { %11564 = vmatprep.subr.bf16.mxu0 %v14418_v15  ;;  %v1025_v11 = vld [vmem:[%s16779_s2 + $0x1408] sm:$0xff]  ;;  %v14546_v15 = vcombine.high %v769_v9, %v777_v10 }
 0x1b7   : > { %v1033_v12 = vld [vmem:[%s16779_s2 + $0x1448] sm:$0xff] }
 0x1b8   : > { %11606 = vmatpush1.bf16.msra.mxu1 %v14689_v14  ;;  %v14817_v14 = vcombine.low %v1041_v3, %v1049_v4  ;;  %v1265_v17 = vld [vmem:[%s16779_s2 + $0x1b88] sm:$0xff] }
 0x1b9   : > { %11607 = vmatprep.subr.bf16.mxu1 %v14674_v16  ;;  %11565 = vmatpush1.bf16.msra.mxu0 %v14417_v21  ;;  %v14802_v16 = vcombine.high %v1025_v11, %v1033_v12  ;;  %v1273_v18 = vld [vmem:[%s16779_s2 + $0x1bc8] sm:$0xff]  ;;  %v14545_v21 = vcombine.low %v769_v9, %v777_v10 }
 0x1ba   : > { %11566 = vmatprep.subr.bf16.mxu0 %v14658_v23  ;;  %v1521_v19 = vld [vmem:[%s16779_s2 + $0x2388] sm:$0xff]  ;;  %v15042_v23 = vcombine.high %v1265_v17, %v1273_v18 }
 0x1bb   : > { %v1529_v20 = vld [vmem:[%s16779_s2 + $0x23c8] sm:$0xff] }
 0x1bc   : > { %11608 = vmatpush1.bf16.msra.mxu1 %v14673_v22  ;;  %v14801_v22 = vcombine.low %v1025_v11, %v1033_v12  ;;  %v1249_v25 = vld [vmem:[%s16779_s2 + $0x1b08] sm:$0xff] }
 0x1bd   : > { %11609 = vmatprep.subr.bf16.mxu1 %v14914_v24  ;;  %11567 = vmatpush2.bf16.msra.mxu0 %v14657_v29  ;;  %v15298_v24 = vcombine.high %v1521_v19, %v1529_v20  ;;  %v1257_v26 = vld [vmem:[%s16779_s2 + $0x1b48] sm:$0xff]  ;;  %v15041_v29 = vcombine.low %v1265_v17, %v1273_v18 }
 0x1be   : > { %11568 = vmatprep.subr.bf16.mxu0 %v14642_v31  ;;  %v1505_v27 = vld [vmem:[%s16779_s2 + $0x2308] sm:$0xff]  ;;  %v15026_v31 = vcombine.high %v1249_v25, %v1257_v26 }
 0x1bf   : > { %v1513_v28 = vld [vmem:[%s16779_s2 + $0x2348] sm:$0xff] }
 0x1c0   : > { %11610 = vmatpush2.bf16.msra.mxu1 %v14913_v30  ;;  %v15297_v30 = vcombine.low %v1521_v19, %v1529_v20  ;;  %v1233_v33 = vld [vmem:[%s16779_s2 + $0x1a88] sm:$0xff] }
 0x1c1   : > { %11611 = vmatprep.subr.bf16.mxu1 %v14898_v32  ;;  %11569 = vmatpush2.bf16.msra.mxu0 %v14641_v37  ;;  %v15282_v32 = vcombine.high %v1505_v27, %v1513_v28  ;;  %v1241_v34 = vld [vmem:[%s16779_s2 + $0x1ac8] sm:$0xff] }
 0x1c2   : > { %11570 = vmatprep.subr.bf16.mxu0 %v14626_v39  ;;  %v16168_v35 = vld [vmem:[%s16771_s30 + $0x8] ss:$56 sps:$4 sm:$0xff]   ;;  %v15025_v39 = vcombine.low %v1249_v25, %v1257_v26  ;;  %v15010_v41 = vcombine.high %v1233_v33, %v1241_v34  ;;  %v15009_v49 = vcombine.low %v1233_v33, %v1241_v34 }
 0x1c3   : > { %v1489_v36 = vld [vmem:[%s16779_s2 + $0x2288] sm:$0xff] }
 0x1c4   : > { %11612 = vmatpush2.bf16.msra.mxu1 %v14897_v38  ;;  %v1497_v37 = vld [vmem:[%s16779_s2 + $0x22c8] sm:$0xff] }
 0x1c5   : > { %11613 = vmatprep.subr.bf16.mxu1 %v14882_v40  ;;  %11571 = vmatpush2.bf16.msra.mxu0 %v14625_v45  ;;  %v16169_v38 = vld [vmem:[%s16771_s30 + $0x10] ss:$56 sps:$4 sm:$0xff]   ;;  %v15281_v40 = vcombine.low %v1505_v27, %v1513_v28  ;;  %v15266_v42 = vcombine.high %v1489_v36, %v1497_v37  ;;  %v16170_v45 = vld [vmem:[%s16771_s30 + $0x1c] ss:$56 sps:$4 sm:$0xff]   ;;  %v15265_v50 = vcombine.low %v1489_v36, %v1497_v37 }
 0x1c6   : > { %11572 = vmatprep.subr.bf16.mxu0 %v14610_v47  ;;  %v1217_v43 = vld [vmem:[%s16779_s2 + $0x1a08] sm:$0xff] }
 0x1c7   : > { %v1225_v44 = vld [vmem:[%s16779_s2 + $0x1a48] sm:$0xff] }
 0x1c8   : > { %11614 = vmatpush2.bf16.msra.mxu1 %v14881_v46  ;;  %v1473_v46 = vld [vmem:[%s16779_s2 + $0x2208] sm:$0xff]  ;;  %v14994_v51 = vcombine.high %v1217_v43, %v1225_v44  ;;  %v14993_v57 = vcombine.low %v1217_v43, %v1225_v44 }
 0x1c9   : > { %11615 = vmatprep.subr.bf16.mxu1 %v14866_v48  ;;  %11573 = vmatpush2.bf16.msra.mxu0 %v14609_v53  ;;  %v1481_v47 = vld [vmem:[%s16779_s2 + $0x2248] sm:$0xff] }
 0x1ca   : > { %11574 = vmatprep.subr.bf16.mxu0 %v14594_v55  ;;  %v16171_v48 = vld [vmem:[%s16771_s30 + $0x24] ss:$56 sps:$4 sm:$0xff]   ;;  %v15250_v52 = vcombine.high %v1473_v46, %v1481_v47  ;;  %v15249_v58 = vcombine.low %v1473_v46, %v1481_v47 }
 0x1cb   : > { %v1201_v53 = vld [vmem:[%s16779_s2 + $0x1988] sm:$0xff] }
 0x1cc   : > { %11616 = vmatpush2.bf16.msra.mxu1 %v14865_v54  ;;  %v1209_v54 = vld [vmem:[%s16779_s2 + $0x19c8] sm:$0xff] }
 0x1cd   : > { %11617 = vmatprep.subr.bf16.mxu1 %v14850_v56  ;;  %11575 = vmatpush2.bf16.msra.mxu0 %v14593_v61  ;;  %v1457_v55 = vld [vmem:[%s16779_s2 + $0x2188] sm:$0xff]  ;;  %v14978_v59 = vcombine.high %v1201_v53, %v1209_v54  ;;  %v14977_v1 = vcombine.low %v1201_v53, %v1209_v54 }
 0x1ce   : > { %11576 = vmatprep.subr.bf16.mxu0 %v14578_v63  ;;  %v1465_v56 = vld [vmem:[%s16779_s2 + $0x21c8] sm:$0xff] }
 0x1cf   : > { %v15234_v60 = vcombine.high %v1457_v55, %v1465_v56  ;;  %v1185_v61 = vld [vmem:[%s16779_s2 + $0x1908] sm:$0xff]  ;;  %v15233_v2 = vcombine.low %v1457_v55, %v1465_v56 }
 0x1d0   : > { %11618 = vmatpush2.bf16.msra.mxu1 %v14849_v62  ;;  %v1193_v62 = vld [vmem:[%s16779_s2 + $0x1948] sm:$0xff] }
 0x1d1   : > { %11619 = vmatprep.subr.bf16.mxu1 %v14834_v0  ;;  %11577 = vmatpush2.bf16.msra.mxu0 %v14577_v5  ;;  %v1441_v63 = vld [vmem:[%s16779_s2 + $0x2108] sm:$0xff]  ;;  %v14962_v3 = vcombine.high %v1185_v61, %v1193_v62  ;;  %v14961_v9 = vcombine.low %v1185_v61, %v1193_v62 }
 0x1d2   : > { %11578 = vmatprep.subr.bf16.mxu0 %v14562_v7  ;;  %v1449_v0 = vld [vmem:[%s16779_s2 + $0x2148] sm:$0xff] }
 0x1d3   : > { %v15218_v4 = vcombine.high %v1441_v63, %v1449_v0  ;;  %v1169_v5 = vld [vmem:[%s16779_s2 + $0x1888] sm:$0xff]  ;;  %v15217_v10 = vcombine.low %v1441_v63, %v1449_v0 }
 0x1d4   : > { %11620 = vmatpush2.bf16.msra.mxu1 %v14833_v6  ;;  %v1177_v6 = vld [vmem:[%s16779_s2 + $0x18c8] sm:$0xff] }
 0x1d5   : > { %11621 = vmatprep.subr.bf16.mxu1 %v14818_v8  ;;  %11579 = vmatpush2.bf16.msra.mxu0 %v14561_v13  ;;  %v1425_v7 = vld [vmem:[%s16779_s2 + $0x2088] sm:$0xff]  ;;  %v14946_v11 = vcombine.high %v1169_v5, %v1177_v6  ;;  %v14945_v17 = vcombine.low %v1169_v5, %v1177_v6 }
 0x1d6   : > { %11580 = vmatprep.subr.bf16.mxu0 %v14546_v15  ;;  %v1433_v8 = vld [vmem:[%s16779_s2 + $0x20c8] sm:$0xff] }
 0x1d7   : > { %v15202_v12 = vcombine.high %v1425_v7, %v1433_v8  ;;  %v1153_v13 = vld [vmem:[%s16779_s2 + $0x1808] sm:$0xff]  ;;  %v15201_v18 = vcombine.low %v1425_v7, %v1433_v8 }
 0x1d8   : > { %11622 = vmatpush2.bf16.msra.mxu1 %v14817_v14  ;;  %v1161_v14 = vld [vmem:[%s16779_s2 + $0x1848] sm:$0xff] }
 0x1d9   : > { %11623 = vmatprep.subr.bf16.mxu1 %v14802_v16  ;;  %11581 = vmatpush2.bf16.msra.mxu0 %v14545_v21  ;;  %v1409_v15 = vld [vmem:[%s16779_s2 + $0x2008] sm:$0xff]  ;;  %v14930_v19 = vcombine.high %v1153_v13, %v1161_v14  ;;  %v14929_v25 = vcombine.low %v1153_v13, %v1161_v14 }
 0x1da   : > { %11636 = vmatprep.subr.bf16.mxu0 %v15042_v23  ;;  %v1417_v16 = vld [vmem:[%s16779_s2 + $0x2048] sm:$0xff] }
 0x1db   : > { %v15186_v20 = vcombine.high %v1409_v15, %v1417_v16  ;;  %v1393_v21 = vld [vmem:[%s16779_s2 + $0x1f88] sm:$0xff]  ;;  %v15185_v26 = vcombine.low %v1409_v15, %v1417_v16 }
 0x1dc   : > { %11624 = vmatpush2.bf16.msra.mxu1 %v14801_v22  ;;  %11583 = vmatmul.mubr.bf16.vlgmr.msra.gmra.mxu0 %v16168_v35  ;;  %v1401_v22 = vld [vmem:[%s16779_s2 + $0x1fc8] sm:$0xff] }
 0x1dd   : > { %11679 = vmatprep.subr.bf16.mxu1 %v15298_v24  ;;  %11637 = vmatpush1.bf16.msra.mxu0 %v15041_v29  ;;  %v1649_v23 = vld [vmem:[%s16779_s2 + $0x2788] sm:$0xff]  ;;  %v15170_v27 = vcombine.high %v1393_v21, %v1401_v22  ;;  %v15169_v33 = vcombine.low %v1393_v21, %v1401_v22 }
 0x1de   : > { %11638 = vmatprep.subr.bf16.mxu0 %v15026_v31  ;;  %11668 = vmatprep.mubr.bf16.mxu0 %v16170_v45  ;;  %v1657_v24 = vld [vmem:[%s16779_s2 + $0x27c8] sm:$0xff] }
 0x1df   : > { %11626 = vmatmul.mubr.bf16.vlgmr.msra.gmra.mxu1 %v16169_v38  ;;  %v15426_v28 = vcombine.high %v1649_v23, %v1657_v24  ;;  %v1377_v29 = vld [vmem:[%s16779_s2 + $0x1f08] sm:$0xff]  ;;  %v15425_v34 = vcombine.low %v1649_v23, %v1657_v24 }
 0x1e0   : > { %11680 = vmatpush1.bf16.msra.mxu1 %v15297_v30  ;;  %11711 = vmatprep.mubr.bf16.mxu1 %v16171_v48  ;;  %v1385_v30 = vld [vmem:[%s16779_s2 + $0x1f48] sm:$0xff] }
 0x1e1   : > { %11681 = vmatprep.subr.bf16.mxu1 %v15282_v32  ;;  %11639 = vmatpush1.bf16.msra.mxu0 %v15025_v39  ;;  %v1633_v31 = vld [vmem:[%s16779_s2 + $0x2708] sm:$0xff]  ;;  %v15154_v35 = vcombine.high %v1377_v29, %v1385_v30 }
 0x1e2   : > { %11640 = vmatprep.subr.bf16.mxu0 %v15010_v41  ;;  %v1641_v32 = vld [vmem:[%s16779_s2 + $0x2748] sm:$0xff]  ;;  %v15153_v41 = vcombine.low %v1377_v29, %v1385_v30 }
 0x1e3   : > { %v15410_v36 = vcombine.high %v1633_v31, %v1641_v32  ;;  %v1361_v37 = vld [vmem:[%s16779_s2 + $0x1e88] sm:$0xff] }
 0x1e4   : > { %11682 = vmatpush1.bf16.msra.mxu1 %v15281_v40  ;;  %v1369_v38 = vld [vmem:[%s16779_s2 + $0x1ec8] sm:$0xff] }
 0x1e5   : > { %11683 = vmatprep.subr.bf16.mxu1 %v15266_v42  ;;  %11641 = vmatpush1.bf16.msra.mxu0 %v15009_v49  ;;  %v1617_v39 = vld [vmem:[%s16779_s2 + $0x2688] sm:$0xff]  ;;  %v15409_v42 = vcombine.low %v1633_v31, %v1641_v32  ;;  %v15138_v43 = vcombine.high %v1361_v37, %v1369_v38  ;;  %v15137_v49 = vcombine.low %v1361_v37, %v1369_v38 }
 0x1e6   : > { %11642 = vmatprep.subr.bf16.mxu0 %v14994_v51  ;;  %v1625_v40 = vld [vmem:[%s16779_s2 + $0x26c8] sm:$0xff] }
 0x1e7   : > { %v15394_v44 = vcombine.high %v1617_v39, %v1625_v40  ;;  %v1345_v45 = vld [vmem:[%s16779_s2 + $0x1e08] sm:$0xff] }
 0x1e8   : > { %11684 = vmatpush1.bf16.msra.mxu1 %v15265_v50  ;;  %v1353_v46 = vld [vmem:[%s16779_s2 + $0x1e48] sm:$0xff]  ;;  %v15393_v50 = vcombine.low %v1617_v39, %v1625_v40 }
 0x1e9   : > { %11685 = vmatprep.subr.bf16.mxu1 %v15250_v52  ;;  %11643 = vmatpush1.bf16.msra.mxu0 %v14993_v57  ;;  %v1601_v47 = vld [vmem:[%s16779_s2 + $0x2608] sm:$0xff]  ;;  %v15122_v51 = vcombine.high %v1345_v45, %v1353_v46  ;;  %v15121_v57 = vcombine.low %v1345_v45, %v1353_v46 }
 0x1ea   : > { %11644 = vmatprep.subr.bf16.mxu0 %v14978_v59  ;;  %v1609_v48 = vld [vmem:[%s16779_s2 + $0x2648] sm:$0xff] }
 0x1eb   : > { %v15378_v52 = vcombine.high %v1601_v47, %v1609_v48  ;;  %v1329_v53 = vld [vmem:[%s16779_s2 + $0x1d88] sm:$0xff] }
 0x1ec   : > { %11686 = vmatpush1.bf16.msra.mxu1 %v15249_v58  ;;  %v1337_v54 = vld [vmem:[%s16779_s2 + $0x1dc8] sm:$0xff]  ;;  %v15377_v58 = vcombine.low %v1601_v47, %v1609_v48 }
 0x1ed   : > { %11687 = vmatprep.subr.bf16.mxu1 %v15234_v60  ;;  %11645 = vmatpush1.bf16.msra.mxu0 %v14977_v1  ;;  %v1585_v55 = vld [vmem:[%s16779_s2 + $0x2588] sm:$0xff]  ;;  %v15106_v59 = vcombine.high %v1329_v53, %v1337_v54  ;;  %v15105_v1 = vcombine.low %v1329_v53, %v1337_v54 }
 0x1ee   : > { %11646 = vmatprep.subr.bf16.mxu0 %v14962_v3  ;;  %v1593_v56 = vld [vmem:[%s16779_s2 + $0x25c8] sm:$0xff] }
 0x1ef   : > { %v15362_v60 = vcombine.high %v1585_v55, %v1593_v56  ;;  %v1313_v61 = vld [vmem:[%s16779_s2 + $0x1d08] sm:$0xff] }
 0x1f0   : > { %11688 = vmatpush1.bf16.msra.mxu1 %v15233_v2  ;;  %v1321_v62 = vld [vmem:[%s16779_s2 + $0x1d48] sm:$0xff]  ;;  %v15361_v2 = vcombine.low %v1585_v55, %v1593_v56 }
 0x1f1   : > { %11689 = vmatprep.subr.bf16.mxu1 %v15218_v4  ;;  %11647 = vmatpush1.bf16.msra.mxu0 %v14961_v9  ;;  %v1569_v63 = vld [vmem:[%s16779_s2 + $0x2508] sm:$0xff]  ;;  %v15090_v3 = vcombine.high %v1313_v61, %v1321_v62  ;;  %v15089_v9 = vcombine.low %v1313_v61, %v1321_v62 }
 0x1f2   : > { %11648 = vmatprep.subr.bf16.mxu0 %v14946_v11  ;;  %v1577_v0 = vld [vmem:[%s16779_s2 + $0x2548] sm:$0xff] }
 0x1f3   : > { %v15346_v4 = vcombine.high %v1569_v63, %v1577_v0  ;;  %v1297_v5 = vld [vmem:[%s16779_s2 + $0x1c88] sm:$0xff] }
 0x1f4   : > { %11690 = vmatpush1.bf16.msra.mxu1 %v15217_v10  ;;  %v1305_v6 = vld [vmem:[%s16779_s2 + $0x1cc8] sm:$0xff]  ;;  %v15345_v10 = vcombine.low %v1569_v63, %v1577_v0 }
 0x1f5   : > { %11691 = vmatprep.subr.bf16.mxu1 %v15202_v12  ;;  %11649 = vmatpush1.bf16.msra.mxu0 %v14945_v17  ;;  %v1553_v7 = vld [vmem:[%s16779_s2 + $0x2488] sm:$0xff]  ;;  %v15074_v11 = vcombine.high %v1297_v5, %v1305_v6  ;;  %v15073_v17 = vcombine.low %v1297_v5, %v1305_v6 }
 0x1f6   : > { %11650 = vmatprep.subr.bf16.mxu0 %v14930_v19  ;;  %v1561_v8 = vld [vmem:[%s16779_s2 + $0x24c8] sm:$0xff] }
 0x1f7   : > { %v15330_v12 = vcombine.high %v1553_v7, %v1561_v8  ;;  %v1281_v13 = vld [vmem:[%s16779_s2 + $0x1c08] sm:$0xff] }
 0x1f8   : > { %11692 = vmatpush1.bf16.msra.mxu1 %v15201_v18  ;;  %v1289_v14 = vld [vmem:[%s16779_s2 + $0x1c48] sm:$0xff]  ;;  %v15329_v18 = vcombine.low %v1553_v7, %v1561_v8 }
 0x1f9   : > { %11693 = vmatprep.subr.bf16.mxu1 %v15186_v20  ;;  %11651 = vmatpush1.bf16.msra.mxu0 %v14929_v25  ;;  %v1537_v15 = vld [vmem:[%s16779_s2 + $0x2408] sm:$0xff]  ;;  %v15058_v19 = vcombine.high %v1281_v13, %v1289_v14  ;;  %v15057_v25 = vcombine.low %v1281_v13, %v1289_v14 }
 0x1fa   : > { %11652 = vmatprep.subr.bf16.mxu0 %v15170_v27  ;;  %v1545_v16 = vld [vmem:[%s16779_s2 + $0x2448] sm:$0xff] }
 0x1fb   : > { %v15314_v20 = vcombine.high %v1537_v15, %v1545_v16  ;;  %v1777_v21 = vld [vmem:[%s16779_s2 + $0x2b88] sm:$0xff] }
 0x1fc   : > { %11694 = vmatpush1.bf16.msra.mxu1 %v15185_v26  ;;  %v1785_v22 = vld [vmem:[%s16779_s2 + $0x2bc8] sm:$0xff]  ;;  %v15313_v26 = vcombine.low %v1537_v15, %v1545_v16 }
 0x1fd   : > { %11695 = vmatprep.subr.bf16.mxu1 %v15426_v28  ;;  %11653 = vmatpush2.bf16.msra.mxu0 %v15169_v33  ;;  %v2033_v23 = vld [vmem:[%s16779_s2 + $0x3388] sm:$0xff]  ;;  %v15554_v27 = vcombine.high %v1777_v21, %v1785_v22  ;;  %v15553_v33 = vcombine.low %v1777_v21, %v1785_v22  ;;  %v17241_v22 = vpop.f32.mrf.mxu0 }
 0x1fe   : > { %11654 = vmatprep.subr.bf16.mxu0 %v15154_v35  ;;  %v2041_v24 = vld [vmem:[%s16779_s2 + $0x33c8] sm:$0xff] }
 0x1ff   : > { %v15810_v28 = vcombine.high %v2033_v23, %v2041_v24  ;;  %v1761_v29 = vld [vmem:[%s16779_s2 + $0x2b08] sm:$0xff] }
 0x200   : > { %11696 = vmatpush2.bf16.msra.mxu1 %v15425_v34  ;;  %v1769_v30 = vld [vmem:[%s16779_s2 + $0x2b48] sm:$0xff]  ;;  %v15809_v34 = vcombine.low %v2033_v23, %v2041_v24 }
 0x201   : > { %11697 = vmatprep.subr.bf16.mxu1 %v15410_v36  ;;  %11655 = vmatpush2.bf16.msra.mxu0 %v15153_v41  ;;  %v2017_v31 = vld [vmem:[%s16779_s2 + $0x3308] sm:$0xff]  ;;  %v15538_v35 = vcombine.high %v1761_v29, %v1769_v30 }
 0x202   : > { %11656 = vmatprep.subr.bf16.mxu0 %v15138_v43  ;;  %v2025_v32 = vld [vmem:[%s16779_s2 + $0x3348] sm:$0xff]  ;;  %v15537_v43 = vcombine.low %v1761_v29, %v1769_v30 }
 0x203   : > { %v15794_v36 = vcombine.high %v2017_v31, %v2025_v32  ;;  %v1745_v37 = vld [vmem:[%s16779_s2 + $0x2a88] sm:$0xff] }
 0x204   : > { %11698 = vmatpush2.bf16.msra.mxu1 %v15409_v42  ;;  %v1753_v38 = vld [vmem:[%s16779_s2 + $0x2ac8] sm:$0xff] }
 0x205   : > { %11699 = vmatprep.subr.bf16.mxu1 %v15394_v44  ;;  %11657 = vmatpush2.bf16.msra.mxu0 %v15137_v49  ;;  %v16172_v39 = vld [vmem:[%s16771_s30 + $0x18] ss:$56 sps:$4 sm:$0xff]   ;;  %v15793_v44 = vcombine.low %v2017_v31, %v2025_v32  ;;  %v15522_v45 = vcombine.high %v1745_v37, %v1753_v38  ;;  %v16174_v49 = vld [vmem:[%s16771_s30 + $0x2c] ss:$56 sps:$4 sm:$0xff]   ;;  %v15521_v53 = vcombine.low %v1745_v37, %v1753_v38  ;;  %v17247_v31 = vpop.f32.mrf.mxu0  ;;  %v17251_v37 = vpop.f32.mrf.mxu1 }
 0x206   : > { %11658 = vmatprep.subr.bf16.mxu0 %v15122_v51  ;;  %v2001_v40 = vld [vmem:[%s16779_s2 + $0x3288] sm:$0xff] }
 0x207   : > { %v2009_v41 = vld [vmem:[%s16779_s2 + $0x32c8] sm:$0xff] }
 0x208   : > { %11700 = vmatpush2.bf16.msra.mxu1 %v15393_v50  ;;  %v16173_v42 = vld [vmem:[%s16771_s30 + $0x20] ss:$56 sps:$4 sm:$0xff]   ;;  %v15778_v46 = vcombine.high %v2001_v40, %v2009_v41  ;;  %v15777_v54 = vcombine.low %v2001_v40, %v2009_v41  ;;  %v17255_v41 = vpop.f32.mrf.mxu0 }
 0x209   : > { %11701 = vmatprep.subr.bf16.mxu1 %v15378_v52  ;;  %11659 = vmatpush2.bf16.msra.mxu0 %v15121_v57  ;;  %v1729_v47 = vld [vmem:[%s16779_s2 + $0x2a08] sm:$0xff] }
 0x20a   : > { %11660 = vmatprep.subr.bf16.mxu0 %v15106_v59  ;;  %v1737_v48 = vld [vmem:[%s16779_s2 + $0x2a48] sm:$0xff] }
 0x20b   : > { %v1985_v50 = vld [vmem:[%s16779_s2 + $0x3208] sm:$0xff]  ;;  %v15506_v55 = vcombine.high %v1729_v47, %v1737_v48  ;;  %v15505_v61 = vcombine.low %v1729_v47, %v1737_v48  ;;  %v17259_v47 = vpop.f32.mrf.mxu1 }
 0x20c   : > { %11702 = vmatpush2.bf16.msra.mxu1 %v15377_v58  ;;  %v1993_v51 = vld [vmem:[%s16779_s2 + $0x3248] sm:$0xff] }
 0x20d   : > { %11703 = vmatprep.subr.bf16.mxu1 %v15362_v60  ;;  %11661 = vmatpush2.bf16.msra.mxu0 %v15105_v1  ;;  %v16175_v52 = vld [vmem:[%s16771_s30 + $0x34] ss:$56 sps:$4 sm:$0xff]   ;;  %v15762_v56 = vcombine.high %v1985_v50, %v1993_v51  ;;  %v15761_v62 = vcombine.low %v1985_v50, %v1993_v51  ;;  %v17263_v51 = vpop.f32.mrf.mxu0 }
 0x20e   : > { %11662 = vmatprep.subr.bf16.mxu0 %v15090_v3  ;;  %v1713_v57 = vld [vmem:[%s16779_s2 + $0x2988] sm:$0xff] }
 0x20f   : > { %v1721_v58 = vld [vmem:[%s16779_s2 + $0x29c8] sm:$0xff] }
 0x210   : > { %11704 = vmatpush2.bf16.msra.mxu1 %v15361_v2  ;;  %v1969_v59 = vld [vmem:[%s16779_s2 + $0x3188] sm:$0xff]  ;;  %v15490_v63 = vcombine.high %v1713_v57, %v1721_v58  ;;  %v15489_v5 = vcombine.low %v1713_v57, %v1721_v58  ;;  %v17267_v57 = vpop.f32.mrf.mxu1  ;;  %v11326_v58 = vpop.f32.mrf.mxu0 }
 0x211   : > { %11705 = vmatprep.subr.bf16.mxu1 %v15346_v4  ;;  %11663 = vmatpush2.bf16.msra.mxu0 %v15089_v9  ;;  %v1977_v60 = vld [vmem:[%s16779_s2 + $0x31c8] sm:$0xff] }
 0x212   : > { %11664 = vmatprep.subr.bf16.mxu0 %v15074_v11  ;;  %v15746_v0 = vcombine.high %v1969_v59, %v1977_v60  ;;  %v1697_v1 = vld [vmem:[%s16779_s2 + $0x2908] sm:$0xff]  ;;  %v15745_v6 = vcombine.low %v1969_v59, %v1977_v60 }
 0x213   : > { %v1705_v2 = vld [vmem:[%s16779_s2 + $0x2948] sm:$0xff] }
 0x214   : > { %11706 = vmatpush2.bf16.msra.mxu1 %v15345_v10  ;;  %v1953_v3 = vld [vmem:[%s16779_s2 + $0x3108] sm:$0xff]  ;;  %v15474_v7 = vcombine.high %v1697_v1, %v1705_v2  ;;  %v15473_v13 = vcombine.low %v1697_v1, %v1705_v2 }
 0x215   : > { %11707 = vmatprep.subr.bf16.mxu1 %v15330_v12  ;;  %11665 = vmatpush2.bf16.msra.mxu0 %v15073_v17  ;;  %v1961_v4 = vld [vmem:[%s16779_s2 + $0x3148] sm:$0xff] }
 0x216   : > { %11666 = vmatprep.subr.bf16.mxu0 %v15058_v19  ;;  %v15730_v8 = vcombine.high %v1953_v3, %v1961_v4  ;;  %v1681_v9 = vld [vmem:[%s16779_s2 + $0x2888] sm:$0xff]  ;;  %v15729_v14 = vcombine.low %v1953_v3, %v1961_v4  ;;  %v17273_v3 = vpop.f32.mrf.mxu1  ;;  %v11328_v4 = vpop.f32.mrf.mxu0 }
 0x217   : > { %v1689_v10 = vld [vmem:[%s16779_s2 + $0x28c8] sm:$0xff] }
 0x218   : > { %11708 = vmatpush2.bf16.msra.mxu1 %v15329_v18  ;;  %v1937_v11 = vld [vmem:[%s16779_s2 + $0x3088] sm:$0xff]  ;;  %v15458_v15 = vcombine.high %v1681_v9, %v1689_v10  ;;  %v15457_v21 = vcombine.low %v1681_v9, %v1689_v10 }
 0x219   : > { %11709 = vmatprep.subr.bf16.mxu1 %v15314_v20  ;;  %11667 = vmatpush2.bf16.msra.mxu0 %v15057_v25  ;;  %v1945_v12 = vld [vmem:[%s16779_s2 + $0x30c8] sm:$0xff] }
 0x21a   : > { %11722 = vmatprep.subr.bf16.mxu0 %v15554_v27  ;;  %v15714_v16 = vcombine.high %v1937_v11, %v1945_v12  ;;  %v1665_v17 = vld [vmem:[%s16779_s2 + $0x2808] sm:$0xff]  ;;  %v15713_v23 = vcombine.low %v1937_v11, %v1945_v12 }
 0x21b   : > { %v1673_v18 = vld [vmem:[%s16779_s2 + $0x2848] sm:$0xff] }
 0x21c   : > { %11710 = vmatpush2.bf16.msra.mxu1 %v15313_v26  ;;  %11669 = vmatmul.mubr.bf16.vlgmr.msra.gmra.mxu0 %v16172_v39  ;;  %v1921_v19 = vld [vmem:[%s16779_s2 + $0x3008] sm:$0xff]  ;;  %v15442_v24 = vcombine.high %v1665_v17, %v1673_v18  ;;  %v15441_v30 = vcombine.low %v1665_v17, %v1673_v18 }
 0x21d   : > { %11765 = vmatprep.subr.bf16.mxu1 %v15810_v28  ;;  %11723 = vmatpush1.bf16.msra.mxu0 %v15553_v33  ;;  %v1929_v20 = vld [vmem:[%s16779_s2 + $0x3048] sm:$0xff] }
 0x21e   : > { %11724 = vmatprep.subr.bf16.mxu0 %v15538_v35  ;;  %11754 = vmatprep.mubr.bf16.mxu0 %v16174_v49  ;;  %v15698_v25 = vcombine.high %v1921_v19, %v1929_v20  ;;  %v1905_v26 = vld [vmem:[%s16779_s2 + $0x2f88] sm:$0xff]  ;;  %v15697_v32 = vcombine.low %v1921_v19, %v1929_v20 }
 0x21f   : > { %11712 = vmatmul.mubr.bf16.vlgmr.msra.gmra.mxu1 %v16173_v42  ;;  %v1913_v27 = vld [vmem:[%s16779_s2 + $0x2fc8] sm:$0xff] }
 0x220   : > { %11766 = vmatpush1.bf16.msra.mxu1 %v15809_v34  ;;  %11797 = vmatprep.mubr.bf16.mxu1 %v16175_v52  ;;  %v2161_v28 = vld [vmem:[%s16779_s2 + $0x3788] sm:$0xff]  ;;  %v15682_v33 = vcombine.high %v1905_v26, %v1913_v27  ;;  %v15681_v40 = vcombine.low %v1905_v26, %v1913_v27 }
 0x221   : > { %11767 = vmatprep.subr.bf16.mxu1 %v15794_v36  ;;  %11725 = vmatpush1.bf16.msra.mxu0 %v15537_v43  ;;  %v2169_v29 = vld [vmem:[%s16779_s2 + $0x37c8] sm:$0xff] }
 0x222   : > { %11726 = vmatprep.subr.bf16.mxu0 %v15522_v45  ;;  %v15938_v34 = vcombine.high %v2161_v28, %v2169_v29  ;;  %v1889_v35 = vld [vmem:[%s16779_s2 + $0x2f08] sm:$0xff]  ;;  %v15937_v42 = vcombine.low %v2161_v28, %v2169_v29 }
 0x223   : > { %v1897_v36 = vld [vmem:[%s16779_s2 + $0x2f48] sm:$0xff] }
 0x224   : > { %11768 = vmatpush1.bf16.msra.mxu1 %v15793_v44  ;;  %v2145_v38 = vld [vmem:[%s16779_s2 + $0x3708] sm:$0xff]  ;;  %v15666_v43 = vcombine.high %v1889_v35, %v1897_v36  ;;  %v15665_v50 = vcombine.low %v1889_v35, %v1897_v36 }
 0x225   : > { %11769 = vmatprep.subr.bf16.mxu1 %v15778_v46  ;;  %11727 = vmatpush1.bf16.msra.mxu0 %v15521_v53  ;;  %v2153_v39 = vld [vmem:[%s16779_s2 + $0x3748] sm:$0xff] }
 0x226   : > { %11728 = vmatprep.subr.bf16.mxu0 %v15506_v55  ;;  %v15922_v44 = vcombine.high %v2145_v38, %v2153_v39  ;;  %v1873_v45 = vld [vmem:[%s16779_s2 + $0x2e88] sm:$0xff]  ;;  %v15921_v52 = vcombine.low %v2145_v38, %v2153_v39 }
 0x227   : > { %v1881_v46 = vld [vmem:[%s16779_s2 + $0x2ec8] sm:$0xff] }
 0x228   : > { %11770 = vmatpush1.bf16.msra.mxu1 %v15777_v54  ;;  %v2129_v48 = vld [vmem:[%s16779_s2 + $0x3688] sm:$0xff]  ;;  %v15650_v53 = vcombine.high %v1873_v45, %v1881_v46 }
 0x229   : > { %11771 = vmatprep.subr.bf16.mxu1 %v15762_v56  ;;  %11729 = vmatpush1.bf16.msra.mxu0 %v15505_v61  ;;  %v2137_v49 = vld [vmem:[%s16779_s2 + $0x36c8] sm:$0xff]  ;;  %v15649_v61 = vcombine.low %v1873_v45, %v1881_v46 }
 0x22a   : > { %11730 = vmatprep.subr.bf16.mxu0 %v15490_v63  ;;  %v15906_v54 = vcombine.high %v2129_v48, %v2137_v49  ;;  %v1857_v55 = vld [vmem:[%s16779_s2 + $0x2e08] sm:$0xff] }
 0x22b   : > { %v1865_v56 = vld [vmem:[%s16779_s2 + $0x2e48] sm:$0xff] }
 0x22c   : > { %11772 = vmatpush1.bf16.msra.mxu1 %v15761_v62  ;;  %v2113_v59 = vld [vmem:[%s16779_s2 + $0x3608] sm:$0xff]  ;;  %v15905_v62 = vcombine.low %v2129_v48, %v2137_v49  ;;  %v15634_v63 = vcombine.high %v1857_v55, %v1865_v56  ;;  %v11288_v48 = vadd.f32 %v17267_v57, %v17255_v41 }
 0x22d   : > { %11773 = vmatprep.subr.bf16.mxu1 %v15746_v0  ;;  %11731 = vmatpush1.bf16.msra.mxu0 %v15489_v5  ;;  %v2121_v60 = vld [vmem:[%s16779_s2 + $0x3648] sm:$0xff] }
 0x22e   : > { %11732 = vmatprep.subr.bf16.mxu0 %v15474_v7  ;;  %v15890_v0 = vcombine.high %v2113_v59, %v2121_v60  ;;  %v1841_v1 = vld [vmem:[%s16779_s2 + $0x2d88] sm:$0xff]  ;;  %v15633_v7 = vcombine.low %v1857_v55, %v1865_v56  ;;  %v15889_v9 = vcombine.low %v2113_v59, %v2121_v60  ;;  %v11290_v55 = vadd.f32 %v17273_v3, %v17263_v51  ;;  %v490_v51 = vld [vmem:[%s16779_s2 + $0x350] sm:$0xff] }
 0x22f   : > { %v1849_v2 = vld [vmem:[%s16779_s2 + $0x2dc8] sm:$0xff]  ;;  %v738_v3 = vld [vmem:[%s16779_s2 + $0xb10] sm:$0xff] }
 0x230   : > { %11774 = vmatpush1.bf16.msra.mxu1 %v15745_v6  ;;  %v2097_v5 = vld [vmem:[%s16779_s2 + $0x3588] sm:$0xff]  ;;  %v15618_v10 = vcombine.high %v1841_v1, %v1849_v2  ;;  %v15617_v17 = vcombine.low %v1841_v1, %v1849_v2  ;;  %v482_v1 = vld [vmem:[%s16779_s2 + $0x310] sm:$0xff] }
 0x231   : > { %11775 = vmatprep.subr.bf16.mxu1 %v15730_v8  ;;  %11733 = vmatpush1.bf16.msra.mxu0 %v15473_v13  ;;  %v2105_v6 = vld [vmem:[%s16779_s2 + $0x35c8] sm:$0xff]  ;;  %v11369_v8 = vpop.f32.mrf.mxu1 }
 0x232   : > { %11734 = vmatprep.subr.bf16.mxu0 %v15458_v15  ;;  %v15874_v11 = vcombine.high %v2097_v5, %v2105_v6  ;;  %v1825_v12 = vld [vmem:[%s16779_s2 + $0x2d08] sm:$0xff]  ;;  %v15873_v19 = vcombine.low %v2097_v5, %v2105_v6 }
 0x233   : > { %v1833_v13 = vld [vmem:[%s16779_s2 + $0x2d48] sm:$0xff]  ;;  %v11371_v18 = vpop.f32.mrf.mxu1 }
 0x234   : > { %11776 = vmatpush1.bf16.msra.mxu1 %v15729_v14  ;;  %v11330_v14 = vpop.f32.mrf.mxu0  ;;  %v2081_v15 = vld [vmem:[%s16779_s2 + $0x3508] sm:$0xff]  ;;  %v15602_v20 = vcombine.high %v1825_v12, %v1833_v13  ;;  %v15601_v28 = vcombine.low %v1825_v12, %v1833_v13 }
 0x235   : > { %11777 = vmatprep.subr.bf16.mxu1 %v15714_v16  ;;  %11735 = vmatpush1.bf16.msra.mxu0 %v15457_v21  ;;  %v2089_v16 = vld [vmem:[%s16779_s2 + $0x3548] sm:$0xff]  ;;  %v11373_v29 = vpop.f32.mrf.mxu1 }
 0x236   : > { %11736 = vmatprep.subr.bf16.mxu0 %v15442_v24  ;;  %v15858_v21 = vcombine.high %v2081_v15, %v2089_v16  ;;  %v1817_v24 = vld [vmem:[%s16779_s2 + $0x2cc8] sm:$0xff] }
 0x237   : > { %v2065_v26 = vld [vmem:[%s16779_s2 + $0x3488] sm:$0xff]  ;;  %v11375_v45 = vpop.f32.mrf.mxu1 }
 0x238   : > { %11778 = vmatpush1.bf16.msra.mxu1 %v15713_v23  ;;  %v1809_v23 = vld [vmem:[%s16779_s2 + $0x2c88] sm:$0xff] }
 0x239   : > { %11779 = vmatprep.subr.bf16.mxu1 %v15698_v25  ;;  %11737 = vmatpush1.bf16.msra.mxu0 %v15441_v30  ;;  %v11332_v25 = vpop.f32.mrf.mxu0  ;;  %v2073_v27 = vld [vmem:[%s16779_s2 + $0x34c8] sm:$0xff] }
 0x23a   : > { %11738 = vmatprep.subr.bf16.mxu0 %v15682_v33  ;;  %v15586_v33 = vcombine.high %v1809_v23, %v1817_v24  ;;  %v15842_v35 = vcombine.high %v2065_v26, %v2073_v27  ;;  %v1793_v36 = vld [vmem:[%s16779_s2 + $0x2c08] sm:$0xff] }
 0x23b   : > { %v11412_v30 = vpop.f32.mrf.mxu0  ;;  %v1801_v38 = vld [vmem:[%s16779_s2 + $0x2c48] sm:$0xff] }
 0x23c   : > { %11780 = vmatpush1.bf16.msra.mxu1 %v15697_v32  ;;  %v15857_v32 = vcombine.low %v2081_v15, %v2089_v16  ;;  %v2049_v39 = vld [vmem:[%s16779_s2 + $0x3408] sm:$0xff]  ;;  %v15569_v59 = vcombine.low %v1793_v36, %v1801_v38  ;;  %v474_v16 = vld [vmem:[%s16779_s2 + $0x2d0] sm:$0xff] }
 0x23d   : > { %11781 = vmatprep.subr.bf16.mxu1 %v15938_v34  ;;  %11739 = vmatpush2.bf16.msra.mxu0 %v15681_v40  ;;  %v11284_v34 = vadd.f32 %v17251_v37, %v17241_v22  ;;  %v2057_v40 = vld [vmem:[%s16779_s2 + $0x3448] sm:$0xff]  ;;  %v11414_v46 = vpop.f32.mrf.mxu0  ;;  %v15841_v22 = vcombine.low %v2065_v26, %v2073_v27  ;;  %v15570_v37 = vcombine.high %v1793_v36, %v1801_v38 }
 0x23e   : > { %11740 = vmatprep.subr.bf16.mxu0 %v15666_v43  ;;  %v15825_v57 = vcombine.low %v2049_v39, %v2057_v40 }
 0x23f   : > { %v11327_v43 = vadd.f32 %v11326_v58, %v11284_v34  ;;  %v11331_v58 = vadd.f32 %v11330_v14, %v11288_v48  ;;  %v11416_v41 = vpop.f32.mrf.mxu0 }
 0x240   : > { %11782 = vmatpush2.bf16.msra.mxu1 %v15937_v42  ;;  %v11286_v42 = vadd.f32 %v17259_v47, %v17247_v31  ;;  %v11455_v31 = vpop.f32.mrf.mxu1  ;;  %v754_v47 = vld [vmem:[%s16779_s2 + $0xb90] sm:$0xff] }
 0x241   : > { %11783 = vmatprep.subr.bf16.mxu1 %v15922_v44  ;;  %11741 = vmatpush2.bf16.msra.mxu0 %v15665_v50  ;;  %v15585_v44 = vcombine.low %v1809_v23, %v1817_v24  ;;  %v15826_v50 = vcombine.high %v2049_v39, %v2057_v40  ;;  %v11370_v56 = vadd.f32 %v11369_v8, %v11327_v43  ;;  %v11418_v8 = vpop.f32.mrf.mxu0  ;;  %v16176_v23 = vld [vmem:[%s16771_s30 + $0x28] ss:$56 sps:$4 sm:$0xff]  }
 0x242   : > { %11742 = vmatprep.subr.bf16.mxu0 %v15650_v53  ;;  %v11329_v49 = vadd.f32 %v11328_v4, %v11286_v42  ;;  %v506_v53 = vld [vmem:[%s16779_s2 + $0x3d0] sm:$0xff]  ;;  %v11457_v2 = vpop.f32.mrf.mxu1  ;;  %v11374_v5 = vadd.f32 %v11373_v29, %v11331_v58  ;;  %v14259_v24 = vcombine.low %v482_v1, %v490_v51  ;;  %v339_v29 = vld [vmem:[#allocation2] sm:$0xff] }
 0x243   : > { %v746_v4 = vld [vmem:[%s16779_s2 + $0xb50] sm:$0xff] }
 0x244   : > { %11784 = vmatpush2.bf16.msra.mxu1 %v15921_v52  ;;  %v498_v52 = vld [vmem:[%s16779_s2 + $0x390] sm:$0xff]  ;;  %v11417_v14 = vadd.f32 %v11416_v41, %v11374_v5  ;;  %v14516_v15 = vcombine.high %v738_v3, %v746_v4 }
 0x245   : > { %11785 = vmatprep.subr.bf16.mxu1 %v15906_v54  ;;  %11743 = vmatpush2.bf16.msra.mxu0 %v15649_v61  ;;  %v762_v54 = vld [vmem:[%s16779_s2 + $0xbd0] sm:$0xff]  ;;  %v14276_v60 = vcombine.high %v498_v52, %v506_v53  ;;  %v11372_v61 = vadd.f32 %v11371_v18, %v11329_v49 }
 0x246   : > { %11744 = vmatprep.subr.bf16.mxu0 %v15634_v63  ;;  %v11413_v63 = vadd.f32 %v11412_v30, %v11370_v56  ;;  %v730_v18 = vld [vmem:[%s16779_s2 + $0xad0] sm:$0xff] }
 0x247   : > { %v11415_v6 = vadd.f32 %v11414_v46, %v11372_v61  ;;  %v450_v39 = vld [vmem:[%s16779_s2 + $0x210] sm:$0xff] }
 0x248   : > { %11786 = vmatpush2.bf16.msra.mxu1 %v15905_v62  ;;  %v11333_v62 = vadd.f32 %v11332_v25, %v11290_v55  ;;  %v11456_v13 = vadd.f32 %v11455_v31, %v11413_v63  ;;  %v458_v40 = vld [vmem:[%s16779_s2 + $0x250] sm:$0xff] }
 0x249   : > { %11787 = vmatprep.subr.bf16.mxu1 %v15890_v0  ;;  %11745 = vmatpush2.bf16.msra.mxu0 %v15633_v7  ;;  %v14532_v0 = vcombine.high %v754_v47, %v762_v54  ;;  %v14275_v7 = vcombine.low %v498_v52, %v506_v53  ;;  %v11458_v25 = vadd.f32 %v11457_v2, %v11415_v6  ;;  %v16178_v42 = vld [vmem:[%s16771_s30 + $0x4] ss:$56 sps:$4 sm:$0xff]  }
 0x24a   : > { %11746 = vmatprep.subr.bf16.mxu0 %v15618_v10  ;;  %v14260_v10 = vcombine.high %v482_v1, %v490_v51  ;;  %v11376_v12 = vadd.f32 %v11375_v45, %v11333_v62  ;;  %v706_v46 = vld [vmem:[%s16779_s2 + $0xa10] sm:$0xff]  ;;  %v355_v53 = vld [vmem:[#allocation2 + $0x58] sm:$0xff]  ;;  %v14227_v62 = vcombine.low %v450_v39, %v458_v40 }
 0x24b   : > { %v442_v41 = vld [vmem:[%s16779_s2 + $0x1d0] sm:$0xff] }
 0x24c   : > { %11788 = vmatpush2.bf16.msra.mxu1 %v15889_v9  ;;  %v14531_v9 = vcombine.low %v754_v47, %v762_v54  ;;  %v11419_v26 = vadd.f32 %v11418_v8, %v11376_v12  ;;  %v14228_v54 = vcombine.high %v450_v39, %v458_v40  ;;  %v418_v51 = vld [vmem:[%s16779_s2 + $0x110] sm:$0xff] }
 0x24d   : > { %11789 = vmatprep.subr.bf16.mxu1 %v15874_v11  ;;  %11747 = vmatpush2.bf16.msra.mxu0 %v15617_v17  ;;  %v17306_v11 = vld [vmem:[%s16779_s2 + $0x290] sm:$0xff] }
 0x24e   : > { %11748 = vmatprep.subr.bf16.mxu0 %v15602_v20  ;;  %v722_v17 = vld [vmem:[%s16779_s2 + $0xa90] sm:$0xff]  ;;  %v14243_v52 = vcombine.low %v17306_v11, %v474_v16 }
 0x24f   : > { %v338_v20 = vld [vmem:[#allocation2 + $0xb0] sm:$0xff]  ;;  %v14500_v34 = vcombine.high %v722_v17, %v730_v18  ;;  %v14499_v47 = vcombine.low %v722_v17, %v730_v18 }
 0x250   : > { %11790 = vmatpush2.bf16.msra.mxu1 %v15873_v19  ;;  %v11459_v19 = vpop.f32.mrf.mxu1  ;;  %v426_v2 = vld [vmem:[%s16779_s2 + $0x150] sm:$0xff] }
 0x251   : > { %11791 = vmatprep.subr.bf16.mxu1 %v15858_v21  ;;  %11749 = vmatpush2.bf16.msra.mxu0 %v15601_v28  ;;  %v16177_v28 = vld [vmem:[%s16771_s30 + $0x30] ss:$56 sps:$4 sm:$0xff]  }
 0x252   : > { %11750 = vmatprep.subr.bf16.mxu0 %v15586_v33  ;;  %v14244_v33 = vcombine.high %v17306_v11, %v474_v16  ;;  %v11461_v43 = vpop.f32.mrf.mxu1  ;;  %v658_v11 = vld [vmem:[%s16779_s2 + $0x890] sm:$0xff] }
 0x253   : > { %v11462_v48 = vadd.f32 %v11461_v43, %v11419_v26  ;;  %v666_v12 = vld [vmem:[%s16779_s2 + $0x8d0] sm:$0xff] }
 0x254   : > { %11792 = vmatpush2.bf16.msra.mxu1 %v15857_v32  ;;  %v14515_v32 = vcombine.low %v738_v3, %v746_v4  ;;  %v674_v3 = vld [vmem:[%s16779_s2 + $0x910] sm:$0xff]  ;;  %v14436_v16 = vcombine.high %v658_v11, %v666_v12 }
 0x255   : > { %11793 = vmatprep.subr.bf16.mxu1 %v15842_v35  ;;  %11751 = vmatpush2.bf16.msra.mxu0 %v15585_v44  ;;  %v11460_v35 = vadd.f32 %v11459_v19, %v11417_v14  ;;  %v354_v44 = vld [vmem:[#allocation2 + $0x38] sm:$0xff]  ;;  %v682_v4 = vld [vmem:[%s16779_s2 + $0x950] sm:$0xff] }
 0x256   : > { %11752 = vmatprep.subr.bf16.mxu0 %v15570_v37  ;;  %v16179_v37 = vld [vmem:[%s16771_s30 + $0xc] ss:$56 sps:$4 sm:$0xff]   ;;  %v14452_v8 = vcombine.high %v674_v3, %v682_v4  ;;  %v14451_v14 = vcombine.low %v674_v3, %v682_v4 }
 0x257   : > { %v386_v17 = vld [vmem:[%s16779_s2 + $0x10] sm:$0xff] }
 0x258   : > { %11794 = vmatpush2.bf16.msra.mxu1 %v15841_v22  ;;  %v714_v22 = vld [vmem:[%s16779_s2 + $0xa50] sm:$0xff] }
 0x259   : > { %11795 = vmatprep.subr.bf16.mxu1 %v15826_v50  ;;  %11753 = vmatpush2.bf16.msra.mxu0 %v15569_v59  ;;  %v14484_v58 = vcombine.high %v706_v46, %v714_v22  ;;  %v434_v59 = vld [vmem:[%s16779_s2 + $0x190] sm:$0xff]  ;;  %v14483_v63 = vcombine.low %v706_v46, %v714_v22 }
 0x25a   : > { %11808 = vmatprep.subr.bf16.mxu0 %v14276_v60  ;;  %v698_v60 = vld [vmem:[%s16779_s2 + $0x9d0] sm:$0xff]  ;;  %v14211_v5 = vcombine.low %v434_v59, %v442_v41 }
 0x25b   : > { %v394_v18 = vld [vmem:[%s16779_s2 + $0x50] sm:$0xff] }
 0x25c   : > { %11796 = vmatpush2.bf16.msra.mxu1 %v15825_v57  ;;  %v11498_v21 = vpop.f32.mrf.mxu0  ;;  %11755 = vmatmul.mubr.bf16.vlgmr.msra.gmra.mxu0 %v16176_v23  ;;  %v690_v57 = vld [vmem:[%s16779_s2 + $0x990] sm:$0xff]  ;;  %v14435_v23 = vcombine.low %v658_v11, %v666_v12 }
 0x25d   : > { %11851 = vmatprep.subr.bf16.mxu1 %v14532_v0  ;;  %v11499_v27 = vadd.f32 %v11498_v21, %v11456_v13  ;;  %11809 = vmatpush1.bf16.msra.mxu0 %v14275_v7  ;;  %v14212_v0 = vcombine.high %v434_v59, %v442_v41  ;;  %v14468_v1 = vcombine.high %v690_v57, %v698_v60  ;;  %v642_v19 = vld [vmem:[%s16779_s2 + $0x810] sm:$0xff] }
 0x25e   : > { %v11500_v30 = vpop.f32.mrf.mxu0  ;;  %11810 = vmatprep.subr.bf16.mxu0 %v14260_v10  ;;  %11840 = vmatprep.mubr.bf16.mxu0 %v16178_v42  ;;  %v14467_v6 = vcombine.low %v690_v57, %v698_v60  ;;  %v14196_v7 = vcombine.high %v418_v51, %v426_v2  ;;  %v410_v10 = vld [vmem:[%s16779_s2 + $0xd0] sm:$0xff]  ;;  %v14195_v13 = vcombine.low %v418_v51, %v426_v2 }
 0x25f   : > { %11798 = vmatmul.mubr.bf16.vlgmr.msra.gmra.mxu1 %v16177_v28  ;;  %v13614_v36 = vadd.f32 %v11499_v27, %v338_v20  ;;  %v11501_v38 = vadd.f32 %v11500_v30, %v11458_v25  ;;  %v650_v20 = vld [vmem:[%s16779_s2 + $0x850] sm:$0xff]  ;;  %v14163_v30 = vcombine.low %v386_v17, %v394_v18 }
 0x260   : > { %11852 = vmatpush1.bf16.msra.mxu1 %v14531_v9  ;;  %v11502_v45 = vpop.f32.mrf.mxu0  ;;  %11883 = vmatprep.mubr.bf16.mxu1 %v16179_v37  ;;  %v402_v9 = vld [vmem:[%s16779_s2 + $0x90] sm:$0xff]  ;;  %v14420_v25 = vcombine.high %v642_v19, %v650_v20 }
 0x261   : > { %11853 = vmatprep.subr.bf16.mxu1 %v14516_v15  ;;  %13646 = vst [vmem:[#allocation2 + $0xb0] sm:$0xff] %v13614_v36  ;;  %v13615_v49 = vadd.f32 %v11501_v38, %v339_v29  ;;  %v11503_v50 = vadd.f32 %v11502_v45, %v11460_v35  ;;  %11811 = vmatpush1.bf16.msra.mxu0 %v14259_v24  ;;  %v626_v26 = vld [vmem:[%s16779_s2 + $0x790] sm:$0xff] }
 0x262   : > { %v11504_v31 = vpop.f32.mrf.mxu0  ;;  %11812 = vmatprep.subr.bf16.mxu0 %v14244_v33  ;;  %v14180_v15 = vcombine.high %v402_v9, %v410_v10  ;;  %v14179_v21 = vcombine.low %v402_v9, %v410_v10  ;;  %v14164_v24 = vcombine.high %v386_v17, %v394_v18  ;;  %v634_v27 = vld [vmem:[%s16779_s2 + $0x7d0] sm:$0xff] }
 0x263   : > { %13647 = vst [vmem:[#allocation2] sm:$0xff] %v13615_v49  ;;  %v13630_v55 = vadd.f32 %v11503_v50, %v354_v44  ;;  %v11505_v56 = vadd.f32 %v11504_v31, %v11462_v48  ;;  %v882_v28 = vld [vmem:[%s16779_s2 + $0xf90] sm:$0xff]  ;;  %v14404_v33 = vcombine.high %v626_v26, %v634_v27  ;;  %v14403_v40 = vcombine.low %v626_v26, %v634_v27 }
 0x264   : > { %11854 = vmatpush1.bf16.msra.mxu1 %v14515_v32  ;;  %v890_v29 = vld [vmem:[%s16779_s2 + $0xfd0] sm:$0xff]  ;;  %v14419_v32 = vcombine.low %v642_v19, %v650_v20 }
 0x265   : > { %11855 = vmatprep.subr.bf16.mxu1 %v14500_v34  ;;  %13662 = vst [vmem:[#allocation2 + $0x38] sm:$0xff] %v13630_v55  ;;  %v13631_v61 = vadd.f32 %v11505_v56, %v355_v53  ;;  %11813 = vmatpush1.bf16.msra.mxu0 %v14243_v52  ;;  %v14660_v34 = vcombine.high %v882_v28, %v890_v29  ;;  %v610_v35 = vld [vmem:[%s16779_s2 + $0x710] sm:$0xff] }
 0x266   : > { %11814 = vmatprep.subr.bf16.mxu0 %v14228_v54  ;;  %v618_v36 = vld [vmem:[%s16779_s2 + $0x750] sm:$0xff]  ;;  %v14659_v42 = vcombine.low %v882_v28, %v890_v29 }
 0x267   : > { %13663 = vst [vmem:[#allocation2 + $0x58] sm:$0xff] %v13631_v61  ;;  %v866_v38 = vld [vmem:[%s16779_s2 + $0xf10] sm:$0xff]  ;;  %v14388_v43 = vcombine.high %v610_v35, %v618_v36  ;;  %v14387_v48 = vcombine.low %v610_v35, %v618_v36 }
 0x268   : > { %11856 = vmatpush1.bf16.msra.mxu1 %v14499_v47  ;;  %v874_v39 = vld [vmem:[%s16779_s2 + $0xf50] sm:$0xff] }
 0x269   : > { %11857 = vmatprep.subr.bf16.mxu1 %v14484_v58  ;;  %11815 = vmatpush1.bf16.msra.mxu0 %v14227_v62  ;;  %v14644_v44 = vcombine.high %v866_v38, %v874_v39  ;;  %v594_v45 = vld [vmem:[%s16779_s2 + $0x690] sm:$0xff]  ;;  %v14643_v49 = vcombine.low %v866_v38, %v874_v39 }
 0x26a   : > { %11816 = vmatprep.subr.bf16.mxu0 %v14212_v0  ;;  %v602_v46 = vld [vmem:[%s16779_s2 + $0x6d0] sm:$0xff] }
 0x26b   : > { %v850_v22 = vld [vmem:[%s16779_s2 + $0xe90] sm:$0xff]  ;;  %v14372_v50 = vcombine.high %v594_v45, %v602_v46  ;;  %v14371_v55 = vcombine.low %v594_v45, %v602_v46 }
 0x26c   : > { %11858 = vmatpush1.bf16.msra.mxu1 %v14483_v63  ;;  %v858_v37 = vld [vmem:[%s16779_s2 + $0xed0] sm:$0xff] }
 0x26d   : > { %11859 = vmatprep.subr.bf16.mxu1 %v14468_v1  ;;  %11817 = vmatpush1.bf16.msra.mxu0 %v14211_v5  ;;  %v14628_v52 = vcombine.high %v850_v22, %v858_v37  ;;  %v578_v53 = vld [vmem:[%s16779_s2 + $0x610] sm:$0xff]  ;;  %v14627_v56 = vcombine.low %v850_v22, %v858_v37 }
 0x26e   : > { %11818 = vmatprep.subr.bf16.mxu0 %v14196_v7  ;;  %v586_v31 = vld [vmem:[%s16779_s2 + $0x650] sm:$0xff] }
 0x26f   : > { %v834_v47 = vld [vmem:[%s16779_s2 + $0xe10] sm:$0xff]  ;;  %v14356_v58 = vcombine.high %v578_v53, %v586_v31  ;;  %v14355_v62 = vcombine.low %v578_v53, %v586_v31 }
 0x270   : > { %11860 = vmatpush1.bf16.msra.mxu1 %v14467_v6  ;;  %v842_v54 = vld [vmem:[%s16779_s2 + $0xe50] sm:$0xff] }
 0x271   : > { %11861 = vmatprep.subr.bf16.mxu1 %v14452_v8  ;;  %11819 = vmatpush1.bf16.msra.mxu0 %v14195_v13  ;;  %v14612_v59 = vcombine.high %v834_v47, %v842_v54  ;;  %v562_v41 = vld [vmem:[%s16779_s2 + $0x590] sm:$0xff]  ;;  %v14611_v63 = vcombine.low %v834_v47, %v842_v54 }
 0x272   : > { %11820 = vmatprep.subr.bf16.mxu0 %v14180_v15  ;;  %v570_v57 = vld [vmem:[%s16779_s2 + $0x5d0] sm:$0xff] }
 0x273   : > { %v818_v60 = vld [vmem:[%s16779_s2 + $0xd90] sm:$0xff]  ;;  %v14340_v0 = vcombine.high %v562_v41, %v570_v57  ;;  %v14339_v5 = vcombine.low %v562_v41, %v570_v57 }
 0x274   : > { %11862 = vmatpush1.bf16.msra.mxu1 %v14451_v14  ;;  %v826_v61 = vld [vmem:[%s16779_s2 + $0xdd0] sm:$0xff] }
 0x275   : > { %11863 = vmatprep.subr.bf16.mxu1 %v14436_v16  ;;  %11821 = vmatpush1.bf16.msra.mxu0 %v14179_v21  ;;  %v14596_v1 = vcombine.high %v818_v60, %v826_v61  ;;  %v546_v51 = vld [vmem:[%s16779_s2 + $0x510] sm:$0xff]  ;;  %v14595_v6 = vcombine.low %v818_v60, %v826_v61 }
 0x276   : > { %11822 = vmatprep.subr.bf16.mxu0 %v14164_v24  ;;  %v554_v2 = vld [vmem:[%s16779_s2 + $0x550] sm:$0xff] }
 0x277   : > { %v802_v3 = vld [vmem:[%s16779_s2 + $0xd10] sm:$0xff]  ;;  %v14324_v7 = vcombine.high %v546_v51, %v554_v2  ;;  %v14323_v13 = vcombine.low %v546_v51, %v554_v2 }
 0x278   : > { %11864 = vmatpush1.bf16.msra.mxu1 %v14435_v23  ;;  %v810_v4 = vld [vmem:[%s16779_s2 + $0xd50] sm:$0xff] }
 0x279   : > { %11865 = vmatprep.subr.bf16.mxu1 %v14420_v25  ;;  %11823 = vmatpush1.bf16.msra.mxu0 %v14163_v30  ;;  %v14580_v8 = vcombine.high %v802_v3, %v810_v4  ;;  %v530_v9 = vld [vmem:[%s16779_s2 + $0x490] sm:$0xff]  ;;  %v14579_v14 = vcombine.low %v802_v3, %v810_v4 }
 0x27a   : > { %11824 = vmatprep.subr.bf16.mxu0 %v14404_v33  ;;  %v538_v10 = vld [vmem:[%s16779_s2 + $0x4d0] sm:$0xff] }
 0x27b   : > { %v786_v11 = vld [vmem:[%s16779_s2 + $0xc90] sm:$0xff]  ;;  %v14308_v15 = vcombine.high %v530_v9, %v538_v10  ;;  %v14307_v21 = vcombine.low %v530_v9, %v538_v10 }
 0x27c   : > { %11866 = vmatpush1.bf16.msra.mxu1 %v14419_v32  ;;  %v794_v12 = vld [vmem:[%s16779_s2 + $0xcd0] sm:$0xff] }
 0x27d   : > { %11867 = vmatprep.subr.bf16.mxu1 %v14660_v34  ;;  %11825 = vmatpush2.bf16.msra.mxu0 %v14403_v40  ;;  %v14564_v16 = vcombine.high %v786_v11, %v794_v12  ;;  %v514_v17 = vld [vmem:[%s16779_s2 + $0x410] sm:$0xff]  ;;  %v14563_v23 = vcombine.low %v786_v11, %v794_v12 }
 0x27e   : > { %11826 = vmatprep.subr.bf16.mxu0 %v14388_v43  ;;  %v522_v18 = vld [vmem:[%s16779_s2 + $0x450] sm:$0xff] }
 0x27f   : > { %v770_v19 = vld [vmem:[%s16779_s2 + $0xc10] sm:$0xff]  ;;  %v14292_v24 = vcombine.high %v514_v17, %v522_v18  ;;  %v14291_v30 = vcombine.low %v514_v17, %v522_v18 }
 0x280   : > { %11868 = vmatpush2.bf16.msra.mxu1 %v14659_v42  ;;  %v778_v20 = vld [vmem:[%s16779_s2 + $0xc50] sm:$0xff] }
 0x281   : > { %11869 = vmatprep.subr.bf16.mxu1 %v14644_v44  ;;  %11827 = vmatpush2.bf16.msra.mxu0 %v14387_v48  ;;  %v14548_v25 = vcombine.high %v770_v19, %v778_v20  ;;  %v1010_v26 = vld [vmem:[%s16779_s2 + $0x1390] sm:$0xff]  ;;  %v14547_v32 = vcombine.low %v770_v19, %v778_v20 }
 0x282   : > { %11828 = vmatprep.subr.bf16.mxu0 %v14372_v50  ;;  %v1018_v27 = vld [vmem:[%s16779_s2 + $0x13d0] sm:$0xff] }
 0x283   : > { %v1266_v28 = vld [vmem:[%s16779_s2 + $0x1b90] sm:$0xff]  ;;  %v14788_v33 = vcombine.high %v1010_v26, %v1018_v27  ;;  %v14787_v40 = vcombine.low %v1010_v26, %v1018_v27 }
 0x284   : > { %11870 = vmatpush2.bf16.msra.mxu1 %v14643_v49  ;;  %v1274_v29 = vld [vmem:[%s16779_s2 + $0x1bd0] sm:$0xff] }
 0x285   : > { %11871 = vmatprep.subr.bf16.mxu1 %v14628_v52  ;;  %11829 = vmatpush2.bf16.msra.mxu0 %v14371_v55  ;;  %v15044_v34 = vcombine.high %v1266_v28, %v1274_v29  ;;  %v994_v35 = vld [vmem:[%s16779_s2 + $0x1310] sm:$0xff]  ;;  %v15043_v42 = vcombine.low %v1266_v28, %v1274_v29 }
 0x286   : > { %11830 = vmatprep.subr.bf16.mxu0 %v14356_v58  ;;  %v1002_v36 = vld [vmem:[%s16779_s2 + $0x1350] sm:$0xff] }
 0x287   : > { %v1250_v38 = vld [vmem:[%s16779_s2 + $0x1b10] sm:$0xff]  ;;  %v14772_v43 = vcombine.high %v994_v35, %v1002_v36  ;;  %v14771_v50 = vcombine.low %v994_v35, %v1002_v36 }
 0x288   : > { %11872 = vmatpush2.bf16.msra.mxu1 %v14627_v56  ;;  %v1258_v39 = vld [vmem:[%s16779_s2 + $0x1b50] sm:$0xff] }
 0x289   : > { %11873 = vmatprep.subr.bf16.mxu1 %v14612_v59  ;;  %11831 = vmatpush2.bf16.msra.mxu0 %v14355_v62  ;;  %v15028_v44 = vcombine.high %v1250_v38, %v1258_v39  ;;  %v978_v45 = vld [vmem:[%s16779_s2 + $0x1290] sm:$0xff]  ;;  %v15027_v52 = vcombine.low %v1250_v38, %v1258_v39 }
 0x28a   : > { %11832 = vmatprep.subr.bf16.mxu0 %v14340_v0  ;;  %v986_v46 = vld [vmem:[%s16779_s2 + $0x12d0] sm:$0xff] }
 0x28b   : > { %v16180_v22 = vld [vmem:[%s16771_s30] ss:$56 sps:$4 sm:$0xff]   ;;  %v14756_v53 = vcombine.high %v978_v45, %v986_v46  ;;  %v16182_v55 = vld [vmem:[%s16771_s30 + $0x14] ss:$56 sps:$4 sm:$0xff]   ;;  %v14755_v41 = vcombine.low %v978_v45, %v986_v46 }
 0x28c   : > { %11874 = vmatpush2.bf16.msra.mxu1 %v14611_v63  ;;  %v1234_v37 = vld [vmem:[%s16779_s2 + $0x1a90] sm:$0xff] }
 0x28d   : > { %11875 = vmatprep.subr.bf16.mxu1 %v14596_v1  ;;  %11833 = vmatpush2.bf16.msra.mxu0 %v14339_v5  ;;  %v1242_v48 = vld [vmem:[%s16779_s2 + $0x1ad0] sm:$0xff] }
 0x28e   : > { %11834 = vmatprep.subr.bf16.mxu0 %v14324_v7  ;;  %v16181_v49 = vld [vmem:[%s16771_s30 + $0x8] ss:$56 sps:$4 sm:$0xff]   ;;  %v15012_v31 = vcombine.high %v1234_v37, %v1242_v48  ;;  %v16183_v59 = vld [vmem:[%s16771_s30 + $0x1c] ss:$56 sps:$4 sm:$0xff]   ;;  %v15011_v57 = vcombine.low %v1234_v37, %v1242_v48 }
 0x28f   : > { %v962_v47 = vld [vmem:[%s16779_s2 + $0x1210] sm:$0xff] }
 0x290   : > { %11876 = vmatpush2.bf16.msra.mxu1 %v14595_v6  ;;  %v970_v54 = vld [vmem:[%s16779_s2 + $0x1250] sm:$0xff] }
 0x291   : > { %11877 = vmatprep.subr.bf16.mxu1 %v14580_v8  ;;  %11835 = vmatpush2.bf16.msra.mxu0 %v14323_v13  ;;  %v1218_v56 = vld [vmem:[%s16779_s2 + $0x1a10] sm:$0xff]  ;;  %v14740_v60 = vcombine.high %v962_v47, %v970_v54  ;;  %v14739_v51 = vcombine.low %v962_v47, %v970_v54 }
 0x292   : > { %11836 = vmatprep.subr.bf16.mxu0 %v14308_v15  ;;  %v1226_v58 = vld [vmem:[%s16779_s2 + $0x1a50] sm:$0xff] }
 0x293   : > { %v14996_v61 = vcombine.high %v1218_v56, %v1226_v58  ;;  %v946_v62 = vld [vmem:[%s16779_s2 + $0x1190] sm:$0xff]  ;;  %v14995_v2 = vcombine.low %v1218_v56, %v1226_v58 }
 0x294   : > { %11878 = vmatpush2.bf16.msra.mxu1 %v14579_v14  ;;  %v954_v63 = vld [vmem:[%s16779_s2 + $0x11d0] sm:$0xff] }
 0x295   : > { %11879 = vmatprep.subr.bf16.mxu1 %v14564_v16  ;;  %11837 = vmatpush2.bf16.msra.mxu0 %v14307_v21  ;;  %v1202_v0 = vld [vmem:[%s16779_s2 + $0x1990] sm:$0xff]  ;;  %v14724_v3 = vcombine.high %v946_v62, %v954_v63  ;;  %v14723_v9 = vcombine.low %v946_v62, %v954_v63 }
 0x296   : > { %11838 = vmatprep.subr.bf16.mxu0 %v14292_v24  ;;  %v1210_v1 = vld [vmem:[%s16779_s2 + $0x19d0] sm:$0xff] }
 0x297   : > { %v14980_v4 = vcombine.high %v1202_v0, %v1210_v1  ;;  %v930_v5 = vld [vmem:[%s16779_s2 + $0x1110] sm:$0xff]  ;;  %v14979_v10 = vcombine.low %v1202_v0, %v1210_v1 }
 0x298   : > { %11880 = vmatpush2.bf16.msra.mxu1 %v14563_v23  ;;  %v938_v6 = vld [vmem:[%s16779_s2 + $0x1150] sm:$0xff] }
 0x299   : > { %11881 = vmatprep.subr.bf16.mxu1 %v14548_v25  ;;  %11839 = vmatpush2.bf16.msra.mxu0 %v14291_v30  ;;  %v1186_v7 = vld [vmem:[%s16779_s2 + $0x1910] sm:$0xff]  ;;  %v14708_v11 = vcombine.high %v930_v5, %v938_v6  ;;  %v14707_v17 = vcombine.low %v930_v5, %v938_v6 }
 0x29a   : > { %11894 = vmatprep.subr.bf16.mxu0 %v14788_v33  ;;  %v1194_v8 = vld [vmem:[%s16779_s2 + $0x1950] sm:$0xff] }
 0x29b   : > { %v14964_v12 = vcombine.high %v1186_v7, %v1194_v8  ;;  %v914_v13 = vld [vmem:[%s16779_s2 + $0x1090] sm:$0xff]  ;;  %v14963_v18 = vcombine.low %v1186_v7, %v1194_v8 }
 0x29c   : > { %11882 = vmatpush2.bf16.msra.mxu1 %v14547_v32  ;;  %11841 = vmatmul.mubr.bf16.vlgmr.msra.gmra.mxu0 %v16180_v22  ;;  %v922_v14 = vld [vmem:[%s16779_s2 + $0x10d0] sm:$0xff] }
 0x29d   : > { %11937 = vmatprep.subr.bf16.mxu1 %v15044_v34  ;;  %11895 = vmatpush1.bf16.msra.mxu0 %v14787_v40  ;;  %v1170_v15 = vld [vmem:[%s16779_s2 + $0x1890] sm:$0xff]  ;;  %v14692_v19 = vcombine.high %v914_v13, %v922_v14  ;;  %v14691_v26 = vcombine.low %v914_v13, %v922_v14 }
 0x29e   : > { %11896 = vmatprep.subr.bf16.mxu0 %v14772_v43  ;;  %11926 = vmatprep.mubr.bf16.mxu0 %v16182_v55  ;;  %v1178_v16 = vld [vmem:[%s16779_s2 + $0x18d0] sm:$0xff] }
 0x29f   : > { %11884 = vmatmul.mubr.bf16.vlgmr.msra.gmra.mxu1 %v16181_v49  ;;  %v14948_v20 = vcombine.high %v1170_v15, %v1178_v16  ;;  %v898_v21 = vld [vmem:[%s16779_s2 + $0x1010] sm:$0xff]  ;;  %v14947_v27 = vcombine.low %v1170_v15, %v1178_v16 }
 0x2a0   : > { %11938 = vmatpush1.bf16.msra.mxu1 %v15043_v42  ;;  %11969 = vmatprep.mubr.bf16.mxu1 %v16183_v59  ;;  %v906_v23 = vld [vmem:[%s16779_s2 + $0x1050] sm:$0xff] }
 0x2a1   : > { %11939 = vmatprep.subr.bf16.mxu1 %v15028_v44  ;;  %11897 = vmatpush1.bf16.msra.mxu0 %v14771_v50  ;;  %v1154_v24 = vld [vmem:[%s16779_s2 + $0x1810] sm:$0xff]  ;;  %v14676_v28 = vcombine.high %v898_v21, %v906_v23  ;;  %v14675_v35 = vcombine.low %v898_v21, %v906_v23 }
 0x2a2   : > { %11898 = vmatprep.subr.bf16.mxu0 %v14756_v53  ;;  %v1162_v25 = vld [vmem:[%s16779_s2 + $0x1850] sm:$0xff] }
 0x2a3   : > { %v14932_v29 = vcombine.high %v1154_v24, %v1162_v25  ;;  %v1138_v30 = vld [vmem:[%s16779_s2 + $0x1790] sm:$0xff]  ;;  %v14931_v36 = vcombine.low %v1154_v24, %v1162_v25 }
 0x2a4   : > { %11940 = vmatpush1.bf16.msra.mxu1 %v15027_v52  ;;  %v1146_v32 = vld [vmem:[%s16779_s2 + $0x17d0] sm:$0xff] }
 0x2a5   : > { %11941 = vmatprep.subr.bf16.mxu1 %v15012_v31  ;;  %11899 = vmatpush1.bf16.msra.mxu0 %v14755_v41  ;;  %v1394_v33 = vld [vmem:[%s16779_s2 + $0x1f90] sm:$0xff]  ;;  %v14916_v38 = vcombine.high %v1138_v30, %v1146_v32  ;;  %v14915_v45 = vcombine.low %v1138_v30, %v1146_v32 }
 0x2a6   : > { %11900 = vmatprep.subr.bf16.mxu0 %v14740_v60  ;;  %v1402_v34 = vld [vmem:[%s16779_s2 + $0x1fd0] sm:$0xff] }
 0x2a7   : > { %v15172_v39 = vcombine.high %v1394_v33, %v1402_v34  ;;  %v1122_v40 = vld [vmem:[%s16779_s2 + $0x1710] sm:$0xff]  ;;  %v15171_v46 = vcombine.low %v1394_v33, %v1402_v34 }
 0x2a8   : > { %11942 = vmatpush1.bf16.msra.mxu1 %v15011_v57  ;;  %v1130_v42 = vld [vmem:[%s16779_s2 + $0x1750] sm:$0xff] }
 0x2a9   : > { %11943 = vmatprep.subr.bf16.mxu1 %v14996_v61  ;;  %11901 = vmatpush1.bf16.msra.mxu0 %v14739_v51  ;;  %v1378_v43 = vld [vmem:[%s16779_s2 + $0x1f10] sm:$0xff]  ;;  %v14900_v22 = vcombine.high %v1122_v40, %v1130_v42  ;;  %v14899_v53 = vcombine.low %v1122_v40, %v1130_v42 }
 0x2aa   : > { %11902 = vmatprep.subr.bf16.mxu0 %v14724_v3  ;;  %v1386_v44 = vld [vmem:[%s16779_s2 + $0x1f50] sm:$0xff] }
 0x2ab   : > { %v15156_v37 = vcombine.high %v1378_v43, %v1386_v44  ;;  %v1106_v48 = vld [vmem:[%s16779_s2 + $0x1690] sm:$0xff]  ;;  %v15155_v31 = vcombine.low %v1378_v43, %v1386_v44 }
 0x2ac   : > { %11944 = vmatpush1.bf16.msra.mxu1 %v14995_v2  ;;  %v1114_v49 = vld [vmem:[%s16779_s2 + $0x16d0] sm:$0xff] }
 0x2ad   : > { %11945 = vmatprep.subr.bf16.mxu1 %v14980_v4  ;;  %11903 = vmatpush1.bf16.msra.mxu0 %v14723_v9  ;;  %v1362_v50 = vld [vmem:[%s16779_s2 + $0x1e90] sm:$0xff]  ;;  %v14884_v47 = vcombine.high %v1106_v48, %v1114_v49  ;;  %v14883_v41 = vcombine.low %v1106_v48, %v1114_v49 }
 0x2ae   : > { %11904 = vmatprep.subr.bf16.mxu0 %v14708_v11  ;;  %v1370_v52 = vld [vmem:[%s16779_s2 + $0x1ed0] sm:$0xff] }
 0x2af   : > { %v15140_v54 = vcombine.high %v1362_v50, %v1370_v52  ;;  %v1090_v55 = vld [vmem:[%s16779_s2 + $0x1610] sm:$0xff]  ;;  %v15139_v57 = vcombine.low %v1362_v50, %v1370_v52 }
 0x2b0   : > { %11946 = vmatpush1.bf16.msra.mxu1 %v14979_v10  ;;  %v1098_v56 = vld [vmem:[%s16779_s2 + $0x1650] sm:$0xff] }
 0x2b1   : > { %11947 = vmatprep.subr.bf16.mxu1 %v14964_v12  ;;  %11905 = vmatpush1.bf16.msra.mxu0 %v14707_v17  ;;  %v1346_v58 = vld [vmem:[%s16779_s2 + $0x1e10] sm:$0xff]  ;;  %v14868_v60 = vcombine.high %v1090_v55, %v1098_v56  ;;  %v14867_v51 = vcombine.low %v1090_v55, %v1098_v56 }
 0x2b2   : > { %11906 = vmatprep.subr.bf16.mxu0 %v14692_v19  ;;  %v1354_v59 = vld [vmem:[%s16779_s2 + $0x1e50] sm:$0xff] }
 0x2b3   : > { %v15124_v61 = vcombine.high %v1346_v58, %v1354_v59  ;;  %v1074_v62 = vld [vmem:[%s16779_s2 + $0x1590] sm:$0xff]  ;;  %v15123_v2 = vcombine.low %v1346_v58, %v1354_v59 }
 0x2b4   : > { %11948 = vmatpush1.bf16.msra.mxu1 %v14963_v18  ;;  %v1082_v63 = vld [vmem:[%s16779_s2 + $0x15d0] sm:$0xff] }
 0x2b5   : > { %11949 = vmatprep.subr.bf16.mxu1 %v14948_v20  ;;  %11907 = vmatpush1.bf16.msra.mxu0 %v14691_v26  ;;  %v1330_v0 = vld [vmem:[%s16779_s2 + $0x1d90] sm:$0xff]  ;;  %v14852_v3 = vcombine.high %v1074_v62, %v1082_v63  ;;  %v14851_v9 = vcombine.low %v1074_v62, %v1082_v63 }
 0x2b6   : > { %11908 = vmatprep.subr.bf16.mxu0 %v14676_v28  ;;  %v1338_v1 = vld [vmem:[%s16779_s2 + $0x1dd0] sm:$0xff] }
 0x2b7   : > { %v15108_v4 = vcombine.high %v1330_v0, %v1338_v1  ;;  %v1058_v5 = vld [vmem:[%s16779_s2 + $0x1510] sm:$0xff]  ;;  %v15107_v10 = vcombine.low %v1330_v0, %v1338_v1 }
 0x2b8   : > { %11950 = vmatpush1.bf16.msra.mxu1 %v14947_v27  ;;  %v1066_v6 = vld [vmem:[%s16779_s2 + $0x1550] sm:$0xff] }
 0x2b9   : > { %11951 = vmatprep.subr.bf16.mxu1 %v14932_v29  ;;  %11909 = vmatpush1.bf16.msra.mxu0 %v14675_v35  ;;  %v1314_v7 = vld [vmem:[%s16779_s2 + $0x1d10] sm:$0xff]  ;;  %v14836_v11 = vcombine.high %v1058_v5, %v1066_v6  ;;  %v14835_v17 = vcombine.low %v1058_v5, %v1066_v6 }
 0x2ba   : > { %11910 = vmatprep.subr.bf16.mxu0 %v14916_v38  ;;  %v1322_v8 = vld [vmem:[%s16779_s2 + $0x1d50] sm:$0xff] }
 0x2bb   : > { %v15092_v12 = vcombine.high %v1314_v7, %v1322_v8  ;;  %v1042_v13 = vld [vmem:[%s16779_s2 + $0x1490] sm:$0xff]  ;;  %v15091_v18 = vcombine.low %v1314_v7, %v1322_v8 }
 0x2bc   : > { %11952 = vmatpush1.bf16.msra.mxu1 %v14931_v36  ;;  %v1050_v14 = vld [vmem:[%s16779_s2 + $0x14d0] sm:$0xff] }
 0x2bd   : > { %11953 = vmatprep.subr.bf16.mxu1 %v15172_v39  ;;  %11911 = vmatpush2.bf16.msra.mxu0 %v14915_v45  ;;  %v1298_v15 = vld [vmem:[%s16779_s2 + $0x1c90] sm:$0xff]  ;;  %v14820_v19 = vcombine.high %v1042_v13, %v1050_v14  ;;  %v14819_v26 = vcombine.low %v1042_v13, %v1050_v14 }
 0x2be   : > { %11912 = vmatprep.subr.bf16.mxu0 %v14900_v22  ;;  %v1306_v16 = vld [vmem:[%s16779_s2 + $0x1cd0] sm:$0xff] }
 0x2bf   : > { %v15076_v20 = vcombine.high %v1298_v15, %v1306_v16  ;;  %v1026_v21 = vld [vmem:[%s16779_s2 + $0x1410] sm:$0xff]  ;;  %v15075_v27 = vcombine.low %v1298_v15, %v1306_v16 }
 0x2c0   : > { %11954 = vmatpush2.bf16.msra.mxu1 %v15171_v46  ;;  %v1034_v23 = vld [vmem:[%s16779_s2 + $0x1450] sm:$0xff] }
 0x2c1   : > { %11955 = vmatprep.subr.bf16.mxu1 %v15156_v37  ;;  %11913 = vmatpush2.bf16.msra.mxu0 %v14899_v53  ;;  %v1282_v24 = vld [vmem:[%s16779_s2 + $0x1c10] sm:$0xff]  ;;  %v14804_v28 = vcombine.high %v1026_v21, %v1034_v23  ;;  %v14803_v35 = vcombine.low %v1026_v21, %v1034_v23 }
 0x2c2   : > { %11914 = vmatprep.subr.bf16.mxu0 %v14884_v47  ;;  %v1290_v25 = vld [vmem:[%s16779_s2 + $0x1c50] sm:$0xff] }
 0x2c3   : > { %v15060_v29 = vcombine.high %v1282_v24, %v1290_v25  ;;  %v1522_v30 = vld [vmem:[%s16779_s2 + $0x2390] sm:$0xff]  ;;  %v15059_v36 = vcombine.low %v1282_v24, %v1290_v25 }
 0x2c4   : > { %11956 = vmatpush2.bf16.msra.mxu1 %v15155_v31  ;;  %v1530_v32 = vld [vmem:[%s16779_s2 + $0x23d0] sm:$0xff] }
 0x2c5   : > { %11957 = vmatprep.subr.bf16.mxu1 %v15140_v54  ;;  %11915 = vmatpush2.bf16.msra.mxu0 %v14883_v41  ;;  %v1778_v33 = vld [vmem:[%s16779_s2 + $0x2b90] sm:$0xff]  ;;  %v15300_v38 = vcombine.high %v1522_v30, %v1530_v32  ;;  %v15299_v45 = vcombine.low %v1522_v30, %v1530_v32 }
 0x2c6   : > { %11916 = vmatprep.subr.bf16.mxu0 %v14868_v60  ;;  %v1786_v34 = vld [vmem:[%s16779_s2 + $0x2bd0] sm:$0xff] }
 0x2c7   : > { %v15556_v39 = vcombine.high %v1778_v33, %v1786_v34  ;;  %v1506_v40 = vld [vmem:[%s16779_s2 + $0x2310] sm:$0xff]  ;;  %v15555_v46 = vcombine.low %v1778_v33, %v1786_v34  ;;  %v17473_v34 = vpop.f32.mrf.mxu1 }
 0x2c8   : > { %11958 = vmatpush2.bf16.msra.mxu1 %v15139_v57  ;;  %v1514_v42 = vld [vmem:[%s16779_s2 + $0x2350] sm:$0xff] }
 0x2c9   : > { %11959 = vmatprep.subr.bf16.mxu1 %v15124_v61  ;;  %11917 = vmatpush2.bf16.msra.mxu0 %v14867_v51  ;;  %v1762_v43 = vld [vmem:[%s16779_s2 + $0x2b10] sm:$0xff]  ;;  %v15284_v22 = vcombine.high %v1506_v40, %v1514_v42  ;;  %v15283_v47 = vcombine.low %v1506_v40, %v1514_v42 }
 0x2ca   : > { %11918 = vmatprep.subr.bf16.mxu0 %v14852_v3  ;;  %v1770_v44 = vld [vmem:[%s16779_s2 + $0x2b50] sm:$0xff] }
 0x2cb   : > { %v15540_v37 = vcombine.high %v1762_v43, %v1770_v44  ;;  %v1490_v48 = vld [vmem:[%s16779_s2 + $0x2290] sm:$0xff]  ;;  %v15539_v54 = vcombine.low %v1762_v43, %v1770_v44 }
 0x2cc   : > { %11960 = vmatpush2.bf16.msra.mxu1 %v15123_v2  ;;  %v1498_v49 = vld [vmem:[%s16779_s2 + $0x22d0] sm:$0xff] }
 0x2cd   : > { %11961 = vmatprep.subr.bf16.mxu1 %v15108_v4  ;;  %11919 = vmatpush2.bf16.msra.mxu0 %v14851_v9  ;;  %v16184_v50 = vld [vmem:[%s16771_s30 + $0x10] ss:$56 sps:$4 sm:$0xff]   ;;  %v15268_v55 = vcombine.high %v1490_v48, %v1498_v49  ;;  %v16186_v41 = vld [vmem:[%s16771_s30 + $0x24] ss:$56 sps:$4 sm:$0xff]   ;;  %v15267_v62 = vcombine.low %v1490_v48, %v1498_v49 }
 0x2ce   : > { %11920 = vmatprep.subr.bf16.mxu0 %v14836_v11  ;;  %v1746_v52 = vld [vmem:[%s16779_s2 + $0x2a90] sm:$0xff] }
 0x2cf   : > { %v1754_v53 = vld [vmem:[%s16779_s2 + $0x2ad0] sm:$0xff] }
 0x2d0   : > { %11962 = vmatpush2.bf16.msra.mxu1 %v15107_v10  ;;  %v16185_v31 = vld [vmem:[%s16771_s30 + $0x18] ss:$56 sps:$4 sm:$0xff]   ;;  %v15524_v56 = vcombine.high %v1746_v52, %v1754_v53  ;;  %v16187_v61 = vld [vmem:[%s16771_s30 + $0x2c] ss:$56 sps:$4 sm:$0xff]   ;;  %v15523_v63 = vcombine.low %v1746_v52, %v1754_v53 }
 0x2d1   : > { %11963 = vmatprep.subr.bf16.mxu1 %v15092_v12  ;;  %11921 = vmatpush2.bf16.msra.mxu0 %v14835_v17  ;;  %v1474_v58 = vld [vmem:[%s16779_s2 + $0x2210] sm:$0xff] }
 0x2d2   : > { %11922 = vmatprep.subr.bf16.mxu0 %v14820_v19  ;;  %v1482_v59 = vld [vmem:[%s16779_s2 + $0x2250] sm:$0xff] }
 0x2d3   : > { %v1730_v57 = vld [vmem:[%s16779_s2 + $0x2a10] sm:$0xff]  ;;  %v15252_v0 = vcombine.high %v1474_v58, %v1482_v59  ;;  %v15251_v5 = vcombine.low %v1474_v58, %v1482_v59 }
 0x2d4   : > { %11964 = vmatpush2.bf16.msra.mxu1 %v15091_v18  ;;  %v1738_v60 = vld [vmem:[%s16779_s2 + $0x2a50] sm:$0xff] }
 0x2d5   : > { %11965 = vmatprep.subr.bf16.mxu1 %v15076_v20  ;;  %11923 = vmatpush2.bf16.msra.mxu0 %v14819_v26  ;;  %v15508_v1 = vcombine.high %v1730_v57, %v1738_v60  ;;  %v1458_v51 = vld [vmem:[%s16779_s2 + $0x2190] sm:$0xff]  ;;  %v15507_v6 = vcombine.low %v1730_v57, %v1738_v60 }
 0x2d6   : > { %11924 = vmatprep.subr.bf16.mxu0 %v14804_v28  ;;  %v1466_v2 = vld [vmem:[%s16779_s2 + $0x21d0] sm:$0xff] }
 0x2d7   : > { %v1714_v3 = vld [vmem:[%s16779_s2 + $0x2990] sm:$0xff]  ;;  %v15236_v7 = vcombine.high %v1458_v51, %v1466_v2  ;;  %v15235_v13 = vcombine.low %v1458_v51, %v1466_v2 }
 0x2d8   : > { %11966 = vmatpush2.bf16.msra.mxu1 %v15075_v27  ;;  %v1722_v4 = vld [vmem:[%s16779_s2 + $0x29d0] sm:$0xff] }
 0x2d9   : > { %11967 = vmatprep.subr.bf16.mxu1 %v15060_v29  ;;  %11925 = vmatpush2.bf16.msra.mxu0 %v14803_v35  ;;  %v15492_v8 = vcombine.high %v1714_v3, %v1722_v4  ;;  %v1442_v9 = vld [vmem:[%s16779_s2 + $0x2110] sm:$0xff]  ;;  %v15491_v14 = vcombine.low %v1714_v3, %v1722_v4 }
 0x2da   : > { %11980 = vmatprep.subr.bf16.mxu0 %v15300_v38  ;;  %v1450_v10 = vld [vmem:[%s16779_s2 + $0x2150] sm:$0xff] }
 0x2db   : > { %v1698_v11 = vld [vmem:[%s16779_s2 + $0x2910] sm:$0xff]  ;;  %v15220_v15 = vcombine.high %v1442_v9, %v1450_v10  ;;  %v15219_v21 = vcombine.low %v1442_v9, %v1450_v10 }
 0x2dc   : > { %11968 = vmatpush2.bf16.msra.mxu1 %v15059_v36  ;;  %11927 = vmatmul.mubr.bf16.vlgmr.msra.gmra.mxu0 %v16184_v50  ;;  %v1706_v12 = vld [vmem:[%s16779_s2 + $0x2950] sm:$0xff] }
 0x2dd   : > { %12023 = vmatprep.subr.bf16.mxu1 %v15556_v39  ;;  %11981 = vmatpush1.bf16.msra.mxu0 %v15299_v45  ;;  %v15476_v16 = vcombine.high %v1698_v11, %v1706_v12  ;;  %v1426_v17 = vld [vmem:[%s16779_s2 + $0x2090] sm:$0xff]  ;;  %v15475_v23 = vcombine.low %v1698_v11, %v1706_v12  ;;  %v17479_v45 = vpop.f32.mrf.mxu1 }
 0x2de   : > { %11982 = vmatprep.subr.bf16.mxu0 %v15284_v22  ;;  %12012 = vmatprep.mubr.bf16.mxu0 %v16186_v41  ;;  %v1434_v18 = vld [vmem:[%s16779_s2 + $0x20d0] sm:$0xff] }
 0x2df   : > { %11970 = vmatmul.mubr.bf16.vlgmr.msra.gmra.mxu1 %v16185_v31  ;;  %v1682_v19 = vld [vmem:[%s16779_s2 + $0x2890] sm:$0xff]  ;;  %v15204_v24 = vcombine.high %v1426_v17, %v1434_v18  ;;  %v15203_v30 = vcombine.low %v1426_v17, %v1434_v18  ;;  %v17485_v31 = vpop.f32.mrf.mxu1 }
 0x2e0   : > { %12024 = vmatpush1.bf16.msra.mxu1 %v15555_v46  ;;  %12055 = vmatprep.mubr.bf16.mxu1 %v16187_v61  ;;  %v1690_v20 = vld [vmem:[%s16779_s2 + $0x28d0] sm:$0xff] }
 0x2e1   : > { %12025 = vmatprep.subr.bf16.mxu1 %v15540_v37  ;;  %11983 = vmatpush1.bf16.msra.mxu0 %v15283_v47  ;;  %v15460_v25 = vcombine.high %v1682_v19, %v1690_v20  ;;  %v1410_v26 = vld [vmem:[%s16779_s2 + $0x2010] sm:$0xff]  ;;  %v15459_v32 = vcombine.low %v1682_v19, %v1690_v20  ;;  %v17491_v60 = vpop.f32.mrf.mxu1 }
 0x2e2   : > { %11984 = vmatprep.subr.bf16.mxu0 %v15268_v55  ;;  %v1418_v27 = vld [vmem:[%s16779_s2 + $0x2050] sm:$0xff] }
 0x2e3   : > { %v1666_v28 = vld [vmem:[%s16779_s2 + $0x2810] sm:$0xff]  ;;  %v15188_v33 = vcombine.high %v1410_v26, %v1418_v27  ;;  %v15187_v42 = vcombine.low %v1410_v26, %v1418_v27  ;;  %v17497_v2 = vpop.f32.mrf.mxu1 }
 0x2e4   : > { %12026 = vmatpush1.bf16.msra.mxu1 %v15539_v54  ;;  %v1674_v29 = vld [vmem:[%s16779_s2 + $0x2850] sm:$0xff] }
 0x2e5   : > { %12027 = vmatprep.subr.bf16.mxu1 %v15524_v56  ;;  %11985 = vmatpush1.bf16.msra.mxu0 %v15267_v62  ;;  %v15444_v35 = vcombine.high %v1666_v28, %v1674_v29  ;;  %v1650_v36 = vld [vmem:[%s16779_s2 + $0x2790] sm:$0xff]  ;;  %v15443_v43 = vcombine.low %v1666_v28, %v1674_v29  ;;  %v17503_v12 = vpop.f32.mrf.mxu1 }
 0x2e6   : > { %11986 = vmatprep.subr.bf16.mxu0 %v15252_v0  ;;  %v1658_v38 = vld [vmem:[%s16779_s2 + $0x27d0] sm:$0xff]  ;;  %v11584_v0 = vpop.f32.mrf.mxu0 }
 0x2e7   : > { %v1906_v39 = vld [vmem:[%s16779_s2 + $0x2f90] sm:$0xff]  ;;  %v15428_v44 = vcombine.high %v1650_v36, %v1658_v38  ;;  %v15427_v50 = vcombine.low %v1650_v36, %v1658_v38 }
 0x2e8   : > { %12028 = vmatpush1.bf16.msra.mxu1 %v15523_v63  ;;  %v1914_v40 = vld [vmem:[%s16779_s2 + $0x2fd0] sm:$0xff]  ;;  %v11586_v9 = vpop.f32.mrf.mxu0 }
 0x2e9   : > { %12029 = vmatprep.subr.bf16.mxu1 %v15508_v1  ;;  %11987 = vmatpush1.bf16.msra.mxu0 %v15251_v5  ;;  %v15684_v46 = vcombine.high %v1906_v39, %v1914_v40  ;;  %v1634_v22 = vld [vmem:[%s16779_s2 + $0x2710] sm:$0xff]  ;;  %v15683_v52 = vcombine.low %v1906_v39, %v1914_v40 }
 0x2ea   : > { %11988 = vmatprep.subr.bf16.mxu0 %v15236_v7  ;;  %v1642_v37 = vld [vmem:[%s16779_s2 + $0x2750] sm:$0xff]  ;;  %v11588_v19 = vpop.f32.mrf.mxu0 }
 0x2eb   : > { %v1890_v48 = vld [vmem:[%s16779_s2 + $0x2f10] sm:$0xff]  ;;  %v15412_v53 = vcombine.high %v1634_v22, %v1642_v37  ;;  %v15411_v59 = vcombine.low %v1634_v22, %v1642_v37 }
 0x2ec   : > { %12030 = vmatpush1.bf16.msra.mxu1 %v15507_v6  ;;  %v1898_v49 = vld [vmem:[%s16779_s2 + $0x2f50] sm:$0xff] }
 0x2ed   : > { %12031 = vmatprep.subr.bf16.mxu1 %v15492_v8  ;;  %11989 = vmatpush1.bf16.msra.mxu0 %v15235_v13  ;;  %v15668_v47 = vcombine.high %v1890_v48, %v1898_v49  ;;  %v1618_v54 = vld [vmem:[%s16779_s2 + $0x2690] sm:$0xff]  ;;  %v15667_v41 = vcombine.low %v1890_v48, %v1898_v49  ;;  %v11585_v48 = vadd.f32 %v11584_v0, %v17473_v34 }
 0x2ee   : > { %11990 = vmatprep.subr.bf16.mxu0 %v15220_v15  ;;  %v1626_v55 = vld [vmem:[%s16779_s2 + $0x26d0] sm:$0xff]  ;;  %v11589_v34 = vadd.f32 %v11588_v19, %v17485_v31  ;;  %v17541_v19 = vld [vmem:[%s16779_s2 + $0x298] sm:$0xff] }
 0x2ef   : > { %v1874_v56 = vld [vmem:[%s16779_s2 + $0x2e90] sm:$0xff]  ;;  %v15396_v57 = vcombine.high %v1618_v54, %v1626_v55  ;;  %v15395_v3 = vcombine.low %v1618_v54, %v1626_v55 }
 0x2f0   : > { %12032 = vmatpush1.bf16.msra.mxu1 %v15491_v14  ;;  %v1882_v58 = vld [vmem:[%s16779_s2 + $0x2ed0] sm:$0xff] }
 0x2f1   : > { %12033 = vmatprep.subr.bf16.mxu1 %v15476_v16  ;;  %11991 = vmatpush1.bf16.msra.mxu0 %v15219_v21  ;;  %v15652_v61 = vcombine.high %v1874_v56, %v1882_v58  ;;  %v1602_v62 = vld [vmem:[%s16779_s2 + $0x2610] sm:$0xff]  ;;  %v15651_v4 = vcombine.low %v1874_v56, %v1882_v58 }
 0x2f2   : > { %11992 = vmatprep.subr.bf16.mxu0 %v15204_v24  ;;  %v1610_v63 = vld [vmem:[%s16779_s2 + $0x2650] sm:$0xff] }
 0x2f3   : > { %v1858_v1 = vld [vmem:[%s16779_s2 + $0x2e10] sm:$0xff]  ;;  %v15380_v5 = vcombine.high %v1602_v62, %v1610_v63  ;;  %v15379_v13 = vcombine.low %v1602_v62, %v1610_v63 }
 0x2f4   : > { %12034 = vmatpush1.bf16.msra.mxu1 %v15475_v23  ;;  %v1866_v51 = vld [vmem:[%s16779_s2 + $0x2e50] sm:$0xff]  ;;  %v17509_v23 = vpop.f32.mrf.mxu1 }
 0x2f5   : > { %12035 = vmatprep.subr.bf16.mxu1 %v15460_v25  ;;  %11993 = vmatpush1.bf16.msra.mxu0 %v15203_v30  ;;  %v15636_v6 = vcombine.high %v1858_v1, %v1866_v51  ;;  %v1586_v7 = vld [vmem:[%s16779_s2 + $0x2590] sm:$0xff]  ;;  %v15635_v14 = vcombine.low %v1858_v1, %v1866_v51  ;;  %v11590_v30 = vpop.f32.mrf.mxu0 }
 0x2f6   : > { %11994 = vmatprep.subr.bf16.mxu0 %v15188_v33  ;;  %v1594_v8 = vld [vmem:[%s16779_s2 + $0x25d0] sm:$0xff]  ;;  %v11591_v1 = vadd.f32 %v11590_v30, %v17491_v60  ;;  %v340_v30 = vld [vmem:[#allocation2 + $0xd8] sm:$0xff] }
 0x2f7   : > { %v1842_v10 = vld [vmem:[%s16779_s2 + $0x2d90] sm:$0xff]  ;;  %v15364_v15 = vcombine.high %v1586_v7, %v1594_v8  ;;  %v15363_v24 = vcombine.low %v1586_v7, %v1594_v8  ;;  %v11670_v38 = vpop.f32.mrf.mxu0  ;;  %v11632_v7 = vadd.f32 %v17509_v23, %v11589_v34 }
 0x2f8   : > { %12036 = vmatpush1.bf16.msra.mxu1 %v15459_v32  ;;  %v1850_v11 = vld [vmem:[%s16779_s2 + $0x2dd0] sm:$0xff] }
 0x2f9   : > { %12037 = vmatprep.subr.bf16.mxu1 %v15444_v35  ;;  %11995 = vmatpush1.bf16.msra.mxu0 %v15187_v42  ;;  %v15620_v16 = vcombine.high %v1842_v10, %v1850_v11  ;;  %v1570_v17 = vld [vmem:[%s16779_s2 + $0x2510] sm:$0xff]  ;;  %v15619_v25 = vcombine.low %v1842_v10, %v1850_v11  ;;  %v11633_v35 = vpop.f32.mrf.mxu1 }
 0x2fa   : > { %11996 = vmatprep.subr.bf16.mxu0 %v15428_v44  ;;  %v1578_v18 = vld [vmem:[%s16779_s2 + $0x2550] sm:$0xff] }
 0x2fb   : > { %v1826_v20 = vld [vmem:[%s16779_s2 + $0x2d10] sm:$0xff]  ;;  %v15348_v26 = vcombine.high %v1570_v17, %v1578_v18  ;;  %v15347_v36 = vcombine.low %v1570_v17, %v1578_v18  ;;  %v11713_v42 = vpop.f32.mrf.mxu1 }
 0x2fc   : > { %12038 = vmatpush1.bf16.msra.mxu1 %v15443_v43  ;;  %v1834_v21 = vld [vmem:[%s16779_s2 + $0x2d50] sm:$0xff] }
 0x2fd   : > { %12039 = vmatprep.subr.bf16.mxu1 %v15684_v46  ;;  %11997 = vmatpush2.bf16.msra.mxu0 %v15427_v50  ;;  %v15604_v27 = vcombine.high %v1826_v20, %v1834_v21  ;;  %v1554_v28 = vld [vmem:[%s16779_s2 + $0x2490] sm:$0xff]  ;;  %v15603_v39 = vcombine.low %v1826_v20, %v1834_v21  ;;  %v11672_v50 = vpop.f32.mrf.mxu0  ;;  %v11715_v54 = vpop.f32.mrf.mxu1  ;;  %v17544_v20 = vld [vmem:[%s16779_s2 + $0x2d8] sm:$0xff] }
 0x2fe   : > { %11998 = vmatprep.subr.bf16.mxu0 %v15412_v53  ;;  %v1562_v29 = vld [vmem:[%s16779_s2 + $0x24d0] sm:$0xff] }
 0x2ff   : > { %v1810_v32 = vld [vmem:[%s16779_s2 + $0x2c90] sm:$0xff]  ;;  %v15332_v40 = vcombine.high %v1554_v28, %v1562_v29  ;;  %v15331_v49 = vcombine.low %v1554_v28, %v1562_v29  ;;  %v11674_v62 = vpop.f32.mrf.mxu0 }
 0x300   : > { %12040 = vmatpush2.bf16.msra.mxu1 %v15683_v52  ;;  %v1818_v33 = vld [vmem:[%s16779_s2 + $0x2cd0] sm:$0xff] }
 0x301   : > { %12041 = vmatprep.subr.bf16.mxu1 %v15668_v47  ;;  %11999 = vmatpush2.bf16.msra.mxu0 %v15411_v59  ;;  %v15588_v43 = vcombine.high %v1810_v32, %v1818_v33  ;;  %v1538_v44 = vld [vmem:[%s16779_s2 + $0x2410] sm:$0xff]  ;;  %v15587_v52 = vcombine.low %v1810_v32, %v1818_v33  ;;  %v11587_v47 = vadd.f32 %v11586_v9, %v17479_v45  ;;  %v499_v59 = vld [vmem:[%s16779_s2 + $0x398] sm:$0xff]  ;;  %v11676_v10 = vpop.f32.mrf.mxu0 }
 0x302   : > { %12000 = vmatprep.subr.bf16.mxu0 %v15396_v57  ;;  %v1546_v46 = vld [vmem:[%s16779_s2 + $0x2450] sm:$0xff]  ;;  %v11628_v57 = vadd.f32 %v17497_v2, %v11585_v48 }
 0x303   : > { %v1794_v22 = vld [vmem:[%s16779_s2 + $0x2c10] sm:$0xff]  ;;  %v15316_v53 = vcombine.high %v1538_v44, %v1546_v46  ;;  %v11630_v0 = vadd.f32 %v17503_v12, %v11587_v47 }
 0x304   : > { %12042 = vmatpush2.bf16.msra.mxu1 %v15667_v41  ;;  %v1802_v37 = vld [vmem:[%s16779_s2 + $0x2c50] sm:$0xff]  ;;  %v507_v41 = vld [vmem:[%s16779_s2 + $0x3d8] sm:$0xff]  ;;  %v11671_v51 = vadd.f32 %v11670_v38, %v11628_v57 }
 0x305   : > { %12043 = vmatprep.subr.bf16.mxu1 %v15652_v61  ;;  %12001 = vmatpush2.bf16.msra.mxu0 %v15395_v3  ;;  %v15572_v55 = vcombine.high %v1794_v22, %v1802_v37  ;;  %v2034_v56 = vld [vmem:[%s16779_s2 + $0x3390] sm:$0xff]  ;;  %v15315_v61 = vcombine.low %v1538_v44, %v1546_v46  ;;  %v15571_v45 = vcombine.low %v1794_v22, %v1802_v37  ;;  %v11717_v3 = vpop.f32.mrf.mxu1  ;;  %v341_v22 = vld [vmem:[#allocation2 + $0x18] sm:$0xff] }
 0x306   : > { %12002 = vmatprep.subr.bf16.mxu0 %v15380_v5  ;;  %v2042_v58 = vld [vmem:[%s16779_s2 + $0x33d0] sm:$0xff]  ;;  %v14278_v2 = vcombine.high %v499_v59, %v507_v41  ;;  %v483_v5 = vld [vmem:[%s16779_s2 + $0x318] sm:$0xff]  ;;  %v11673_v8 = vadd.f32 %v11672_v50, %v11630_v0  ;;  %v14277_v60 = vcombine.low %v499_v59, %v507_v41  ;;  %v14245_v41 = vcombine.low %v17541_v19, %v17544_v20 }
 0x307   : > { %v15812_v63 = vcombine.high %v2034_v56, %v2042_v58  ;;  %v2026_v31 = vld [vmem:[%s16779_s2 + $0x3350] sm:$0xff]  ;;  %v15811_v9 = vcombine.low %v2034_v56, %v2042_v58  ;;  %v459_v50 = vld [vmem:[%s16779_s2 + $0x258] sm:$0xff]  ;;  %v356_v58 = vld [vmem:[#allocation2 + $0x40] sm:$0xff] }
 0x308   : > { %12044 = vmatpush2.bf16.msra.mxu1 %v15651_v4  ;;  %v2018_v4 = vld [vmem:[%s16779_s2 + $0x3310] sm:$0xff] }
 0x309   : > { %12045 = vmatprep.subr.bf16.mxu1 %v15636_v6  ;;  %12003 = vmatpush2.bf16.msra.mxu0 %v15379_v13  ;;  %v491_v6 = vld [vmem:[%s16779_s2 + $0x358] sm:$0xff]  ;;  %v15796_v11 = vcombine.high %v2018_v4, %v2026_v31  ;;  %v17535_v12 = vld [vmem:[%s16779_s2 + $0x3290] sm:$0xff]  ;;  %v11634_v13 = vadd.f32 %v11633_v35, %v11591_v1  ;;  %v357_v1 = vld [vmem:[#allocation2 + $0xc8] sm:$0xff] }
 0x30a   : > { %12004 = vmatprep.subr.bf16.mxu0 %v15364_v15  ;;  %v11675_v15 = vadd.f32 %v11674_v62, %v11632_v7  ;;  %v14262_v17 = vcombine.high %v483_v5, %v491_v6  ;;  %v17538_v18 = vld [vmem:[%s16779_s2 + $0x32d0] sm:$0xff]  ;;  %v14261_v33 = vcombine.low %v483_v5, %v491_v6 }
 0x30b   : > { %v16188_v23 = vld [vmem:[%s16771_s30 + $0x20] ss:$56 sps:$4 sm:$0xff]   ;;  %v15780_v35 = vcombine.high %v17535_v12, %v17538_v18  ;;  %v16190_v46 = vld [vmem:[%s16771_s30 + $0x34] ss:$56 sps:$4 sm:$0xff]   ;;  %v15779_v48 = vcombine.low %v17535_v12, %v17538_v18 }
 0x30c   : > { %12046 = vmatpush2.bf16.msra.mxu1 %v15635_v14  ;;  %v11714_v14 = vadd.f32 %v11713_v42, %v11671_v51  ;;  %v16189_v29 = vld [vmem:[%s16771_s30 + $0x28] ss:$56 sps:$4 sm:$0xff]   ;;  %v11718_v38 = vadd.f32 %v11717_v3, %v11675_v15 }
 0x30d   : > { %12047 = vmatprep.subr.bf16.mxu1 %v15620_v16  ;;  %12005 = vmatpush2.bf16.msra.mxu0 %v15363_v24  ;;  %v11719_v16 = vpop.f32.mrf.mxu1  ;;  %v15795_v24 = vcombine.low %v2018_v4, %v2026_v31  ;;  %v1994_v44 = vld [vmem:[%s16779_s2 + $0x3250] sm:$0xff]  ;;  %v435_v3 = vld [vmem:[%s16779_s2 + $0x198] sm:$0xff] }
 0x30e   : > { %12006 = vmatprep.subr.bf16.mxu0 %v15348_v26  ;;  %v11677_v26 = vadd.f32 %v11676_v10, %v11634_v13  ;;  %v1978_v0 = vld [vmem:[%s16779_s2 + $0x31d0] sm:$0xff]  ;;  %v427_v12 = vld [vmem:[%s16779_s2 + $0x158] sm:$0xff] }
 0x30f   : > { %v1954_v10 = vld [vmem:[%s16779_s2 + $0x3110] sm:$0xff] }
 0x310   : > { %12048 = vmatpush2.bf16.msra.mxu1 %v15619_v25  ;;  %v11716_v25 = vadd.f32 %v11715_v54, %v11673_v8  ;;  %v1946_v18 = vld [vmem:[%s16779_s2 + $0x30d0] sm:$0xff] }
 0x311   : > { %12049 = vmatprep.subr.bf16.mxu1 %v15604_v27  ;;  %12007 = vmatpush2.bf16.msra.mxu0 %v15347_v36  ;;  %v14246_v36 = vcombine.high %v17541_v19, %v17544_v20  ;;  %v403_v19 = vld [vmem:[%s16779_s2 + $0x98] sm:$0xff] }
 0x312   : > { %12008 = vmatprep.subr.bf16.mxu0 %v15332_v40  ;;  %v411_v20 = vld [vmem:[%s16779_s2 + $0xd8] sm:$0xff] }
 0x314   : > { %12050 = vmatpush2.bf16.msra.mxu1 %v15603_v39 }
 0x315   : > { %12051 = vmatprep.subr.bf16.mxu1 %v15588_v43  ;;  %12009 = vmatpush2.bf16.msra.mxu0 %v15331_v49  ;;  %v1986_v43 = vld [vmem:[%s16779_s2 + $0x3210] sm:$0xff]  ;;  %v451_v49 = vld [vmem:[%s16779_s2 + $0x218] sm:$0xff] }
 0x316   : > { %12010 = vmatprep.subr.bf16.mxu0 %v15316_v53  ;;  %v11720_v53 = vadd.f32 %v11719_v16, %v11677_v26  ;;  %v15764_v57 = vcombine.high %v1986_v43, %v1994_v44  ;;  %v15763_v5 = vcombine.low %v1986_v43, %v1994_v44  ;;  %v14229_v6 = vcombine.low %v451_v49, %v459_v50  ;;  %v1922_v26 = vld [vmem:[%s16779_s2 + $0x3010] sm:$0xff] }
 0x318   : > { %12052 = vmatpush2.bf16.msra.mxu1 %v15587_v52  ;;  %v16191_v52 = vld [vmem:[%s16771_s30 + $0x4] ss:$56 sps:$4 sm:$0xff]  }
 0x319   : > { %12053 = vmatprep.subr.bf16.mxu1 %v15572_v55  ;;  %12011 = vmatpush2.bf16.msra.mxu0 %v15315_v61 }
 0x31a   : > { %12066 = vmatprep.subr.bf16.mxu0 %v15812_v63  ;;  %v1970_v63 = vld [vmem:[%s16779_s2 + $0x3190] sm:$0xff] }
 0x31b   : > { %v15748_v7 = vcombine.high %v1970_v63, %v1978_v0  ;;  %v15747_v13 = vcombine.low %v1970_v63, %v1978_v0  ;;  %v587_v63 = vld [vmem:[%s16779_s2 + $0x658] sm:$0xff] }
 0x31c   : > { %12054 = vmatpush2.bf16.msra.mxu1 %v15571_v45  ;;  %v11756_v21 = vpop.f32.mrf.mxu0  ;;  %12013 = vmatmul.mubr.bf16.vlgmr.msra.gmra.mxu0 %v16188_v23  ;;  %v14230_v45 = vcombine.high %v451_v49, %v459_v50  ;;  %v619_v49 = vld [vmem:[%s16779_s2 + $0x758] sm:$0xff] }
 0x31d   : > { %12109 = vmatprep.subr.bf16.mxu1 %v14278_v2  ;;  %v11757_v27 = vadd.f32 %v11756_v21, %v11714_v14  ;;  %12067 = vmatpush1.bf16.msra.mxu0 %v15811_v9  ;;  %v443_v2 = vld [vmem:[%s16779_s2 + $0x1d8] sm:$0xff] }
 0x31e   : > { %v11758_v32 = vpop.f32.mrf.mxu0  ;;  %12068 = vmatprep.subr.bf16.mxu0 %v15796_v11  ;;  %12098 = vmatprep.mubr.bf16.mxu0 %v16190_v46  ;;  %v14214_v9 = vcombine.high %v435_v3, %v443_v2  ;;  %v419_v11 = vld [vmem:[%s16779_s2 + $0x118] sm:$0xff]  ;;  %v14213_v14 = vcombine.low %v435_v3, %v443_v2  ;;  %v2098_v2 = vld [vmem:[%s16779_s2 + $0x3590] sm:$0xff] }
 0x31f   : > { %v11799_v28 = vpop.f32.mrf.mxu1  ;;  %12056 = vmatmul.mubr.bf16.vlgmr.msra.gmra.mxu1 %v16189_v29  ;;  %v11759_v40 = vadd.f32 %v11758_v32, %v11716_v25  ;;  %v14198_v16 = vcombine.high %v419_v11, %v427_v12  ;;  %v14197_v23 = vcombine.low %v419_v11, %v427_v12  ;;  %v14182_v25 = vcombine.high %v403_v19, %v411_v20  ;;  %v395_v29 = vld [vmem:[%s16779_s2 + $0x58] sm:$0xff] }
 0x320   : > { %12110 = vmatpush1.bf16.msra.mxu1 %v14277_v60  ;;  %v11800_v39 = vadd.f32 %v11799_v28, %v11757_v27  ;;  %v11760_v37 = vpop.f32.mrf.mxu0  ;;  %12141 = vmatprep.mubr.bf16.mxu1 %v16191_v52  ;;  %v1962_v60 = vld [vmem:[%s16779_s2 + $0x3150] sm:$0xff]  ;;  %v387_v28 = vld [vmem:[%s16779_s2 + $0x18] sm:$0xff]  ;;  %v14181_v32 = vcombine.low %v403_v19, %v411_v20 }
 0x321   : > { %v11801_v42 = vpop.f32.mrf.mxu1  ;;  %12111 = vmatprep.subr.bf16.mxu1 %v14262_v17  ;;  %v11761_v55 = vadd.f32 %v11760_v37, %v11718_v38  ;;  %12069 = vmatpush1.bf16.msra.mxu0 %v15795_v24  ;;  %v15732_v15 = vcombine.high %v1954_v10, %v1962_v60  ;;  %v1938_v17 = vld [vmem:[%s16779_s2 + $0x3090] sm:$0xff]  ;;  %v15731_v21 = vcombine.low %v1954_v10, %v1962_v60  ;;  %v547_v11 = vld [vmem:[%s16779_s2 + $0x518] sm:$0xff] }
 0x322   : > { %v13616_v47 = vadd.f32 %v11800_v39, %v340_v30  ;;  %v11802_v54 = vadd.f32 %v11801_v42, %v11759_v40  ;;  %v11762_v59 = vpop.f32.mrf.mxu0  ;;  %12070 = vmatprep.subr.bf16.mxu0 %v15780_v35  ;;  %v15716_v24 = vcombine.high %v1938_v17, %v1946_v18  ;;  %v1930_v27 = vld [vmem:[%s16779_s2 + $0x3050] sm:$0xff]  ;;  %v15715_v30 = vcombine.low %v1938_v17, %v1946_v18  ;;  %v627_v39 = vld [vmem:[%s16779_s2 + $0x798] sm:$0xff] }
 0x323   : > { %v11803_v56 = vpop.f32.mrf.mxu1  ;;  %v11763_v62 = vadd.f32 %v11762_v59, %v11720_v53  ;;  %v14166_v35 = vcombine.high %v387_v28, %v395_v29  ;;  %v2170_v38 = vld [vmem:[%s16779_s2 + $0x37d0] sm:$0xff]  ;;  %v635_v40 = vld [vmem:[%s16779_s2 + $0x7d8] sm:$0xff]  ;;  %v15699_v42 = vcombine.low %v1922_v26, %v1930_v27  ;;  %v14165_v43 = vcombine.low %v387_v28, %v395_v29 }
 0x324   : > { %12112 = vmatpush1.bf16.msra.mxu1 %v14261_v33  ;;  %13648 = vst [vmem:[#allocation2 + $0xd8] sm:$0xff] %v13616_v47  ;;  %v13617_v34 = vadd.f32 %v11802_v54, %v341_v22  ;;  %v11804_v61 = vadd.f32 %v11803_v56, %v11761_v55  ;;  %v15700_v33 = vcombine.high %v1922_v26, %v1930_v27  ;;  %v2146_v22 = vld [vmem:[%s16779_s2 + $0x3710] sm:$0xff]  ;;  %v595_v56 = vld [vmem:[%s16779_s2 + $0x698] sm:$0xff] }
 0x325   : > { %12113 = vmatprep.subr.bf16.mxu1 %v14246_v36  ;;  %v11805_v51 = vpop.f32.mrf.mxu1  ;;  %12071 = vmatpush1.bf16.msra.mxu0 %v15779_v48  ;;  %v2162_v36 = vld [vmem:[%s16779_s2 + $0x3790] sm:$0xff]  ;;  %v14406_v46 = vcombine.high %v627_v39, %v635_v40  ;;  %v611_v48 = vld [vmem:[%s16779_s2 + $0x718] sm:$0xff]  ;;  %v14405_v52 = vcombine.low %v627_v39, %v635_v40 }
 0x326   : > { %13649 = vst [vmem:[#allocation2 + $0x18] sm:$0xff] %v13617_v34  ;;  %v13632_v4 = vadd.f32 %v11804_v61, %v356_v58  ;;  %v11806_v31 = vadd.f32 %v11805_v51, %v11763_v62  ;;  %12072 = vmatprep.subr.bf16.mxu0 %v15764_v57  ;;  %v15940_v44 = vcombine.high %v2162_v36, %v2170_v38  ;;  %v2154_v37 = vld [vmem:[%s16779_s2 + $0x3750] sm:$0xff]  ;;  %v603_v58 = vld [vmem:[%s16779_s2 + $0x6d8] sm:$0xff] }
 0x327   : > { %v15939_v50 = vcombine.low %v2162_v36, %v2170_v38  ;;  %v15924_v53 = vcombine.high %v2146_v22, %v2154_v37  ;;  %v14390_v47 = vcombine.high %v611_v48, %v619_v49  ;;  %v2130_v54 = vld [vmem:[%s16779_s2 + $0x3690] sm:$0xff]  ;;  %v15923_v59 = vcombine.low %v2146_v22, %v2154_v37  ;;  %v555_v12 = vld [vmem:[%s16779_s2 + $0x558] sm:$0xff] }
 0x328   : > { %12114 = vmatpush1.bf16.msra.mxu1 %v14245_v41  ;;  %13664 = vst [vmem:[#allocation2 + $0x40] sm:$0xff] %v13632_v4  ;;  %v13633_v8 = vadd.f32 %v11806_v31, %v357_v1  ;;  %v2138_v55 = vld [vmem:[%s16779_s2 + $0x36d0] sm:$0xff]  ;;  %v14389_v41 = vcombine.low %v611_v48, %v619_v49  ;;  %v14374_v34 = vcombine.high %v595_v56, %v603_v58  ;;  %v563_v31 = vld [vmem:[%s16779_s2 + $0x598] sm:$0xff] }
 0x329   : > { %12115 = vmatprep.subr.bf16.mxu1 %v14230_v45  ;;  %12073 = vmatpush1.bf16.msra.mxu0 %v15763_v5  ;;  %v15908_v57 = vcombine.high %v2130_v54, %v2138_v55  ;;  %v2114_v61 = vld [vmem:[%s16779_s2 + $0x3610] sm:$0xff]  ;;  %v579_v45 = vld [vmem:[%s16779_s2 + $0x618] sm:$0xff]  ;;  %v15907_v0 = vcombine.low %v2130_v54, %v2138_v55  ;;  %v14373_v1 = vcombine.low %v595_v56, %v603_v58 }
 0x32a   : > { %13665 = vst [vmem:[#allocation2 + $0xc8] sm:$0xff] %v13633_v8  ;;  %12074 = vmatprep.subr.bf16.mxu0 %v15748_v7  ;;  %v2122_v62 = vld [vmem:[%s16779_s2 + $0x3650] sm:$0xff]  ;;  %v14358_v3 = vcombine.high %v579_v45, %v587_v63  ;;  %v571_v5 = vld [vmem:[%s16779_s2 + $0x5d8] sm:$0xff]  ;;  %v14357_v7 = vcombine.low %v579_v45, %v587_v63 }
 0x32b   : > { %v15892_v51 = vcombine.high %v2114_v61, %v2122_v62  ;;  %v2106_v4 = vld [vmem:[%s16779_s2 + $0x35d0] sm:$0xff]  ;;  %v531_v19 = vld [vmem:[%s16779_s2 + $0x498] sm:$0xff] }
 0x32c   : > { %12116 = vmatpush1.bf16.msra.mxu1 %v14229_v6  ;;  %v15891_v6 = vcombine.low %v2114_v61, %v2122_v62  ;;  %v15876_v8 = vcombine.high %v2098_v2, %v2106_v4  ;;  %v2082_v10 = vld [vmem:[%s16779_s2 + $0x3510] sm:$0xff]  ;;  %v539_v20 = vld [vmem:[%s16779_s2 + $0x4d8] sm:$0xff] }
 0x32d   : > { %12117 = vmatprep.subr.bf16.mxu1 %v14214_v9  ;;  %12075 = vmatpush1.bf16.msra.mxu0 %v15747_v13  ;;  %v14342_v9 = vcombine.high %v563_v31, %v571_v5  ;;  %v2090_v60 = vld [vmem:[%s16779_s2 + $0x3550] sm:$0xff]  ;;  %v15875_v13 = vcombine.low %v2098_v2, %v2106_v4  ;;  %v515_v28 = vld [vmem:[%s16779_s2 + $0x418] sm:$0xff] }
 0x32e   : > { %12076 = vmatprep.subr.bf16.mxu0 %v15732_v15  ;;  %v15860_v15 = vcombine.high %v2082_v10, %v2090_v60  ;;  %v2066_v17 = vld [vmem:[%s16779_s2 + $0x3490] sm:$0xff]  ;;  %v523_v29 = vld [vmem:[%s16779_s2 + $0x458] sm:$0xff] }
 0x32f   : > { %v2074_v18 = vld [vmem:[%s16779_s2 + $0x34d0] sm:$0xff]  ;;  %v755_v36 = vld [vmem:[%s16779_s2 + $0xb98] sm:$0xff] }
 0x330   : > { %12118 = vmatpush1.bf16.msra.mxu1 %v14213_v14  ;;  %v14341_v14 = vcombine.low %v563_v31, %v571_v5  ;;  %v2050_v26 = vld [vmem:[%s16779_s2 + $0x3410] sm:$0xff]  ;;  %v763_v38 = vld [vmem:[%s16779_s2 + $0xbd8] sm:$0xff] }
 0x331   : > { %12119 = vmatprep.subr.bf16.mxu1 %v14198_v16  ;;  %12077 = vmatpush1.bf16.msra.mxu0 %v15731_v21  ;;  %v14326_v16 = vcombine.high %v547_v11, %v555_v12  ;;  %v15859_v21 = vcombine.low %v2082_v10, %v2090_v60  ;;  %v2058_v27 = vld [vmem:[%s16779_s2 + $0x3450] sm:$0xff]  ;;  %v1011_v39 = vld [vmem:[%s16779_s2 + $0x1398] sm:$0xff] }
 0x332   : > { %12078 = vmatprep.subr.bf16.mxu0 %v15716_v24  ;;  %v15844_v24 = vcombine.high %v2066_v17, %v2074_v18  ;;  %v1019_v40 = vld [vmem:[%s16779_s2 + $0x13d8] sm:$0xff] }
 0x333   : > { %v739_v22 = vld [vmem:[%s16779_s2 + $0xb18] sm:$0xff] }
 0x334   : > { %12120 = vmatpush1.bf16.msra.mxu1 %v14197_v23  ;;  %v14325_v23 = vcombine.low %v547_v11, %v555_v12  ;;  %v747_v37 = vld [vmem:[%s16779_s2 + $0xb58] sm:$0xff] }
 0x335   : > { %12121 = vmatprep.subr.bf16.mxu1 %v14182_v25  ;;  %12079 = vmatpush1.bf16.msra.mxu0 %v15715_v30  ;;  %v14310_v25 = vcombine.high %v531_v19, %v539_v20  ;;  %v15843_v30 = vcombine.low %v2066_v17, %v2074_v18  ;;  %v995_v48 = vld [vmem:[%s16779_s2 + $0x1318] sm:$0xff] }
 0x336   : > { %12080 = vmatprep.subr.bf16.mxu0 %v15700_v33  ;;  %v15828_v33 = vcombine.high %v2050_v26, %v2058_v27  ;;  %v1003_v49 = vld [vmem:[%s16779_s2 + $0x1358] sm:$0xff] }
 0x337   : > { %v723_v54 = vld [vmem:[%s16779_s2 + $0xa98] sm:$0xff] }
 0x338   : > { %12122 = vmatpush1.bf16.msra.mxu1 %v14181_v32  ;;  %v14309_v32 = vcombine.low %v531_v19, %v539_v20  ;;  %v731_v55 = vld [vmem:[%s16779_s2 + $0xad8] sm:$0xff] }
 0x339   : > { %12123 = vmatprep.subr.bf16.mxu1 %v14166_v35  ;;  %12081 = vmatpush1.bf16.msra.mxu0 %v15699_v42  ;;  %v14294_v35 = vcombine.high %v515_v28, %v523_v29  ;;  %v15827_v42 = vcombine.low %v2050_v26, %v2058_v27  ;;  %v16192_v56 = vld [vmem:[%s16771_s30 + $0x30] ss:$56 sps:$4 sm:$0xff]   ;;  %v14502_v61 = vcombine.high %v723_v54, %v731_v55 }
 0x33a   : > { %12082 = vmatprep.subr.bf16.mxu0 %v15940_v44  ;;  %v14534_v44 = vcombine.high %v755_v36, %v763_v38  ;;  %v979_v58 = vld [vmem:[%s16779_s2 + $0x1298] sm:$0xff]  ;;  %v14501_v2 = vcombine.low %v723_v54, %v731_v55 }
 0x33b   : > { %v707_v45 = vld [vmem:[%s16779_s2 + $0xa18] sm:$0xff] }
 0x33c   : > { %12124 = vmatpush1.bf16.msra.mxu1 %v14165_v43  ;;  %v14293_v43 = vcombine.low %v515_v28, %v523_v29  ;;  %v715_v63 = vld [vmem:[%s16779_s2 + $0xa58] sm:$0xff] }
 0x33d   : > { %12125 = vmatprep.subr.bf16.mxu1 %v14406_v46  ;;  %12083 = vmatpush2.bf16.msra.mxu0 %v15939_v50  ;;  %v14790_v46 = vcombine.high %v1011_v39, %v1019_v40  ;;  %v14533_v50 = vcombine.low %v755_v36, %v763_v38  ;;  %v14486_v31 = vcombine.high %v707_v45, %v715_v63 }
 0x33e   : > { %12084 = vmatprep.subr.bf16.mxu0 %v15924_v53  ;;  %v14518_v53 = vcombine.high %v739_v22, %v747_v37  ;;  %v14485_v10 = vcombine.low %v707_v45, %v715_v63 }
 0x340   : > { %12126 = vmatpush2.bf16.msra.mxu1 %v14405_v52  ;;  %v14789_v52 = vcombine.low %v1011_v39, %v1019_v40 }
 0x341   : > { %12127 = vmatprep.subr.bf16.mxu1 %v14390_v47  ;;  %12085 = vmatpush2.bf16.msra.mxu0 %v15923_v59  ;;  %v14774_v47 = vcombine.high %v995_v48, %v1003_v49  ;;  %v987_v59 = vld [vmem:[%s16779_s2 + $0x12d8] sm:$0xff] }
 0x342   : > { %12086 = vmatprep.subr.bf16.mxu0 %v15908_v57  ;;  %v14517_v57 = vcombine.low %v739_v22, %v747_v37  ;;  %v14758_v62 = vcombine.high %v979_v58, %v987_v59  ;;  %v14757_v4 = vcombine.low %v979_v58, %v987_v59  ;;  %v851_v59 = vld [vmem:[%s16779_s2 + $0xe98] sm:$0xff] }
 0x344   : > { %12128 = vmatpush2.bf16.msra.mxu1 %v14389_v41  ;;  %v16193_v41 = vld [vmem:[%s16771_s30] ss:$56 sps:$4 sm:$0xff]  }
 0x345   : > { %12129 = vmatprep.subr.bf16.mxu1 %v14374_v34  ;;  %12087 = vmatpush2.bf16.msra.mxu0 %v15907_v0  ;;  %v14773_v34 = vcombine.low %v995_v48, %v1003_v49  ;;  %v16194_v0 = vld [vmem:[%s16771_s30 + $0xc] ss:$56 sps:$4 sm:$0xff]  }
 0x346   : > { %12088 = vmatprep.subr.bf16.mxu0 %v15892_v51  ;;  %v971_v51 = vld [vmem:[%s16779_s2 + $0x1258] sm:$0xff] }
 0x348   : > { %12130 = vmatpush2.bf16.msra.mxu1 %v14373_v1  ;;  %v963_v1 = vld [vmem:[%s16779_s2 + $0x1218] sm:$0xff] }
 0x349   : > { %12131 = vmatprep.subr.bf16.mxu1 %v14358_v3  ;;  %12089 = vmatpush2.bf16.msra.mxu0 %v15891_v6  ;;  %v16195_v3 = vld [vmem:[%s16771_s30 + $0x14] ss:$56 sps:$4 sm:$0xff]   ;;  %v14742_v5 = vcombine.high %v963_v1, %v971_v51  ;;  %v14741_v60 = vcombine.low %v963_v1, %v971_v51 }
 0x34a   : > { %12090 = vmatprep.subr.bf16.mxu0 %v15876_v8  ;;  %v691_v6 = vld [vmem:[%s16779_s2 + $0x998] sm:$0xff] }
 0x34b   : > { %v947_v8 = vld [vmem:[%s16779_s2 + $0x1198] sm:$0xff] }
 0x34c   : > { %12132 = vmatpush2.bf16.msra.mxu1 %v14357_v7  ;;  %v699_v7 = vld [vmem:[%s16779_s2 + $0x9d8] sm:$0xff] }
 0x34d   : > { %12133 = vmatprep.subr.bf16.mxu1 %v14342_v9  ;;  %12091 = vmatpush2.bf16.msra.mxu0 %v15875_v13  ;;  %v955_v9 = vld [vmem:[%s16779_s2 + $0x11d8] sm:$0xff]  ;;  %v14470_v11 = vcombine.high %v691_v6, %v699_v7  ;;  %v14469_v17 = vcombine.low %v691_v6, %v699_v7 }
 0x34e   : > { %12092 = vmatprep.subr.bf16.mxu0 %v15860_v15  ;;  %v14726_v12 = vcombine.high %v947_v8, %v955_v9  ;;  %v675_v13 = vld [vmem:[%s16779_s2 + $0x918] sm:$0xff]  ;;  %v14725_v18 = vcombine.low %v947_v8, %v955_v9 }
 0x34f   : > { %v931_v15 = vld [vmem:[%s16779_s2 + $0x1118] sm:$0xff] }
 0x350   : > { %12134 = vmatpush2.bf16.msra.mxu1 %v14341_v14  ;;  %v683_v14 = vld [vmem:[%s16779_s2 + $0x958] sm:$0xff] }
 0x351   : > { %12135 = vmatprep.subr.bf16.mxu1 %v14326_v16  ;;  %12093 = vmatpush2.bf16.msra.mxu0 %v15859_v21  ;;  %v939_v16 = vld [vmem:[%s16779_s2 + $0x1158] sm:$0xff]  ;;  %v14454_v19 = vcombine.high %v675_v13, %v683_v14  ;;  %v14453_v26 = vcombine.low %v675_v13, %v683_v14 }
 0x352   : > { %12094 = vmatprep.subr.bf16.mxu0 %v15844_v24  ;;  %v14710_v20 = vcombine.high %v931_v15, %v939_v16  ;;  %v659_v21 = vld [vmem:[%s16779_s2 + $0x898] sm:$0xff]  ;;  %v14709_v27 = vcombine.low %v931_v15, %v939_v16 }
 0x353   : > { %v915_v24 = vld [vmem:[%s16779_s2 + $0x1098] sm:$0xff] }
 0x354   : > { %12136 = vmatpush2.bf16.msra.mxu1 %v14325_v23  ;;  %v667_v23 = vld [vmem:[%s16779_s2 + $0x8d8] sm:$0xff] }
 0x355   : > { %12137 = vmatprep.subr.bf16.mxu1 %v14310_v25  ;;  %12095 = vmatpush2.bf16.msra.mxu0 %v15843_v30  ;;  %v923_v25 = vld [vmem:[%s16779_s2 + $0x10d8] sm:$0xff]  ;;  %v14438_v28 = vcombine.high %v659_v21, %v667_v23  ;;  %v14437_v36 = vcombine.low %v659_v21, %v667_v23 }
 0x356   : > { %12096 = vmatprep.subr.bf16.mxu0 %v15828_v33  ;;  %v14694_v29 = vcombine.high %v915_v24, %v923_v25  ;;  %v643_v30 = vld [vmem:[%s16779_s2 + $0x818] sm:$0xff]  ;;  %v14693_v38 = vcombine.low %v915_v24, %v923_v25 }
 0x357   : > { %v899_v33 = vld [vmem:[%s16779_s2 + $0x1018] sm:$0xff] }
 0x358   : > { %12138 = vmatpush2.bf16.msra.mxu1 %v14309_v32  ;;  %v651_v32 = vld [vmem:[%s16779_s2 + $0x858] sm:$0xff] }
 0x359   : > { %12139 = vmatprep.subr.bf16.mxu1 %v14294_v35  ;;  %12097 = vmatpush2.bf16.msra.mxu0 %v15827_v42  ;;  %v907_v35 = vld [vmem:[%s16779_s2 + $0x1058] sm:$0xff]  ;;  %v14422_v39 = vcombine.high %v643_v30, %v651_v32  ;;  %v14421_v22 = vcombine.low %v643_v30, %v651_v32 }
 0x35a   : > { %12152 = vmatprep.subr.bf16.mxu0 %v14534_v44  ;;  %v14678_v40 = vcombine.high %v899_v33, %v907_v35  ;;  %v883_v42 = vld [vmem:[%s16779_s2 + $0xf98] sm:$0xff]  ;;  %v14677_v37 = vcombine.low %v899_v33, %v907_v35 }
 0x35b   : > { %v1139_v44 = vld [vmem:[%s16779_s2 + $0x1798] sm:$0xff] }
 0x35c   : > { %12140 = vmatpush2.bf16.msra.mxu1 %v14293_v43  ;;  %12099 = vmatmul.mubr.bf16.vlgmr.msra.gmra.mxu0 %v16192_v56  ;;  %v891_v43 = vld [vmem:[%s16779_s2 + $0xfd8] sm:$0xff] }
 0x35d   : > { %12195 = vmatprep.subr.bf16.mxu1 %v14790_v46  ;;  %12153 = vmatpush1.bf16.msra.mxu0 %v14533_v50  ;;  %v1147_v46 = vld [vmem:[%s16779_s2 + $0x17d8] sm:$0xff]  ;;  %v14662_v48 = vcombine.high %v883_v42, %v891_v43  ;;  %v14661_v54 = vcombine.low %v883_v42, %v891_v43 }
 0x35e   : > { %12154 = vmatprep.subr.bf16.mxu0 %v14518_v53  ;;  %12184 = vmatprep.mubr.bf16.mxu0 %v16194_v0  ;;  %v14918_v49 = vcombine.high %v1139_v44, %v1147_v46  ;;  %v867_v50 = vld [vmem:[%s16779_s2 + $0xf18] sm:$0xff]  ;;  %v14917_v55 = vcombine.low %v1139_v44, %v1147_v46 }
 0x35f   : > { %12142 = vmatmul.mubr.bf16.vlgmr.msra.gmra.mxu1 %v16193_v41  ;;  %v1123_v53 = vld [vmem:[%s16779_s2 + $0x1718] sm:$0xff] }
 0x360   : > { %12196 = vmatpush1.bf16.msra.mxu1 %v14789_v52  ;;  %12227 = vmatprep.mubr.bf16.mxu1 %v16195_v3  ;;  %v875_v52 = vld [vmem:[%s16779_s2 + $0xf58] sm:$0xff] }
 0x361   : > { %12197 = vmatprep.subr.bf16.mxu1 %v14774_v47  ;;  %12155 = vmatpush1.bf16.msra.mxu0 %v14517_v57  ;;  %v1131_v47 = vld [vmem:[%s16779_s2 + $0x1758] sm:$0xff]  ;;  %v14646_v56 = vcombine.high %v867_v50, %v875_v52 }
 0x362   : > { %12156 = vmatprep.subr.bf16.mxu0 %v14502_v61  ;;  %v14902_v58 = vcombine.high %v1123_v53, %v1131_v47  ;;  %v859_v41 = vld [vmem:[%s16779_s2 + $0xed8] sm:$0xff]  ;;  %v14645_v61 = vcombine.low %v867_v50, %v875_v52 }
 0x363   : > { %v1107_v57 = vld [vmem:[%s16779_s2 + $0x1698] sm:$0xff]  ;;  %v14630_v45 = vcombine.high %v851_v59, %v859_v41 }
 0x364   : > { %12198 = vmatpush1.bf16.msra.mxu1 %v14773_v34  ;;  %v1115_v34 = vld [vmem:[%s16779_s2 + $0x16d8] sm:$0xff] }
 0x365   : > { %12199 = vmatprep.subr.bf16.mxu1 %v14758_v62  ;;  %12157 = vmatpush1.bf16.msra.mxu0 %v14501_v2  ;;  %v14901_v62 = vcombine.low %v1123_v53, %v1131_v47  ;;  %v14886_v63 = vcombine.high %v1107_v57, %v1115_v34  ;;  %v835_v0 = vld [vmem:[%s16779_s2 + $0xe18] sm:$0xff]  ;;  %v14629_v2 = vcombine.low %v851_v59, %v859_v41 }
 0x366   : > { %12158 = vmatprep.subr.bf16.mxu0 %v14486_v31  ;;  %v843_v1 = vld [vmem:[%s16779_s2 + $0xe58] sm:$0xff] }
 0x367   : > { %v1091_v51 = vld [vmem:[%s16779_s2 + $0x1618] sm:$0xff]  ;;  %v14614_v31 = vcombine.high %v835_v0, %v843_v1 }
 0x368   : > { %12200 = vmatpush1.bf16.msra.mxu1 %v14757_v4  ;;  %v1099_v3 = vld [vmem:[%s16779_s2 + $0x1658] sm:$0xff]  ;;  %v14885_v4 = vcombine.low %v1107_v57, %v1115_v34 }
 0x369   : > { %12201 = vmatprep.subr.bf16.mxu1 %v14742_v5  ;;  %12159 = vmatpush1.bf16.msra.mxu0 %v14485_v10  ;;  %v14870_v5 = vcombine.high %v1091_v51, %v1099_v3  ;;  %v819_v6 = vld [vmem:[%s16779_s2 + $0xd98] sm:$0xff]  ;;  %v14613_v10 = vcombine.low %v835_v0, %v843_v1 }
 0x36a   : > { %12160 = vmatprep.subr.bf16.mxu0 %v14470_v11  ;;  %v827_v7 = vld [vmem:[%s16779_s2 + $0xdd8] sm:$0xff] }
 0x36b   : > { %v1075_v8 = vld [vmem:[%s16779_s2 + $0x1598] sm:$0xff]  ;;  %v14598_v11 = vcombine.high %v819_v6, %v827_v7 }
 0x36c   : > { %12202 = vmatpush1.bf16.msra.mxu1 %v14741_v60  ;;  %v1083_v9 = vld [vmem:[%s16779_s2 + $0x15d8] sm:$0xff]  ;;  %v14869_v60 = vcombine.low %v1091_v51, %v1099_v3 }
 0x36d   : > { %12203 = vmatprep.subr.bf16.mxu1 %v14726_v12  ;;  %12161 = vmatpush1.bf16.msra.mxu0 %v14469_v17  ;;  %v14854_v12 = vcombine.high %v1075_v8, %v1083_v9  ;;  %v803_v13 = vld [vmem:[%s16779_s2 + $0xd18] sm:$0xff]  ;;  %v14597_v17 = vcombine.low %v819_v6, %v827_v7 }
 0x36e   : > { %12162 = vmatprep.subr.bf16.mxu0 %v14454_v19  ;;  %v811_v14 = vld [vmem:[%s16779_s2 + $0xd58] sm:$0xff] }
 0x36f   : > { %v1059_v15 = vld [vmem:[%s16779_s2 + $0x1518] sm:$0xff]  ;;  %v14582_v19 = vcombine.high %v803_v13, %v811_v14 }
 0x370   : > { %12204 = vmatpush1.bf16.msra.mxu1 %v14725_v18  ;;  %v1067_v16 = vld [vmem:[%s16779_s2 + $0x1558] sm:$0xff]  ;;  %v14853_v18 = vcombine.low %v1075_v8, %v1083_v9 }
 0x371   : > { %12205 = vmatprep.subr.bf16.mxu1 %v14710_v20  ;;  %12163 = vmatpush1.bf16.msra.mxu0 %v14453_v26  ;;  %v14838_v20 = vcombine.high %v1059_v15, %v1067_v16  ;;  %v787_v21 = vld [vmem:[%s16779_s2 + $0xc98] sm:$0xff]  ;;  %v14581_v26 = vcombine.low %v803_v13, %v811_v14 }
 0x372   : > { %12164 = vmatprep.subr.bf16.mxu0 %v14438_v28  ;;  %v795_v23 = vld [vmem:[%s16779_s2 + $0xcd8] sm:$0xff] }
 0x373   : > { %v1043_v24 = vld [vmem:[%s16779_s2 + $0x1498] sm:$0xff]  ;;  %v14566_v28 = vcombine.high %v787_v21, %v795_v23 }
 0x374   : > { %12206 = vmatpush1.bf16.msra.mxu1 %v14709_v27  ;;  %v1051_v25 = vld [vmem:[%s16779_s2 + $0x14d8] sm:$0xff]  ;;  %v14837_v27 = vcombine.low %v1059_v15, %v1067_v16 }
 0x375   : > { %12207 = vmatprep.subr.bf16.mxu1 %v14694_v29  ;;  %12165 = vmatpush1.bf16.msra.mxu0 %v14437_v36  ;;  %v14822_v29 = vcombine.high %v1043_v24, %v1051_v25  ;;  %v771_v30 = vld [vmem:[%s16779_s2 + $0xc18] sm:$0xff]  ;;  %v14565_v36 = vcombine.low %v787_v21, %v795_v23 }
 0x376   : > { %12166 = vmatprep.subr.bf16.mxu0 %v14422_v39  ;;  %v779_v32 = vld [vmem:[%s16779_s2 + $0xc58] sm:$0xff] }
 0x377   : > { %v1027_v33 = vld [vmem:[%s16779_s2 + $0x1418] sm:$0xff]  ;;  %v14550_v39 = vcombine.high %v771_v30, %v779_v32 }
 0x378   : > { %12208 = vmatpush1.bf16.msra.mxu1 %v14693_v38  ;;  %v1035_v35 = vld [vmem:[%s16779_s2 + $0x1458] sm:$0xff]  ;;  %v14821_v38 = vcombine.low %v1043_v24, %v1051_v25 }
 0x379   : > { %12209 = vmatprep.subr.bf16.mxu1 %v14678_v40  ;;  %12167 = vmatpush1.bf16.msra.mxu0 %v14421_v22  ;;  %v14806_v40 = vcombine.high %v1027_v33, %v1035_v35  ;;  %v1267_v42 = vld [vmem:[%s16779_s2 + $0x1b98] sm:$0xff]  ;;  %v14549_v22 = vcombine.low %v771_v30, %v779_v32 }
 0x37a   : > { %12168 = vmatprep.subr.bf16.mxu0 %v14662_v48  ;;  %v1275_v43 = vld [vmem:[%s16779_s2 + $0x1bd8] sm:$0xff] }
 0x37b   : > { %v1523_v44 = vld [vmem:[%s16779_s2 + $0x2398] sm:$0xff]  ;;  %v15046_v48 = vcombine.high %v1267_v42, %v1275_v43 }
 0x37c   : > { %12210 = vmatpush1.bf16.msra.mxu1 %v14677_v37  ;;  %v1531_v46 = vld [vmem:[%s16779_s2 + $0x23d8] sm:$0xff]  ;;  %v14805_v37 = vcombine.low %v1027_v33, %v1035_v35 }
 0x37d   : > { %12211 = vmatprep.subr.bf16.mxu1 %v14918_v49  ;;  %12169 = vmatpush2.bf16.msra.mxu0 %v14661_v54  ;;  %v15302_v49 = vcombine.high %v1523_v44, %v1531_v46  ;;  %v1251_v50 = vld [vmem:[%s16779_s2 + $0x1b18] sm:$0xff]  ;;  %v15045_v54 = vcombine.low %v1267_v42, %v1275_v43 }
 0x37e   : > { %12170 = vmatprep.subr.bf16.mxu0 %v14646_v56  ;;  %v1259_v52 = vld [vmem:[%s16779_s2 + $0x1b58] sm:$0xff] }
 0x37f   : > { %v1507_v53 = vld [vmem:[%s16779_s2 + $0x2318] sm:$0xff]  ;;  %v15030_v56 = vcombine.high %v1251_v50, %v1259_v52 }
 0x380   : > { %12212 = vmatpush2.bf16.msra.mxu1 %v14917_v55  ;;  %v1515_v47 = vld [vmem:[%s16779_s2 + $0x2358] sm:$0xff]  ;;  %v15301_v55 = vcombine.low %v1523_v44, %v1531_v46 }
 0x381   : > { %12213 = vmatprep.subr.bf16.mxu1 %v14902_v58  ;;  %12171 = vmatpush2.bf16.msra.mxu0 %v14645_v61  ;;  %v15286_v58 = vcombine.high %v1507_v53, %v1515_v47  ;;  %v1235_v59 = vld [vmem:[%s16779_s2 + $0x1a98] sm:$0xff] }
 0x382   : > { %12172 = vmatprep.subr.bf16.mxu0 %v14630_v45  ;;  %v1243_v41 = vld [vmem:[%s16779_s2 + $0x1ad8] sm:$0xff]  ;;  %v15029_v45 = vcombine.low %v1251_v50, %v1259_v52 }
 0x383   : > { %v16196_v57 = vld [vmem:[%s16771_s30 + $0x8] ss:$56 sps:$4 sm:$0xff]   ;;  %v15014_v0 = vcombine.high %v1235_v59, %v1243_v41  ;;  %v15013_v6 = vcombine.low %v1235_v59, %v1243_v41 }
 0x384   : > { %12214 = vmatpush2.bf16.msra.mxu1 %v14901_v62  ;;  %v1491_v34 = vld [vmem:[%s16779_s2 + $0x2298] sm:$0xff] }
 0x385   : > { %12215 = vmatprep.subr.bf16.mxu1 %v14886_v63  ;;  %12173 = vmatpush2.bf16.msra.mxu0 %v14629_v2  ;;  %v1499_v61 = vld [vmem:[%s16779_s2 + $0x22d8] sm:$0xff]  ;;  %v15285_v63 = vcombine.low %v1507_v53, %v1515_v47 }
 0x386   : > { %12174 = vmatprep.subr.bf16.mxu0 %v14614_v31  ;;  %v16197_v62 = vld [vmem:[%s16771_s30 + $0x10] ss:$56 sps:$4 sm:$0xff]   ;;  %v15270_v1 = vcombine.high %v1491_v34, %v1499_v61  ;;  %v16198_v2 = vld [vmem:[%s16771_s30 + $0x1c] ss:$56 sps:$4 sm:$0xff]   ;;  %v15269_v7 = vcombine.low %v1491_v34, %v1499_v61 }
 0x387   : > { %v1219_v51 = vld [vmem:[%s16779_s2 + $0x1a18] sm:$0xff] }
 0x388   : > { %12216 = vmatpush2.bf16.msra.mxu1 %v14885_v4  ;;  %v1227_v3 = vld [vmem:[%s16779_s2 + $0x1a58] sm:$0xff] }
 0x389   : > { %12217 = vmatprep.subr.bf16.mxu1 %v14870_v5  ;;  %12175 = vmatpush2.bf16.msra.mxu0 %v14613_v10  ;;  %v1475_v4 = vld [vmem:[%s16779_s2 + $0x2218] sm:$0xff]  ;;  %v14998_v8 = vcombine.high %v1219_v51, %v1227_v3  ;;  %v14997_v13 = vcombine.low %v1219_v51, %v1227_v3 }
 0x38a   : > { %12176 = vmatprep.subr.bf16.mxu0 %v14598_v11  ;;  %v1483_v31 = vld [vmem:[%s16779_s2 + $0x2258] sm:$0xff] }
 0x38b   : > { %v16199_v5 = vld [vmem:[%s16771_s30 + $0x24] ss:$56 sps:$4 sm:$0xff]   ;;  %v15254_v9 = vcombine.high %v1475_v4, %v1483_v31  ;;  %v15253_v14 = vcombine.low %v1475_v4, %v1483_v31 }
 0x38c   : > { %12218 = vmatpush2.bf16.msra.mxu1 %v14869_v60  ;;  %v1203_v10 = vld [vmem:[%s16779_s2 + $0x1998] sm:$0xff] }
 0x38d   : > { %12219 = vmatprep.subr.bf16.mxu1 %v14854_v12  ;;  %12177 = vmatpush2.bf16.msra.mxu0 %v14597_v17  ;;  %v1211_v60 = vld [vmem:[%s16779_s2 + $0x19d8] sm:$0xff] }
 0x38e   : > { %12178 = vmatprep.subr.bf16.mxu0 %v14582_v19  ;;  %v1459_v11 = vld [vmem:[%s16779_s2 + $0x2198] sm:$0xff]  ;;  %v14982_v15 = vcombine.high %v1203_v10, %v1211_v60  ;;  %v14981_v21 = vcombine.low %v1203_v10, %v1211_v60 }
 0x38f   : > { %v1467_v12 = vld [vmem:[%s16779_s2 + $0x21d8] sm:$0xff] }
 0x390   : > { %12220 = vmatpush2.bf16.msra.mxu1 %v14853_v18  ;;  %v15238_v16 = vcombine.high %v1459_v11, %v1467_v12  ;;  %v1187_v17 = vld [vmem:[%s16779_s2 + $0x1918] sm:$0xff]  ;;  %v15237_v23 = vcombine.low %v1459_v11, %v1467_v12 }
 0x391   : > { %12221 = vmatprep.subr.bf16.mxu1 %v14838_v20  ;;  %12179 = vmatpush2.bf16.msra.mxu0 %v14581_v26  ;;  %v1195_v18 = vld [vmem:[%s16779_s2 + $0x1958] sm:$0xff] }
 0x392   : > { %12180 = vmatprep.subr.bf16.mxu0 %v14566_v28  ;;  %v1443_v19 = vld [vmem:[%s16779_s2 + $0x2118] sm:$0xff]  ;;  %v14966_v24 = vcombine.high %v1187_v17, %v1195_v18  ;;  %v14965_v30 = vcombine.low %v1187_v17, %v1195_v18 }
 0x393   : > { %v1451_v20 = vld [vmem:[%s16779_s2 + $0x2158] sm:$0xff] }
 0x394   : > { %12222 = vmatpush2.bf16.msra.mxu1 %v14837_v27  ;;  %v15222_v25 = vcombine.high %v1443_v19, %v1451_v20  ;;  %v1171_v26 = vld [vmem:[%s16779_s2 + $0x1898] sm:$0xff]  ;;  %v15221_v32 = vcombine.low %v1443_v19, %v1451_v20 }
 0x395   : > { %12223 = vmatprep.subr.bf16.mxu1 %v14822_v29  ;;  %12181 = vmatpush2.bf16.msra.mxu0 %v14565_v36  ;;  %v1179_v27 = vld [vmem:[%s16779_s2 + $0x18d8] sm:$0xff] }
 0x396   : > { %12182 = vmatprep.subr.bf16.mxu0 %v14550_v39  ;;  %v1427_v28 = vld [vmem:[%s16779_s2 + $0x2098] sm:$0xff]  ;;  %v14950_v33 = vcombine.high %v1171_v26, %v1179_v27  ;;  %v14949_v42 = vcombine.low %v1171_v26, %v1179_v27 }
 0x397   : > { %v1435_v29 = vld [vmem:[%s16779_s2 + $0x20d8] sm:$0xff] }
 0x398   : > { %12224 = vmatpush2.bf16.msra.mxu1 %v14821_v38  ;;  %v15206_v35 = vcombine.high %v1427_v28, %v1435_v29  ;;  %v1155_v36 = vld [vmem:[%s16779_s2 + $0x1818] sm:$0xff]  ;;  %v15205_v43 = vcombine.low %v1427_v28, %v1435_v29 }
 0x399   : > { %12225 = vmatprep.subr.bf16.mxu1 %v14806_v40  ;;  %12183 = vmatpush2.bf16.msra.mxu0 %v14549_v22  ;;  %v1163_v38 = vld [vmem:[%s16779_s2 + $0x1858] sm:$0xff] }
 0x39a   : > { %12238 = vmatprep.subr.bf16.mxu0 %v15046_v48  ;;  %v1411_v39 = vld [vmem:[%s16779_s2 + $0x2018] sm:$0xff]  ;;  %v14934_v44 = vcombine.high %v1155_v36, %v1163_v38  ;;  %v14933_v50 = vcombine.low %v1155_v36, %v1163_v38 }
 0x39b   : > { %v1419_v40 = vld [vmem:[%s16779_s2 + $0x2058] sm:$0xff] }
 0x39c   : > { %12226 = vmatpush2.bf16.msra.mxu1 %v14805_v37  ;;  %12185 = vmatmul.mubr.bf16.vlgmr.msra.gmra.mxu0 %v16196_v57  ;;  %v15190_v46 = vcombine.high %v1411_v39, %v1419_v40  ;;  %v1395_v22 = vld [vmem:[%s16779_s2 + $0x1f98] sm:$0xff]  ;;  %v15189_v52 = vcombine.low %v1411_v39, %v1419_v40 }
 0x39d   : > { %12281 = vmatprep.subr.bf16.mxu1 %v15302_v49  ;;  %12239 = vmatpush1.bf16.msra.mxu0 %v15045_v54  ;;  %v1403_v37 = vld [vmem:[%s16779_s2 + $0x1fd8] sm:$0xff] }
 0x39e   : > { %12240 = vmatprep.subr.bf16.mxu0 %v15030_v56  ;;  %12270 = vmatprep.mubr.bf16.mxu0 %v16198_v2  ;;  %v1651_v48 = vld [vmem:[%s16779_s2 + $0x2798] sm:$0xff]  ;;  %v15174_v53 = vcombine.high %v1395_v22, %v1403_v37  ;;  %v15173_v59 = vcombine.low %v1395_v22, %v1403_v37 }
 0x39f   : > { %12228 = vmatmul.mubr.bf16.vlgmr.msra.gmra.mxu1 %v16197_v62  ;;  %v1659_v49 = vld [vmem:[%s16779_s2 + $0x27d8] sm:$0xff] }
 0x3a0   : > { %12282 = vmatpush1.bf16.msra.mxu1 %v15301_v55  ;;  %12313 = vmatprep.mubr.bf16.mxu1 %v16199_v5  ;;  %v15430_v47 = vcombine.high %v1651_v48, %v1659_v49  ;;  %v1379_v54 = vld [vmem:[%s16779_s2 + $0x1f18] sm:$0xff]  ;;  %v15429_v41 = vcombine.low %v1651_v48, %v1659_v49 }
 0x3a1   : > { %12283 = vmatprep.subr.bf16.mxu1 %v15286_v58  ;;  %12241 = vmatpush1.bf16.msra.mxu0 %v15029_v45  ;;  %v1387_v55 = vld [vmem:[%s16779_s2 + $0x1f58] sm:$0xff] }
 0x3a2   : > { %12242 = vmatprep.subr.bf16.mxu0 %v15014_v0  ;;  %v1635_v56 = vld [vmem:[%s16779_s2 + $0x2718] sm:$0xff]  ;;  %v15158_v57 = vcombine.high %v1379_v54, %v1387_v55  ;;  %v15157_v0 = vcombine.low %v1379_v54, %v1387_v55 }
 0x3a3   : > { %v1643_v58 = vld [vmem:[%s16779_s2 + $0x2758] sm:$0xff] }
 0x3a4   : > { %12284 = vmatpush1.bf16.msra.mxu1 %v15285_v63  ;;  %v15414_v34 = vcombine.high %v1635_v56, %v1643_v58  ;;  %v1363_v61 = vld [vmem:[%s16779_s2 + $0x1e98] sm:$0xff] }
 0x3a5   : > { %12285 = vmatprep.subr.bf16.mxu1 %v15270_v1  ;;  %12243 = vmatpush1.bf16.msra.mxu0 %v15013_v6  ;;  %v1371_v62 = vld [vmem:[%s16779_s2 + $0x1ed8] sm:$0xff]  ;;  %v15413_v1 = vcombine.low %v1635_v56, %v1643_v58 }
 0x3a6   : > { %12244 = vmatprep.subr.bf16.mxu0 %v14998_v8  ;;  %v1619_v45 = vld [vmem:[%s16779_s2 + $0x2698] sm:$0xff]  ;;  %v15142_v51 = vcombine.high %v1363_v61, %v1371_v62  ;;  %v15141_v6 = vcombine.low %v1363_v61, %v1371_v62 }
 0x3a7   : > { %v1627_v63 = vld [vmem:[%s16779_s2 + $0x26d8] sm:$0xff] }
 0x3a8   : > { %12286 = vmatpush1.bf16.msra.mxu1 %v15269_v7  ;;  %v15398_v3 = vcombine.high %v1619_v45, %v1627_v63  ;;  %v1347_v2 = vld [vmem:[%s16779_s2 + $0x1e18] sm:$0xff]  ;;  %v15397_v7 = vcombine.low %v1619_v45, %v1627_v63 }
 0x3a9   : > { %12287 = vmatprep.subr.bf16.mxu1 %v15254_v9  ;;  %12245 = vmatpush1.bf16.msra.mxu0 %v14997_v13  ;;  %v1355_v4 = vld [vmem:[%s16779_s2 + $0x1e58] sm:$0xff] }
 0x3aa   : > { %12246 = vmatprep.subr.bf16.mxu0 %v14982_v15  ;;  %v1603_v31 = vld [vmem:[%s16779_s2 + $0x2618] sm:$0xff]  ;;  %v15126_v8 = vcombine.high %v1347_v2, %v1355_v4  ;;  %v15125_v13 = vcombine.low %v1347_v2, %v1355_v4 }
 0x3ab   : > { %v1611_v5 = vld [vmem:[%s16779_s2 + $0x2658] sm:$0xff] }
 0x3ac   : > { %12288 = vmatpush1.bf16.msra.mxu1 %v15253_v14  ;;  %v15382_v9 = vcombine.high %v1603_v31, %v1611_v5  ;;  %v1331_v10 = vld [vmem:[%s16779_s2 + $0x1d98] sm:$0xff]  ;;  %v15381_v14 = vcombine.low %v1603_v31, %v1611_v5 }
 0x3ad   : > { %12289 = vmatprep.subr.bf16.mxu1 %v15238_v16  ;;  %12247 = vmatpush1.bf16.msra.mxu0 %v14981_v21  ;;  %v1339_v60 = vld [vmem:[%s16779_s2 + $0x1dd8] sm:$0xff] }
 0x3ae   : > { %12248 = vmatprep.subr.bf16.mxu0 %v14966_v24  ;;  %v1587_v11 = vld [vmem:[%s16779_s2 + $0x2598] sm:$0xff]  ;;  %v15110_v15 = vcombine.high %v1331_v10, %v1339_v60  ;;  %v15109_v21 = vcombine.low %v1331_v10, %v1339_v60 }
 0x3af   : > { %v1595_v12 = vld [vmem:[%s16779_s2 + $0x25d8] sm:$0xff] }
 0x3b0   : > { %12290 = vmatpush1.bf16.msra.mxu1 %v15237_v23  ;;  %v15366_v16 = vcombine.high %v1587_v11, %v1595_v12  ;;  %v1315_v17 = vld [vmem:[%s16779_s2 + $0x1d18] sm:$0xff]  ;;  %v15365_v23 = vcombine.low %v1587_v11, %v1595_v12 }
 0x3b1   : > { %12291 = vmatprep.subr.bf16.mxu1 %v15222_v25  ;;  %12249 = vmatpush1.bf16.msra.mxu0 %v14965_v30  ;;  %v1323_v18 = vld [vmem:[%s16779_s2 + $0x1d58] sm:$0xff] }
 0x3b2   : > { %12250 = vmatprep.subr.bf16.mxu0 %v14950_v33  ;;  %v1571_v19 = vld [vmem:[%s16779_s2 + $0x2518] sm:$0xff]  ;;  %v15094_v24 = vcombine.high %v1315_v17, %v1323_v18  ;;  %v15093_v30 = vcombine.low %v1315_v17, %v1323_v18 }
 0x3b3   : > { %v1579_v20 = vld [vmem:[%s16779_s2 + $0x2558] sm:$0xff] }
 0x3b4   : > { %12292 = vmatpush1.bf16.msra.mxu1 %v15221_v32  ;;  %v15350_v25 = vcombine.high %v1571_v19, %v1579_v20  ;;  %v1299_v26 = vld [vmem:[%s16779_s2 + $0x1c98] sm:$0xff]  ;;  %v15349_v32 = vcombine.low %v1571_v19, %v1579_v20 }
 0x3b5   : > { %12293 = vmatprep.subr.bf16.mxu1 %v15206_v35  ;;  %12251 = vmatpush1.bf16.msra.mxu0 %v14949_v42  ;;  %v1307_v27 = vld [vmem:[%s16779_s2 + $0x1cd8] sm:$0xff] }
 0x3b6   : > { %12252 = vmatprep.subr.bf16.mxu0 %v14934_v44  ;;  %v1555_v28 = vld [vmem:[%s16779_s2 + $0x2498] sm:$0xff]  ;;  %v15078_v33 = vcombine.high %v1299_v26, %v1307_v27  ;;  %v15077_v42 = vcombine.low %v1299_v26, %v1307_v27 }
 0x3b7   : > { %v1563_v29 = vld [vmem:[%s16779_s2 + $0x24d8] sm:$0xff] }
 0x3b8   : > { %12294 = vmatpush1.bf16.msra.mxu1 %v15205_v43  ;;  %v15334_v35 = vcombine.high %v1555_v28, %v1563_v29  ;;  %v1283_v36 = vld [vmem:[%s16779_s2 + $0x1c18] sm:$0xff]  ;;  %v15333_v43 = vcombine.low %v1555_v28, %v1563_v29 }
 0x3b9   : > { %12295 = vmatprep.subr.bf16.mxu1 %v15190_v46  ;;  %12253 = vmatpush1.bf16.msra.mxu0 %v14933_v50  ;;  %v1291_v38 = vld [vmem:[%s16779_s2 + $0x1c58] sm:$0xff] }
 0x3ba   : > { %12254 = vmatprep.subr.bf16.mxu0 %v15174_v53  ;;  %v1539_v39 = vld [vmem:[%s16779_s2 + $0x2418] sm:$0xff]  ;;  %v15062_v44 = vcombine.high %v1283_v36, %v1291_v38  ;;  %v15061_v50 = vcombine.low %v1283_v36, %v1291_v38 }
 0x3bb   : > { %v1547_v40 = vld [vmem:[%s16779_s2 + $0x2458] sm:$0xff] }
 0x3bc   : > { %12296 = vmatpush1.bf16.msra.mxu1 %v15189_v52  ;;  %v15318_v46 = vcombine.high %v1539_v39, %v1547_v40  ;;  %v1779_v22 = vld [vmem:[%s16779_s2 + $0x2b98] sm:$0xff]  ;;  %v15317_v52 = vcombine.low %v1539_v39, %v1547_v40 }
 0x3bd   : > { %12297 = vmatprep.subr.bf16.mxu1 %v15430_v47  ;;  %12255 = vmatpush2.bf16.msra.mxu0 %v15173_v59  ;;  %v1787_v37 = vld [vmem:[%s16779_s2 + $0x2bd8] sm:$0xff] }
 0x3be   : > { %12256 = vmatprep.subr.bf16.mxu0 %v15158_v57  ;;  %v2035_v48 = vld [vmem:[%s16779_s2 + $0x3398] sm:$0xff]  ;;  %v15558_v53 = vcombine.high %v1779_v22, %v1787_v37  ;;  %v15557_v59 = vcombine.low %v1779_v22, %v1787_v37  ;;  %v17782_v37 = vpop.f32.mrf.mxu0 }
 0x3bf   : > { %v2043_v49 = vld [vmem:[%s16779_s2 + $0x33d8] sm:$0xff] }
 0x3c0   : > { %12298 = vmatpush2.bf16.msra.mxu1 %v15429_v41  ;;  %v15814_v47 = vcombine.high %v2035_v48, %v2043_v49  ;;  %v1763_v54 = vld [vmem:[%s16779_s2 + $0x2b18] sm:$0xff]  ;;  %v15813_v41 = vcombine.low %v2035_v48, %v2043_v49 }
 0x3c1   : > { %12299 = vmatprep.subr.bf16.mxu1 %v15414_v34  ;;  %12257 = vmatpush2.bf16.msra.mxu0 %v15157_v0  ;;  %v1771_v55 = vld [vmem:[%s16779_s2 + $0x2b58] sm:$0xff] }
 0x3c2   : > { %12258 = vmatprep.subr.bf16.mxu0 %v15142_v51  ;;  %v2019_v56 = vld [vmem:[%s16779_s2 + $0x3318] sm:$0xff]  ;;  %v15542_v57 = vcombine.high %v1763_v54, %v1771_v55  ;;  %v15541_v51 = vcombine.low %v1763_v54, %v1771_v55 }
 0x3c3   : > { %v2027_v58 = vld [vmem:[%s16779_s2 + $0x3358] sm:$0xff] }
 0x3c4   : > { %12300 = vmatpush2.bf16.msra.mxu1 %v15413_v1  ;;  %v15798_v34 = vcombine.high %v2019_v56, %v2027_v58  ;;  %v1747_v61 = vld [vmem:[%s16779_s2 + $0x2a98] sm:$0xff] }
 0x3c5   : > { %12301 = vmatprep.subr.bf16.mxu1 %v15398_v3  ;;  %12259 = vmatpush2.bf16.msra.mxu0 %v15141_v6  ;;  %v1755_v62 = vld [vmem:[%s16779_s2 + $0x2ad8] sm:$0xff]  ;;  %v15797_v3 = vcombine.low %v2019_v56, %v2027_v58  ;;  %v17788_v56 = vpop.f32.mrf.mxu0 }
 0x3c6   : > { %12260 = vmatprep.subr.bf16.mxu0 %v15126_v8  ;;  %v16200_v45 = vld [vmem:[%s16771_s30 + $0x18] ss:$56 sps:$4 sm:$0xff]   ;;  %v15526_v2 = vcombine.high %v1747_v61, %v1755_v62  ;;  %v16202_v6 = vld [vmem:[%s16771_s30 + $0x2c] ss:$56 sps:$4 sm:$0xff]   ;;  %v15525_v10 = vcombine.low %v1747_v61, %v1755_v62  ;;  %v17792_v61 = vpop.f32.mrf.mxu1 }
 0x3c7   : > { %v2003_v63 = vld [vmem:[%s16779_s2 + $0x3298] sm:$0xff] }
 0x3c8   : > { %12302 = vmatpush2.bf16.msra.mxu1 %v15397_v7  ;;  %v2011_v0 = vld [vmem:[%s16779_s2 + $0x32d8] sm:$0xff] }
 0x3c9   : > { %12303 = vmatprep.subr.bf16.mxu1 %v15382_v9  ;;  %12261 = vmatpush2.bf16.msra.mxu0 %v15125_v13  ;;  %v16201_v1 = vld [vmem:[%s16771_s30 + $0x20] ss:$56 sps:$4 sm:$0xff]   ;;  %v15782_v4 = vcombine.high %v2003_v63, %v2011_v0  ;;  %v16203_v9 = vld [vmem:[%s16771_s30 + $0x34] ss:$56 sps:$4 sm:$0xff]   ;;  %v15781_v60 = vcombine.low %v2003_v63, %v2011_v0  ;;  %v17796_v0 = vpop.f32.mrf.mxu0 }
 0x3ca   : > { %12262 = vmatprep.subr.bf16.mxu0 %v15110_v15  ;;  %v1731_v31 = vld [vmem:[%s16779_s2 + $0x2a18] sm:$0xff] }
 0x3cb   : > { %v1739_v5 = vld [vmem:[%s16779_s2 + $0x2a58] sm:$0xff] }
 0x3cc   : > { %12304 = vmatpush2.bf16.msra.mxu1 %v15381_v14  ;;  %v1987_v7 = vld [vmem:[%s16779_s2 + $0x3218] sm:$0xff]  ;;  %v15510_v11 = vcombine.high %v1731_v31, %v1739_v5  ;;  %v15509_v17 = vcombine.low %v1731_v31, %v1739_v5  ;;  %v17800_v31 = vpop.f32.mrf.mxu1 }
 0x3cd   : > { %12305 = vmatprep.subr.bf16.mxu1 %v15366_v16  ;;  %12263 = vmatpush2.bf16.msra.mxu0 %v15109_v21  ;;  %v1995_v8 = vld [vmem:[%s16779_s2 + $0x3258] sm:$0xff] }
 0x3ce   : > { %12264 = vmatprep.subr.bf16.mxu0 %v15094_v24  ;;  %v15766_v12 = vcombine.high %v1987_v7, %v1995_v8  ;;  %v1715_v13 = vld [vmem:[%s16779_s2 + $0x2998] sm:$0xff]  ;;  %v15765_v18 = vcombine.low %v1987_v7, %v1995_v8  ;;  %v17804_v8 = vpop.f32.mrf.mxu0 }
 0x3cf   : > { %v1723_v14 = vld [vmem:[%s16779_s2 + $0x29d8] sm:$0xff] }
 0x3d0   : > { %12306 = vmatpush2.bf16.msra.mxu1 %v15365_v23  ;;  %v1971_v15 = vld [vmem:[%s16779_s2 + $0x3198] sm:$0xff]  ;;  %v15494_v19 = vcombine.high %v1715_v13, %v1723_v14  ;;  %v15493_v26 = vcombine.low %v1715_v13, %v1723_v14  ;;  %v17808_v13 = vpop.f32.mrf.mxu1  ;;  %v11928_v14 = vpop.f32.mrf.mxu0 }
 0x3d1   : > { %12307 = vmatprep.subr.bf16.mxu1 %v15350_v25  ;;  %12265 = vmatpush2.bf16.msra.mxu0 %v15093_v30  ;;  %v1979_v16 = vld [vmem:[%s16779_s2 + $0x31d8] sm:$0xff] }
 0x3d2   : > { %12266 = vmatprep.subr.bf16.mxu0 %v15078_v33  ;;  %v15750_v20 = vcombine.high %v1971_v15, %v1979_v16  ;;  %v1699_v21 = vld [vmem:[%s16779_s2 + $0x2918] sm:$0xff]  ;;  %v15749_v27 = vcombine.low %v1971_v15, %v1979_v16 }
 0x3d3   : > { %v1707_v23 = vld [vmem:[%s16779_s2 + $0x2958] sm:$0xff] }
 0x3d4   : > { %12308 = vmatpush2.bf16.msra.mxu1 %v15349_v32  ;;  %v1955_v24 = vld [vmem:[%s16779_s2 + $0x3118] sm:$0xff]  ;;  %v15478_v28 = vcombine.high %v1699_v21, %v1707_v23  ;;  %v15477_v36 = vcombine.low %v1699_v21, %v1707_v23 }
 0x3d5   : > { %12309 = vmatprep.subr.bf16.mxu1 %v15334_v35  ;;  %12267 = vmatpush2.bf16.msra.mxu0 %v15077_v42  ;;  %v1963_v25 = vld [vmem:[%s16779_s2 + $0x3158] sm:$0xff] }
 0x3d6   : > { %12268 = vmatprep.subr.bf16.mxu0 %v15062_v44  ;;  %v15734_v29 = vcombine.high %v1955_v24, %v1963_v25  ;;  %v1683_v30 = vld [vmem:[%s16779_s2 + $0x2898] sm:$0xff]  ;;  %v15733_v38 = vcombine.low %v1955_v24, %v1963_v25  ;;  %v17814_v24 = vpop.f32.mrf.mxu1  ;;  %v11930_v25 = vpop.f32.mrf.mxu0 }
 0x3d7   : > { %v1691_v32 = vld [vmem:[%s16779_s2 + $0x28d8] sm:$0xff] }
 0x3d8   : > { %12310 = vmatpush2.bf16.msra.mxu1 %v15333_v43  ;;  %v1939_v33 = vld [vmem:[%s16779_s2 + $0x3098] sm:$0xff]  ;;  %v15462_v39 = vcombine.high %v1683_v30, %v1691_v32  ;;  %v15461_v22 = vcombine.low %v1683_v30, %v1691_v32 }
 0x3d9   : > { %12311 = vmatprep.subr.bf16.mxu1 %v15318_v46  ;;  %12269 = vmatpush2.bf16.msra.mxu0 %v15061_v50  ;;  %v1947_v35 = vld [vmem:[%s16779_s2 + $0x30d8] sm:$0xff] }
 0x3da   : > { %12324 = vmatprep.subr.bf16.mxu0 %v15558_v53  ;;  %v15718_v40 = vcombine.high %v1939_v33, %v1947_v35  ;;  %v1667_v42 = vld [vmem:[%s16779_s2 + $0x2818] sm:$0xff]  ;;  %v15717_v48 = vcombine.low %v1939_v33, %v1947_v35 }
 0x3db   : > { %v1675_v43 = vld [vmem:[%s16779_s2 + $0x2858] sm:$0xff] }
 0x3dc   : > { %12312 = vmatpush2.bf16.msra.mxu1 %v15317_v52  ;;  %12271 = vmatmul.mubr.bf16.vlgmr.msra.gmra.mxu0 %v16200_v45  ;;  %v1923_v44 = vld [vmem:[%s16779_s2 + $0x3018] sm:$0xff]  ;;  %v15446_v49 = vcombine.high %v1667_v42, %v1675_v43  ;;  %v15445_v55 = vcombine.low %v1667_v42, %v1675_v43 }
 0x3dd   : > { %12367 = vmatprep.subr.bf16.mxu1 %v15814_v47  ;;  %12325 = vmatpush1.bf16.msra.mxu0 %v15557_v59  ;;  %v1931_v46 = vld [vmem:[%s16779_s2 + $0x3058] sm:$0xff] }
 0x3de   : > { %12326 = vmatprep.subr.bf16.mxu0 %v15542_v57  ;;  %12356 = vmatprep.mubr.bf16.mxu0 %v16202_v6  ;;  %v15702_v50 = vcombine.high %v1923_v44, %v1931_v46  ;;  %v1907_v52 = vld [vmem:[%s16779_s2 + $0x2f98] sm:$0xff]  ;;  %v15701_v58 = vcombine.low %v1923_v44, %v1931_v46 }
 0x3df   : > { %12314 = vmatmul.mubr.bf16.vlgmr.msra.gmra.mxu1 %v16201_v1  ;;  %v1915_v53 = vld [vmem:[%s16779_s2 + $0x2fd8] sm:$0xff] }
 0x3e0   : > { %12368 = vmatpush1.bf16.msra.mxu1 %v15813_v41  ;;  %12399 = vmatprep.mubr.bf16.mxu1 %v16203_v9  ;;  %v2163_v47 = vld [vmem:[%s16779_s2 + $0x3798] sm:$0xff]  ;;  %v15686_v59 = vcombine.high %v1907_v52, %v1915_v53  ;;  %v15685_v63 = vcombine.low %v1907_v52, %v1915_v53 }
 0x3e1   : > { %12369 = vmatprep.subr.bf16.mxu1 %v15798_v34  ;;  %12327 = vmatpush1.bf16.msra.mxu0 %v15541_v51  ;;  %v2171_v54 = vld [vmem:[%s16779_s2 + $0x37d8] sm:$0xff] }
 0x3e2   : > { %12328 = vmatprep.subr.bf16.mxu0 %v15526_v2  ;;  %v15942_v41 = vcombine.high %v2163_v47, %v2171_v54  ;;  %v1891_v57 = vld [vmem:[%s16779_s2 + $0x2f18] sm:$0xff]  ;;  %v15941_v1 = vcombine.low %v2163_v47, %v2171_v54 }
 0x3e3   : > { %v1899_v34 = vld [vmem:[%s16779_s2 + $0x2f58] sm:$0xff] }
 0x3e4   : > { %12370 = vmatpush1.bf16.msra.mxu1 %v15797_v3  ;;  %v2147_v62 = vld [vmem:[%s16779_s2 + $0x3718] sm:$0xff]  ;;  %v15670_v51 = vcombine.high %v1891_v57, %v1899_v34  ;;  %v15669_v7 = vcombine.low %v1891_v57, %v1899_v34 }
 0x3e5   : > { %12371 = vmatprep.subr.bf16.mxu1 %v15782_v4  ;;  %12329 = vmatpush1.bf16.msra.mxu0 %v15525_v10  ;;  %v2155_v45 = vld [vmem:[%s16779_s2 + $0x3758] sm:$0xff] }
 0x3e6   : > { %12330 = vmatprep.subr.bf16.mxu0 %v15510_v11  ;;  %v15926_v3 = vcombine.high %v2147_v62, %v2155_v45  ;;  %v1875_v2 = vld [vmem:[%s16779_s2 + $0x2e98] sm:$0xff]  ;;  %v15925_v9 = vcombine.low %v2147_v62, %v2155_v45 }
 0x3e7   : > { %v1883_v4 = vld [vmem:[%s16779_s2 + $0x2ed8] sm:$0xff] }
 0x3e8   : > { %12372 = vmatpush1.bf16.msra.mxu1 %v15781_v60  ;;  %v2131_v5 = vld [vmem:[%s16779_s2 + $0x3698] sm:$0xff]  ;;  %v15654_v10 = vcombine.high %v1875_v2, %v1883_v4 }
 0x3e9   : > { %12373 = vmatprep.subr.bf16.mxu1 %v15766_v12  ;;  %12331 = vmatpush1.bf16.msra.mxu0 %v15509_v17  ;;  %v2139_v6 = vld [vmem:[%s16779_s2 + $0x36d8] sm:$0xff]  ;;  %v15653_v17 = vcombine.low %v1875_v2, %v1883_v4 }
 0x3ea   : > { %12332 = vmatprep.subr.bf16.mxu0 %v15494_v19  ;;  %v15910_v60 = vcombine.high %v2131_v5, %v2139_v6  ;;  %v1859_v11 = vld [vmem:[%s16779_s2 + $0x2e18] sm:$0xff] }
 0x3eb   : > { %v1867_v12 = vld [vmem:[%s16779_s2 + $0x2e58] sm:$0xff] }
 0x3ec   : > { %12374 = vmatpush1.bf16.msra.mxu1 %v15765_v18  ;;  %v2115_v15 = vld [vmem:[%s16779_s2 + $0x3618] sm:$0xff]  ;;  %v15909_v18 = vcombine.low %v2131_v5, %v2139_v6  ;;  %v15638_v19 = vcombine.high %v1859_v11, %v1867_v12  ;;  %v11890_v5 = vadd.f32 %v17808_v13, %v17796_v0 }
 0x3ed   : > { %12375 = vmatprep.subr.bf16.mxu1 %v15750_v20  ;;  %12333 = vmatpush1.bf16.msra.mxu0 %v15493_v26  ;;  %v2123_v16 = vld [vmem:[%s16779_s2 + $0x3658] sm:$0xff] }
 0x3ee   : > { %12334 = vmatprep.subr.bf16.mxu0 %v15478_v28  ;;  %v15894_v20 = vcombine.high %v2115_v15, %v2123_v16  ;;  %v1843_v21 = vld [vmem:[%s16779_s2 + $0x2d98] sm:$0xff]  ;;  %v15637_v28 = vcombine.low %v1859_v11, %v1867_v12  ;;  %v15893_v30 = vcombine.low %v2115_v15, %v2123_v16  ;;  %v11892_v11 = vadd.f32 %v17814_v24, %v17804_v8  ;;  %v492_v8 = vld [vmem:[%s16779_s2 + $0x360] sm:$0xff] }
 0x3ef   : > { %v1851_v23 = vld [vmem:[%s16779_s2 + $0x2dd8] sm:$0xff]  ;;  %v740_v24 = vld [vmem:[%s16779_s2 + $0xb20] sm:$0xff] }
 0x3f0   : > { %12376 = vmatpush1.bf16.msra.mxu1 %v15749_v27  ;;  %v2099_v26 = vld [vmem:[%s16779_s2 + $0x3598] sm:$0xff]  ;;  %v15622_v32 = vcombine.high %v1843_v21, %v1851_v23  ;;  %v15621_v42 = vcombine.low %v1843_v21, %v1851_v23  ;;  %v484_v21 = vld [vmem:[%s16779_s2 + $0x320] sm:$0xff] }
 0x3f1   : > { %12377 = vmatprep.subr.bf16.mxu1 %v15734_v29  ;;  %12335 = vmatpush1.bf16.msra.mxu0 %v15477_v36  ;;  %v2107_v27 = vld [vmem:[%s16779_s2 + $0x35d8] sm:$0xff]  ;;  %v11971_v29 = vpop.f32.mrf.mxu1 }
 0x3f2   : > { %12336 = vmatprep.subr.bf16.mxu0 %v15462_v39  ;;  %v15878_v33 = vcombine.high %v2099_v26, %v2107_v27  ;;  %v1827_v35 = vld [vmem:[%s16779_s2 + $0x2d18] sm:$0xff]  ;;  %v15877_v44 = vcombine.low %v2099_v26, %v2107_v27 }
 0x3f3   : > { %v1835_v36 = vld [vmem:[%s16779_s2 + $0x2d58] sm:$0xff]  ;;  %v11973_v43 = vpop.f32.mrf.mxu1 }
 0x3f4   : > { %12378 = vmatpush1.bf16.msra.mxu1 %v15733_v38  ;;  %v11932_v38 = vpop.f32.mrf.mxu0  ;;  %v2083_v39 = vld [vmem:[%s16779_s2 + $0x3518] sm:$0xff]  ;;  %v15606_v46 = vcombine.high %v1827_v35, %v1835_v36  ;;  %v15605_v47 = vcombine.low %v1827_v35, %v1835_v36 }
 0x3f5   : > { %12379 = vmatprep.subr.bf16.mxu1 %v15718_v40  ;;  %12337 = vmatpush1.bf16.msra.mxu0 %v15461_v22  ;;  %v2091_v40 = vld [vmem:[%s16779_s2 + $0x3558] sm:$0xff]  ;;  %v11975_v54 = vpop.f32.mrf.mxu1 }
 0x3f6   : > { %12338 = vmatprep.subr.bf16.mxu0 %v15446_v49  ;;  %v15862_v22 = vcombine.high %v2083_v39, %v2091_v40  ;;  %v1819_v49 = vld [vmem:[%s16779_s2 + $0x2cd8] sm:$0xff] }
 0x3f7   : > { %v2067_v52 = vld [vmem:[%s16779_s2 + $0x3498] sm:$0xff]  ;;  %v11977_v2 = vpop.f32.mrf.mxu1 }
 0x3f8   : > { %12380 = vmatpush1.bf16.msra.mxu1 %v15717_v48  ;;  %v1811_v48 = vld [vmem:[%s16779_s2 + $0x2c98] sm:$0xff] }
 0x3f9   : > { %12381 = vmatprep.subr.bf16.mxu1 %v15702_v50  ;;  %12339 = vmatpush1.bf16.msra.mxu0 %v15445_v55  ;;  %v11934_v50 = vpop.f32.mrf.mxu0  ;;  %v2075_v53 = vld [vmem:[%s16779_s2 + $0x34d8] sm:$0xff] }
 0x3fa   : > { %12340 = vmatprep.subr.bf16.mxu0 %v15686_v59  ;;  %v15590_v59 = vcombine.high %v1811_v48, %v1819_v49  ;;  %v15846_v57 = vcombine.high %v2067_v52, %v2075_v53  ;;  %v1795_v34 = vld [vmem:[%s16779_s2 + $0x2c18] sm:$0xff] }
 0x3fb   : > { %v12014_v55 = vpop.f32.mrf.mxu0  ;;  %v1803_v62 = vld [vmem:[%s16779_s2 + $0x2c58] sm:$0xff] }
 0x3fc   : > { %12382 = vmatpush1.bf16.msra.mxu1 %v15701_v58  ;;  %v15861_v58 = vcombine.low %v2083_v39, %v2091_v40  ;;  %v2051_v45 = vld [vmem:[%s16779_s2 + $0x3418] sm:$0xff]  ;;  %v15573_v15 = vcombine.low %v1795_v34, %v1803_v62  ;;  %v476_v40 = vld [vmem:[%s16779_s2 + $0x2e0] sm:$0xff] }
 0x3fd   : > { %12383 = vmatprep.subr.bf16.mxu1 %v15942_v41  ;;  %12341 = vmatpush2.bf16.msra.mxu0 %v15685_v63  ;;  %v11886_v41 = vadd.f32 %v17792_v61, %v17782_v37  ;;  %v2059_v63 = vld [vmem:[%s16779_s2 + $0x3458] sm:$0xff]  ;;  %v12016_v4 = vpop.f32.mrf.mxu0  ;;  %v15845_v37 = vcombine.low %v2067_v52, %v2075_v53  ;;  %v15574_v61 = vcombine.high %v1795_v34, %v1803_v62 }
 0x3fe   : > { %12342 = vmatprep.subr.bf16.mxu0 %v15670_v51  ;;  %v15829_v13 = vcombine.low %v2051_v45, %v2059_v63 }
 0x3ff   : > { %v11929_v51 = vadd.f32 %v11928_v14, %v11886_v41  ;;  %v11933_v14 = vadd.f32 %v11932_v38, %v11890_v5  ;;  %v12018_v0 = vpop.f32.mrf.mxu0 }
 0x400   : > { %12384 = vmatpush2.bf16.msra.mxu1 %v15941_v1  ;;  %v11888_v1 = vadd.f32 %v17800_v31, %v17788_v56  ;;  %v12057_v56 = vpop.f32.mrf.mxu1  ;;  %v756_v31 = vld [vmem:[%s16779_s2 + $0xba0] sm:$0xff] }
 0x401   : > { %12385 = vmatprep.subr.bf16.mxu1 %v15926_v3  ;;  %12343 = vmatpush2.bf16.msra.mxu0 %v15669_v7  ;;  %v15589_v3 = vcombine.low %v1811_v48, %v1819_v49  ;;  %v15830_v7 = vcombine.high %v2051_v45, %v2059_v63  ;;  %v11972_v12 = vadd.f32 %v11971_v29, %v11929_v51  ;;  %v12020_v29 = vpop.f32.mrf.mxu0  ;;  %v16204_v48 = vld [vmem:[%s16771_s30 + $0x28] ss:$56 sps:$4 sm:$0xff]  }
 0x402   : > { %12344 = vmatprep.subr.bf16.mxu0 %v15654_v10  ;;  %v11931_v6 = vadd.f32 %v11930_v25, %v11888_v1  ;;  %v508_v10 = vld [vmem:[%s16779_s2 + $0x3e0] sm:$0xff]  ;;  %v12059_v23 = vpop.f32.mrf.mxu1  ;;  %v11976_v26 = vadd.f32 %v11975_v54, %v11933_v14  ;;  %v14263_v49 = vcombine.low %v484_v21, %v492_v8  ;;  %v343_v54 = vld [vmem:[#allocation2 + $0x68] sm:$0xff] }
 0x403   : > { %v748_v25 = vld [vmem:[%s16779_s2 + $0xb60] sm:$0xff] }
 0x404   : > { %12386 = vmatpush2.bf16.msra.mxu1 %v15925_v9  ;;  %v500_v9 = vld [vmem:[%s16779_s2 + $0x3a0] sm:$0xff]  ;;  %v12019_v38 = vadd.f32 %v12018_v0, %v11976_v26  ;;  %v14520_v39 = vcombine.high %v740_v24, %v748_v25 }
 0x405   : > { %12387 = vmatprep.subr.bf16.mxu1 %v15910_v60  ;;  %12345 = vmatpush2.bf16.msra.mxu0 %v15653_v17  ;;  %v764_v60 = vld [vmem:[%s16779_s2 + $0xbe0] sm:$0xff]  ;;  %v14280_v16 = vcombine.high %v500_v9, %v508_v10  ;;  %v11974_v17 = vadd.f32 %v11973_v43, %v11931_v6 }
 0x406   : > { %12346 = vmatprep.subr.bf16.mxu0 %v15638_v19  ;;  %v12015_v19 = vadd.f32 %v12014_v55, %v11972_v12  ;;  %v732_v43 = vld [vmem:[%s16779_s2 + $0xae0] sm:$0xff] }
 0x407   : > { %v12017_v27 = vadd.f32 %v12016_v4, %v11974_v17  ;;  %v452_v45 = vld [vmem:[%s16779_s2 + $0x220] sm:$0xff] }
 0x408   : > { %12388 = vmatpush2.bf16.msra.mxu1 %v15909_v18  ;;  %v11935_v18 = vadd.f32 %v11934_v50, %v11892_v11  ;;  %v12058_v36 = vadd.f32 %v12057_v56, %v12015_v19  ;;  %v460_v63 = vld [vmem:[%s16779_s2 + $0x260] sm:$0xff] }
 0x409   : > { %12389 = vmatprep.subr.bf16.mxu1 %v15894_v20  ;;  %12347 = vmatpush2.bf16.msra.mxu0 %v15637_v28  ;;  %v14536_v20 = vcombine.high %v756_v31, %v764_v60  ;;  %v14279_v28 = vcombine.low %v500_v9, %v508_v10  ;;  %v12060_v50 = vadd.f32 %v12059_v23, %v12017_v27  ;;  %v16206_v1 = vld [vmem:[%s16771_s30 + $0x4] ss:$56 sps:$4 sm:$0xff]  }
 0x40a   : > { %12348 = vmatprep.subr.bf16.mxu0 %v15622_v32  ;;  %v14264_v32 = vcombine.high %v484_v21, %v492_v8  ;;  %v11978_v35 = vadd.f32 %v11977_v2, %v11935_v18  ;;  %v708_v4 = vld [vmem:[%s16779_s2 + $0xa20] sm:$0xff]  ;;  %v359_v10 = vld [vmem:[#allocation2 + $0x90] sm:$0xff]  ;;  %v14231_v18 = vcombine.low %v452_v45, %v460_v63 }
 0x40b   : > { %v444_v0 = vld [vmem:[%s16779_s2 + $0x1e0] sm:$0xff] }
 0x40c   : > { %12390 = vmatpush2.bf16.msra.mxu1 %v15893_v30  ;;  %v14535_v30 = vcombine.low %v756_v31, %v764_v60  ;;  %v12021_v52 = vadd.f32 %v12020_v29, %v11978_v35  ;;  %v14232_v60 = vcombine.high %v452_v45, %v460_v63  ;;  %v420_v8 = vld [vmem:[%s16779_s2 + $0x120] sm:$0xff] }
 0x40d   : > { %12391 = vmatprep.subr.bf16.mxu1 %v15878_v33  ;;  %12349 = vmatpush2.bf16.msra.mxu0 %v15621_v42  ;;  %v17847_v33 = vld [vmem:[%s16779_s2 + $0x2a0] sm:$0xff] }
 0x40e   : > { %12350 = vmatprep.subr.bf16.mxu0 %v15606_v46  ;;  %v724_v42 = vld [vmem:[%s16779_s2 + $0xaa0] sm:$0xff]  ;;  %v342_v46 = vld [vmem:[#allocation2 + $0x50] sm:$0xff]  ;;  %v14247_v9 = vcombine.low %v17847_v33, %v476_v40 }
 0x40f   : > { %v14504_v41 = vcombine.high %v724_v42, %v732_v43  ;;  %v14503_v31 = vcombine.low %v724_v42, %v732_v43  ;;  %v428_v23 = vld [vmem:[%s16779_s2 + $0x160] sm:$0xff] }
 0x410   : > { %12392 = vmatpush2.bf16.msra.mxu1 %v15877_v44  ;;  %v12061_v44 = vpop.f32.mrf.mxu1  ;;  %v668_v35 = vld [vmem:[%s16779_s2 + $0x8e0] sm:$0xff] }
 0x411   : > { %12393 = vmatprep.subr.bf16.mxu1 %v15862_v22  ;;  %12351 = vmatpush2.bf16.msra.mxu0 %v15605_v47  ;;  %v16205_v47 = vld [vmem:[%s16771_s30 + $0x30] ss:$56 sps:$4 sm:$0xff]  }
 0x412   : > { %12352 = vmatprep.subr.bf16.mxu0 %v15590_v59  ;;  %v14248_v59 = vcombine.high %v17847_v33, %v476_v40  ;;  %v12063_v51 = vpop.f32.mrf.mxu1  ;;  %v660_v33 = vld [vmem:[%s16779_s2 + $0x8a0] sm:$0xff] }
 0x413   : > { %v12064_v5 = vadd.f32 %v12063_v51, %v12021_v52  ;;  %v14440_v40 = vcombine.high %v660_v33, %v668_v35  ;;  %v388_v42 = vld [vmem:[%s16779_s2 + $0x20] sm:$0xff] }
 0x414   : > { %12394 = vmatpush2.bf16.msra.mxu1 %v15861_v58  ;;  %v14519_v58 = vcombine.low %v740_v24, %v748_v25  ;;  %v676_v24 = vld [vmem:[%s16779_s2 + $0x920] sm:$0xff] }
 0x415   : > { %12395 = vmatprep.subr.bf16.mxu1 %v15846_v57  ;;  %12353 = vmatpush2.bf16.msra.mxu0 %v15589_v3  ;;  %v12062_v57 = vadd.f32 %v12061_v44, %v12019_v38  ;;  %v358_v3 = vld [vmem:[#allocation2 + $0xe0] sm:$0xff] }
 0x416   : > { %12354 = vmatprep.subr.bf16.mxu0 %v15574_v61  ;;  %v16207_v61 = vld [vmem:[%s16771_s30 + $0xc] ss:$56 sps:$4 sm:$0xff]  }
 0x417   : > { %v684_v25 = vld [vmem:[%s16779_s2 + $0x960] sm:$0xff] }
 0x418   : > { %12396 = vmatpush2.bf16.msra.mxu1 %v15845_v37  ;;  %v716_v37 = vld [vmem:[%s16779_s2 + $0xa60] sm:$0xff]  ;;  %v14456_v29 = vcombine.high %v676_v24, %v684_v25  ;;  %v14455_v38 = vcombine.low %v676_v24, %v684_v25 }
 0x419   : > { %12397 = vmatprep.subr.bf16.mxu1 %v15830_v7  ;;  %12355 = vmatpush2.bf16.msra.mxu0 %v15573_v15  ;;  %v14488_v14 = vcombine.high %v708_v4, %v716_v37  ;;  %v436_v15 = vld [vmem:[%s16779_s2 + $0x1a0] sm:$0xff]  ;;  %v14487_v19 = vcombine.low %v708_v4, %v716_v37 }
 0x41a   : > { %12410 = vmatprep.subr.bf16.mxu0 %v14280_v16  ;;  %v700_v16 = vld [vmem:[%s16779_s2 + $0x9e0] sm:$0xff]  ;;  %v14215_v26 = vcombine.low %v436_v15, %v444_v0 }
 0x41b   : > { %v396_v43 = vld [vmem:[%s16779_s2 + $0x60] sm:$0xff] }
 0x41c   : > { %12398 = vmatpush2.bf16.msra.mxu1 %v15829_v13  ;;  %v12100_v22 = vpop.f32.mrf.mxu0  ;;  %12357 = vmatmul.mubr.bf16.vlgmr.msra.gmra.mxu0 %v16204_v48  ;;  %v692_v13 = vld [vmem:[%s16779_s2 + $0x9a0] sm:$0xff]  ;;  %v14439_v48 = vcombine.low %v660_v33, %v668_v35 }
 0x41d   : > { %12453 = vmatprep.subr.bf16.mxu1 %v14536_v20  ;;  %v12101_v53 = vadd.f32 %v12100_v22, %v12058_v36  ;;  %12411 = vmatpush1.bf16.msra.mxu0 %v14279_v28  ;;  %v14216_v20 = vcombine.high %v436_v15, %v444_v0  ;;  %v14472_v21 = vcombine.high %v692_v13, %v700_v16  ;;  %v644_v44 = vld [vmem:[%s16779_s2 + $0x820] sm:$0xff] }
 0x41e   : > { %v12102_v55 = vpop.f32.mrf.mxu0  ;;  %12412 = vmatprep.subr.bf16.mxu0 %v14264_v32  ;;  %12442 = vmatprep.mubr.bf16.mxu0 %v16206_v1  ;;  %v14471_v27 = vcombine.low %v692_v13, %v700_v16  ;;  %v14200_v28 = vcombine.high %v420_v8, %v428_v23  ;;  %v412_v32 = vld [vmem:[%s16779_s2 + $0xe0] sm:$0xff]  ;;  %v14199_v36 = vcombine.low %v420_v8, %v428_v23 }
 0x41f   : > { %12400 = vmatmul.mubr.bf16.vlgmr.msra.gmra.mxu1 %v16205_v47  ;;  %v13618_v34 = vadd.f32 %v12101_v53, %v342_v46  ;;  %v12103_v62 = vadd.f32 %v12102_v55, %v12060_v50  ;;  %v652_v46 = vld [vmem:[%s16779_s2 + $0x860] sm:$0xff]  ;;  %v14167_v55 = vcombine.low %v388_v42, %v396_v43 }
 0x420   : > { %12454 = vmatpush1.bf16.msra.mxu1 %v14535_v30  ;;  %v12104_v2 = vpop.f32.mrf.mxu0  ;;  %12485 = vmatprep.mubr.bf16.mxu1 %v16207_v61  ;;  %v404_v30 = vld [vmem:[%s16779_s2 + $0xa0] sm:$0xff]  ;;  %v14424_v50 = vcombine.high %v644_v44, %v652_v46 }
 0x421   : > { %12455 = vmatprep.subr.bf16.mxu1 %v14520_v39  ;;  %13650 = vst [vmem:[#allocation2 + $0x50] sm:$0xff] %v13618_v34  ;;  %v13619_v6 = vadd.f32 %v12103_v62, %v343_v54  ;;  %v12105_v7 = vadd.f32 %v12104_v2, %v12062_v57  ;;  %12413 = vmatpush1.bf16.msra.mxu0 %v14263_v49  ;;  %v628_v52 = vld [vmem:[%s16779_s2 + $0x7a0] sm:$0xff] }
 0x422   : > { %v12106_v56 = vpop.f32.mrf.mxu0  ;;  %12414 = vmatprep.subr.bf16.mxu0 %v14248_v59  ;;  %v14184_v39 = vcombine.high %v404_v30, %v412_v32  ;;  %v14183_v22 = vcombine.low %v404_v30, %v412_v32  ;;  %v14168_v49 = vcombine.high %v388_v42, %v396_v43  ;;  %v636_v53 = vld [vmem:[%s16779_s2 + $0x7e0] sm:$0xff] }
 0x423   : > { %13651 = vst [vmem:[#allocation2 + $0x68] sm:$0xff] %v13619_v6  ;;  %v13634_v11 = vadd.f32 %v12105_v7, %v358_v3  ;;  %v12107_v12 = vadd.f32 %v12106_v56, %v12064_v5  ;;  %v884_v47 = vld [vmem:[%s16779_s2 + $0xfa0] sm:$0xff]  ;;  %v14408_v59 = vcombine.high %v628_v52, %v636_v53  ;;  %v14407_v63 = vcombine.low %v628_v52, %v636_v53 }
 0x424   : > { %12456 = vmatpush1.bf16.msra.mxu1 %v14519_v58  ;;  %v892_v54 = vld [vmem:[%s16779_s2 + $0xfe0] sm:$0xff]  ;;  %v14423_v58 = vcombine.low %v644_v44, %v652_v46 }
 0x425   : > { %12457 = vmatprep.subr.bf16.mxu1 %v14504_v41  ;;  %13666 = vst [vmem:[#allocation2 + $0xe0] sm:$0xff] %v13634_v11  ;;  %v13635_v17 = vadd.f32 %v12107_v12, %v359_v10  ;;  %12415 = vmatpush1.bf16.msra.mxu0 %v14247_v9  ;;  %v14664_v41 = vcombine.high %v884_v47, %v892_v54  ;;  %v612_v57 = vld [vmem:[%s16779_s2 + $0x720] sm:$0xff] }
 0x426   : > { %12416 = vmatprep.subr.bf16.mxu0 %v14232_v60  ;;  %v620_v34 = vld [vmem:[%s16779_s2 + $0x760] sm:$0xff]  ;;  %v14663_v1 = vcombine.low %v884_v47, %v892_v54 }
 0x427   : > { %13667 = vst [vmem:[#allocation2 + $0x90] sm:$0xff] %v13635_v17  ;;  %v868_v62 = vld [vmem:[%s16779_s2 + $0xf20] sm:$0xff]  ;;  %v14392_v51 = vcombine.high %v612_v57, %v620_v34  ;;  %v14391_v5 = vcombine.low %v612_v57, %v620_v34 }
 0x428   : > { %12458 = vmatpush1.bf16.msra.mxu1 %v14503_v31  ;;  %v876_v45 = vld [vmem:[%s16779_s2 + $0xf60] sm:$0xff] }
 0x429   : > { %12459 = vmatprep.subr.bf16.mxu1 %v14488_v14  ;;  %12417 = vmatpush1.bf16.msra.mxu0 %v14231_v18  ;;  %v14648_v3 = vcombine.high %v868_v62, %v876_v45  ;;  %v596_v2 = vld [vmem:[%s16779_s2 + $0x6a0] sm:$0xff]  ;;  %v14647_v6 = vcombine.low %v868_v62, %v876_v45 }
 0x42a   : > { %12418 = vmatprep.subr.bf16.mxu0 %v14216_v20  ;;  %v604_v4 = vld [vmem:[%s16779_s2 + $0x6e0] sm:$0xff] }
 0x42b   : > { %v852_v37 = vld [vmem:[%s16779_s2 + $0xea0] sm:$0xff]  ;;  %v14376_v7 = vcombine.high %v596_v2, %v604_v4  ;;  %v14375_v11 = vcombine.low %v596_v2, %v604_v4 }
 0x42c   : > { %12460 = vmatpush1.bf16.msra.mxu1 %v14487_v19  ;;  %v860_v61 = vld [vmem:[%s16779_s2 + $0xee0] sm:$0xff] }
 0x42d   : > { %12461 = vmatprep.subr.bf16.mxu1 %v14472_v21  ;;  %12419 = vmatpush1.bf16.msra.mxu0 %v14215_v26  ;;  %v14632_v9 = vcombine.high %v852_v37, %v860_v61  ;;  %v580_v10 = vld [vmem:[%s16779_s2 + $0x620] sm:$0xff]  ;;  %v14631_v12 = vcombine.low %v852_v37, %v860_v61 }
 0x42e   : > { %12420 = vmatprep.subr.bf16.mxu0 %v14200_v28  ;;  %v588_v56 = vld [vmem:[%s16779_s2 + $0x660] sm:$0xff] }
 0x42f   : > { %v836_v31 = vld [vmem:[%s16779_s2 + $0xe20] sm:$0xff]  ;;  %v14360_v14 = vcombine.high %v580_v10, %v588_v56  ;;  %v14359_v18 = vcombine.low %v580_v10, %v588_v56 }
 0x430   : > { %12462 = vmatpush1.bf16.msra.mxu1 %v14471_v27  ;;  %v844_v60 = vld [vmem:[%s16779_s2 + $0xe60] sm:$0xff] }
 0x431   : > { %12463 = vmatprep.subr.bf16.mxu1 %v14456_v29  ;;  %12421 = vmatpush1.bf16.msra.mxu0 %v14199_v36  ;;  %v14616_v15 = vcombine.high %v836_v31, %v844_v60  ;;  %v564_v0 = vld [vmem:[%s16779_s2 + $0x5a0] sm:$0xff]  ;;  %v14615_v19 = vcombine.low %v836_v31, %v844_v60 }
 0x432   : > { %12422 = vmatprep.subr.bf16.mxu0 %v14184_v39  ;;  %v572_v13 = vld [vmem:[%s16779_s2 + $0x5e0] sm:$0xff] }
 0x433   : > { %v820_v16 = vld [vmem:[%s16779_s2 + $0xda0] sm:$0xff]  ;;  %v14344_v20 = vcombine.high %v564_v0, %v572_v13  ;;  %v14343_v26 = vcombine.low %v564_v0, %v572_v13 }
 0x434   : > { %12464 = vmatpush1.bf16.msra.mxu1 %v14455_v38  ;;  %v828_v17 = vld [vmem:[%s16779_s2 + $0xde0] sm:$0xff] }
 0x435   : > { %12465 = vmatprep.subr.bf16.mxu1 %v14440_v40  ;;  %12423 = vmatpush1.bf16.msra.mxu0 %v14183_v22  ;;  %v14600_v21 = vcombine.high %v820_v16, %v828_v17  ;;  %v548_v8 = vld [vmem:[%s16779_s2 + $0x520] sm:$0xff]  ;;  %v14599_v27 = vcombine.low %v820_v16, %v828_v17 }
 0x436   : > { %12424 = vmatprep.subr.bf16.mxu0 %v14168_v49  ;;  %v556_v23 = vld [vmem:[%s16779_s2 + $0x560] sm:$0xff] }
 0x437   : > { %v804_v24 = vld [vmem:[%s16779_s2 + $0xd20] sm:$0xff]  ;;  %v14328_v28 = vcombine.high %v548_v8, %v556_v23  ;;  %v14327_v36 = vcombine.low %v548_v8, %v556_v23 }
 0x438   : > { %12466 = vmatpush1.bf16.msra.mxu1 %v14439_v48  ;;  %v812_v25 = vld [vmem:[%s16779_s2 + $0xd60] sm:$0xff] }
 0x439   : > { %12467 = vmatprep.subr.bf16.mxu1 %v14424_v50  ;;  %12425 = vmatpush1.bf16.msra.mxu0 %v14167_v55  ;;  %v14584_v29 = vcombine.high %v804_v24, %v812_v25  ;;  %v532_v30 = vld [vmem:[%s16779_s2 + $0x4a0] sm:$0xff]  ;;  %v14583_v38 = vcombine.low %v804_v24, %v812_v25 }
 0x43a   : > { %12426 = vmatprep.subr.bf16.mxu0 %v14408_v59  ;;  %v540_v32 = vld [vmem:[%s16779_s2 + $0x4e0] sm:$0xff] }
 0x43b   : > { %v788_v33 = vld [vmem:[%s16779_s2 + $0xca0] sm:$0xff]  ;;  %v14312_v39 = vcombine.high %v532_v30, %v540_v32  ;;  %v14311_v22 = vcombine.low %v532_v30, %v540_v32 }
 0x43c   : > { %12468 = vmatpush1.bf16.msra.mxu1 %v14423_v58  ;;  %v796_v35 = vld [vmem:[%s16779_s2 + $0xce0] sm:$0xff] }
 0x43d   : > { %12469 = vmatprep.subr.bf16.mxu1 %v14664_v41  ;;  %12427 = vmatpush2.bf16.msra.mxu0 %v14407_v63  ;;  %v14568_v40 = vcombine.high %v788_v33, %v796_v35  ;;  %v516_v42 = vld [vmem:[%s16779_s2 + $0x420] sm:$0xff]  ;;  %v14567_v48 = vcombine.low %v788_v33, %v796_v35 }
 0x43e   : > { %12428 = vmatprep.subr.bf16.mxu0 %v14392_v51  ;;  %v524_v43 = vld [vmem:[%s16779_s2 + $0x460] sm:$0xff] }
 0x43f   : > { %v772_v44 = vld [vmem:[%s16779_s2 + $0xc20] sm:$0xff]  ;;  %v14296_v49 = vcombine.high %v516_v42, %v524_v43  ;;  %v14295_v55 = vcombine.low %v516_v42, %v524_v43 }
 0x440   : > { %12470 = vmatpush2.bf16.msra.mxu1 %v14663_v1  ;;  %v780_v46 = vld [vmem:[%s16779_s2 + $0xc60] sm:$0xff] }
 0x441   : > { %12471 = vmatprep.subr.bf16.mxu1 %v14648_v3  ;;  %12429 = vmatpush2.bf16.msra.mxu0 %v14391_v5  ;;  %v14552_v50 = vcombine.high %v772_v44, %v780_v46  ;;  %v1012_v52 = vld [vmem:[%s16779_s2 + $0x13a0] sm:$0xff]  ;;  %v14551_v58 = vcombine.low %v772_v44, %v780_v46 }
 0x442   : > { %12430 = vmatprep.subr.bf16.mxu0 %v14376_v7  ;;  %v1020_v53 = vld [vmem:[%s16779_s2 + $0x13e0] sm:$0xff] }
 0x443   : > { %v1268_v47 = vld [vmem:[%s16779_s2 + $0x1ba0] sm:$0xff]  ;;  %v14792_v59 = vcombine.high %v1012_v52, %v1020_v53  ;;  %v14791_v63 = vcombine.low %v1012_v52, %v1020_v53 }
 0x444   : > { %12472 = vmatpush2.bf16.msra.mxu1 %v14647_v6  ;;  %v1276_v54 = vld [vmem:[%s16779_s2 + $0x1be0] sm:$0xff] }
 0x445   : > { %12473 = vmatprep.subr.bf16.mxu1 %v14632_v9  ;;  %12431 = vmatpush2.bf16.msra.mxu0 %v14375_v11  ;;  %v15048_v41 = vcombine.high %v1268_v47, %v1276_v54  ;;  %v996_v57 = vld [vmem:[%s16779_s2 + $0x1320] sm:$0xff]  ;;  %v15047_v1 = vcombine.low %v1268_v47, %v1276_v54 }
 0x446   : > { %12432 = vmatprep.subr.bf16.mxu0 %v14360_v14  ;;  %v1004_v34 = vld [vmem:[%s16779_s2 + $0x1360] sm:$0xff] }
 0x447   : > { %v1252_v62 = vld [vmem:[%s16779_s2 + $0x1b20] sm:$0xff]  ;;  %v14776_v51 = vcombine.high %v996_v57, %v1004_v34  ;;  %v14775_v7 = vcombine.low %v996_v57, %v1004_v34 }
 0x448   : > { %12474 = vmatpush2.bf16.msra.mxu1 %v14631_v12  ;;  %v1260_v45 = vld [vmem:[%s16779_s2 + $0x1b60] sm:$0xff] }
 0x449   : > { %12475 = vmatprep.subr.bf16.mxu1 %v14616_v15  ;;  %12433 = vmatpush2.bf16.msra.mxu0 %v14359_v18  ;;  %v15032_v3 = vcombine.high %v1252_v62, %v1260_v45  ;;  %v980_v2 = vld [vmem:[%s16779_s2 + $0x12a0] sm:$0xff]  ;;  %v15031_v9 = vcombine.low %v1252_v62, %v1260_v45 }
 0x44a   : > { %12434 = vmatprep.subr.bf16.mxu0 %v14344_v20  ;;  %v988_v4 = vld [vmem:[%s16779_s2 + $0x12e0] sm:$0xff] }
 0x44b   : > { %v16208_v37 = vld [vmem:[%s16771_s30] ss:$56 sps:$4 sm:$0xff]   ;;  %v14760_v10 = vcombine.high %v980_v2, %v988_v4  ;;  %v16210_v11 = vld [vmem:[%s16771_s30 + $0x14] ss:$56 sps:$4 sm:$0xff]   ;;  %v14759_v0 = vcombine.low %v980_v2, %v988_v4 }
 0x44c   : > { %12476 = vmatpush2.bf16.msra.mxu1 %v14615_v19  ;;  %v1236_v61 = vld [vmem:[%s16779_s2 + $0x1aa0] sm:$0xff] }
 0x44d   : > { %12477 = vmatprep.subr.bf16.mxu1 %v14600_v21  ;;  %12435 = vmatpush2.bf16.msra.mxu0 %v14343_v26  ;;  %v1244_v5 = vld [vmem:[%s16779_s2 + $0x1ae0] sm:$0xff] }
 0x44e   : > { %12436 = vmatprep.subr.bf16.mxu0 %v14328_v28  ;;  %v16209_v6 = vld [vmem:[%s16771_s30 + $0x8] ss:$56 sps:$4 sm:$0xff]   ;;  %v15016_v56 = vcombine.high %v1236_v61, %v1244_v5  ;;  %v16211_v15 = vld [vmem:[%s16771_s30 + $0x1c] ss:$56 sps:$4 sm:$0xff]   ;;  %v15015_v13 = vcombine.low %v1236_v61, %v1244_v5 }
 0x44f   : > { %v964_v31 = vld [vmem:[%s16779_s2 + $0x1220] sm:$0xff] }
 0x450   : > { %12478 = vmatpush2.bf16.msra.mxu1 %v14599_v27  ;;  %v972_v60 = vld [vmem:[%s16779_s2 + $0x1260] sm:$0xff] }
 0x451   : > { %12479 = vmatprep.subr.bf16.mxu1 %v14584_v29  ;;  %12437 = vmatpush2.bf16.msra.mxu0 %v14327_v36  ;;  %v1220_v12 = vld [vmem:[%s16779_s2 + $0x1a20] sm:$0xff]  ;;  %v14744_v16 = vcombine.high %v964_v31, %v972_v60  ;;  %v14743_v8 = vcombine.low %v964_v31, %v972_v60 }
 0x452   : > { %12438 = vmatprep.subr.bf16.mxu0 %v14312_v39  ;;  %v1228_v14 = vld [vmem:[%s16779_s2 + $0x1a60] sm:$0xff] }
 0x453   : > { %v15000_v17 = vcombine.high %v1220_v12, %v1228_v14  ;;  %v948_v18 = vld [vmem:[%s16779_s2 + $0x11a0] sm:$0xff]  ;;  %v14999_v23 = vcombine.low %v1220_v12, %v1228_v14 }
 0x454   : > { %12480 = vmatpush2.bf16.msra.mxu1 %v14583_v38  ;;  %v956_v19 = vld [vmem:[%s16779_s2 + $0x11e0] sm:$0xff] }
 0x455   : > { %12481 = vmatprep.subr.bf16.mxu1 %v14568_v40  ;;  %12439 = vmatpush2.bf16.msra.mxu0 %v14311_v22  ;;  %v1204_v20 = vld [vmem:[%s16779_s2 + $0x19a0] sm:$0xff]  ;;  %v14728_v24 = vcombine.high %v948_v18, %v956_v19  ;;  %v14727_v30 = vcombine.low %v948_v18, %v956_v19 }
 0x456   : > { %12440 = vmatprep.subr.bf16.mxu0 %v14296_v49  ;;  %v1212_v21 = vld [vmem:[%s16779_s2 + $0x19e0] sm:$0xff] }
 0x457   : > { %v14984_v25 = vcombine.high %v1204_v20, %v1212_v21  ;;  %v932_v26 = vld [vmem:[%s16779_s2 + $0x1120] sm:$0xff]  ;;  %v14983_v32 = vcombine.low %v1204_v20, %v1212_v21 }
 0x458   : > { %12482 = vmatpush2.bf16.msra.mxu1 %v14567_v48  ;;  %v940_v27 = vld [vmem:[%s16779_s2 + $0x1160] sm:$0xff] }
 0x459   : > { %12483 = vmatprep.subr.bf16.mxu1 %v14552_v50  ;;  %12441 = vmatpush2.bf16.msra.mxu0 %v14295_v55  ;;  %v1188_v28 = vld [vmem:[%s16779_s2 + $0x1920] sm:$0xff]  ;;  %v14712_v33 = vcombine.high %v932_v26, %v940_v27  ;;  %v14711_v42 = vcombine.low %v932_v26, %v940_v27 }
 0x45a   : > { %12496 = vmatprep.subr.bf16.mxu0 %v14792_v59  ;;  %v1196_v29 = vld [vmem:[%s16779_s2 + $0x1960] sm:$0xff] }
 0x45b   : > { %v14968_v35 = vcombine.high %v1188_v28, %v1196_v29  ;;  %v916_v36 = vld [vmem:[%s16779_s2 + $0x10a0] sm:$0xff]  ;;  %v14967_v43 = vcombine.low %v1188_v28, %v1196_v29 }
 0x45c   : > { %12484 = vmatpush2.bf16.msra.mxu1 %v14551_v58  ;;  %12443 = vmatmul.mubr.bf16.vlgmr.msra.gmra.mxu0 %v16208_v37  ;;  %v924_v38 = vld [vmem:[%s16779_s2 + $0x10e0] sm:$0xff] }
 0x45d   : > { %12539 = vmatprep.subr.bf16.mxu1 %v15048_v41  ;;  %12497 = vmatpush1.bf16.msra.mxu0 %v14791_v63  ;;  %v1172_v39 = vld [vmem:[%s16779_s2 + $0x18a0] sm:$0xff]  ;;  %v14696_v44 = vcombine.high %v916_v36, %v924_v38  ;;  %v14695_v52 = vcombine.low %v916_v36, %v924_v38 }
 0x45e   : > { %12498 = vmatprep.subr.bf16.mxu0 %v14776_v51  ;;  %12528 = vmatprep.mubr.bf16.mxu0 %v16210_v11  ;;  %v1180_v40 = vld [vmem:[%s16779_s2 + $0x18e0] sm:$0xff] }
 0x45f   : > { %12486 = vmatmul.mubr.bf16.vlgmr.msra.gmra.mxu1 %v16209_v6  ;;  %v14952_v46 = vcombine.high %v1172_v39, %v1180_v40  ;;  %v900_v22 = vld [vmem:[%s16779_s2 + $0x1020] sm:$0xff]  ;;  %v14951_v53 = vcombine.low %v1172_v39, %v1180_v40 }
 0x460   : > { %12540 = vmatpush1.bf16.msra.mxu1 %v15047_v1  ;;  %12571 = vmatprep.mubr.bf16.mxu1 %v16211_v15  ;;  %v908_v48 = vld [vmem:[%s16779_s2 + $0x1060] sm:$0xff] }
 0x461   : > { %12541 = vmatprep.subr.bf16.mxu1 %v15032_v3  ;;  %12499 = vmatpush1.bf16.msra.mxu0 %v14775_v7  ;;  %v1156_v49 = vld [vmem:[%s16779_s2 + $0x1820] sm:$0xff]  ;;  %v14680_v47 = vcombine.high %v900_v22, %v908_v48  ;;  %v14679_v57 = vcombine.low %v900_v22, %v908_v48 }
 0x462   : > { %12500 = vmatprep.subr.bf16.mxu0 %v14760_v10  ;;  %v1164_v50 = vld [vmem:[%s16779_s2 + $0x1860] sm:$0xff] }
 0x463   : > { %v14936_v54 = vcombine.high %v1156_v49, %v1164_v50  ;;  %v1140_v55 = vld [vmem:[%s16779_s2 + $0x17a0] sm:$0xff]  ;;  %v14935_v34 = vcombine.low %v1156_v49, %v1164_v50 }
 0x464   : > { %12542 = vmatpush1.bf16.msra.mxu1 %v15031_v9  ;;  %v1148_v58 = vld [vmem:[%s16779_s2 + $0x17e0] sm:$0xff] }
 0x465   : > { %12543 = vmatprep.subr.bf16.mxu1 %v15016_v56  ;;  %12501 = vmatpush1.bf16.msra.mxu0 %v14759_v0  ;;  %v1396_v59 = vld [vmem:[%s16779_s2 + $0x1fa0] sm:$0xff]  ;;  %v14920_v62 = vcombine.high %v1140_v55, %v1148_v58  ;;  %v14919_v2 = vcombine.low %v1140_v55, %v1148_v58 }
 0x466   : > { %12502 = vmatprep.subr.bf16.mxu0 %v14744_v16  ;;  %v1404_v41 = vld [vmem:[%s16779_s2 + $0x1fe0] sm:$0xff] }
 0x467   : > { %v15176_v45 = vcombine.high %v1396_v59, %v1404_v41  ;;  %v1124_v63 = vld [vmem:[%s16779_s2 + $0x1720] sm:$0xff]  ;;  %v15175_v4 = vcombine.low %v1396_v59, %v1404_v41 }
 0x468   : > { %12544 = vmatpush1.bf16.msra.mxu1 %v15015_v13  ;;  %v1132_v1 = vld [vmem:[%s16779_s2 + $0x1760] sm:$0xff] }
 0x469   : > { %12545 = vmatprep.subr.bf16.mxu1 %v15000_v17  ;;  %12503 = vmatpush1.bf16.msra.mxu0 %v14743_v8  ;;  %v1380_v51 = vld [vmem:[%s16779_s2 + $0x1f20] sm:$0xff]  ;;  %v14904_v37 = vcombine.high %v1124_v63, %v1132_v1  ;;  %v14903_v10 = vcombine.low %v1124_v63, %v1132_v1 }
 0x46a   : > { %12504 = vmatprep.subr.bf16.mxu0 %v14728_v24  ;;  %v1388_v3 = vld [vmem:[%s16779_s2 + $0x1f60] sm:$0xff] }
 0x46b   : > { %v15160_v61 = vcombine.high %v1380_v51, %v1388_v3  ;;  %v1108_v5 = vld [vmem:[%s16779_s2 + $0x16a0] sm:$0xff]  ;;  %v15159_v56 = vcombine.low %v1380_v51, %v1388_v3 }
 0x46c   : > { %12546 = vmatpush1.bf16.msra.mxu1 %v14999_v23  ;;  %v1116_v6 = vld [vmem:[%s16779_s2 + $0x16e0] sm:$0xff] }
 0x46d   : > { %12547 = vmatprep.subr.bf16.mxu1 %v14984_v25  ;;  %12505 = vmatpush1.bf16.msra.mxu0 %v14727_v30  ;;  %v1364_v7 = vld [vmem:[%s16779_s2 + $0x1ea0] sm:$0xff]  ;;  %v14888_v31 = vcombine.high %v1108_v5, %v1116_v6  ;;  %v14887_v0 = vcombine.low %v1108_v5, %v1116_v6 }
 0x46e   : > { %12506 = vmatprep.subr.bf16.mxu0 %v14712_v33  ;;  %v1372_v9 = vld [vmem:[%s16779_s2 + $0x1ee0] sm:$0xff] }
 0x46f   : > { %v15144_v60 = vcombine.high %v1364_v7, %v1372_v9  ;;  %v1092_v11 = vld [vmem:[%s16779_s2 + $0x1620] sm:$0xff]  ;;  %v15143_v13 = vcombine.low %v1364_v7, %v1372_v9 }
 0x470   : > { %12548 = vmatpush1.bf16.msra.mxu1 %v14983_v32  ;;  %v1100_v12 = vld [vmem:[%s16779_s2 + $0x1660] sm:$0xff] }
 0x471   : > { %12549 = vmatprep.subr.bf16.mxu1 %v14968_v35  ;;  %12507 = vmatpush1.bf16.msra.mxu0 %v14711_v42  ;;  %v1348_v14 = vld [vmem:[%s16779_s2 + $0x1e20] sm:$0xff]  ;;  %v14872_v16 = vcombine.high %v1092_v11, %v1100_v12  ;;  %v14871_v8 = vcombine.low %v1092_v11, %v1100_v12 }
 0x472   : > { %12508 = vmatprep.subr.bf16.mxu0 %v14696_v44  ;;  %v1356_v15 = vld [vmem:[%s16779_s2 + $0x1e60] sm:$0xff] }
 0x473   : > { %v15128_v17 = vcombine.high %v1348_v14, %v1356_v15  ;;  %v1076_v18 = vld [vmem:[%s16779_s2 + $0x15a0] sm:$0xff]  ;;  %v15127_v23 = vcombine.low %v1348_v14, %v1356_v15 }
 0x474   : > { %12550 = vmatpush1.bf16.msra.mxu1 %v14967_v43  ;;  %v1084_v19 = vld [vmem:[%s16779_s2 + $0x15e0] sm:$0xff] }
 0x475   : > { %12551 = vmatprep.subr.bf16.mxu1 %v14952_v46  ;;  %12509 = vmatpush1.bf16.msra.mxu0 %v14695_v52  ;;  %v1332_v20 = vld [vmem:[%s16779_s2 + $0x1da0] sm:$0xff]  ;;  %v14856_v24 = vcombine.high %v1076_v18, %v1084_v19  ;;  %v14855_v30 = vcombine.low %v1076_v18, %v1084_v19 }
 0x476   : > { %12510 = vmatprep.subr.bf16.mxu0 %v14680_v47  ;;  %v1340_v21 = vld [vmem:[%s16779_s2 + $0x1de0] sm:$0xff] }
 0x477   : > { %v15112_v25 = vcombine.high %v1332_v20, %v1340_v21  ;;  %v1060_v26 = vld [vmem:[%s16779_s2 + $0x1520] sm:$0xff]  ;;  %v15111_v32 = vcombine.low %v1332_v20, %v1340_v21 }
 0x478   : > { %12552 = vmatpush1.bf16.msra.mxu1 %v14951_v53  ;;  %v1068_v27 = vld [vmem:[%s16779_s2 + $0x1560] sm:$0xff] }
 0x479   : > { %12553 = vmatprep.subr.bf16.mxu1 %v14936_v54  ;;  %12511 = vmatpush1.bf16.msra.mxu0 %v14679_v57  ;;  %v1316_v28 = vld [vmem:[%s16779_s2 + $0x1d20] sm:$0xff]  ;;  %v14840_v33 = vcombine.high %v1060_v26, %v1068_v27  ;;  %v14839_v42 = vcombine.low %v1060_v26, %v1068_v27 }
 0x47a   : > { %12512 = vmatprep.subr.bf16.mxu0 %v14920_v62  ;;  %v1324_v29 = vld [vmem:[%s16779_s2 + $0x1d60] sm:$0xff] }
 0x47b   : > { %v15096_v35 = vcombine.high %v1316_v28, %v1324_v29  ;;  %v1044_v36 = vld [vmem:[%s16779_s2 + $0x14a0] sm:$0xff]  ;;  %v15095_v43 = vcombine.low %v1316_v28, %v1324_v29 }
 0x47c   : > { %12554 = vmatpush1.bf16.msra.mxu1 %v14935_v34  ;;  %v1052_v38 = vld [vmem:[%s16779_s2 + $0x14e0] sm:$0xff] }
 0x47d   : > { %12555 = vmatprep.subr.bf16.mxu1 %v15176_v45  ;;  %12513 = vmatpush2.bf16.msra.mxu0 %v14919_v2  ;;  %v1300_v39 = vld [vmem:[%s16779_s2 + $0x1ca0] sm:$0xff]  ;;  %v14824_v44 = vcombine.high %v1044_v36, %v1052_v38  ;;  %v14823_v52 = vcombine.low %v1044_v36, %v1052_v38 }
 0x47e   : > { %12514 = vmatprep.subr.bf16.mxu0 %v14904_v37  ;;  %v1308_v40 = vld [vmem:[%s16779_s2 + $0x1ce0] sm:$0xff] }
 0x47f   : > { %v15080_v46 = vcombine.high %v1300_v39, %v1308_v40  ;;  %v1028_v22 = vld [vmem:[%s16779_s2 + $0x1420] sm:$0xff]  ;;  %v15079_v53 = vcombine.low %v1300_v39, %v1308_v40 }
 0x480   : > { %12556 = vmatpush2.bf16.msra.mxu1 %v15175_v4  ;;  %v1036_v48 = vld [vmem:[%s16779_s2 + $0x1460] sm:$0xff] }
 0x481   : > { %12557 = vmatprep.subr.bf16.mxu1 %v15160_v61  ;;  %12515 = vmatpush2.bf16.msra.mxu0 %v14903_v10  ;;  %v1284_v49 = vld [vmem:[%s16779_s2 + $0x1c20] sm:$0xff]  ;;  %v14808_v47 = vcombine.high %v1028_v22, %v1036_v48  ;;  %v14807_v57 = vcombine.low %v1028_v22, %v1036_v48 }
 0x482   : > { %12516 = vmatprep.subr.bf16.mxu0 %v14888_v31  ;;  %v1292_v50 = vld [vmem:[%s16779_s2 + $0x1c60] sm:$0xff] }
 0x483   : > { %v15064_v54 = vcombine.high %v1284_v49, %v1292_v50  ;;  %v1524_v55 = vld [vmem:[%s16779_s2 + $0x23a0] sm:$0xff]  ;;  %v15063_v34 = vcombine.low %v1284_v49, %v1292_v50 }
 0x484   : > { %12558 = vmatpush2.bf16.msra.mxu1 %v15159_v56  ;;  %v1532_v58 = vld [vmem:[%s16779_s2 + $0x23e0] sm:$0xff] }
 0x485   : > { %12559 = vmatprep.subr.bf16.mxu1 %v15144_v60  ;;  %12517 = vmatpush2.bf16.msra.mxu0 %v14887_v0  ;;  %v1780_v59 = vld [vmem:[%s16779_s2 + $0x2ba0] sm:$0xff]  ;;  %v15304_v62 = vcombine.high %v1524_v55, %v1532_v58  ;;  %v15303_v2 = vcombine.low %v1524_v55, %v1532_v58 }
 0x486   : > { %12518 = vmatprep.subr.bf16.mxu0 %v14872_v16  ;;  %v1788_v41 = vld [vmem:[%s16779_s2 + $0x2be0] sm:$0xff] }
 0x487   : > { %v15560_v45 = vcombine.high %v1780_v59, %v1788_v41  ;;  %v1508_v63 = vld [vmem:[%s16779_s2 + $0x2320] sm:$0xff]  ;;  %v15559_v4 = vcombine.low %v1780_v59, %v1788_v41  ;;  %v18014_v41 = vpop.f32.mrf.mxu1 }
 0x488   : > { %12560 = vmatpush2.bf16.msra.mxu1 %v15143_v13  ;;  %v1516_v1 = vld [vmem:[%s16779_s2 + $0x2360] sm:$0xff] }
 0x489   : > { %12561 = vmatprep.subr.bf16.mxu1 %v15128_v17  ;;  %12519 = vmatpush2.bf16.msra.mxu0 %v14871_v8  ;;  %v1764_v51 = vld [vmem:[%s16779_s2 + $0x2b20] sm:$0xff]  ;;  %v15288_v37 = vcombine.high %v1508_v63, %v1516_v1  ;;  %v15287_v31 = vcombine.low %v1508_v63, %v1516_v1 }
 0x48a   : > { %12520 = vmatprep.subr.bf16.mxu0 %v14856_v24  ;;  %v1772_v3 = vld [vmem:[%s16779_s2 + $0x2b60] sm:$0xff] }
 0x48b   : > { %v15544_v61 = vcombine.high %v1764_v51, %v1772_v3  ;;  %v1492_v5 = vld [vmem:[%s16779_s2 + $0x22a0] sm:$0xff]  ;;  %v15543_v60 = vcombine.low %v1764_v51, %v1772_v3 }
 0x48c   : > { %12562 = vmatpush2.bf16.msra.mxu1 %v15127_v23  ;;  %v1500_v6 = vld [vmem:[%s16779_s2 + $0x22e0] sm:$0xff] }
 0x48d   : > { %12563 = vmatprep.subr.bf16.mxu1 %v15112_v25  ;;  %12521 = vmatpush2.bf16.msra.mxu0 %v14855_v30  ;;  %v16212_v7 = vld [vmem:[%s16771_s30 + $0x10] ss:$56 sps:$4 sm:$0xff]   ;;  %v15272_v11 = vcombine.high %v1492_v5, %v1500_v6  ;;  %v16214_v0 = vld [vmem:[%s16771_s30 + $0x24] ss:$56 sps:$4 sm:$0xff]   ;;  %v15271_v18 = vcombine.low %v1492_v5, %v1500_v6 }
 0x48e   : > { %12522 = vmatprep.subr.bf16.mxu0 %v14840_v33  ;;  %v1748_v9 = vld [vmem:[%s16779_s2 + $0x2aa0] sm:$0xff] }
 0x48f   : > { %v1756_v10 = vld [vmem:[%s16779_s2 + $0x2ae0] sm:$0xff] }
 0x490   : > { %12564 = vmatpush2.bf16.msra.mxu1 %v15111_v32  ;;  %v16213_v56 = vld [vmem:[%s16771_s30 + $0x18] ss:$56 sps:$4 sm:$0xff]   ;;  %v15528_v12 = vcombine.high %v1748_v9, %v1756_v10  ;;  %v16215_v17 = vld [vmem:[%s16771_s30 + $0x2c] ss:$56 sps:$4 sm:$0xff]   ;;  %v15527_v19 = vcombine.low %v1748_v9, %v1756_v10 }
 0x491   : > { %12565 = vmatprep.subr.bf16.mxu1 %v15096_v35  ;;  %12523 = vmatpush2.bf16.msra.mxu0 %v14839_v42  ;;  %v1476_v14 = vld [vmem:[%s16779_s2 + $0x2220] sm:$0xff] }
 0x492   : > { %12524 = vmatprep.subr.bf16.mxu0 %v14824_v44  ;;  %v1484_v15 = vld [vmem:[%s16779_s2 + $0x2260] sm:$0xff] }
 0x493   : > { %v1732_v13 = vld [vmem:[%s16779_s2 + $0x2a20] sm:$0xff]  ;;  %v15256_v20 = vcombine.high %v1476_v14, %v1484_v15  ;;  %v15255_v26 = vcombine.low %v1476_v14, %v1484_v15 }
 0x494   : > { %12566 = vmatpush2.bf16.msra.mxu1 %v15095_v43  ;;  %v1740_v16 = vld [vmem:[%s16779_s2 + $0x2a60] sm:$0xff] }
 0x495   : > { %12567 = vmatprep.subr.bf16.mxu1 %v15080_v46  ;;  %12525 = vmatpush2.bf16.msra.mxu0 %v14823_v52  ;;  %v15512_v21 = vcombine.high %v1732_v13, %v1740_v16  ;;  %v1460_v8 = vld [vmem:[%s16779_s2 + $0x21a0] sm:$0xff]  ;;  %v15511_v27 = vcombine.low %v1732_v13, %v1740_v16 }
 0x496   : > { %12526 = vmatprep.subr.bf16.mxu0 %v14808_v47  ;;  %v1468_v23 = vld [vmem:[%s16779_s2 + $0x21e0] sm:$0xff] }
 0x497   : > { %v1716_v24 = vld [vmem:[%s16779_s2 + $0x29a0] sm:$0xff]  ;;  %v15240_v28 = vcombine.high %v1460_v8, %v1468_v23  ;;  %v15239_v36 = vcombine.low %v1460_v8, %v1468_v23 }
 0x498   : > { %12568 = vmatpush2.bf16.msra.mxu1 %v15079_v53  ;;  %v1724_v25 = vld [vmem:[%s16779_s2 + $0x29e0] sm:$0xff] }
 0x499   : > { %12569 = vmatprep.subr.bf16.mxu1 %v15064_v54  ;;  %12527 = vmatpush2.bf16.msra.mxu0 %v14807_v57  ;;  %v15496_v29 = vcombine.high %v1716_v24, %v1724_v25  ;;  %v1444_v30 = vld [vmem:[%s16779_s2 + $0x2120] sm:$0xff]  ;;  %v15495_v38 = vcombine.low %v1716_v24, %v1724_v25 }
 0x49a   : > { %12582 = vmatprep.subr.bf16.mxu0 %v15304_v62  ;;  %v1452_v32 = vld [vmem:[%s16779_s2 + $0x2160] sm:$0xff] }
 0x49b   : > { %v1700_v33 = vld [vmem:[%s16779_s2 + $0x2920] sm:$0xff]  ;;  %v15224_v39 = vcombine.high %v1444_v30, %v1452_v32  ;;  %v15223_v22 = vcombine.low %v1444_v30, %v1452_v32 }
 0x49c   : > { %12570 = vmatpush2.bf16.msra.mxu1 %v15063_v34  ;;  %12529 = vmatmul.mubr.bf16.vlgmr.msra.gmra.mxu0 %v16212_v7  ;;  %v1708_v35 = vld [vmem:[%s16779_s2 + $0x2960] sm:$0xff] }
 0x49d   : > { %12625 = vmatprep.subr.bf16.mxu1 %v15560_v45  ;;  %12583 = vmatpush1.bf16.msra.mxu0 %v15303_v2  ;;  %v15480_v40 = vcombine.high %v1700_v33, %v1708_v35  ;;  %v1428_v42 = vld [vmem:[%s16779_s2 + $0x20a0] sm:$0xff]  ;;  %v15479_v48 = vcombine.low %v1700_v33, %v1708_v35  ;;  %v18020_v2 = vpop.f32.mrf.mxu1 }
 0x49e   : > { %12584 = vmatprep.subr.bf16.mxu0 %v15288_v37  ;;  %12614 = vmatprep.mubr.bf16.mxu0 %v16214_v0  ;;  %v1436_v43 = vld [vmem:[%s16779_s2 + $0x20e0] sm:$0xff] }
 0x49f   : > { %12572 = vmatmul.mubr.bf16.vlgmr.msra.gmra.mxu1 %v16213_v56  ;;  %v1684_v44 = vld [vmem:[%s16779_s2 + $0x28a0] sm:$0xff]  ;;  %v15208_v49 = vcombine.high %v1428_v42, %v1436_v43  ;;  %v15207_v55 = vcombine.low %v1428_v42, %v1436_v43  ;;  %v18026_v56 = vpop.f32.mrf.mxu1 }
 0x4a0   : > { %12626 = vmatpush1.bf16.msra.mxu1 %v15559_v4  ;;  %12657 = vmatprep.mubr.bf16.mxu1 %v16215_v17  ;;  %v1692_v46 = vld [vmem:[%s16779_s2 + $0x28e0] sm:$0xff] }
 0x4a1   : > { %12627 = vmatprep.subr.bf16.mxu1 %v15544_v61  ;;  %12585 = vmatpush1.bf16.msra.mxu0 %v15287_v31  ;;  %v15464_v50 = vcombine.high %v1684_v44, %v1692_v46  ;;  %v1412_v52 = vld [vmem:[%s16779_s2 + $0x2020] sm:$0xff]  ;;  %v15463_v58 = vcombine.low %v1684_v44, %v1692_v46  ;;  %v18032_v16 = vpop.f32.mrf.mxu1 }
 0x4a2   : > { %12586 = vmatprep.subr.bf16.mxu0 %v15272_v11  ;;  %v1420_v53 = vld [vmem:[%s16779_s2 + $0x2060] sm:$0xff] }
 0x4a3   : > { %v1668_v47 = vld [vmem:[%s16779_s2 + $0x2820] sm:$0xff]  ;;  %v15192_v59 = vcombine.high %v1412_v52, %v1420_v53  ;;  %v15191_v1 = vcombine.low %v1412_v52, %v1420_v53  ;;  %v18038_v23 = vpop.f32.mrf.mxu1 }
 0x4a4   : > { %12628 = vmatpush1.bf16.msra.mxu1 %v15543_v60  ;;  %v1676_v54 = vld [vmem:[%s16779_s2 + $0x2860] sm:$0xff] }
 0x4a5   : > { %12629 = vmatprep.subr.bf16.mxu1 %v15528_v12  ;;  %12587 = vmatpush1.bf16.msra.mxu0 %v15271_v18  ;;  %v15448_v57 = vcombine.high %v1668_v47, %v1676_v54  ;;  %v1652_v34 = vld [vmem:[%s16779_s2 + $0x27a0] sm:$0xff]  ;;  %v15447_v51 = vcombine.low %v1668_v47, %v1676_v54  ;;  %v18044_v35 = vpop.f32.mrf.mxu1 }
 0x4a6   : > { %12588 = vmatprep.subr.bf16.mxu0 %v15256_v20  ;;  %v1660_v62 = vld [vmem:[%s16779_s2 + $0x27e0] sm:$0xff]  ;;  %v12186_v20 = vpop.f32.mrf.mxu0 }
 0x4a7   : > { %v1908_v45 = vld [vmem:[%s16779_s2 + $0x2fa0] sm:$0xff]  ;;  %v15432_v3 = vcombine.high %v1652_v34, %v1660_v62  ;;  %v15431_v7 = vcombine.low %v1652_v34, %v1660_v62 }
 0x4a8   : > { %12630 = vmatpush1.bf16.msra.mxu1 %v15527_v19  ;;  %v1916_v63 = vld [vmem:[%s16779_s2 + $0x2fe0] sm:$0xff]  ;;  %v12188_v30 = vpop.f32.mrf.mxu0 }
 0x4a9   : > { %12631 = vmatprep.subr.bf16.mxu1 %v15512_v21  ;;  %12589 = vmatpush1.bf16.msra.mxu0 %v15255_v26  ;;  %v15688_v4 = vcombine.high %v1908_v45, %v1916_v63  ;;  %v1636_v37 = vld [vmem:[%s16779_s2 + $0x2720] sm:$0xff]  ;;  %v15687_v9 = vcombine.low %v1908_v45, %v1916_v63 }
 0x4aa   : > { %12590 = vmatprep.subr.bf16.mxu0 %v15240_v28  ;;  %v1644_v61 = vld [vmem:[%s16779_s2 + $0x2760] sm:$0xff]  ;;  %v12190_v44 = vpop.f32.mrf.mxu0 }
 0x4ab   : > { %v1892_v5 = vld [vmem:[%s16779_s2 + $0x2f20] sm:$0xff]  ;;  %v15416_v10 = vcombine.high %v1636_v37, %v1644_v61  ;;  %v15415_v15 = vcombine.low %v1636_v37, %v1644_v61 }
 0x4ac   : > { %12632 = vmatpush1.bf16.msra.mxu1 %v15511_v27  ;;  %v1900_v6 = vld [vmem:[%s16779_s2 + $0x2f60] sm:$0xff] }
 0x4ad   : > { %12633 = vmatprep.subr.bf16.mxu1 %v15496_v29  ;;  %12591 = vmatpush1.bf16.msra.mxu0 %v15239_v36  ;;  %v15672_v31 = vcombine.high %v1892_v5, %v1900_v6  ;;  %v1620_v60 = vld [vmem:[%s16779_s2 + $0x26a0] sm:$0xff]  ;;  %v15671_v0 = vcombine.low %v1892_v5, %v1900_v6  ;;  %v12187_v5 = vadd.f32 %v12186_v20, %v18014_v41 }
 0x4ae   : > { %12592 = vmatprep.subr.bf16.mxu0 %v15224_v39  ;;  %v1628_v11 = vld [vmem:[%s16779_s2 + $0x26e0] sm:$0xff]  ;;  %v12191_v41 = vadd.f32 %v12190_v44, %v18026_v56  ;;  %v18082_v44 = vld [vmem:[%s16779_s2 + $0x2a8] sm:$0xff] }
 0x4af   : > { %v1876_v12 = vld [vmem:[%s16779_s2 + $0x2ea0] sm:$0xff]  ;;  %v15400_v13 = vcombine.high %v1620_v60, %v1628_v11  ;;  %v15399_v24 = vcombine.low %v1620_v60, %v1628_v11 }
 0x4b0   : > { %12634 = vmatpush1.bf16.msra.mxu1 %v15495_v38  ;;  %v1884_v14 = vld [vmem:[%s16779_s2 + $0x2ee0] sm:$0xff] }
 0x4b1   : > { %12635 = vmatprep.subr.bf16.mxu1 %v15480_v40  ;;  %12593 = vmatpush1.bf16.msra.mxu0 %v15223_v22  ;;  %v15656_v17 = vcombine.high %v1876_v12, %v1884_v14  ;;  %v1604_v18 = vld [vmem:[%s16779_s2 + $0x2620] sm:$0xff]  ;;  %v15655_v25 = vcombine.low %v1876_v12, %v1884_v14 }
 0x4b2   : > { %12594 = vmatprep.subr.bf16.mxu0 %v15208_v49  ;;  %v1612_v19 = vld [vmem:[%s16779_s2 + $0x2660] sm:$0xff] }
 0x4b3   : > { %v1860_v21 = vld [vmem:[%s16779_s2 + $0x2e20] sm:$0xff]  ;;  %v15384_v26 = vcombine.high %v1604_v18, %v1612_v19  ;;  %v15383_v36 = vcombine.low %v1604_v18, %v1612_v19 }
 0x4b4   : > { %12636 = vmatpush1.bf16.msra.mxu1 %v15479_v48  ;;  %v1868_v8 = vld [vmem:[%s16779_s2 + $0x2e60] sm:$0xff]  ;;  %v18050_v48 = vpop.f32.mrf.mxu1 }
 0x4b5   : > { %12637 = vmatprep.subr.bf16.mxu1 %v15464_v50  ;;  %12595 = vmatpush1.bf16.msra.mxu0 %v15207_v55  ;;  %v15640_v27 = vcombine.high %v1860_v21, %v1868_v8  ;;  %v1588_v28 = vld [vmem:[%s16779_s2 + $0x25a0] sm:$0xff]  ;;  %v15639_v38 = vcombine.low %v1860_v21, %v1868_v8  ;;  %v12192_v55 = vpop.f32.mrf.mxu0 }
 0x4b6   : > { %12596 = vmatprep.subr.bf16.mxu0 %v15192_v59  ;;  %v1596_v29 = vld [vmem:[%s16779_s2 + $0x25e0] sm:$0xff]  ;;  %v12193_v21 = vadd.f32 %v12192_v55, %v18032_v16  ;;  %v344_v55 = vld [vmem:[#allocation2 + $0x30] sm:$0xff] }
 0x4b7   : > { %v1844_v32 = vld [vmem:[%s16779_s2 + $0x2da0] sm:$0xff]  ;;  %v15368_v39 = vcombine.high %v1588_v28, %v1596_v29  ;;  %v15367_v49 = vcombine.low %v1588_v28, %v1596_v29  ;;  %v12272_v62 = vpop.f32.mrf.mxu0  ;;  %v12234_v28 = vadd.f32 %v18050_v48, %v12191_v41 }
 0x4b8   : > { %12638 = vmatpush1.bf16.msra.mxu1 %v15463_v58  ;;  %v1852_v33 = vld [vmem:[%s16779_s2 + $0x2de0] sm:$0xff] }
 0x4b9   : > { %12639 = vmatprep.subr.bf16.mxu1 %v15448_v57  ;;  %12597 = vmatpush1.bf16.msra.mxu0 %v15191_v1  ;;  %v15624_v40 = vcombine.high %v1844_v32, %v1852_v33  ;;  %v1572_v42 = vld [vmem:[%s16779_s2 + $0x2520] sm:$0xff]  ;;  %v15623_v50 = vcombine.low %v1844_v32, %v1852_v33  ;;  %v12235_v57 = vpop.f32.mrf.mxu1 }
 0x4ba   : > { %12598 = vmatprep.subr.bf16.mxu0 %v15432_v3  ;;  %v1580_v43 = vld [vmem:[%s16779_s2 + $0x2560] sm:$0xff] }
 0x4bb   : > { %v1828_v46 = vld [vmem:[%s16779_s2 + $0x2d20] sm:$0xff]  ;;  %v15352_v52 = vcombine.high %v1572_v42, %v1580_v43  ;;  %v15351_v34 = vcombine.low %v1572_v42, %v1580_v43  ;;  %v12315_v1 = vpop.f32.mrf.mxu1 }
 0x4bc   : > { %12640 = vmatpush1.bf16.msra.mxu1 %v15447_v51  ;;  %v1836_v22 = vld [vmem:[%s16779_s2 + $0x2d60] sm:$0xff] }
 0x4bd   : > { %12641 = vmatprep.subr.bf16.mxu1 %v15688_v4  ;;  %12599 = vmatpush2.bf16.msra.mxu0 %v15431_v7  ;;  %v15608_v53 = vcombine.high %v1828_v46, %v1836_v22  ;;  %v1556_v47 = vld [vmem:[%s16779_s2 + $0x24a0] sm:$0xff]  ;;  %v15607_v45 = vcombine.low %v1828_v46, %v1836_v22  ;;  %v12274_v7 = vpop.f32.mrf.mxu0  ;;  %v12317_v60 = vpop.f32.mrf.mxu1  ;;  %v18085_v46 = vld [vmem:[%s16779_s2 + $0x2e8] sm:$0xff] }
 0x4be   : > { %12600 = vmatprep.subr.bf16.mxu0 %v15416_v10  ;;  %v1564_v54 = vld [vmem:[%s16779_s2 + $0x24e0] sm:$0xff] }
 0x4bf   : > { %v1812_v58 = vld [vmem:[%s16779_s2 + $0x2ca0] sm:$0xff]  ;;  %v15336_v63 = vcombine.high %v1556_v47, %v1564_v54  ;;  %v15335_v6 = vcombine.low %v1556_v47, %v1564_v54  ;;  %v12276_v18 = vpop.f32.mrf.mxu0 }
 0x4c0   : > { %12642 = vmatpush2.bf16.msra.mxu1 %v15687_v9  ;;  %v1820_v59 = vld [vmem:[%s16779_s2 + $0x2ce0] sm:$0xff] }
 0x4c1   : > { %12643 = vmatprep.subr.bf16.mxu1 %v15672_v31  ;;  %12601 = vmatpush2.bf16.msra.mxu0 %v15415_v15  ;;  %v15592_v51 = vcombine.high %v1812_v58, %v1820_v59  ;;  %v1540_v3 = vld [vmem:[%s16779_s2 + $0x2420] sm:$0xff]  ;;  %v15591_v9 = vcombine.low %v1812_v58, %v1820_v59  ;;  %v12189_v31 = vadd.f32 %v12188_v30, %v18020_v2  ;;  %v501_v15 = vld [vmem:[%s16779_s2 + $0x3a8] sm:$0xff]  ;;  %v12278_v32 = vpop.f32.mrf.mxu0 }
 0x4c2   : > { %12602 = vmatprep.subr.bf16.mxu0 %v15400_v13  ;;  %v1548_v4 = vld [vmem:[%s16779_s2 + $0x2460] sm:$0xff]  ;;  %v12230_v13 = vadd.f32 %v18038_v23, %v12187_v5 }
 0x4c3   : > { %v1796_v37 = vld [vmem:[%s16779_s2 + $0x2c20] sm:$0xff]  ;;  %v15320_v10 = vcombine.high %v1540_v3, %v1548_v4  ;;  %v12232_v20 = vadd.f32 %v18044_v35, %v12189_v31 }
 0x4c4   : > { %12644 = vmatpush2.bf16.msra.mxu1 %v15671_v0  ;;  %v1804_v61 = vld [vmem:[%s16779_s2 + $0x2c60] sm:$0xff]  ;;  %v509_v0 = vld [vmem:[%s16779_s2 + $0x3e8] sm:$0xff]  ;;  %v12273_v8 = vadd.f32 %v12272_v62, %v12230_v13 }
 0x4c5   : > { %12645 = vmatprep.subr.bf16.mxu1 %v15656_v17  ;;  %12603 = vmatpush2.bf16.msra.mxu0 %v15399_v24  ;;  %v15576_v11 = vcombine.high %v1796_v37, %v1804_v61  ;;  %v2036_v12 = vld [vmem:[%s16779_s2 + $0x33a0] sm:$0xff]  ;;  %v15319_v17 = vcombine.low %v1540_v3, %v1548_v4  ;;  %v15575_v2 = vcombine.low %v1796_v37, %v1804_v61  ;;  %v12319_v24 = vpop.f32.mrf.mxu1  ;;  %v345_v37 = vld [vmem:[#allocation2 + $0x48] sm:$0xff] }
 0x4c6   : > { %12604 = vmatprep.subr.bf16.mxu0 %v15384_v26  ;;  %v2044_v14 = vld [vmem:[%s16779_s2 + $0x33e0] sm:$0xff]  ;;  %v14282_v23 = vcombine.high %v501_v15, %v509_v0  ;;  %v485_v26 = vld [vmem:[%s16779_s2 + $0x328] sm:$0xff]  ;;  %v12275_v29 = vadd.f32 %v12274_v7, %v12232_v20  ;;  %v14281_v16 = vcombine.low %v501_v15, %v509_v0  ;;  %v14249_v0 = vcombine.low %v18082_v44, %v18085_v46 }
 0x4c7   : > { %v15816_v19 = vcombine.high %v2036_v12, %v2044_v14  ;;  %v2028_v56 = vld [vmem:[%s16779_s2 + $0x3360] sm:$0xff]  ;;  %v15815_v30 = vcombine.low %v2036_v12, %v2044_v14  ;;  %v461_v7 = vld [vmem:[%s16779_s2 + $0x268] sm:$0xff]  ;;  %v360_v14 = vld [vmem:[#allocation2 + $0x70] sm:$0xff] }
 0x4c8   : > { %12646 = vmatpush2.bf16.msra.mxu1 %v15655_v25  ;;  %v2020_v25 = vld [vmem:[%s16779_s2 + $0x3320] sm:$0xff] }
 0x4c9   : > { %12647 = vmatprep.subr.bf16.mxu1 %v15640_v27  ;;  %12605 = vmatpush2.bf16.msra.mxu0 %v15383_v36  ;;  %v493_v27 = vld [vmem:[%s16779_s2 + $0x368] sm:$0xff]  ;;  %v15800_v33 = vcombine.high %v2020_v25, %v2028_v56  ;;  %v18076_v35 = vld [vmem:[%s16779_s2 + $0x32a0] sm:$0xff]  ;;  %v12236_v36 = vadd.f32 %v12235_v57, %v12193_v21 }
 0x4ca   : > { %12606 = vmatprep.subr.bf16.mxu0 %v15368_v39  ;;  %v12277_v39 = vadd.f32 %v12276_v18, %v12234_v28  ;;  %v14266_v42 = vcombine.high %v485_v26, %v493_v27  ;;  %v18079_v43 = vld [vmem:[%s16779_s2 + $0x32e0] sm:$0xff]  ;;  %v14265_v59 = vcombine.low %v485_v26, %v493_v27 }
 0x4cb   : > { %v16216_v48 = vld [vmem:[%s16771_s30 + $0x20] ss:$56 sps:$4 sm:$0xff]   ;;  %v15784_v57 = vcombine.high %v18076_v35, %v18079_v43  ;;  %v16218_v4 = vld [vmem:[%s16771_s30 + $0x34] ss:$56 sps:$4 sm:$0xff]   ;;  %v15783_v5 = vcombine.low %v18076_v35, %v18079_v43 }
 0x4cc   : > { %12648 = vmatpush2.bf16.msra.mxu1 %v15639_v38  ;;  %v12316_v38 = vadd.f32 %v12315_v1, %v12273_v8  ;;  %v16217_v54 = vld [vmem:[%s16771_s30 + $0x28] ss:$56 sps:$4 sm:$0xff]   ;;  %v12320_v62 = vadd.f32 %v12319_v24, %v12277_v39 }
 0x4cd   : > { %12649 = vmatprep.subr.bf16.mxu1 %v15624_v40  ;;  %12607 = vmatpush2.bf16.msra.mxu0 %v15367_v49  ;;  %v12321_v40 = vpop.f32.mrf.mxu1  ;;  %v15799_v49 = vcombine.low %v2020_v25, %v2028_v56  ;;  %v1996_v3 = vld [vmem:[%s16779_s2 + $0x3260] sm:$0xff]  ;;  %v437_v24 = vld [vmem:[%s16779_s2 + $0x1a8] sm:$0xff] }
 0x4ce   : > { %12608 = vmatprep.subr.bf16.mxu0 %v15352_v52  ;;  %v12279_v52 = vadd.f32 %v12278_v32, %v12236_v36  ;;  %v1980_v20 = vld [vmem:[%s16779_s2 + $0x31e0] sm:$0xff]  ;;  %v429_v35 = vld [vmem:[%s16779_s2 + $0x168] sm:$0xff] }
 0x4cf   : > { %v361_v21 = vld [vmem:[#allocation2 + $0xc0] sm:$0xff] }
 0x4d0   : > { %12650 = vmatpush2.bf16.msra.mxu1 %v15623_v50  ;;  %v12318_v50 = vadd.f32 %v12317_v60, %v12275_v29  ;;  %v1956_v32 = vld [vmem:[%s16779_s2 + $0x3120] sm:$0xff] }
 0x4d1   : > { %12651 = vmatprep.subr.bf16.mxu1 %v15608_v53  ;;  %12609 = vmatpush2.bf16.msra.mxu0 %v15351_v34  ;;  %v14250_v34 = vcombine.high %v18082_v44, %v18085_v46  ;;  %v1948_v43 = vld [vmem:[%s16779_s2 + $0x30e0] sm:$0xff]  ;;  %v405_v44 = vld [vmem:[%s16779_s2 + $0xa8] sm:$0xff] }
 0x4d2   : > { %12610 = vmatprep.subr.bf16.mxu0 %v15336_v63  ;;  %v413_v46 = vld [vmem:[%s16779_s2 + $0xe8] sm:$0xff] }
 0x4d4   : > { %12652 = vmatpush2.bf16.msra.mxu1 %v15607_v45 }
 0x4d5   : > { %12653 = vmatprep.subr.bf16.mxu1 %v15592_v51  ;;  %12611 = vmatpush2.bf16.msra.mxu0 %v15335_v6  ;;  %v1988_v51 = vld [vmem:[%s16779_s2 + $0x3220] sm:$0xff]  ;;  %v453_v6 = vld [vmem:[%s16779_s2 + $0x228] sm:$0xff] }
 0x4d6   : > { %12612 = vmatprep.subr.bf16.mxu0 %v15320_v10  ;;  %v12322_v10 = vadd.f32 %v12321_v40, %v12279_v52  ;;  %v15768_v13 = vcombine.high %v1988_v51, %v1996_v3  ;;  %v15767_v26 = vcombine.low %v1988_v51, %v1996_v3  ;;  %v14233_v27 = vcombine.low %v453_v6, %v461_v7  ;;  %v1924_v52 = vld [vmem:[%s16779_s2 + $0x3020] sm:$0xff] }
 0x4d8   : > { %12654 = vmatpush2.bf16.msra.mxu1 %v15591_v9  ;;  %v16219_v9 = vld [vmem:[%s16771_s30 + $0x4] ss:$56 sps:$4 sm:$0xff]  }
 0x4d9   : > { %12655 = vmatprep.subr.bf16.mxu1 %v15576_v11  ;;  %12613 = vmatpush2.bf16.msra.mxu0 %v15319_v17 }
 0x4da   : > { %12668 = vmatprep.subr.bf16.mxu0 %v15816_v19  ;;  %v1972_v19 = vld [vmem:[%s16779_s2 + $0x31a0] sm:$0xff] }
 0x4db   : > { %v15752_v28 = vcombine.high %v1972_v19, %v1980_v20  ;;  %v15751_v36 = vcombine.low %v1972_v19, %v1980_v20  ;;  %v589_v19 = vld [vmem:[%s16779_s2 + $0x668] sm:$0xff] }
 0x4dc   : > { %12656 = vmatpush2.bf16.msra.mxu1 %v15575_v2  ;;  %v12358_v22 = vpop.f32.mrf.mxu0  ;;  %12615 = vmatmul.mubr.bf16.vlgmr.msra.gmra.mxu0 %v16216_v48  ;;  %v14234_v2 = vcombine.high %v453_v6, %v461_v7  ;;  %v621_v6 = vld [vmem:[%s16779_s2 + $0x768] sm:$0xff] }
 0x4dd   : > { %12711 = vmatprep.subr.bf16.mxu1 %v14282_v23  ;;  %v12359_v53 = vadd.f32 %v12358_v22, %v12316_v38  ;;  %12669 = vmatpush1.bf16.msra.mxu0 %v15815_v30  ;;  %v445_v23 = vld [vmem:[%s16779_s2 + $0x1e8] sm:$0xff] }
 0x4de   : > { %v12360_v58 = vpop.f32.mrf.mxu0  ;;  %12670 = vmatprep.subr.bf16.mxu0 %v15800_v33  ;;  %12700 = vmatprep.mubr.bf16.mxu0 %v16218_v4  ;;  %v14218_v30 = vcombine.high %v437_v24, %v445_v23  ;;  %v421_v33 = vld [vmem:[%s16779_s2 + $0x128] sm:$0xff]  ;;  %v14217_v38 = vcombine.low %v437_v24, %v445_v23  ;;  %v2100_v23 = vld [vmem:[%s16779_s2 + $0x35a0] sm:$0xff] }
 0x4df   : > { %v12401_v47 = vpop.f32.mrf.mxu1  ;;  %12658 = vmatmul.mubr.bf16.vlgmr.msra.gmra.mxu1 %v16217_v54  ;;  %v12361_v63 = vadd.f32 %v12360_v58, %v12318_v50  ;;  %v14202_v40 = vcombine.high %v421_v33, %v429_v35  ;;  %v14201_v48 = vcombine.low %v421_v33, %v429_v35  ;;  %v14186_v50 = vcombine.high %v405_v44, %v413_v46  ;;  %v397_v54 = vld [vmem:[%s16779_s2 + $0x68] sm:$0xff] }
 0x4e0   : > { %12712 = vmatpush1.bf16.msra.mxu1 %v14281_v16  ;;  %v12402_v45 = vadd.f32 %v12401_v47, %v12359_v53  ;;  %v12362_v61 = vpop.f32.mrf.mxu0  ;;  %12743 = vmatprep.mubr.bf16.mxu1 %v16219_v9  ;;  %v1964_v16 = vld [vmem:[%s16779_s2 + $0x3160] sm:$0xff]  ;;  %v389_v47 = vld [vmem:[%s16779_s2 + $0x28] sm:$0xff]  ;;  %v14185_v58 = vcombine.low %v405_v44, %v413_v46 }
 0x4e1   : > { %v12403_v1 = vpop.f32.mrf.mxu1  ;;  %12713 = vmatprep.subr.bf16.mxu1 %v14266_v42  ;;  %v12363_v11 = vadd.f32 %v12362_v61, %v12320_v62  ;;  %12671 = vmatpush1.bf16.msra.mxu0 %v15799_v49  ;;  %v15736_v39 = vcombine.high %v1956_v32, %v1964_v16  ;;  %v1940_v42 = vld [vmem:[%s16779_s2 + $0x30a0] sm:$0xff]  ;;  %v15735_v22 = vcombine.low %v1956_v32, %v1964_v16  ;;  %v549_v33 = vld [vmem:[%s16779_s2 + $0x528] sm:$0xff] }
 0x4e2   : > { %v13620_v31 = vadd.f32 %v12402_v45, %v344_v55  ;;  %v12404_v60 = vadd.f32 %v12403_v1, %v12361_v63  ;;  %v12364_v15 = vpop.f32.mrf.mxu0  ;;  %12672 = vmatprep.subr.bf16.mxu0 %v15784_v57  ;;  %v15720_v49 = vcombine.high %v1940_v42, %v1948_v43  ;;  %v1932_v53 = vld [vmem:[%s16779_s2 + $0x3060] sm:$0xff]  ;;  %v15719_v55 = vcombine.low %v1940_v42, %v1948_v43  ;;  %v629_v45 = vld [vmem:[%s16779_s2 + $0x7a8] sm:$0xff] }
 0x4e3   : > { %v12405_v12 = vpop.f32.mrf.mxu1  ;;  %v12365_v18 = vadd.f32 %v12364_v15, %v12322_v10  ;;  %v14170_v57 = vcombine.high %v389_v47, %v397_v54  ;;  %v2172_v62 = vld [vmem:[%s16779_s2 + $0x37e0] sm:$0xff]  ;;  %v637_v63 = vld [vmem:[%s16779_s2 + $0x7e8] sm:$0xff]  ;;  %v15703_v1 = vcombine.low %v1924_v52, %v1932_v53  ;;  %v14169_v51 = vcombine.low %v389_v47, %v397_v54 }
 0x4e4   : > { %12714 = vmatpush1.bf16.msra.mxu1 %v14265_v59  ;;  %13652 = vst [vmem:[#allocation2 + $0x30] sm:$0xff] %v13620_v31  ;;  %v13621_v41 = vadd.f32 %v12404_v60, %v345_v37  ;;  %v12406_v17 = vadd.f32 %v12405_v12, %v12363_v11  ;;  %v15704_v59 = vcombine.high %v1924_v52, %v1932_v53  ;;  %v2148_v37 = vld [vmem:[%s16779_s2 + $0x3720] sm:$0xff]  ;;  %v597_v12 = vld [vmem:[%s16779_s2 + $0x6a8] sm:$0xff] }
 0x4e5   : > { %12715 = vmatprep.subr.bf16.mxu1 %v14250_v34  ;;  %v12407_v8 = vpop.f32.mrf.mxu1  ;;  %12673 = vmatpush1.bf16.msra.mxu0 %v15783_v5  ;;  %v2164_v34 = vld [vmem:[%s16779_s2 + $0x37a0] sm:$0xff]  ;;  %v14410_v4 = vcombine.high %v629_v45, %v637_v63  ;;  %v613_v5 = vld [vmem:[%s16779_s2 + $0x728] sm:$0xff]  ;;  %v14409_v9 = vcombine.low %v629_v45, %v637_v63 }
 0x4e6   : > { %13653 = vst [vmem:[#allocation2 + $0x48] sm:$0xff] %v13621_v41  ;;  %v13636_v25 = vadd.f32 %v12406_v17, %v360_v14  ;;  %v12408_v56 = vadd.f32 %v12407_v8, %v12365_v18  ;;  %12674 = vmatprep.subr.bf16.mxu0 %v15768_v13  ;;  %v15944_v3 = vcombine.high %v2164_v34, %v2172_v62  ;;  %v2156_v61 = vld [vmem:[%s16779_s2 + $0x3760] sm:$0xff]  ;;  %v605_v14 = vld [vmem:[%s16779_s2 + $0x6e8] sm:$0xff] }
 0x4e7   : > { %v15943_v7 = vcombine.low %v2164_v34, %v2172_v62  ;;  %v15928_v10 = vcombine.high %v2148_v37, %v2156_v61  ;;  %v14394_v31 = vcombine.high %v613_v5, %v621_v6  ;;  %v2132_v60 = vld [vmem:[%s16779_s2 + $0x36a0] sm:$0xff]  ;;  %v15927_v15 = vcombine.low %v2148_v37, %v2156_v61  ;;  %v557_v35 = vld [vmem:[%s16779_s2 + $0x568] sm:$0xff] }
 0x4e8   : > { %12716 = vmatpush1.bf16.msra.mxu1 %v14249_v0  ;;  %13668 = vst [vmem:[#allocation2 + $0x70] sm:$0xff] %v13636_v25  ;;  %v13637_v29 = vadd.f32 %v12408_v56, %v361_v21  ;;  %v2140_v11 = vld [vmem:[%s16779_s2 + $0x36e0] sm:$0xff]  ;;  %v14393_v0 = vcombine.low %v613_v5, %v621_v6  ;;  %v14378_v41 = vcombine.high %v597_v12, %v605_v14  ;;  %v565_v56 = vld [vmem:[%s16779_s2 + $0x5a8] sm:$0xff] }
 0x4e9   : > { %12717 = vmatprep.subr.bf16.mxu1 %v14234_v2  ;;  %12675 = vmatpush1.bf16.msra.mxu0 %v15767_v26  ;;  %v15912_v13 = vcombine.high %v2132_v60, %v2140_v11  ;;  %v2116_v17 = vld [vmem:[%s16779_s2 + $0x3620] sm:$0xff]  ;;  %v581_v2 = vld [vmem:[%s16779_s2 + $0x628] sm:$0xff]  ;;  %v15911_v20 = vcombine.low %v2132_v60, %v2140_v11  ;;  %v14377_v21 = vcombine.low %v597_v12, %v605_v14 }
 0x4ea   : > { %13669 = vst [vmem:[#allocation2 + $0xc0] sm:$0xff] %v13637_v29  ;;  %12676 = vmatprep.subr.bf16.mxu0 %v15752_v28  ;;  %v2124_v18 = vld [vmem:[%s16779_s2 + $0x3660] sm:$0xff]  ;;  %v14362_v24 = vcombine.high %v581_v2, %v589_v19  ;;  %v573_v26 = vld [vmem:[%s16779_s2 + $0x5e8] sm:$0xff]  ;;  %v14361_v28 = vcombine.low %v581_v2, %v589_v19 }
 0x4eb   : > { %v15896_v8 = vcombine.high %v2116_v17, %v2124_v18  ;;  %v2108_v25 = vld [vmem:[%s16779_s2 + $0x35e0] sm:$0xff]  ;;  %v533_v44 = vld [vmem:[%s16779_s2 + $0x4a8] sm:$0xff] }
 0x4ec   : > { %12718 = vmatpush1.bf16.msra.mxu1 %v14233_v27  ;;  %v15895_v27 = vcombine.low %v2116_v17, %v2124_v18  ;;  %v15880_v29 = vcombine.high %v2100_v23, %v2108_v25  ;;  %v2084_v32 = vld [vmem:[%s16779_s2 + $0x3520] sm:$0xff]  ;;  %v541_v46 = vld [vmem:[%s16779_s2 + $0x4e8] sm:$0xff] }
 0x4ed   : > { %12719 = vmatprep.subr.bf16.mxu1 %v14218_v30  ;;  %12677 = vmatpush1.bf16.msra.mxu0 %v15751_v36  ;;  %v14346_v30 = vcombine.high %v565_v56, %v573_v26  ;;  %v2092_v16 = vld [vmem:[%s16779_s2 + $0x3560] sm:$0xff]  ;;  %v15879_v36 = vcombine.low %v2100_v23, %v2108_v25  ;;  %v517_v47 = vld [vmem:[%s16779_s2 + $0x428] sm:$0xff] }
 0x4ee   : > { %12678 = vmatprep.subr.bf16.mxu0 %v15736_v39  ;;  %v15864_v39 = vcombine.high %v2084_v32, %v2092_v16  ;;  %v2068_v42 = vld [vmem:[%s16779_s2 + $0x34a0] sm:$0xff]  ;;  %v525_v54 = vld [vmem:[%s16779_s2 + $0x468] sm:$0xff] }
 0x4ef   : > { %v2076_v43 = vld [vmem:[%s16779_s2 + $0x34e0] sm:$0xff]  ;;  %v757_v34 = vld [vmem:[%s16779_s2 + $0xba8] sm:$0xff] }
 0x4f0   : > { %12720 = vmatpush1.bf16.msra.mxu1 %v14217_v38  ;;  %v14345_v38 = vcombine.low %v565_v56, %v573_v26  ;;  %v2052_v52 = vld [vmem:[%s16779_s2 + $0x3420] sm:$0xff]  ;;  %v765_v62 = vld [vmem:[%s16779_s2 + $0xbe8] sm:$0xff] }
 0x4f1   : > { %12721 = vmatprep.subr.bf16.mxu1 %v14202_v40  ;;  %12679 = vmatpush1.bf16.msra.mxu0 %v15735_v22  ;;  %v14330_v40 = vcombine.high %v549_v33, %v557_v35  ;;  %v15863_v22 = vcombine.low %v2084_v32, %v2092_v16  ;;  %v2060_v53 = vld [vmem:[%s16779_s2 + $0x3460] sm:$0xff]  ;;  %v1013_v45 = vld [vmem:[%s16779_s2 + $0x13a8] sm:$0xff] }
 0x4f2   : > { %12680 = vmatprep.subr.bf16.mxu0 %v15720_v49  ;;  %v15848_v49 = vcombine.high %v2068_v42, %v2076_v43  ;;  %v1021_v63 = vld [vmem:[%s16779_s2 + $0x13e8] sm:$0xff] }
 0x4f3   : > { %v741_v37 = vld [vmem:[%s16779_s2 + $0xb28] sm:$0xff] }
 0x4f4   : > { %12722 = vmatpush1.bf16.msra.mxu1 %v14201_v48  ;;  %v14329_v48 = vcombine.low %v549_v33, %v557_v35  ;;  %v749_v61 = vld [vmem:[%s16779_s2 + $0xb68] sm:$0xff] }
 0x4f5   : > { %12723 = vmatprep.subr.bf16.mxu1 %v14186_v50  ;;  %12681 = vmatpush1.bf16.msra.mxu0 %v15719_v55  ;;  %v14314_v50 = vcombine.high %v533_v44, %v541_v46  ;;  %v15847_v55 = vcombine.low %v2068_v42, %v2076_v43  ;;  %v997_v5 = vld [vmem:[%s16779_s2 + $0x1328] sm:$0xff] }
 0x4f6   : > { %12682 = vmatprep.subr.bf16.mxu0 %v15704_v59  ;;  %v15832_v59 = vcombine.high %v2052_v52, %v2060_v53  ;;  %v1005_v6 = vld [vmem:[%s16779_s2 + $0x1368] sm:$0xff] }
 0x4f7   : > { %v725_v60 = vld [vmem:[%s16779_s2 + $0xaa8] sm:$0xff] }
 0x4f8   : > { %12724 = vmatpush1.bf16.msra.mxu1 %v14185_v58  ;;  %v14313_v58 = vcombine.low %v533_v44, %v541_v46  ;;  %v733_v11 = vld [vmem:[%s16779_s2 + $0xae8] sm:$0xff] }
 0x4f9   : > { %12725 = vmatprep.subr.bf16.mxu1 %v14170_v57  ;;  %12683 = vmatpush1.bf16.msra.mxu0 %v15703_v1  ;;  %v14298_v57 = vcombine.high %v517_v47, %v525_v54  ;;  %v15831_v1 = vcombine.low %v2052_v52, %v2060_v53  ;;  %v16220_v12 = vld [vmem:[%s16771_s30 + $0x30] ss:$56 sps:$4 sm:$0xff]   ;;  %v14506_v17 = vcombine.high %v725_v60, %v733_v11 }
 0x4fa   : > { %12684 = vmatprep.subr.bf16.mxu0 %v15944_v3  ;;  %v14538_v3 = vcombine.high %v757_v34, %v765_v62  ;;  %v981_v14 = vld [vmem:[%s16779_s2 + $0x12a8] sm:$0xff]  ;;  %v14505_v23 = vcombine.low %v725_v60, %v733_v11 }
 0x4fb   : > { %v709_v2 = vld [vmem:[%s16779_s2 + $0xa28] sm:$0xff] }
 0x4fc   : > { %12726 = vmatpush1.bf16.msra.mxu1 %v14169_v51  ;;  %v14297_v51 = vcombine.low %v517_v47, %v525_v54  ;;  %v717_v19 = vld [vmem:[%s16779_s2 + $0xa68] sm:$0xff] }
 0x4fd   : > { %12727 = vmatprep.subr.bf16.mxu1 %v14410_v4  ;;  %12685 = vmatpush2.bf16.msra.mxu0 %v15943_v7  ;;  %v14794_v4 = vcombine.high %v1013_v45, %v1021_v63  ;;  %v14537_v7 = vcombine.low %v757_v34, %v765_v62  ;;  %v14490_v56 = vcombine.high %v709_v2, %v717_v19 }
 0x4fe   : > { %12686 = vmatprep.subr.bf16.mxu0 %v15928_v10  ;;  %v14522_v10 = vcombine.high %v741_v37, %v749_v61  ;;  %v14489_v32 = vcombine.low %v709_v2, %v717_v19 }
 0x500   : > { %12728 = vmatpush2.bf16.msra.mxu1 %v14409_v9  ;;  %v14793_v9 = vcombine.low %v1013_v45, %v1021_v63 }
 0x501   : > { %12729 = vmatprep.subr.bf16.mxu1 %v14394_v31  ;;  %12687 = vmatpush2.bf16.msra.mxu0 %v15927_v15  ;;  %v14778_v31 = vcombine.high %v997_v5, %v1005_v6  ;;  %v989_v15 = vld [vmem:[%s16779_s2 + $0x12e8] sm:$0xff] }
 0x502   : > { %12688 = vmatprep.subr.bf16.mxu0 %v15912_v13  ;;  %v14521_v13 = vcombine.low %v741_v37, %v749_v61  ;;  %v14762_v18 = vcombine.high %v981_v14, %v989_v15  ;;  %v14761_v25 = vcombine.low %v981_v14, %v989_v15  ;;  %v853_v15 = vld [vmem:[%s16779_s2 + $0xea8] sm:$0xff] }
 0x504   : > { %12730 = vmatpush2.bf16.msra.mxu1 %v14393_v0  ;;  %v16221_v0 = vld [vmem:[%s16771_s30] ss:$56 sps:$4 sm:$0xff]  }
 0x505   : > { %12731 = vmatprep.subr.bf16.mxu1 %v14378_v41  ;;  %12689 = vmatpush2.bf16.msra.mxu0 %v15911_v20  ;;  %v14777_v41 = vcombine.low %v997_v5, %v1005_v6  ;;  %v16222_v20 = vld [vmem:[%s16771_s30 + $0xc] ss:$56 sps:$4 sm:$0xff]  }
 0x506   : > { %12690 = vmatprep.subr.bf16.mxu0 %v15896_v8  ;;  %v973_v8 = vld [vmem:[%s16779_s2 + $0x1268] sm:$0xff] }
 0x508   : > { %12732 = vmatpush2.bf16.msra.mxu1 %v14377_v21  ;;  %v965_v21 = vld [vmem:[%s16779_s2 + $0x1228] sm:$0xff] }
 0x509   : > { %12733 = vmatprep.subr.bf16.mxu1 %v14362_v24  ;;  %12691 = vmatpush2.bf16.msra.mxu0 %v15895_v27  ;;  %v16223_v24 = vld [vmem:[%s16771_s30 + $0x14] ss:$56 sps:$4 sm:$0xff]   ;;  %v14746_v26 = vcombine.high %v965_v21, %v973_v8  ;;  %v14745_v16 = vcombine.low %v965_v21, %v973_v8 }
 0x50a   : > { %12692 = vmatprep.subr.bf16.mxu0 %v15880_v29  ;;  %v693_v27 = vld [vmem:[%s16779_s2 + $0x9a8] sm:$0xff] }
 0x50b   : > { %v949_v29 = vld [vmem:[%s16779_s2 + $0x11a8] sm:$0xff] }
 0x50c   : > { %12734 = vmatpush2.bf16.msra.mxu1 %v14361_v28  ;;  %v701_v28 = vld [vmem:[%s16779_s2 + $0x9e8] sm:$0xff] }
 0x50d   : > { %12735 = vmatprep.subr.bf16.mxu1 %v14346_v30  ;;  %12693 = vmatpush2.bf16.msra.mxu0 %v15879_v36  ;;  %v957_v30 = vld [vmem:[%s16779_s2 + $0x11e8] sm:$0xff]  ;;  %v14474_v33 = vcombine.high %v693_v27, %v701_v28  ;;  %v14473_v42 = vcombine.low %v693_v27, %v701_v28 }
 0x50e   : > { %12694 = vmatprep.subr.bf16.mxu0 %v15864_v39  ;;  %v14730_v35 = vcombine.high %v949_v29, %v957_v30  ;;  %v677_v36 = vld [vmem:[%s16779_s2 + $0x928] sm:$0xff]  ;;  %v14729_v43 = vcombine.low %v949_v29, %v957_v30 }
 0x50f   : > { %v933_v39 = vld [vmem:[%s16779_s2 + $0x1128] sm:$0xff] }
 0x510   : > { %12736 = vmatpush2.bf16.msra.mxu1 %v14345_v38  ;;  %v685_v38 = vld [vmem:[%s16779_s2 + $0x968] sm:$0xff] }
 0x511   : > { %12737 = vmatprep.subr.bf16.mxu1 %v14330_v40  ;;  %12695 = vmatpush2.bf16.msra.mxu0 %v15863_v22  ;;  %v941_v40 = vld [vmem:[%s16779_s2 + $0x1168] sm:$0xff]  ;;  %v14458_v44 = vcombine.high %v677_v36, %v685_v38  ;;  %v14457_v52 = vcombine.low %v677_v36, %v685_v38 }
 0x512   : > { %12696 = vmatprep.subr.bf16.mxu0 %v15848_v49  ;;  %v14714_v46 = vcombine.high %v933_v39, %v941_v40  ;;  %v661_v22 = vld [vmem:[%s16779_s2 + $0x8a8] sm:$0xff]  ;;  %v14713_v53 = vcombine.low %v933_v39, %v941_v40 }
 0x513   : > { %v917_v49 = vld [vmem:[%s16779_s2 + $0x10a8] sm:$0xff] }
 0x514   : > { %12738 = vmatpush2.bf16.msra.mxu1 %v14329_v48  ;;  %v669_v48 = vld [vmem:[%s16779_s2 + $0x8e8] sm:$0xff] }
 0x515   : > { %12739 = vmatprep.subr.bf16.mxu1 %v14314_v50  ;;  %12697 = vmatpush2.bf16.msra.mxu0 %v15847_v55  ;;  %v925_v50 = vld [vmem:[%s16779_s2 + $0x10e8] sm:$0xff]  ;;  %v14442_v47 = vcombine.high %v661_v22, %v669_v48  ;;  %v14441_v34 = vcombine.low %v661_v22, %v669_v48 }
 0x516   : > { %12698 = vmatprep.subr.bf16.mxu0 %v15832_v59  ;;  %v14698_v54 = vcombine.high %v917_v49, %v925_v50  ;;  %v645_v55 = vld [vmem:[%s16779_s2 + $0x828] sm:$0xff]  ;;  %v14697_v62 = vcombine.low %v917_v49, %v925_v50 }
 0x517   : > { %v901_v59 = vld [vmem:[%s16779_s2 + $0x1028] sm:$0xff] }
 0x518   : > { %12740 = vmatpush2.bf16.msra.mxu1 %v14313_v58  ;;  %v653_v58 = vld [vmem:[%s16779_s2 + $0x868] sm:$0xff] }
 0x519   : > { %12741 = vmatprep.subr.bf16.mxu1 %v14298_v57  ;;  %12699 = vmatpush2.bf16.msra.mxu0 %v15831_v1  ;;  %v909_v57 = vld [vmem:[%s16779_s2 + $0x1068] sm:$0xff]  ;;  %v14426_v45 = vcombine.high %v645_v55, %v653_v58  ;;  %v14425_v37 = vcombine.low %v645_v55, %v653_v58 }
 0x51a   : > { %12754 = vmatprep.subr.bf16.mxu0 %v14538_v3  ;;  %v14682_v63 = vcombine.high %v901_v59, %v909_v57  ;;  %v885_v1 = vld [vmem:[%s16779_s2 + $0xfa8] sm:$0xff]  ;;  %v14681_v61 = vcombine.low %v901_v59, %v909_v57 }
 0x51b   : > { %v1141_v3 = vld [vmem:[%s16779_s2 + $0x17a8] sm:$0xff] }
 0x51c   : > { %12742 = vmatpush2.bf16.msra.mxu1 %v14297_v51  ;;  %12701 = vmatmul.mubr.bf16.vlgmr.msra.gmra.mxu0 %v16220_v12  ;;  %v893_v51 = vld [vmem:[%s16779_s2 + $0xfe8] sm:$0xff] }
 0x51d   : > { %12797 = vmatprep.subr.bf16.mxu1 %v14794_v4  ;;  %12755 = vmatpush1.bf16.msra.mxu0 %v14537_v7  ;;  %v1149_v4 = vld [vmem:[%s16779_s2 + $0x17e8] sm:$0xff]  ;;  %v14666_v5 = vcombine.high %v885_v1, %v893_v51  ;;  %v14665_v60 = vcombine.low %v885_v1, %v893_v51 }
 0x51e   : > { %12756 = vmatprep.subr.bf16.mxu0 %v14522_v10  ;;  %12786 = vmatprep.mubr.bf16.mxu0 %v16222_v20  ;;  %v14922_v6 = vcombine.high %v1141_v3, %v1149_v4  ;;  %v869_v7 = vld [vmem:[%s16779_s2 + $0xf28] sm:$0xff]  ;;  %v14921_v11 = vcombine.low %v1141_v3, %v1149_v4 }
 0x51f   : > { %12744 = vmatmul.mubr.bf16.vlgmr.msra.gmra.mxu1 %v16221_v0  ;;  %v1125_v10 = vld [vmem:[%s16779_s2 + $0x1728] sm:$0xff] }
 0x520   : > { %12798 = vmatpush1.bf16.msra.mxu1 %v14793_v9  ;;  %12829 = vmatprep.mubr.bf16.mxu1 %v16223_v24  ;;  %v877_v9 = vld [vmem:[%s16779_s2 + $0xf68] sm:$0xff] }
 0x521   : > { %12799 = vmatprep.subr.bf16.mxu1 %v14778_v31  ;;  %12757 = vmatpush1.bf16.msra.mxu0 %v14521_v13  ;;  %v1133_v31 = vld [vmem:[%s16779_s2 + $0x1768] sm:$0xff]  ;;  %v14650_v12 = vcombine.high %v869_v7, %v877_v9 }
 0x522   : > { %12758 = vmatprep.subr.bf16.mxu0 %v14506_v17  ;;  %v14906_v14 = vcombine.high %v1125_v10, %v1133_v31  ;;  %v861_v0 = vld [vmem:[%s16779_s2 + $0xee8] sm:$0xff]  ;;  %v14649_v17 = vcombine.low %v869_v7, %v877_v9 }
 0x523   : > { %v1109_v13 = vld [vmem:[%s16779_s2 + $0x16a8] sm:$0xff]  ;;  %v14634_v2 = vcombine.high %v853_v15, %v861_v0 }
 0x524   : > { %12800 = vmatpush1.bf16.msra.mxu1 %v14777_v41  ;;  %v1117_v41 = vld [vmem:[%s16779_s2 + $0x16e8] sm:$0xff] }
 0x525   : > { %12801 = vmatprep.subr.bf16.mxu1 %v14762_v18  ;;  %12759 = vmatpush1.bf16.msra.mxu0 %v14505_v23  ;;  %v14905_v18 = vcombine.low %v1125_v10, %v1133_v31  ;;  %v14890_v19 = vcombine.high %v1109_v13, %v1117_v41  ;;  %v837_v20 = vld [vmem:[%s16779_s2 + $0xe28] sm:$0xff]  ;;  %v14633_v23 = vcombine.low %v853_v15, %v861_v0 }
 0x526   : > { %12760 = vmatprep.subr.bf16.mxu0 %v14490_v56  ;;  %v845_v21 = vld [vmem:[%s16779_s2 + $0xe68] sm:$0xff] }
 0x527   : > { %v1093_v8 = vld [vmem:[%s16779_s2 + $0x1628] sm:$0xff]  ;;  %v14618_v56 = vcombine.high %v837_v20, %v845_v21 }
 0x528   : > { %12802 = vmatpush1.bf16.msra.mxu1 %v14761_v25  ;;  %v1101_v24 = vld [vmem:[%s16779_s2 + $0x1668] sm:$0xff]  ;;  %v14889_v25 = vcombine.low %v1109_v13, %v1117_v41 }
 0x529   : > { %12803 = vmatprep.subr.bf16.mxu1 %v14746_v26  ;;  %12761 = vmatpush1.bf16.msra.mxu0 %v14489_v32  ;;  %v14874_v26 = vcombine.high %v1093_v8, %v1101_v24  ;;  %v821_v27 = vld [vmem:[%s16779_s2 + $0xda8] sm:$0xff]  ;;  %v14617_v32 = vcombine.low %v837_v20, %v845_v21 }
 0x52a   : > { %12762 = vmatprep.subr.bf16.mxu0 %v14474_v33  ;;  %v829_v28 = vld [vmem:[%s16779_s2 + $0xde8] sm:$0xff] }
 0x52b   : > { %v1077_v29 = vld [vmem:[%s16779_s2 + $0x15a8] sm:$0xff]  ;;  %v14602_v33 = vcombine.high %v821_v27, %v829_v28 }
 0x52c   : > { %12804 = vmatpush1.bf16.msra.mxu1 %v14745_v16  ;;  %v1085_v30 = vld [vmem:[%s16779_s2 + $0x15e8] sm:$0xff]  ;;  %v14873_v16 = vcombine.low %v1093_v8, %v1101_v24 }
 0x52d   : > { %12805 = vmatprep.subr.bf16.mxu1 %v14730_v35  ;;  %12763 = vmatpush1.bf16.msra.mxu0 %v14473_v42  ;;  %v14858_v35 = vcombine.high %v1077_v29, %v1085_v30  ;;  %v805_v36 = vld [vmem:[%s16779_s2 + $0xd28] sm:$0xff]  ;;  %v14601_v42 = vcombine.low %v821_v27, %v829_v28 }
 0x52e   : > { %12764 = vmatprep.subr.bf16.mxu0 %v14458_v44  ;;  %v813_v38 = vld [vmem:[%s16779_s2 + $0xd68] sm:$0xff] }
 0x52f   : > { %v1061_v39 = vld [vmem:[%s16779_s2 + $0x1528] sm:$0xff]  ;;  %v14586_v44 = vcombine.high %v805_v36, %v813_v38 }
 0x530   : > { %12806 = vmatpush1.bf16.msra.mxu1 %v14729_v43  ;;  %v1069_v40 = vld [vmem:[%s16779_s2 + $0x1568] sm:$0xff]  ;;  %v14857_v43 = vcombine.low %v1077_v29, %v1085_v30 }
 0x531   : > { %12807 = vmatprep.subr.bf16.mxu1 %v14714_v46  ;;  %12765 = vmatpush1.bf16.msra.mxu0 %v14457_v52  ;;  %v14842_v46 = vcombine.high %v1061_v39, %v1069_v40  ;;  %v789_v22 = vld [vmem:[%s16779_s2 + $0xca8] sm:$0xff]  ;;  %v14585_v52 = vcombine.low %v805_v36, %v813_v38 }
 0x532   : > { %12766 = vmatprep.subr.bf16.mxu0 %v14442_v47  ;;  %v797_v48 = vld [vmem:[%s16779_s2 + $0xce8] sm:$0xff] }
 0x533   : > { %v1045_v49 = vld [vmem:[%s16779_s2 + $0x14a8] sm:$0xff]  ;;  %v14570_v47 = vcombine.high %v789_v22, %v797_v48 }
 0x534   : > { %12808 = vmatpush1.bf16.msra.mxu1 %v14713_v53  ;;  %v1053_v50 = vld [vmem:[%s16779_s2 + $0x14e8] sm:$0xff]  ;;  %v14841_v53 = vcombine.low %v1061_v39, %v1069_v40 }
 0x535   : > { %12809 = vmatprep.subr.bf16.mxu1 %v14698_v54  ;;  %12767 = vmatpush1.bf16.msra.mxu0 %v14441_v34  ;;  %v14826_v54 = vcombine.high %v1045_v49, %v1053_v50  ;;  %v773_v55 = vld [vmem:[%s16779_s2 + $0xc28] sm:$0xff]  ;;  %v14569_v34 = vcombine.low %v789_v22, %v797_v48 }
 0x536   : > { %12768 = vmatprep.subr.bf16.mxu0 %v14426_v45  ;;  %v781_v58 = vld [vmem:[%s16779_s2 + $0xc68] sm:$0xff] }
 0x537   : > { %v1029_v59 = vld [vmem:[%s16779_s2 + $0x1428] sm:$0xff]  ;;  %v14554_v45 = vcombine.high %v773_v55, %v781_v58 }
 0x538   : > { %12810 = vmatpush1.bf16.msra.mxu1 %v14697_v62  ;;  %v1037_v57 = vld [vmem:[%s16779_s2 + $0x1468] sm:$0xff]  ;;  %v14825_v62 = vcombine.low %v1045_v49, %v1053_v50 }
 0x539   : > { %12811 = vmatprep.subr.bf16.mxu1 %v14682_v63  ;;  %12769 = vmatpush1.bf16.msra.mxu0 %v14425_v37  ;;  %v14810_v63 = vcombine.high %v1029_v59, %v1037_v57  ;;  %v1269_v1 = vld [vmem:[%s16779_s2 + $0x1ba8] sm:$0xff]  ;;  %v14553_v37 = vcombine.low %v773_v55, %v781_v58 }
 0x53a   : > { %12770 = vmatprep.subr.bf16.mxu0 %v14666_v5  ;;  %v1277_v51 = vld [vmem:[%s16779_s2 + $0x1be8] sm:$0xff] }
 0x53b   : > { %v1525_v3 = vld [vmem:[%s16779_s2 + $0x23a8] sm:$0xff]  ;;  %v15050_v5 = vcombine.high %v1269_v1, %v1277_v51 }
 0x53c   : > { %12812 = vmatpush1.bf16.msra.mxu1 %v14681_v61  ;;  %v1533_v4 = vld [vmem:[%s16779_s2 + $0x23e8] sm:$0xff]  ;;  %v14809_v61 = vcombine.low %v1029_v59, %v1037_v57 }
 0x53d   : > { %12813 = vmatprep.subr.bf16.mxu1 %v14922_v6  ;;  %12771 = vmatpush2.bf16.msra.mxu0 %v14665_v60  ;;  %v15306_v6 = vcombine.high %v1525_v3, %v1533_v4  ;;  %v1253_v7 = vld [vmem:[%s16779_s2 + $0x1b28] sm:$0xff]  ;;  %v15049_v60 = vcombine.low %v1269_v1, %v1277_v51 }
 0x53e   : > { %12772 = vmatprep.subr.bf16.mxu0 %v14650_v12  ;;  %v1261_v9 = vld [vmem:[%s16779_s2 + $0x1b68] sm:$0xff] }
 0x53f   : > { %v1509_v10 = vld [vmem:[%s16779_s2 + $0x2328] sm:$0xff]  ;;  %v15034_v12 = vcombine.high %v1253_v7, %v1261_v9 }
 0x540   : > { %12814 = vmatpush2.bf16.msra.mxu1 %v14921_v11  ;;  %v1517_v31 = vld [vmem:[%s16779_s2 + $0x2368] sm:$0xff]  ;;  %v15305_v11 = vcombine.low %v1525_v3, %v1533_v4 }
 0x541   : > { %12815 = vmatprep.subr.bf16.mxu1 %v14906_v14  ;;  %12773 = vmatpush2.bf16.msra.mxu0 %v14649_v17  ;;  %v15290_v14 = vcombine.high %v1509_v10, %v1517_v31  ;;  %v1237_v15 = vld [vmem:[%s16779_s2 + $0x1aa8] sm:$0xff] }
 0x542   : > { %12774 = vmatprep.subr.bf16.mxu0 %v14634_v2  ;;  %v1245_v0 = vld [vmem:[%s16779_s2 + $0x1ae8] sm:$0xff]  ;;  %v15033_v2 = vcombine.low %v1253_v7, %v1261_v9 }
 0x543   : > { %v16224_v13 = vld [vmem:[%s16771_s30 + $0x8] ss:$56 sps:$4 sm:$0xff]   ;;  %v15018_v20 = vcombine.high %v1237_v15, %v1245_v0  ;;  %v15017_v27 = vcombine.low %v1237_v15, %v1245_v0 }
 0x544   : > { %12816 = vmatpush2.bf16.msra.mxu1 %v14905_v18  ;;  %v1493_v41 = vld [vmem:[%s16779_s2 + $0x22a8] sm:$0xff] }
 0x545   : > { %12817 = vmatprep.subr.bf16.mxu1 %v14890_v19  ;;  %12775 = vmatpush2.bf16.msra.mxu0 %v14633_v23  ;;  %v1501_v17 = vld [vmem:[%s16779_s2 + $0x22e8] sm:$0xff]  ;;  %v15289_v19 = vcombine.low %v1509_v10, %v1517_v31 }
 0x546   : > { %12776 = vmatprep.subr.bf16.mxu0 %v14618_v56  ;;  %v16225_v18 = vld [vmem:[%s16771_s30 + $0x10] ss:$56 sps:$4 sm:$0xff]   ;;  %v15274_v21 = vcombine.high %v1493_v41, %v1501_v17  ;;  %v16226_v23 = vld [vmem:[%s16771_s30 + $0x1c] ss:$56 sps:$4 sm:$0xff]   ;;  %v15273_v28 = vcombine.low %v1493_v41, %v1501_v17 }
 0x547   : > { %v1221_v8 = vld [vmem:[%s16779_s2 + $0x1a28] sm:$0xff] }
 0x548   : > { %12818 = vmatpush2.bf16.msra.mxu1 %v14889_v25  ;;  %v1229_v24 = vld [vmem:[%s16779_s2 + $0x1a68] sm:$0xff] }
 0x549   : > { %12819 = vmatprep.subr.bf16.mxu1 %v14874_v26  ;;  %12777 = vmatpush2.bf16.msra.mxu0 %v14617_v32  ;;  %v1477_v25 = vld [vmem:[%s16779_s2 + $0x2228] sm:$0xff]  ;;  %v15002_v29 = vcombine.high %v1221_v8, %v1229_v24  ;;  %v15001_v36 = vcombine.low %v1221_v8, %v1229_v24 }
 0x54a   : > { %12778 = vmatprep.subr.bf16.mxu0 %v14602_v33  ;;  %v1485_v56 = vld [vmem:[%s16779_s2 + $0x2268] sm:$0xff] }
 0x54b   : > { %v16227_v26 = vld [vmem:[%s16771_s30 + $0x24] ss:$56 sps:$4 sm:$0xff]   ;;  %v15258_v30 = vcombine.high %v1477_v25, %v1485_v56  ;;  %v15257_v38 = vcombine.low %v1477_v25, %v1485_v56 }
 0x54c   : > { %12820 = vmatpush2.bf16.msra.mxu1 %v14873_v16  ;;  %v1205_v32 = vld [vmem:[%s16779_s2 + $0x19a8] sm:$0xff] }
 0x54d   : > { %12821 = vmatprep.subr.bf16.mxu1 %v14858_v35  ;;  %12779 = vmatpush2.bf16.msra.mxu0 %v14601_v42  ;;  %v1213_v16 = vld [vmem:[%s16779_s2 + $0x19e8] sm:$0xff] }
 0x54e   : > { %12780 = vmatprep.subr.bf16.mxu0 %v14586_v44  ;;  %v1461_v33 = vld [vmem:[%s16779_s2 + $0x21a8] sm:$0xff]  ;;  %v14986_v39 = vcombine.high %v1205_v32, %v1213_v16  ;;  %v14985_v22 = vcombine.low %v1205_v32, %v1213_v16 }
 0x54f   : > { %v1469_v35 = vld [vmem:[%s16779_s2 + $0x21e8] sm:$0xff] }
 0x550   : > { %12822 = vmatpush2.bf16.msra.mxu1 %v14857_v43  ;;  %v15242_v40 = vcombine.high %v1461_v33, %v1469_v35  ;;  %v1189_v42 = vld [vmem:[%s16779_s2 + $0x1928] sm:$0xff]  ;;  %v15241_v48 = vcombine.low %v1461_v33, %v1469_v35 }
 0x551   : > { %12823 = vmatprep.subr.bf16.mxu1 %v14842_v46  ;;  %12781 = vmatpush2.bf16.msra.mxu0 %v14585_v52  ;;  %v1197_v43 = vld [vmem:[%s16779_s2 + $0x1968] sm:$0xff] }
 0x552   : > { %12782 = vmatprep.subr.bf16.mxu0 %v14570_v47  ;;  %v1445_v44 = vld [vmem:[%s16779_s2 + $0x2128] sm:$0xff]  ;;  %v14970_v49 = vcombine.high %v1189_v42, %v1197_v43  ;;  %v14969_v55 = vcombine.low %v1189_v42, %v1197_v43 }
 0x553   : > { %v1453_v46 = vld [vmem:[%s16779_s2 + $0x2168] sm:$0xff] }
 0x554   : > { %12824 = vmatpush2.bf16.msra.mxu1 %v14841_v53  ;;  %v15226_v50 = vcombine.high %v1445_v44, %v1453_v46  ;;  %v1173_v52 = vld [vmem:[%s16779_s2 + $0x18a8] sm:$0xff]  ;;  %v15225_v58 = vcombine.low %v1445_v44, %v1453_v46 }
 0x555   : > { %12825 = vmatprep.subr.bf16.mxu1 %v14826_v54  ;;  %12783 = vmatpush2.bf16.msra.mxu0 %v14569_v34  ;;  %v1181_v53 = vld [vmem:[%s16779_s2 + $0x18e8] sm:$0xff] }
 0x556   : > { %12784 = vmatprep.subr.bf16.mxu0 %v14554_v45  ;;  %v1429_v47 = vld [vmem:[%s16779_s2 + $0x20a8] sm:$0xff]  ;;  %v14954_v59 = vcombine.high %v1173_v52, %v1181_v53  ;;  %v14953_v1 = vcombine.low %v1173_v52, %v1181_v53 }
 0x557   : > { %v1437_v54 = vld [vmem:[%s16779_s2 + $0x20e8] sm:$0xff] }
 0x558   : > { %12826 = vmatpush2.bf16.msra.mxu1 %v14825_v62  ;;  %v15210_v57 = vcombine.high %v1429_v47, %v1437_v54  ;;  %v1157_v34 = vld [vmem:[%s16779_s2 + $0x1828] sm:$0xff]  ;;  %v15209_v51 = vcombine.low %v1429_v47, %v1437_v54 }
 0x559   : > { %12827 = vmatprep.subr.bf16.mxu1 %v14810_v63  ;;  %12785 = vmatpush2.bf16.msra.mxu0 %v14553_v37  ;;  %v1165_v62 = vld [vmem:[%s16779_s2 + $0x1868] sm:$0xff] }
 0x55a   : > { %12840 = vmatprep.subr.bf16.mxu0 %v15050_v5  ;;  %v1413_v45 = vld [vmem:[%s16779_s2 + $0x2028] sm:$0xff]  ;;  %v14938_v3 = vcombine.high %v1157_v34, %v1165_v62  ;;  %v14937_v7 = vcombine.low %v1157_v34, %v1165_v62 }
 0x55b   : > { %v1421_v63 = vld [vmem:[%s16779_s2 + $0x2068] sm:$0xff] }
 0x55c   : > { %12828 = vmatpush2.bf16.msra.mxu1 %v14809_v61  ;;  %12787 = vmatmul.mubr.bf16.vlgmr.msra.gmra.mxu0 %v16224_v13  ;;  %v15194_v4 = vcombine.high %v1413_v45, %v1421_v63  ;;  %v1397_v37 = vld [vmem:[%s16779_s2 + $0x1fa8] sm:$0xff]  ;;  %v15193_v9 = vcombine.low %v1413_v45, %v1421_v63 }
 0x55d   : > { %12883 = vmatprep.subr.bf16.mxu1 %v15306_v6  ;;  %12841 = vmatpush1.bf16.msra.mxu0 %v15049_v60  ;;  %v1405_v61 = vld [vmem:[%s16779_s2 + $0x1fe8] sm:$0xff] }
 0x55e   : > { %12842 = vmatprep.subr.bf16.mxu0 %v15034_v12  ;;  %12872 = vmatprep.mubr.bf16.mxu0 %v16226_v23  ;;  %v1653_v5 = vld [vmem:[%s16779_s2 + $0x27a8] sm:$0xff]  ;;  %v15178_v10 = vcombine.high %v1397_v37, %v1405_v61  ;;  %v15177_v15 = vcombine.low %v1397_v37, %v1405_v61 }
 0x55f   : > { %12830 = vmatmul.mubr.bf16.vlgmr.msra.gmra.mxu1 %v16225_v18  ;;  %v1661_v6 = vld [vmem:[%s16779_s2 + $0x27e8] sm:$0xff] }
 0x560   : > { %12884 = vmatpush1.bf16.msra.mxu1 %v15305_v11  ;;  %12915 = vmatprep.mubr.bf16.mxu1 %v16227_v26  ;;  %v15434_v31 = vcombine.high %v1653_v5, %v1661_v6  ;;  %v1381_v60 = vld [vmem:[%s16779_s2 + $0x1f28] sm:$0xff]  ;;  %v15433_v0 = vcombine.low %v1653_v5, %v1661_v6 }
 0x561   : > { %12885 = vmatprep.subr.bf16.mxu1 %v15290_v14  ;;  %12843 = vmatpush1.bf16.msra.mxu0 %v15033_v2  ;;  %v1389_v11 = vld [vmem:[%s16779_s2 + $0x1f68] sm:$0xff] }
 0x562   : > { %12844 = vmatprep.subr.bf16.mxu0 %v15018_v20  ;;  %v1637_v12 = vld [vmem:[%s16779_s2 + $0x2728] sm:$0xff]  ;;  %v15162_v13 = vcombine.high %v1381_v60, %v1389_v11  ;;  %v15161_v20 = vcombine.low %v1381_v60, %v1389_v11 }
 0x563   : > { %v1645_v14 = vld [vmem:[%s16779_s2 + $0x2768] sm:$0xff] }
 0x564   : > { %12886 = vmatpush1.bf16.msra.mxu1 %v15289_v19  ;;  %v15418_v41 = vcombine.high %v1637_v12, %v1645_v14  ;;  %v1365_v17 = vld [vmem:[%s16779_s2 + $0x1ea8] sm:$0xff] }
 0x565   : > { %12887 = vmatprep.subr.bf16.mxu1 %v15274_v21  ;;  %12845 = vmatpush1.bf16.msra.mxu0 %v15017_v27  ;;  %v1373_v18 = vld [vmem:[%s16779_s2 + $0x1ee8] sm:$0xff]  ;;  %v15417_v21 = vcombine.low %v1637_v12, %v1645_v14 }
 0x566   : > { %12846 = vmatprep.subr.bf16.mxu0 %v15002_v29  ;;  %v1621_v2 = vld [vmem:[%s16779_s2 + $0x26a8] sm:$0xff]  ;;  %v15146_v8 = vcombine.high %v1365_v17, %v1373_v18  ;;  %v15145_v27 = vcombine.low %v1365_v17, %v1373_v18 }
 0x567   : > { %v1629_v19 = vld [vmem:[%s16779_s2 + $0x26e8] sm:$0xff] }
 0x568   : > { %12888 = vmatpush1.bf16.msra.mxu1 %v15273_v28  ;;  %v15402_v24 = vcombine.high %v1621_v2, %v1629_v19  ;;  %v1349_v23 = vld [vmem:[%s16779_s2 + $0x1e28] sm:$0xff]  ;;  %v15401_v28 = vcombine.low %v1621_v2, %v1629_v19 }
 0x569   : > { %12889 = vmatprep.subr.bf16.mxu1 %v15258_v30  ;;  %12847 = vmatpush1.bf16.msra.mxu0 %v15001_v36  ;;  %v1357_v25 = vld [vmem:[%s16779_s2 + $0x1e68] sm:$0xff] }
 0x56a   : > { %12848 = vmatprep.subr.bf16.mxu0 %v14986_v39  ;;  %v1605_v56 = vld [vmem:[%s16779_s2 + $0x2628] sm:$0xff]  ;;  %v15130_v29 = vcombine.high %v1349_v23, %v1357_v25  ;;  %v15129_v36 = vcombine.low %v1349_v23, %v1357_v25 }
 0x56b   : > { %v1613_v26 = vld [vmem:[%s16779_s2 + $0x2668] sm:$0xff] }
 0x56c   : > { %12890 = vmatpush1.bf16.msra.mxu1 %v15257_v38  ;;  %v15386_v30 = vcombine.high %v1605_v56, %v1613_v26  ;;  %v1333_v32 = vld [vmem:[%s16779_s2 + $0x1da8] sm:$0xff]  ;;  %v15385_v38 = vcombine.low %v1605_v56, %v1613_v26 }
 0x56d   : > { %12891 = vmatprep.subr.bf16.mxu1 %v15242_v40  ;;  %12849 = vmatpush1.bf16.msra.mxu0 %v14985_v22  ;;  %v1341_v16 = vld [vmem:[%s16779_s2 + $0x1de8] sm:$0xff] }
 0x56e   : > { %12850 = vmatprep.subr.bf16.mxu0 %v14970_v49  ;;  %v1589_v33 = vld [vmem:[%s16779_s2 + $0x25a8] sm:$0xff]  ;;  %v15114_v39 = vcombine.high %v1333_v32, %v1341_v16  ;;  %v15113_v22 = vcombine.low %v1333_v32, %v1341_v16 }
 0x56f   : > { %v1597_v35 = vld [vmem:[%s16779_s2 + $0x25e8] sm:$0xff] }
 0x570   : > { %12892 = vmatpush1.bf16.msra.mxu1 %v15241_v48  ;;  %v15370_v40 = vcombine.high %v1589_v33, %v1597_v35  ;;  %v1317_v42 = vld [vmem:[%s16779_s2 + $0x1d28] sm:$0xff]  ;;  %v15369_v48 = vcombine.low %v1589_v33, %v1597_v35 }
 0x571   : > { %12893 = vmatprep.subr.bf16.mxu1 %v15226_v50  ;;  %12851 = vmatpush1.bf16.msra.mxu0 %v14969_v55  ;;  %v1325_v43 = vld [vmem:[%s16779_s2 + $0x1d68] sm:$0xff] }
 0x572   : > { %12852 = vmatprep.subr.bf16.mxu0 %v14954_v59  ;;  %v1573_v44 = vld [vmem:[%s16779_s2 + $0x2528] sm:$0xff]  ;;  %v15098_v49 = vcombine.high %v1317_v42, %v1325_v43  ;;  %v15097_v55 = vcombine.low %v1317_v42, %v1325_v43 }
 0x573   : > { %v1581_v46 = vld [vmem:[%s16779_s2 + $0x2568] sm:$0xff] }
 0x574   : > { %12894 = vmatpush1.bf16.msra.mxu1 %v15225_v58  ;;  %v15354_v50 = vcombine.high %v1573_v44, %v1581_v46  ;;  %v1301_v52 = vld [vmem:[%s16779_s2 + $0x1ca8] sm:$0xff]  ;;  %v15353_v58 = vcombine.low %v1573_v44, %v1581_v46 }
 0x575   : > { %12895 = vmatprep.subr.bf16.mxu1 %v15210_v57  ;;  %12853 = vmatpush1.bf16.msra.mxu0 %v14953_v1  ;;  %v1309_v53 = vld [vmem:[%s16779_s2 + $0x1ce8] sm:$0xff] }
 0x576   : > { %12854 = vmatprep.subr.bf16.mxu0 %v14938_v3  ;;  %v1557_v47 = vld [vmem:[%s16779_s2 + $0x24a8] sm:$0xff]  ;;  %v15082_v59 = vcombine.high %v1301_v52, %v1309_v53  ;;  %v15081_v1 = vcombine.low %v1301_v52, %v1309_v53 }
 0x577   : > { %v1565_v54 = vld [vmem:[%s16779_s2 + $0x24e8] sm:$0xff] }
 0x578   : > { %12896 = vmatpush1.bf16.msra.mxu1 %v15209_v51  ;;  %v15338_v57 = vcombine.high %v1557_v47, %v1565_v54  ;;  %v1285_v34 = vld [vmem:[%s16779_s2 + $0x1c28] sm:$0xff]  ;;  %v15337_v51 = vcombine.low %v1557_v47, %v1565_v54 }
 0x579   : > { %12897 = vmatprep.subr.bf16.mxu1 %v15194_v4  ;;  %12855 = vmatpush1.bf16.msra.mxu0 %v14937_v7  ;;  %v1293_v62 = vld [vmem:[%s16779_s2 + $0x1c68] sm:$0xff] }
 0x57a   : > { %12856 = vmatprep.subr.bf16.mxu0 %v15178_v10  ;;  %v1541_v45 = vld [vmem:[%s16779_s2 + $0x2428] sm:$0xff]  ;;  %v15066_v3 = vcombine.high %v1285_v34, %v1293_v62  ;;  %v15065_v7 = vcombine.low %v1285_v34, %v1293_v62 }
 0x57b   : > { %v1549_v63 = vld [vmem:[%s16779_s2 + $0x2468] sm:$0xff] }
 0x57c   : > { %12898 = vmatpush1.bf16.msra.mxu1 %v15193_v9  ;;  %v15322_v4 = vcombine.high %v1541_v45, %v1549_v63  ;;  %v1781_v37 = vld [vmem:[%s16779_s2 + $0x2ba8] sm:$0xff]  ;;  %v15321_v9 = vcombine.low %v1541_v45, %v1549_v63 }
 0x57d   : > { %12899 = vmatprep.subr.bf16.mxu1 %v15434_v31  ;;  %12857 = vmatpush2.bf16.msra.mxu0 %v15177_v15  ;;  %v1789_v61 = vld [vmem:[%s16779_s2 + $0x2be8] sm:$0xff] }
 0x57e   : > { %12858 = vmatprep.subr.bf16.mxu0 %v15162_v13  ;;  %v2037_v5 = vld [vmem:[%s16779_s2 + $0x33a8] sm:$0xff]  ;;  %v15562_v10 = vcombine.high %v1781_v37, %v1789_v61  ;;  %v15561_v15 = vcombine.low %v1781_v37, %v1789_v61  ;;  %v18323_v61 = vpop.f32.mrf.mxu0 }
 0x57f   : > { %v2045_v6 = vld [vmem:[%s16779_s2 + $0x33e8] sm:$0xff] }
 0x580   : > { %12900 = vmatpush2.bf16.msra.mxu1 %v15433_v0  ;;  %v15818_v31 = vcombine.high %v2037_v5, %v2045_v6  ;;  %v1765_v60 = vld [vmem:[%s16779_s2 + $0x2b28] sm:$0xff]  ;;  %v15817_v0 = vcombine.low %v2037_v5, %v2045_v6 }
 0x581   : > { %12901 = vmatprep.subr.bf16.mxu1 %v15418_v41  ;;  %12859 = vmatpush2.bf16.msra.mxu0 %v15161_v20  ;;  %v1773_v11 = vld [vmem:[%s16779_s2 + $0x2b68] sm:$0xff] }
 0x582   : > { %12860 = vmatprep.subr.bf16.mxu0 %v15146_v8  ;;  %v2021_v12 = vld [vmem:[%s16779_s2 + $0x3328] sm:$0xff]  ;;  %v15546_v13 = vcombine.high %v1765_v60, %v1773_v11  ;;  %v15545_v8 = vcombine.low %v1765_v60, %v1773_v11 }
 0x583   : > { %v2029_v14 = vld [vmem:[%s16779_s2 + $0x3368] sm:$0xff] }
 0x584   : > { %12902 = vmatpush2.bf16.msra.mxu1 %v15417_v21  ;;  %v15802_v41 = vcombine.high %v2021_v12, %v2029_v14  ;;  %v1749_v17 = vld [vmem:[%s16779_s2 + $0x2aa8] sm:$0xff] }
 0x585   : > { %12903 = vmatprep.subr.bf16.mxu1 %v15402_v24  ;;  %12861 = vmatpush2.bf16.msra.mxu0 %v15145_v27  ;;  %v1757_v18 = vld [vmem:[%s16779_s2 + $0x2ae8] sm:$0xff]  ;;  %v15801_v24 = vcombine.low %v2021_v12, %v2029_v14  ;;  %v18329_v12 = vpop.f32.mrf.mxu0 }
 0x586   : > { %12862 = vmatprep.subr.bf16.mxu0 %v15130_v29  ;;  %v16228_v2 = vld [vmem:[%s16771_s30 + $0x18] ss:$56 sps:$4 sm:$0xff]   ;;  %v15530_v23 = vcombine.high %v1749_v17, %v1757_v18  ;;  %v16230_v27 = vld [vmem:[%s16771_s30 + $0x2c] ss:$56 sps:$4 sm:$0xff]   ;;  %v15529_v32 = vcombine.low %v1749_v17, %v1757_v18  ;;  %v18333_v17 = vpop.f32.mrf.mxu1 }
 0x587   : > { %v2005_v19 = vld [vmem:[%s16779_s2 + $0x32a8] sm:$0xff] }
 0x588   : > { %12904 = vmatpush2.bf16.msra.mxu1 %v15401_v28  ;;  %v2013_v20 = vld [vmem:[%s16779_s2 + $0x32e8] sm:$0xff] }
 0x589   : > { %12905 = vmatprep.subr.bf16.mxu1 %v15386_v30  ;;  %12863 = vmatpush2.bf16.msra.mxu0 %v15129_v36  ;;  %v16229_v21 = vld [vmem:[%s16771_s30 + $0x20] ss:$56 sps:$4 sm:$0xff]   ;;  %v15786_v25 = vcombine.high %v2005_v19, %v2013_v20  ;;  %v16231_v30 = vld [vmem:[%s16771_s30 + $0x34] ss:$56 sps:$4 sm:$0xff]   ;;  %v15785_v16 = vcombine.low %v2005_v19, %v2013_v20  ;;  %v18337_v20 = vpop.f32.mrf.mxu0 }
 0x58a   : > { %12864 = vmatprep.subr.bf16.mxu0 %v15114_v39  ;;  %v1733_v56 = vld [vmem:[%s16779_s2 + $0x2a28] sm:$0xff] }
 0x58b   : > { %v1741_v26 = vld [vmem:[%s16779_s2 + $0x2a68] sm:$0xff] }
 0x58c   : > { %12906 = vmatpush2.bf16.msra.mxu1 %v15385_v38  ;;  %v1989_v28 = vld [vmem:[%s16779_s2 + $0x3228] sm:$0xff]  ;;  %v15514_v33 = vcombine.high %v1733_v56, %v1741_v26  ;;  %v15513_v42 = vcombine.low %v1733_v56, %v1741_v26  ;;  %v18341_v56 = vpop.f32.mrf.mxu1 }
 0x58d   : > { %12907 = vmatprep.subr.bf16.mxu1 %v15370_v40  ;;  %12865 = vmatpush2.bf16.msra.mxu0 %v15113_v22  ;;  %v1997_v29 = vld [vmem:[%s16779_s2 + $0x3268] sm:$0xff] }
 0x58e   : > { %12866 = vmatprep.subr.bf16.mxu0 %v15098_v49  ;;  %v15770_v35 = vcombine.high %v1989_v28, %v1997_v29  ;;  %v1717_v36 = vld [vmem:[%s16779_s2 + $0x29a8] sm:$0xff]  ;;  %v15769_v43 = vcombine.low %v1989_v28, %v1997_v29  ;;  %v18345_v29 = vpop.f32.mrf.mxu0 }
 0x58f   : > { %v1725_v38 = vld [vmem:[%s16779_s2 + $0x29e8] sm:$0xff] }
 0x590   : > { %12908 = vmatpush2.bf16.msra.mxu1 %v15369_v48  ;;  %v1973_v39 = vld [vmem:[%s16779_s2 + $0x31a8] sm:$0xff]  ;;  %v15498_v44 = vcombine.high %v1717_v36, %v1725_v38  ;;  %v15497_v52 = vcombine.low %v1717_v36, %v1725_v38  ;;  %v18349_v36 = vpop.f32.mrf.mxu1  ;;  %v12530_v38 = vpop.f32.mrf.mxu0 }
 0x591   : > { %12909 = vmatprep.subr.bf16.mxu1 %v15354_v50  ;;  %12867 = vmatpush2.bf16.msra.mxu0 %v15097_v55  ;;  %v1981_v40 = vld [vmem:[%s16779_s2 + $0x31e8] sm:$0xff] }
 0x592   : > { %12868 = vmatprep.subr.bf16.mxu0 %v15082_v59  ;;  %v15754_v46 = vcombine.high %v1973_v39, %v1981_v40  ;;  %v1701_v22 = vld [vmem:[%s16779_s2 + $0x2928] sm:$0xff]  ;;  %v15753_v53 = vcombine.low %v1973_v39, %v1981_v40 }
 0x593   : > { %v1709_v48 = vld [vmem:[%s16779_s2 + $0x2968] sm:$0xff] }
 0x594   : > { %12910 = vmatpush2.bf16.msra.mxu1 %v15353_v58  ;;  %v1957_v49 = vld [vmem:[%s16779_s2 + $0x3128] sm:$0xff]  ;;  %v15482_v47 = vcombine.high %v1701_v22, %v1709_v48  ;;  %v15481_v34 = vcombine.low %v1701_v22, %v1709_v48 }
 0x595   : > { %12911 = vmatprep.subr.bf16.mxu1 %v15338_v57  ;;  %12869 = vmatpush2.bf16.msra.mxu0 %v15081_v1  ;;  %v1965_v50 = vld [vmem:[%s16779_s2 + $0x3168] sm:$0xff] }
 0x596   : > { %12870 = vmatprep.subr.bf16.mxu0 %v15066_v3  ;;  %v15738_v54 = vcombine.high %v1957_v49, %v1965_v50  ;;  %v1685_v55 = vld [vmem:[%s16779_s2 + $0x28a8] sm:$0xff]  ;;  %v15737_v62 = vcombine.low %v1957_v49, %v1965_v50  ;;  %v18355_v49 = vpop.f32.mrf.mxu1  ;;  %v12532_v50 = vpop.f32.mrf.mxu0 }
 0x597   : > { %v1693_v58 = vld [vmem:[%s16779_s2 + $0x28e8] sm:$0xff] }
 0x598   : > { %12912 = vmatpush2.bf16.msra.mxu1 %v15337_v51  ;;  %v1941_v59 = vld [vmem:[%s16779_s2 + $0x30a8] sm:$0xff]  ;;  %v15466_v45 = vcombine.high %v1685_v55, %v1693_v58  ;;  %v15465_v37 = vcombine.low %v1685_v55, %v1693_v58 }
 0x599   : > { %12913 = vmatprep.subr.bf16.mxu1 %v15322_v4  ;;  %12871 = vmatpush2.bf16.msra.mxu0 %v15065_v7  ;;  %v1949_v57 = vld [vmem:[%s16779_s2 + $0x30e8] sm:$0xff] }
 0x59a   : > { %12926 = vmatprep.subr.bf16.mxu0 %v15562_v10  ;;  %v15722_v63 = vcombine.high %v1941_v59, %v1949_v57  ;;  %v1669_v1 = vld [vmem:[%s16779_s2 + $0x2828] sm:$0xff]  ;;  %v15721_v5 = vcombine.low %v1941_v59, %v1949_v57 }
 0x59b   : > { %v1677_v51 = vld [vmem:[%s16779_s2 + $0x2868] sm:$0xff] }
 0x59c   : > { %12914 = vmatpush2.bf16.msra.mxu1 %v15321_v9  ;;  %12873 = vmatmul.mubr.bf16.vlgmr.msra.gmra.mxu0 %v16228_v2  ;;  %v1925_v3 = vld [vmem:[%s16779_s2 + $0x3028] sm:$0xff]  ;;  %v15450_v6 = vcombine.high %v1669_v1, %v1677_v51  ;;  %v15449_v11 = vcombine.low %v1669_v1, %v1677_v51 }
 0x59d   : > { %12969 = vmatprep.subr.bf16.mxu1 %v15818_v31  ;;  %12927 = vmatpush1.bf16.msra.mxu0 %v15561_v15  ;;  %v1933_v4 = vld [vmem:[%s16779_s2 + $0x3068] sm:$0xff] }
 0x59e   : > { %12928 = vmatprep.subr.bf16.mxu0 %v15546_v13  ;;  %12958 = vmatprep.mubr.bf16.mxu0 %v16230_v27  ;;  %v15706_v7 = vcombine.high %v1925_v3, %v1933_v4  ;;  %v1909_v9 = vld [vmem:[%s16779_s2 + $0x2fa8] sm:$0xff]  ;;  %v15705_v14 = vcombine.low %v1925_v3, %v1933_v4 }
 0x59f   : > { %12916 = vmatmul.mubr.bf16.vlgmr.msra.gmra.mxu1 %v16229_v21  ;;  %v1917_v10 = vld [vmem:[%s16779_s2 + $0x2fe8] sm:$0xff] }
 0x5a0   : > { %12970 = vmatpush1.bf16.msra.mxu1 %v15817_v0  ;;  %13001 = vmatprep.mubr.bf16.mxu1 %v16231_v30  ;;  %v2165_v31 = vld [vmem:[%s16779_s2 + $0x37a8] sm:$0xff]  ;;  %v15690_v15 = vcombine.high %v1909_v9, %v1917_v10  ;;  %v15689_v19 = vcombine.low %v1909_v9, %v1917_v10 }
 0x5a1   : > { %12971 = vmatprep.subr.bf16.mxu1 %v15802_v41  ;;  %12929 = vmatpush1.bf16.msra.mxu0 %v15545_v8  ;;  %v2173_v60 = vld [vmem:[%s16779_s2 + $0x37e8] sm:$0xff] }
 0x5a2   : > { %12930 = vmatprep.subr.bf16.mxu0 %v15530_v23  ;;  %v15946_v0 = vcombine.high %v2165_v31, %v2173_v60  ;;  %v1893_v13 = vld [vmem:[%s16779_s2 + $0x2f28] sm:$0xff]  ;;  %v15945_v21 = vcombine.low %v2165_v31, %v2173_v60 }
 0x5a3   : > { %v1901_v41 = vld [vmem:[%s16779_s2 + $0x2f68] sm:$0xff] }
 0x5a4   : > { %12972 = vmatpush1.bf16.msra.mxu1 %v15801_v24  ;;  %v2149_v18 = vld [vmem:[%s16779_s2 + $0x3728] sm:$0xff]  ;;  %v15674_v8 = vcombine.high %v1893_v13, %v1901_v41  ;;  %v15673_v28 = vcombine.low %v1893_v13, %v1901_v41 }
 0x5a5   : > { %12973 = vmatprep.subr.bf16.mxu1 %v15786_v25  ;;  %12931 = vmatpush1.bf16.msra.mxu0 %v15529_v32  ;;  %v2157_v2 = vld [vmem:[%s16779_s2 + $0x3768] sm:$0xff] }
 0x5a6   : > { %12932 = vmatprep.subr.bf16.mxu0 %v15514_v33  ;;  %v15930_v24 = vcombine.high %v2149_v18, %v2157_v2  ;;  %v1877_v23 = vld [vmem:[%s16779_s2 + $0x2ea8] sm:$0xff]  ;;  %v15929_v30 = vcombine.low %v2149_v18, %v2157_v2 }
 0x5a7   : > { %v1885_v25 = vld [vmem:[%s16779_s2 + $0x2ee8] sm:$0xff] }
 0x5a8   : > { %12974 = vmatpush1.bf16.msra.mxu1 %v15785_v16  ;;  %v2133_v26 = vld [vmem:[%s16779_s2 + $0x36a8] sm:$0xff]  ;;  %v15658_v32 = vcombine.high %v1877_v23, %v1885_v25 }
 0x5a9   : > { %12975 = vmatprep.subr.bf16.mxu1 %v15770_v35  ;;  %12933 = vmatpush1.bf16.msra.mxu0 %v15513_v42  ;;  %v2141_v27 = vld [vmem:[%s16779_s2 + $0x36e8] sm:$0xff]  ;;  %v15657_v42 = vcombine.low %v1877_v23, %v1885_v25 }
 0x5aa   : > { %12934 = vmatprep.subr.bf16.mxu0 %v15498_v44  ;;  %v15914_v16 = vcombine.high %v2133_v26, %v2141_v27  ;;  %v1861_v33 = vld [vmem:[%s16779_s2 + $0x2e28] sm:$0xff] }
 0x5ab   : > { %v1869_v35 = vld [vmem:[%s16779_s2 + $0x2e68] sm:$0xff] }
 0x5ac   : > { %12976 = vmatpush1.bf16.msra.mxu1 %v15769_v43  ;;  %v2117_v39 = vld [vmem:[%s16779_s2 + $0x3628] sm:$0xff]  ;;  %v15913_v43 = vcombine.low %v2133_v26, %v2141_v27  ;;  %v15642_v44 = vcombine.high %v1861_v33, %v1869_v35  ;;  %v12492_v26 = vadd.f32 %v18349_v36, %v18337_v20 }
 0x5ad   : > { %12977 = vmatprep.subr.bf16.mxu1 %v15754_v46  ;;  %12935 = vmatpush1.bf16.msra.mxu0 %v15497_v52  ;;  %v2125_v40 = vld [vmem:[%s16779_s2 + $0x3668] sm:$0xff] }
 0x5ae   : > { %12936 = vmatprep.subr.bf16.mxu0 %v15482_v47  ;;  %v15898_v46 = vcombine.high %v2117_v39, %v2125_v40  ;;  %v1845_v22 = vld [vmem:[%s16779_s2 + $0x2da8] sm:$0xff]  ;;  %v15641_v47 = vcombine.low %v1861_v33, %v1869_v35  ;;  %v15897_v55 = vcombine.low %v2117_v39, %v2125_v40  ;;  %v12494_v33 = vadd.f32 %v18355_v49, %v18345_v29  ;;  %v494_v29 = vld [vmem:[%s16779_s2 + $0x370] sm:$0xff] }
 0x5af   : > { %v1853_v48 = vld [vmem:[%s16779_s2 + $0x2de8] sm:$0xff]  ;;  %v742_v49 = vld [vmem:[%s16779_s2 + $0xb30] sm:$0xff] }
 0x5b0   : > { %12978 = vmatpush1.bf16.msra.mxu1 %v15753_v53  ;;  %v2101_v52 = vld [vmem:[%s16779_s2 + $0x35a8] sm:$0xff]  ;;  %v15626_v58 = vcombine.high %v1845_v22, %v1853_v48  ;;  %v15625_v1 = vcombine.low %v1845_v22, %v1853_v48  ;;  %v486_v22 = vld [vmem:[%s16779_s2 + $0x330] sm:$0xff] }
 0x5b1   : > { %12979 = vmatprep.subr.bf16.mxu1 %v15738_v54  ;;  %12937 = vmatpush1.bf16.msra.mxu0 %v15481_v34  ;;  %v2109_v53 = vld [vmem:[%s16779_s2 + $0x35e8] sm:$0xff]  ;;  %v12573_v54 = vpop.f32.mrf.mxu1 }
 0x5b2   : > { %12938 = vmatprep.subr.bf16.mxu0 %v15466_v45  ;;  %v15882_v59 = vcombine.high %v2101_v52, %v2109_v53  ;;  %v1829_v57 = vld [vmem:[%s16779_s2 + $0x2d28] sm:$0xff]  ;;  %v15881_v3 = vcombine.low %v2101_v52, %v2109_v53 }
 0x5b3   : > { %v1837_v34 = vld [vmem:[%s16779_s2 + $0x2d68] sm:$0xff]  ;;  %v12575_v51 = vpop.f32.mrf.mxu1 }
 0x5b4   : > { %12980 = vmatpush1.bf16.msra.mxu1 %v15737_v62  ;;  %v12534_v62 = vpop.f32.mrf.mxu0  ;;  %v2085_v45 = vld [vmem:[%s16779_s2 + $0x3528] sm:$0xff]  ;;  %v15610_v4 = vcombine.high %v1829_v57, %v1837_v34  ;;  %v15609_v31 = vcombine.low %v1829_v57, %v1837_v34 }
 0x5b5   : > { %12981 = vmatprep.subr.bf16.mxu1 %v15722_v63  ;;  %12939 = vmatpush1.bf16.msra.mxu0 %v15465_v37  ;;  %v2093_v63 = vld [vmem:[%s16779_s2 + $0x3568] sm:$0xff]  ;;  %v12577_v60 = vpop.f32.mrf.mxu1 }
 0x5b6   : > { %12940 = vmatprep.subr.bf16.mxu0 %v15450_v6  ;;  %v15866_v37 = vcombine.high %v2085_v45, %v2093_v63  ;;  %v1821_v6 = vld [vmem:[%s16779_s2 + $0x2ce8] sm:$0xff] }
 0x5b7   : > { %v2069_v9 = vld [vmem:[%s16779_s2 + $0x34a8] sm:$0xff]  ;;  %v12579_v23 = vpop.f32.mrf.mxu1 }
 0x5b8   : > { %12982 = vmatpush1.bf16.msra.mxu1 %v15721_v5  ;;  %v1813_v5 = vld [vmem:[%s16779_s2 + $0x2ca8] sm:$0xff] }
 0x5b9   : > { %12983 = vmatprep.subr.bf16.mxu1 %v15706_v7  ;;  %12941 = vmatpush1.bf16.msra.mxu0 %v15449_v11  ;;  %v12536_v7 = vpop.f32.mrf.mxu0  ;;  %v2077_v10 = vld [vmem:[%s16779_s2 + $0x34e8] sm:$0xff] }
 0x5ba   : > { %12942 = vmatprep.subr.bf16.mxu0 %v15690_v15  ;;  %v15594_v15 = vcombine.high %v1813_v5, %v1821_v6  ;;  %v15850_v13 = vcombine.high %v2069_v9, %v2077_v10  ;;  %v1797_v41 = vld [vmem:[%s16779_s2 + $0x2c28] sm:$0xff] }
 0x5bb   : > { %v12616_v11 = vpop.f32.mrf.mxu0  ;;  %v1805_v18 = vld [vmem:[%s16779_s2 + $0x2c68] sm:$0xff] }
 0x5bc   : > { %12984 = vmatpush1.bf16.msra.mxu1 %v15705_v14  ;;  %v15865_v14 = vcombine.low %v2085_v45, %v2093_v63  ;;  %v2053_v2 = vld [vmem:[%s16779_s2 + $0x3428] sm:$0xff]  ;;  %v15577_v39 = vcombine.low %v1797_v41, %v1805_v18  ;;  %v478_v63 = vld [vmem:[%s16779_s2 + $0x2f0] sm:$0xff] }
 0x5bd   : > { %12985 = vmatprep.subr.bf16.mxu1 %v15946_v0  ;;  %12943 = vmatpush2.bf16.msra.mxu0 %v15689_v19  ;;  %v12488_v0 = vadd.f32 %v18333_v17, %v18323_v61  ;;  %v2061_v19 = vld [vmem:[%s16779_s2 + $0x3468] sm:$0xff]  ;;  %v12618_v25 = vpop.f32.mrf.mxu0  ;;  %v15849_v61 = vcombine.low %v2069_v9, %v2077_v10  ;;  %v15578_v17 = vcombine.high %v1797_v41, %v1805_v18 }
 0x5be   : > { %12944 = vmatprep.subr.bf16.mxu0 %v15674_v8  ;;  %v15833_v36 = vcombine.low %v2053_v2, %v2061_v19 }
 0x5bf   : > { %v12531_v8 = vadd.f32 %v12530_v38, %v12488_v0  ;;  %v12535_v38 = vadd.f32 %v12534_v62, %v12492_v26  ;;  %v12620_v20 = vpop.f32.mrf.mxu0 }
 0x5c0   : > { %12986 = vmatpush2.bf16.msra.mxu1 %v15945_v21  ;;  %v12490_v21 = vadd.f32 %v18341_v56, %v18329_v12  ;;  %v12659_v12 = vpop.f32.mrf.mxu1  ;;  %v758_v56 = vld [vmem:[%s16779_s2 + $0xbb0] sm:$0xff] }
 0x5c1   : > { %12987 = vmatprep.subr.bf16.mxu1 %v15930_v24  ;;  %12945 = vmatpush2.bf16.msra.mxu0 %v15673_v28  ;;  %v15593_v24 = vcombine.low %v1813_v5, %v1821_v6  ;;  %v15834_v28 = vcombine.high %v2053_v2, %v2061_v19  ;;  %v12574_v35 = vadd.f32 %v12573_v54, %v12531_v8  ;;  %v12622_v54 = vpop.f32.mrf.mxu0  ;;  %v16232_v5 = vld [vmem:[%s16771_s30 + $0x28] ss:$56 sps:$4 sm:$0xff]  }
 0x5c2   : > { %12946 = vmatprep.subr.bf16.mxu0 %v15658_v32  ;;  %v12533_v27 = vadd.f32 %v12532_v50, %v12490_v21  ;;  %v510_v32 = vld [vmem:[%s16779_s2 + $0x3f0] sm:$0xff]  ;;  %v12661_v48 = vpop.f32.mrf.mxu1  ;;  %v12578_v52 = vadd.f32 %v12577_v60, %v12535_v38  ;;  %v14267_v6 = vcombine.low %v486_v22, %v494_v29  ;;  %v347_v60 = vld [vmem:[#allocation2 + $0x88] sm:$0xff] }
 0x5c3   : > { %v750_v50 = vld [vmem:[%s16779_s2 + $0xb70] sm:$0xff] }
 0x5c4   : > { %12988 = vmatpush2.bf16.msra.mxu1 %v15929_v30  ;;  %v502_v30 = vld [vmem:[%s16779_s2 + $0x3b0] sm:$0xff]  ;;  %v12621_v62 = vadd.f32 %v12620_v20, %v12578_v52  ;;  %v14524_v45 = vcombine.high %v742_v49, %v750_v50 }
 0x5c5   : > { %12989 = vmatprep.subr.bf16.mxu1 %v15914_v16  ;;  %12947 = vmatpush2.bf16.msra.mxu0 %v15657_v42  ;;  %v766_v16 = vld [vmem:[%s16779_s2 + $0xbf0] sm:$0xff]  ;;  %v14284_v40 = vcombine.high %v502_v30, %v510_v32  ;;  %v12576_v42 = vadd.f32 %v12575_v51, %v12533_v27 }
 0x5c6   : > { %12948 = vmatprep.subr.bf16.mxu0 %v15642_v44  ;;  %v12617_v44 = vadd.f32 %v12616_v11, %v12574_v35  ;;  %v734_v51 = vld [vmem:[%s16779_s2 + $0xaf0] sm:$0xff] }
 0x5c7   : > { %v12619_v53 = vadd.f32 %v12618_v25, %v12576_v42  ;;  %v454_v2 = vld [vmem:[%s16779_s2 + $0x230] sm:$0xff] }
 0x5c8   : > { %12990 = vmatpush2.bf16.msra.mxu1 %v15913_v43  ;;  %v12537_v43 = vadd.f32 %v12536_v7, %v12494_v33  ;;  %v12660_v34 = vadd.f32 %v12659_v12, %v12617_v44  ;;  %v462_v19 = vld [vmem:[%s16779_s2 + $0x270] sm:$0xff] }
 0x5c9   : > { %12991 = vmatprep.subr.bf16.mxu1 %v15898_v46  ;;  %12949 = vmatpush2.bf16.msra.mxu0 %v15641_v47  ;;  %v14540_v46 = vcombine.high %v758_v56, %v766_v16  ;;  %v14283_v47 = vcombine.low %v502_v30, %v510_v32  ;;  %v12662_v7 = vadd.f32 %v12661_v48, %v12619_v53  ;;  %v16234_v21 = vld [vmem:[%s16771_s30 + $0x4] ss:$56 sps:$4 sm:$0xff]  }
 0x5ca   : > { %12950 = vmatprep.subr.bf16.mxu0 %v15626_v58  ;;  %v14268_v58 = vcombine.high %v486_v22, %v494_v29  ;;  %v12580_v57 = vadd.f32 %v12579_v23, %v12537_v43  ;;  %v710_v25 = vld [vmem:[%s16779_s2 + $0xa30] sm:$0xff]  ;;  %v14235_v43 = vcombine.low %v454_v2, %v462_v19 }
 0x5cb   : > { %v363_v32 = vld [vmem:[#allocation2 + $0xd0] sm:$0xff] }
 0x5cc   : > { %12992 = vmatpush2.bf16.msra.mxu1 %v15897_v55  ;;  %v14539_v55 = vcombine.low %v758_v56, %v766_v16  ;;  %v12623_v9 = vadd.f32 %v12622_v54, %v12580_v57  ;;  %v14236_v16 = vcombine.high %v454_v2, %v462_v19  ;;  %v446_v20 = vld [vmem:[%s16779_s2 + $0x1f0] sm:$0xff] }
 0x5cd   : > { %12993 = vmatprep.subr.bf16.mxu1 %v15882_v59  ;;  %12951 = vmatpush2.bf16.msra.mxu0 %v15625_v1  ;;  %v18388_v59 = vld [vmem:[%s16779_s2 + $0x2b0] sm:$0xff] }
 0x5ce   : > { %12952 = vmatprep.subr.bf16.mxu0 %v15610_v4  ;;  %v726_v1 = vld [vmem:[%s16779_s2 + $0xab0] sm:$0xff]  ;;  %v346_v4 = vld [vmem:[#allocation2 + $0x80] sm:$0xff]  ;;  %v14251_v30 = vcombine.low %v18388_v59, %v478_v63 }
 0x5cf   : > { %v14508_v0 = vcombine.high %v726_v1, %v734_v51  ;;  %v14507_v56 = vcombine.low %v726_v1, %v734_v51  ;;  %v422_v29 = vld [vmem:[%s16779_s2 + $0x130] sm:$0xff] }
 0x5d0   : > { %12994 = vmatpush2.bf16.msra.mxu1 %v15881_v3  ;;  %v12663_v3 = vpop.f32.mrf.mxu1  ;;  %v430_v48 = vld [vmem:[%s16779_s2 + $0x170] sm:$0xff] }
 0x5d1   : > { %12995 = vmatprep.subr.bf16.mxu1 %v15866_v37  ;;  %12953 = vmatpush2.bf16.msra.mxu0 %v15609_v31  ;;  %v16233_v31 = vld [vmem:[%s16771_s30 + $0x30] ss:$56 sps:$4 sm:$0xff]  }
 0x5d2   : > { %12954 = vmatprep.subr.bf16.mxu0 %v15594_v15  ;;  %v14252_v15 = vcombine.high %v18388_v59, %v478_v63  ;;  %v12665_v8 = vpop.f32.mrf.mxu1  ;;  %v662_v59 = vld [vmem:[%s16779_s2 + $0x8b0] sm:$0xff] }
 0x5d3   : > { %v12666_v26 = vadd.f32 %v12665_v8, %v12623_v9  ;;  %v670_v57 = vld [vmem:[%s16779_s2 + $0x8f0] sm:$0xff] }
 0x5d4   : > { %12996 = vmatpush2.bf16.msra.mxu1 %v15865_v14  ;;  %v14523_v14 = vcombine.low %v742_v49, %v750_v50  ;;  %v678_v49 = vld [vmem:[%s16779_s2 + $0x930] sm:$0xff]  ;;  %v14444_v63 = vcombine.high %v662_v59, %v670_v57 }
 0x5d5   : > { %12997 = vmatprep.subr.bf16.mxu1 %v15850_v13  ;;  %12955 = vmatpush2.bf16.msra.mxu0 %v15593_v24  ;;  %v12664_v13 = vadd.f32 %v12663_v3, %v12621_v62  ;;  %v362_v24 = vld [vmem:[#allocation2 + $0xa8] sm:$0xff]  ;;  %v686_v50 = vld [vmem:[%s16779_s2 + $0x970] sm:$0xff] }
 0x5d6   : > { %12956 = vmatprep.subr.bf16.mxu0 %v15578_v17  ;;  %v16235_v17 = vld [vmem:[%s16771_s30 + $0xc] ss:$56 sps:$4 sm:$0xff]   ;;  %v14460_v54 = vcombine.high %v678_v49, %v686_v50  ;;  %v14459_v62 = vcombine.low %v678_v49, %v686_v50 }
 0x5d7   : > { %v390_v1 = vld [vmem:[%s16779_s2 + $0x30] sm:$0xff] }
 0x5d8   : > { %12998 = vmatpush2.bf16.msra.mxu1 %v15849_v61  ;;  %v718_v61 = vld [vmem:[%s16779_s2 + $0xa70] sm:$0xff] }
 0x5d9   : > { %12999 = vmatprep.subr.bf16.mxu1 %v15834_v28  ;;  %12957 = vmatpush2.bf16.msra.mxu0 %v15577_v39  ;;  %v14492_v38 = vcombine.high %v710_v25, %v718_v61  ;;  %v438_v39 = vld [vmem:[%s16779_s2 + $0x1b0] sm:$0xff]  ;;  %v14491_v44 = vcombine.low %v710_v25, %v718_v61 }
 0x5da   : > { %13012 = vmatprep.subr.bf16.mxu0 %v14284_v40  ;;  %v702_v40 = vld [vmem:[%s16779_s2 + $0x9f0] sm:$0xff]  ;;  %v14219_v52 = vcombine.low %v438_v39, %v446_v20 }
 0x5db   : > { %v398_v51 = vld [vmem:[%s16779_s2 + $0x70] sm:$0xff] }
 0x5dc   : > { %13000 = vmatpush2.bf16.msra.mxu1 %v15833_v36  ;;  %v12702_v37 = vpop.f32.mrf.mxu0  ;;  %12959 = vmatmul.mubr.bf16.vlgmr.msra.gmra.mxu0 %v16232_v5  ;;  %v694_v36 = vld [vmem:[%s16779_s2 + $0x9b0] sm:$0xff]  ;;  %v14443_v5 = vcombine.low %v662_v59, %v670_v57 }
 0x5dd   : > { %13055 = vmatprep.subr.bf16.mxu1 %v14540_v46  ;;  %v12703_v10 = vadd.f32 %v12702_v37, %v12660_v34  ;;  %13013 = vmatpush1.bf16.msra.mxu0 %v14283_v47  ;;  %v14220_v46 = vcombine.high %v438_v39, %v446_v20  ;;  %v14476_v22 = vcombine.high %v694_v36, %v702_v40  ;;  %v646_v3 = vld [vmem:[%s16779_s2 + $0x830] sm:$0xff] }
 0x5de   : > { %v12704_v11 = vpop.f32.mrf.mxu0  ;;  %13014 = vmatprep.subr.bf16.mxu0 %v14268_v58  ;;  %13044 = vmatprep.mubr.bf16.mxu0 %v16234_v21  ;;  %v14475_v53 = vcombine.low %v694_v36, %v702_v40  ;;  %v14204_v47 = vcombine.high %v422_v29, %v430_v48  ;;  %v414_v58 = vld [vmem:[%s16779_s2 + $0xf0] sm:$0xff]  ;;  %v14203_v34 = vcombine.low %v422_v29, %v430_v48 }
 0x5df   : > { %13002 = vmatmul.mubr.bf16.vlgmr.msra.gmra.mxu1 %v16233_v31  ;;  %v13622_v41 = vadd.f32 %v12703_v10, %v346_v4  ;;  %v12705_v18 = vadd.f32 %v12704_v11, %v12662_v7  ;;  %v654_v4 = vld [vmem:[%s16779_s2 + $0x870] sm:$0xff]  ;;  %v14171_v11 = vcombine.low %v390_v1, %v398_v51 }
 0x5e0   : > { %13056 = vmatpush1.bf16.msra.mxu1 %v14539_v55  ;;  %v12706_v23 = vpop.f32.mrf.mxu0  ;;  %13087 = vmatprep.mubr.bf16.mxu1 %v16235_v17  ;;  %v406_v55 = vld [vmem:[%s16779_s2 + $0xb0] sm:$0xff]  ;;  %v14428_v7 = vcombine.high %v646_v3, %v654_v4 }
 0x5e1   : > { %13057 = vmatprep.subr.bf16.mxu1 %v14524_v45  ;;  %13654 = vst [vmem:[#allocation2 + $0x80] sm:$0xff] %v13622_v41  ;;  %v13623_v27 = vadd.f32 %v12705_v18, %v347_v60  ;;  %v12707_v28 = vadd.f32 %v12706_v23, %v12664_v13  ;;  %13015 = vmatpush1.bf16.msra.mxu0 %v14267_v6  ;;  %v630_v9 = vld [vmem:[%s16779_s2 + $0x7b0] sm:$0xff] }
 0x5e2   : > { %v12708_v12 = vpop.f32.mrf.mxu0  ;;  %13016 = vmatprep.subr.bf16.mxu0 %v14252_v15  ;;  %v14188_v45 = vcombine.high %v406_v55, %v414_v58  ;;  %v14187_v37 = vcombine.low %v406_v55, %v414_v58  ;;  %v14172_v6 = vcombine.high %v390_v1, %v398_v51  ;;  %v638_v10 = vld [vmem:[%s16779_s2 + $0x7f0] sm:$0xff] }
 0x5e3   : > { %13655 = vst [vmem:[#allocation2 + $0x88] sm:$0xff] %v13623_v27  ;;  %v13638_v33 = vadd.f32 %v12707_v28, %v362_v24  ;;  %v12709_v35 = vadd.f32 %v12708_v12, %v12666_v26  ;;  %v886_v31 = vld [vmem:[%s16779_s2 + $0xfb0] sm:$0xff]  ;;  %v14412_v15 = vcombine.high %v630_v9, %v638_v10  ;;  %v14411_v19 = vcombine.low %v630_v9, %v638_v10 }
 0x5e4   : > { %13058 = vmatpush1.bf16.msra.mxu1 %v14523_v14  ;;  %v894_v60 = vld [vmem:[%s16779_s2 + $0xff0] sm:$0xff]  ;;  %v14427_v14 = vcombine.low %v646_v3, %v654_v4 }
 0x5e5   : > { %13059 = vmatprep.subr.bf16.mxu1 %v14508_v0  ;;  %13670 = vst [vmem:[#allocation2 + $0xa8] sm:$0xff] %v13638_v33  ;;  %v13639_v42 = vadd.f32 %v12709_v35, %v363_v32  ;;  %13017 = vmatpush1.bf16.msra.mxu0 %v14251_v30  ;;  %v14668_v0 = vcombine.high %v886_v31, %v894_v60  ;;  %v614_v13 = vld [vmem:[%s16779_s2 + $0x730] sm:$0xff] }
 0x5e6   : > { %13018 = vmatprep.subr.bf16.mxu0 %v14236_v16  ;;  %v622_v41 = vld [vmem:[%s16779_s2 + $0x770] sm:$0xff]  ;;  %v14667_v21 = vcombine.low %v886_v31, %v894_v60 }
 0x5e7   : > { %13671 = vst [vmem:[#allocation2 + $0xd0] sm:$0xff] %v13639_v42  ;;  %v870_v18 = vld [vmem:[%s16779_s2 + $0xf30] sm:$0xff]  ;;  %v14396_v8 = vcombine.high %v614_v13, %v622_v41  ;;  %v14395_v26 = vcombine.low %v614_v13, %v622_v41 }
 0x5e8   : > { %13060 = vmatpush1.bf16.msra.mxu1 %v14507_v56  ;;  %v878_v2 = vld [vmem:[%s16779_s2 + $0xf70] sm:$0xff] }
 0x5e9   : > { %13061 = vmatprep.subr.bf16.mxu1 %v14492_v38  ;;  %13019 = vmatpush1.bf16.msra.mxu0 %v14235_v43  ;;  %v14652_v24 = vcombine.high %v870_v18, %v878_v2  ;;  %v598_v23 = vld [vmem:[%s16779_s2 + $0x6b0] sm:$0xff]  ;;  %v14651_v27 = vcombine.low %v870_v18, %v878_v2 }
 0x5ea   : > { %13020 = vmatprep.subr.bf16.mxu0 %v14220_v46  ;;  %v606_v25 = vld [vmem:[%s16779_s2 + $0x6f0] sm:$0xff] }
 0x5eb   : > { %v854_v61 = vld [vmem:[%s16779_s2 + $0xeb0] sm:$0xff]  ;;  %v14380_v28 = vcombine.high %v598_v23, %v606_v25  ;;  %v14379_v33 = vcombine.low %v598_v23, %v606_v25 }
 0x5ec   : > { %13062 = vmatpush1.bf16.msra.mxu1 %v14491_v44  ;;  %v862_v17 = vld [vmem:[%s16779_s2 + $0xef0] sm:$0xff] }
 0x5ed   : > { %13063 = vmatprep.subr.bf16.mxu1 %v14476_v22  ;;  %13021 = vmatpush1.bf16.msra.mxu0 %v14219_v52  ;;  %v14636_v30 = vcombine.high %v854_v61, %v862_v17  ;;  %v582_v32 = vld [vmem:[%s16779_s2 + $0x630] sm:$0xff]  ;;  %v14635_v35 = vcombine.low %v854_v61, %v862_v17 }
 0x5ee   : > { %13022 = vmatprep.subr.bf16.mxu0 %v14204_v47  ;;  %v590_v12 = vld [vmem:[%s16779_s2 + $0x670] sm:$0xff] }
 0x5ef   : > { %v838_v56 = vld [vmem:[%s16779_s2 + $0xe30] sm:$0xff]  ;;  %v14364_v38 = vcombine.high %v582_v32, %v590_v12  ;;  %v14363_v43 = vcombine.low %v582_v32, %v590_v12 }
 0x5f0   : > { %13064 = vmatpush1.bf16.msra.mxu1 %v14475_v53  ;;  %v846_v16 = vld [vmem:[%s16779_s2 + $0xe70] sm:$0xff] }
 0x5f1   : > { %13065 = vmatprep.subr.bf16.mxu1 %v14460_v54  ;;  %13023 = vmatpush1.bf16.msra.mxu0 %v14203_v34  ;;  %v14620_v39 = vcombine.high %v838_v56, %v846_v16  ;;  %v566_v20 = vld [vmem:[%s16779_s2 + $0x5b0] sm:$0xff]  ;;  %v14619_v44 = vcombine.low %v838_v56, %v846_v16 }
 0x5f2   : > { %13024 = vmatprep.subr.bf16.mxu0 %v14188_v45  ;;  %v574_v36 = vld [vmem:[%s16779_s2 + $0x5f0] sm:$0xff] }
 0x5f3   : > { %v822_v40 = vld [vmem:[%s16779_s2 + $0xdb0] sm:$0xff]  ;;  %v14348_v46 = vcombine.high %v566_v20, %v574_v36  ;;  %v14347_v52 = vcombine.low %v566_v20, %v574_v36 }
 0x5f4   : > { %13066 = vmatpush1.bf16.msra.mxu1 %v14459_v62  ;;  %v830_v42 = vld [vmem:[%s16779_s2 + $0xdf0] sm:$0xff] }
 0x5f5   : > { %13067 = vmatprep.subr.bf16.mxu1 %v14444_v63  ;;  %13025 = vmatpush1.bf16.msra.mxu0 %v14187_v37  ;;  %v14604_v22 = vcombine.high %v822_v40, %v830_v42  ;;  %v550_v29 = vld [vmem:[%s16779_s2 + $0x530] sm:$0xff]  ;;  %v14603_v53 = vcombine.low %v822_v40, %v830_v42 }
 0x5f6   : > { %13026 = vmatprep.subr.bf16.mxu0 %v14172_v6  ;;  %v558_v48 = vld [vmem:[%s16779_s2 + $0x570] sm:$0xff] }
 0x5f7   : > { %v806_v49 = vld [vmem:[%s16779_s2 + $0xd30] sm:$0xff]  ;;  %v14332_v47 = vcombine.high %v550_v29, %v558_v48  ;;  %v14331_v34 = vcombine.low %v550_v29, %v558_v48 }
 0x5f8   : > { %13068 = vmatpush1.bf16.msra.mxu1 %v14443_v5  ;;  %v814_v50 = vld [vmem:[%s16779_s2 + $0xd70] sm:$0xff] }
 0x5f9   : > { %13069 = vmatprep.subr.bf16.mxu1 %v14428_v7  ;;  %13027 = vmatpush1.bf16.msra.mxu0 %v14171_v11  ;;  %v14588_v54 = vcombine.high %v806_v49, %v814_v50  ;;  %v534_v55 = vld [vmem:[%s16779_s2 + $0x4b0] sm:$0xff]  ;;  %v14587_v62 = vcombine.low %v806_v49, %v814_v50 }
 0x5fa   : > { %13028 = vmatprep.subr.bf16.mxu0 %v14412_v15  ;;  %v542_v58 = vld [vmem:[%s16779_s2 + $0x4f0] sm:$0xff] }
 0x5fb   : > { %v790_v59 = vld [vmem:[%s16779_s2 + $0xcb0] sm:$0xff]  ;;  %v14316_v45 = vcombine.high %v534_v55, %v542_v58  ;;  %v14315_v37 = vcombine.low %v534_v55, %v542_v58 }
 0x5fc   : > { %13070 = vmatpush1.bf16.msra.mxu1 %v14427_v14  ;;  %v798_v57 = vld [vmem:[%s16779_s2 + $0xcf0] sm:$0xff] }
 0x5fd   : > { %13071 = vmatprep.subr.bf16.mxu1 %v14668_v0  ;;  %13029 = vmatpush2.bf16.msra.mxu0 %v14411_v19  ;;  %v14572_v63 = vcombine.high %v790_v59, %v798_v57  ;;  %v518_v1 = vld [vmem:[%s16779_s2 + $0x430] sm:$0xff]  ;;  %v14571_v5 = vcombine.low %v790_v59, %v798_v57 }
 0x5fe   : > { %13030 = vmatprep.subr.bf16.mxu0 %v14396_v8  ;;  %v526_v51 = vld [vmem:[%s16779_s2 + $0x470] sm:$0xff] }
 0x5ff   : > { %v774_v3 = vld [vmem:[%s16779_s2 + $0xc30] sm:$0xff]  ;;  %v14300_v6 = vcombine.high %v518_v1, %v526_v51  ;;  %v14299_v11 = vcombine.low %v518_v1, %v526_v51 }
 0x600   : > { %13072 = vmatpush2.bf16.msra.mxu1 %v14667_v21  ;;  %v782_v4 = vld [vmem:[%s16779_s2 + $0xc70] sm:$0xff] }
 0x601   : > { %13073 = vmatprep.subr.bf16.mxu1 %v14652_v24  ;;  %13031 = vmatpush2.bf16.msra.mxu0 %v14395_v26  ;;  %v14556_v7 = vcombine.high %v774_v3, %v782_v4  ;;  %v1014_v9 = vld [vmem:[%s16779_s2 + $0x13b0] sm:$0xff]  ;;  %v14555_v14 = vcombine.low %v774_v3, %v782_v4 }
 0x602   : > { %13032 = vmatprep.subr.bf16.mxu0 %v14380_v28  ;;  %v1022_v10 = vld [vmem:[%s16779_s2 + $0x13f0] sm:$0xff] }
 0x603   : > { %v1270_v31 = vld [vmem:[%s16779_s2 + $0x1bb0] sm:$0xff]  ;;  %v14796_v15 = vcombine.high %v1014_v9, %v1022_v10  ;;  %v14795_v19 = vcombine.low %v1014_v9, %v1022_v10 }
 0x604   : > { %13074 = vmatpush2.bf16.msra.mxu1 %v14651_v27  ;;  %v1278_v60 = vld [vmem:[%s16779_s2 + $0x1bf0] sm:$0xff] }
 0x605   : > { %13075 = vmatprep.subr.bf16.mxu1 %v14636_v30  ;;  %13033 = vmatpush2.bf16.msra.mxu0 %v14379_v33  ;;  %v15052_v0 = vcombine.high %v1270_v31, %v1278_v60  ;;  %v998_v13 = vld [vmem:[%s16779_s2 + $0x1330] sm:$0xff]  ;;  %v15051_v21 = vcombine.low %v1270_v31, %v1278_v60 }
 0x606   : > { %13034 = vmatprep.subr.bf16.mxu0 %v14364_v38  ;;  %v1006_v41 = vld [vmem:[%s16779_s2 + $0x1370] sm:$0xff] }
 0x607   : > { %v1254_v18 = vld [vmem:[%s16779_s2 + $0x1b30] sm:$0xff]  ;;  %v14780_v8 = vcombine.high %v998_v13, %v1006_v41  ;;  %v14779_v28 = vcombine.low %v998_v13, %v1006_v41 }
 0x608   : > { %13076 = vmatpush2.bf16.msra.mxu1 %v14635_v35  ;;  %v1262_v2 = vld [vmem:[%s16779_s2 + $0x1b70] sm:$0xff] }
 0x609   : > { %13077 = vmatprep.subr.bf16.mxu1 %v14620_v39  ;;  %13035 = vmatpush2.bf16.msra.mxu0 %v14363_v43  ;;  %v15036_v24 = vcombine.high %v1254_v18, %v1262_v2  ;;  %v982_v23 = vld [vmem:[%s16779_s2 + $0x12b0] sm:$0xff]  ;;  %v15035_v30 = vcombine.low %v1254_v18, %v1262_v2 }
 0x60a   : > { %13036 = vmatprep.subr.bf16.mxu0 %v14348_v46  ;;  %v990_v25 = vld [vmem:[%s16779_s2 + $0x12f0] sm:$0xff] }
 0x60b   : > { %v16236_v61 = vld [vmem:[%s16771_s30] ss:$56 sps:$4 sm:$0xff]   ;;  %v14764_v32 = vcombine.high %v982_v23, %v990_v25  ;;  %v16238_v33 = vld [vmem:[%s16771_s30 + $0x14] ss:$56 sps:$4 sm:$0xff]   ;;  %v14763_v20 = vcombine.low %v982_v23, %v990_v25 }
 0x60c   : > { %13078 = vmatpush2.bf16.msra.mxu1 %v14619_v44  ;;  %v1238_v17 = vld [vmem:[%s16779_s2 + $0x1ab0] sm:$0xff] }
 0x60d   : > { %13079 = vmatprep.subr.bf16.mxu1 %v14604_v22  ;;  %13037 = vmatpush2.bf16.msra.mxu0 %v14347_v52  ;;  %v1246_v26 = vld [vmem:[%s16779_s2 + $0x1af0] sm:$0xff] }
 0x60e   : > { %13038 = vmatprep.subr.bf16.mxu0 %v14332_v47  ;;  %v16237_v27 = vld [vmem:[%s16771_s30 + $0x8] ss:$56 sps:$4 sm:$0xff]   ;;  %v15020_v12 = vcombine.high %v1238_v17, %v1246_v26  ;;  %v16239_v39 = vld [vmem:[%s16771_s30 + $0x1c] ss:$56 sps:$4 sm:$0xff]   ;;  %v15019_v36 = vcombine.low %v1238_v17, %v1246_v26 }
 0x60f   : > { %v966_v56 = vld [vmem:[%s16779_s2 + $0x1230] sm:$0xff] }
 0x610   : > { %13080 = vmatpush2.bf16.msra.mxu1 %v14603_v53  ;;  %v974_v16 = vld [vmem:[%s16779_s2 + $0x1270] sm:$0xff] }
 0x611   : > { %13081 = vmatprep.subr.bf16.mxu1 %v14588_v54  ;;  %13039 = vmatpush2.bf16.msra.mxu0 %v14331_v34  ;;  %v1222_v35 = vld [vmem:[%s16779_s2 + $0x1a30] sm:$0xff]  ;;  %v14748_v40 = vcombine.high %v966_v56, %v974_v16  ;;  %v14747_v29 = vcombine.low %v966_v56, %v974_v16 }
 0x612   : > { %13040 = vmatprep.subr.bf16.mxu0 %v14316_v45  ;;  %v1230_v38 = vld [vmem:[%s16779_s2 + $0x1a70] sm:$0xff] }
 0x613   : > { %v15004_v42 = vcombine.high %v1222_v35, %v1230_v38  ;;  %v950_v43 = vld [vmem:[%s16779_s2 + $0x11b0] sm:$0xff]  ;;  %v15003_v48 = vcombine.low %v1222_v35, %v1230_v38 }
 0x614   : > { %13082 = vmatpush2.bf16.msra.mxu1 %v14587_v62  ;;  %v958_v44 = vld [vmem:[%s16779_s2 + $0x11f0] sm:$0xff] }
 0x615   : > { %13083 = vmatprep.subr.bf16.mxu1 %v14572_v63  ;;  %13041 = vmatpush2.bf16.msra.mxu0 %v14315_v37  ;;  %v1206_v46 = vld [vmem:[%s16779_s2 + $0x19b0] sm:$0xff]  ;;  %v14732_v49 = vcombine.high %v950_v43, %v958_v44  ;;  %v14731_v55 = vcombine.low %v950_v43, %v958_v44 }
 0x616   : > { %13042 = vmatprep.subr.bf16.mxu0 %v14300_v6  ;;  %v1214_v22 = vld [vmem:[%s16779_s2 + $0x19f0] sm:$0xff] }
 0x617   : > { %v14988_v50 = vcombine.high %v1206_v46, %v1214_v22  ;;  %v934_v52 = vld [vmem:[%s16779_s2 + $0x1130] sm:$0xff]  ;;  %v14987_v58 = vcombine.low %v1206_v46, %v1214_v22 }
 0x618   : > { %13084 = vmatpush2.bf16.msra.mxu1 %v14571_v5  ;;  %v942_v53 = vld [vmem:[%s16779_s2 + $0x1170] sm:$0xff] }
 0x619   : > { %13085 = vmatprep.subr.bf16.mxu1 %v14556_v7  ;;  %13043 = vmatpush2.bf16.msra.mxu0 %v14299_v11  ;;  %v1190_v47 = vld [vmem:[%s16779_s2 + $0x1930] sm:$0xff]  ;;  %v14716_v59 = vcombine.high %v934_v52, %v942_v53  ;;  %v14715_v1 = vcombine.low %v934_v52, %v942_v53 }
 0x61a   : > { %13098 = vmatprep.subr.bf16.mxu0 %v14796_v15  ;;  %v1198_v54 = vld [vmem:[%s16779_s2 + $0x1970] sm:$0xff] }
 0x61b   : > { %v14972_v57 = vcombine.high %v1190_v47, %v1198_v54  ;;  %v918_v34 = vld [vmem:[%s16779_s2 + $0x10b0] sm:$0xff]  ;;  %v14971_v51 = vcombine.low %v1190_v47, %v1198_v54 }
 0x61c   : > { %13086 = vmatpush2.bf16.msra.mxu1 %v14555_v14  ;;  %13045 = vmatmul.mubr.bf16.vlgmr.msra.gmra.mxu0 %v16236_v61  ;;  %v926_v62 = vld [vmem:[%s16779_s2 + $0x10f0] sm:$0xff] }
 0x61d   : > { %13141 = vmatprep.subr.bf16.mxu1 %v15052_v0  ;;  %13099 = vmatpush1.bf16.msra.mxu0 %v14795_v19  ;;  %v1174_v45 = vld [vmem:[%s16779_s2 + $0x18b0] sm:$0xff]  ;;  %v14700_v3 = vcombine.high %v918_v34, %v926_v62  ;;  %v14699_v9 = vcombine.low %v918_v34, %v926_v62 }
 0x61e   : > { %13100 = vmatprep.subr.bf16.mxu0 %v14780_v8  ;;  %13130 = vmatprep.mubr.bf16.mxu0 %v16238_v33  ;;  %v1182_v63 = vld [vmem:[%s16779_s2 + $0x18f0] sm:$0xff] }
 0x61f   : > { %13088 = vmatmul.mubr.bf16.vlgmr.msra.gmra.mxu1 %v16237_v27  ;;  %v14956_v4 = vcombine.high %v1174_v45, %v1182_v63  ;;  %v902_v37 = vld [vmem:[%s16779_s2 + $0x1030] sm:$0xff]  ;;  %v14955_v10 = vcombine.low %v1174_v45, %v1182_v63 }
 0x620   : > { %13142 = vmatpush1.bf16.msra.mxu1 %v15051_v21  ;;  %13173 = vmatprep.mubr.bf16.mxu1 %v16239_v39  ;;  %v910_v5 = vld [vmem:[%s16779_s2 + $0x1070] sm:$0xff] }
 0x621   : > { %13143 = vmatprep.subr.bf16.mxu1 %v15036_v24  ;;  %13101 = vmatpush1.bf16.msra.mxu0 %v14779_v28  ;;  %v1158_v6 = vld [vmem:[%s16779_s2 + $0x1830] sm:$0xff]  ;;  %v14684_v31 = vcombine.high %v902_v37, %v910_v5  ;;  %v14683_v13 = vcombine.low %v902_v37, %v910_v5 }
 0x622   : > { %13102 = vmatprep.subr.bf16.mxu0 %v14764_v32  ;;  %v1166_v7 = vld [vmem:[%s16779_s2 + $0x1870] sm:$0xff] }
 0x623   : > { %v14940_v60 = vcombine.high %v1158_v6, %v1166_v7  ;;  %v1142_v11 = vld [vmem:[%s16779_s2 + $0x17b0] sm:$0xff]  ;;  %v14939_v41 = vcombine.low %v1158_v6, %v1166_v7 }
 0x624   : > { %13144 = vmatpush1.bf16.msra.mxu1 %v15035_v30  ;;  %v1150_v14 = vld [vmem:[%s16779_s2 + $0x17f0] sm:$0xff] }
 0x625   : > { %13145 = vmatprep.subr.bf16.mxu1 %v15020_v12  ;;  %13103 = vmatpush1.bf16.msra.mxu0 %v14763_v20  ;;  %v1398_v15 = vld [vmem:[%s16779_s2 + $0x1fb0] sm:$0xff]  ;;  %v14924_v18 = vcombine.high %v1142_v11, %v1150_v14  ;;  %v14923_v23 = vcombine.low %v1142_v11, %v1150_v14 }
 0x626   : > { %13104 = vmatprep.subr.bf16.mxu0 %v14748_v40  ;;  %v1406_v0 = vld [vmem:[%s16779_s2 + $0x1ff0] sm:$0xff] }
 0x627   : > { %v15180_v2 = vcombine.high %v1398_v15, %v1406_v0  ;;  %v1126_v19 = vld [vmem:[%s16779_s2 + $0x1730] sm:$0xff]  ;;  %v15179_v25 = vcombine.low %v1398_v15, %v1406_v0 }
 0x628   : > { %13146 = vmatpush1.bf16.msra.mxu1 %v15019_v36  ;;  %v1134_v21 = vld [vmem:[%s16779_s2 + $0x1770] sm:$0xff] }
 0x629   : > { %13147 = vmatprep.subr.bf16.mxu1 %v15004_v42  ;;  %13105 = vmatpush1.bf16.msra.mxu0 %v14747_v29  ;;  %v1382_v8 = vld [vmem:[%s16779_s2 + $0x1f30] sm:$0xff]  ;;  %v14908_v61 = vcombine.high %v1126_v19, %v1134_v21  ;;  %v14907_v32 = vcombine.low %v1126_v19, %v1134_v21 }
 0x62a   : > { %13106 = vmatprep.subr.bf16.mxu0 %v14732_v49  ;;  %v1390_v24 = vld [vmem:[%s16779_s2 + $0x1f70] sm:$0xff] }
 0x62b   : > { %v15164_v17 = vcombine.high %v1382_v8, %v1390_v24  ;;  %v1110_v26 = vld [vmem:[%s16779_s2 + $0x16b0] sm:$0xff]  ;;  %v15163_v12 = vcombine.low %v1382_v8, %v1390_v24 }
 0x62c   : > { %13148 = vmatpush1.bf16.msra.mxu1 %v15003_v48  ;;  %v1118_v27 = vld [vmem:[%s16779_s2 + $0x16f0] sm:$0xff] }
 0x62d   : > { %13149 = vmatprep.subr.bf16.mxu1 %v14988_v50  ;;  %13107 = vmatpush1.bf16.msra.mxu0 %v14731_v55  ;;  %v1366_v28 = vld [vmem:[%s16779_s2 + $0x1eb0] sm:$0xff]  ;;  %v14892_v56 = vcombine.high %v1110_v26, %v1118_v27  ;;  %v14891_v20 = vcombine.low %v1110_v26, %v1118_v27 }
 0x62e   : > { %13108 = vmatprep.subr.bf16.mxu0 %v14716_v59  ;;  %v1374_v30 = vld [vmem:[%s16779_s2 + $0x1ef0] sm:$0xff] }
 0x62f   : > { %v15148_v16 = vcombine.high %v1366_v28, %v1374_v30  ;;  %v1094_v33 = vld [vmem:[%s16779_s2 + $0x1630] sm:$0xff]  ;;  %v15147_v36 = vcombine.low %v1366_v28, %v1374_v30 }
 0x630   : > { %13150 = vmatpush1.bf16.msra.mxu1 %v14987_v58  ;;  %v1102_v35 = vld [vmem:[%s16779_s2 + $0x1670] sm:$0xff] }
 0x631   : > { %13151 = vmatprep.subr.bf16.mxu1 %v14972_v57  ;;  %13109 = vmatpush1.bf16.msra.mxu0 %v14715_v1  ;;  %v1350_v38 = vld [vmem:[%s16779_s2 + $0x1e30] sm:$0xff]  ;;  %v14876_v40 = vcombine.high %v1094_v33, %v1102_v35  ;;  %v14875_v29 = vcombine.low %v1094_v33, %v1102_v35 }
 0x632   : > { %13110 = vmatprep.subr.bf16.mxu0 %v14700_v3  ;;  %v1358_v39 = vld [vmem:[%s16779_s2 + $0x1e70] sm:$0xff] }
 0x633   : > { %v15132_v42 = vcombine.high %v1350_v38, %v1358_v39  ;;  %v1078_v43 = vld [vmem:[%s16779_s2 + $0x15b0] sm:$0xff]  ;;  %v15131_v48 = vcombine.low %v1350_v38, %v1358_v39 }
 0x634   : > { %13152 = vmatpush1.bf16.msra.mxu1 %v14971_v51  ;;  %v1086_v44 = vld [vmem:[%s16779_s2 + $0x15f0] sm:$0xff] }
 0x635   : > { %13153 = vmatprep.subr.bf16.mxu1 %v14956_v4  ;;  %13111 = vmatpush1.bf16.msra.mxu0 %v14699_v9  ;;  %v1334_v46 = vld [vmem:[%s16779_s2 + $0x1db0] sm:$0xff]  ;;  %v14860_v49 = vcombine.high %v1078_v43, %v1086_v44  ;;  %v14859_v55 = vcombine.low %v1078_v43, %v1086_v44 }
 0x636   : > { %13112 = vmatprep.subr.bf16.mxu0 %v14684_v31  ;;  %v1342_v22 = vld [vmem:[%s16779_s2 + $0x1df0] sm:$0xff] }
 0x637   : > { %v15116_v50 = vcombine.high %v1334_v46, %v1342_v22  ;;  %v1062_v52 = vld [vmem:[%s16779_s2 + $0x1530] sm:$0xff]  ;;  %v15115_v58 = vcombine.low %v1334_v46, %v1342_v22 }
 0x638   : > { %13154 = vmatpush1.bf16.msra.mxu1 %v14955_v10  ;;  %v1070_v53 = vld [vmem:[%s16779_s2 + $0x1570] sm:$0xff] }
 0x639   : > { %13155 = vmatprep.subr.bf16.mxu1 %v14940_v60  ;;  %13113 = vmatpush1.bf16.msra.mxu0 %v14683_v13  ;;  %v1318_v47 = vld [vmem:[%s16779_s2 + $0x1d30] sm:$0xff]  ;;  %v14844_v59 = vcombine.high %v1062_v52, %v1070_v53  ;;  %v14843_v1 = vcombine.low %v1062_v52, %v1070_v53 }
 0x63a   : > { %13114 = vmatprep.subr.bf16.mxu0 %v14924_v18  ;;  %v1326_v54 = vld [vmem:[%s16779_s2 + $0x1d70] sm:$0xff] }
 0x63b   : > { %v15100_v57 = vcombine.high %v1318_v47, %v1326_v54  ;;  %v1046_v34 = vld [vmem:[%s16779_s2 + $0x14b0] sm:$0xff]  ;;  %v15099_v51 = vcombine.low %v1318_v47, %v1326_v54 }
 0x63c   : > { %13156 = vmatpush1.bf16.msra.mxu1 %v14939_v41  ;;  %v1054_v62 = vld [vmem:[%s16779_s2 + $0x14f0] sm:$0xff] }
 0x63d   : > { %13157 = vmatprep.subr.bf16.mxu1 %v15180_v2  ;;  %13115 = vmatpush2.bf16.msra.mxu0 %v14923_v23  ;;  %v1302_v45 = vld [vmem:[%s16779_s2 + $0x1cb0] sm:$0xff]  ;;  %v14828_v3 = vcombine.high %v1046_v34, %v1054_v62  ;;  %v14827_v9 = vcombine.low %v1046_v34, %v1054_v62 }
 0x63e   : > { %13116 = vmatprep.subr.bf16.mxu0 %v14908_v61  ;;  %v1310_v63 = vld [vmem:[%s16779_s2 + $0x1cf0] sm:$0xff] }
 0x63f   : > { %v15084_v4 = vcombine.high %v1302_v45, %v1310_v63  ;;  %v1030_v37 = vld [vmem:[%s16779_s2 + $0x1430] sm:$0xff]  ;;  %v15083_v10 = vcombine.low %v1302_v45, %v1310_v63 }
 0x640   : > { %13158 = vmatpush2.bf16.msra.mxu1 %v15179_v25  ;;  %v1038_v5 = vld [vmem:[%s16779_s2 + $0x1470] sm:$0xff] }
 0x641   : > { %13159 = vmatprep.subr.bf16.mxu1 %v15164_v17  ;;  %13117 = vmatpush2.bf16.msra.mxu0 %v14907_v32  ;;  %v1286_v6 = vld [vmem:[%s16779_s2 + $0x1c30] sm:$0xff]  ;;  %v14812_v31 = vcombine.high %v1030_v37, %v1038_v5  ;;  %v14811_v13 = vcombine.low %v1030_v37, %v1038_v5 }
 0x642   : > { %13118 = vmatprep.subr.bf16.mxu0 %v14892_v56  ;;  %v1294_v7 = vld [vmem:[%s16779_s2 + $0x1c70] sm:$0xff] }
 0x643   : > { %v15068_v60 = vcombine.high %v1286_v6, %v1294_v7  ;;  %v1526_v11 = vld [vmem:[%s16779_s2 + $0x23b0] sm:$0xff]  ;;  %v15067_v41 = vcombine.low %v1286_v6, %v1294_v7 }
 0x644   : > { %13160 = vmatpush2.bf16.msra.mxu1 %v15163_v12  ;;  %v1534_v14 = vld [vmem:[%s16779_s2 + $0x23f0] sm:$0xff] }
 0x645   : > { %13161 = vmatprep.subr.bf16.mxu1 %v15148_v16  ;;  %13119 = vmatpush2.bf16.msra.mxu0 %v14891_v20  ;;  %v1782_v15 = vld [vmem:[%s16779_s2 + $0x2bb0] sm:$0xff]  ;;  %v15308_v18 = vcombine.high %v1526_v11, %v1534_v14  ;;  %v15307_v23 = vcombine.low %v1526_v11, %v1534_v14 }
 0x646   : > { %13120 = vmatprep.subr.bf16.mxu0 %v14876_v40  ;;  %v1790_v0 = vld [vmem:[%s16779_s2 + $0x2bf0] sm:$0xff] }
 0x647   : > { %v15564_v2 = vcombine.high %v1782_v15, %v1790_v0  ;;  %v1510_v19 = vld [vmem:[%s16779_s2 + $0x2330] sm:$0xff]  ;;  %v15563_v25 = vcombine.low %v1782_v15, %v1790_v0  ;;  %v18555_v0 = vpop.f32.mrf.mxu1 }
 0x648   : > { %13162 = vmatpush2.bf16.msra.mxu1 %v15147_v36  ;;  %v1518_v21 = vld [vmem:[%s16779_s2 + $0x2370] sm:$0xff] }
 0x649   : > { %13163 = vmatprep.subr.bf16.mxu1 %v15132_v42  ;;  %13121 = vmatpush2.bf16.msra.mxu0 %v14875_v29  ;;  %v1766_v8 = vld [vmem:[%s16779_s2 + $0x2b30] sm:$0xff]  ;;  %v15292_v61 = vcombine.high %v1510_v19, %v1518_v21  ;;  %v15291_v56 = vcombine.low %v1510_v19, %v1518_v21 }
 0x64a   : > { %13122 = vmatprep.subr.bf16.mxu0 %v14860_v49  ;;  %v1774_v24 = vld [vmem:[%s16779_s2 + $0x2b70] sm:$0xff] }
 0x64b   : > { %v15548_v17 = vcombine.high %v1766_v8, %v1774_v24  ;;  %v1494_v26 = vld [vmem:[%s16779_s2 + $0x22b0] sm:$0xff]  ;;  %v15547_v16 = vcombine.low %v1766_v8, %v1774_v24 }
 0x64c   : > { %13164 = vmatpush2.bf16.msra.mxu1 %v15131_v48  ;;  %v1502_v27 = vld [vmem:[%s16779_s2 + $0x22f0] sm:$0xff] }
 0x64d   : > { %13165 = vmatprep.subr.bf16.mxu1 %v15116_v50  ;;  %13123 = vmatpush2.bf16.msra.mxu0 %v14859_v55  ;;  %v16240_v28 = vld [vmem:[%s16771_s30 + $0x10] ss:$56 sps:$4 sm:$0xff]   ;;  %v15276_v33 = vcombine.high %v1494_v26, %v1502_v27  ;;  %v16242_v20 = vld [vmem:[%s16771_s30 + $0x24] ss:$56 sps:$4 sm:$0xff]   ;;  %v15275_v43 = vcombine.low %v1494_v26, %v1502_v27 }
 0x64e   : > { %13124 = vmatprep.subr.bf16.mxu0 %v14844_v59  ;;  %v1750_v30 = vld [vmem:[%s16779_s2 + $0x2ab0] sm:$0xff] }
 0x64f   : > { %v1758_v32 = vld [vmem:[%s16779_s2 + $0x2af0] sm:$0xff] }
 0x650   : > { %13166 = vmatpush2.bf16.msra.mxu1 %v15115_v58  ;;  %v16241_v12 = vld [vmem:[%s16771_s30 + $0x18] ss:$56 sps:$4 sm:$0xff]   ;;  %v15532_v35 = vcombine.high %v1750_v30, %v1758_v32  ;;  %v16243_v42 = vld [vmem:[%s16771_s30 + $0x2c] ss:$56 sps:$4 sm:$0xff]   ;;  %v15531_v44 = vcombine.low %v1750_v30, %v1758_v32 }
 0x651   : > { %13167 = vmatprep.subr.bf16.mxu1 %v15100_v57  ;;  %13125 = vmatpush2.bf16.msra.mxu0 %v14843_v1  ;;  %v1478_v38 = vld [vmem:[%s16779_s2 + $0x2230] sm:$0xff] }
 0x652   : > { %13126 = vmatprep.subr.bf16.mxu0 %v14828_v3  ;;  %v1486_v39 = vld [vmem:[%s16779_s2 + $0x2270] sm:$0xff] }
 0x653   : > { %v1734_v36 = vld [vmem:[%s16779_s2 + $0x2a30] sm:$0xff]  ;;  %v15260_v46 = vcombine.high %v1478_v38, %v1486_v39  ;;  %v15259_v52 = vcombine.low %v1478_v38, %v1486_v39 }
 0x654   : > { %13168 = vmatpush2.bf16.msra.mxu1 %v15099_v51  ;;  %v1742_v40 = vld [vmem:[%s16779_s2 + $0x2a70] sm:$0xff] }
 0x655   : > { %13169 = vmatprep.subr.bf16.mxu1 %v15084_v4  ;;  %13127 = vmatpush2.bf16.msra.mxu0 %v14827_v9  ;;  %v15516_v22 = vcombine.high %v1734_v36, %v1742_v40  ;;  %v1462_v29 = vld [vmem:[%s16779_s2 + $0x21b0] sm:$0xff]  ;;  %v15515_v53 = vcombine.low %v1734_v36, %v1742_v40 }
 0x656   : > { %13128 = vmatprep.subr.bf16.mxu0 %v14812_v31  ;;  %v1470_v48 = vld [vmem:[%s16779_s2 + $0x21f0] sm:$0xff] }
 0x657   : > { %v1718_v49 = vld [vmem:[%s16779_s2 + $0x29b0] sm:$0xff]  ;;  %v15244_v47 = vcombine.high %v1462_v29, %v1470_v48  ;;  %v15243_v34 = vcombine.low %v1462_v29, %v1470_v48 }
 0x658   : > { %13170 = vmatpush2.bf16.msra.mxu1 %v15083_v10  ;;  %v1726_v50 = vld [vmem:[%s16779_s2 + $0x29f0] sm:$0xff] }
 0x659   : > { %13171 = vmatprep.subr.bf16.mxu1 %v15068_v60  ;;  %13129 = vmatpush2.bf16.msra.mxu0 %v14811_v13  ;;  %v15500_v54 = vcombine.high %v1718_v49, %v1726_v50  ;;  %v1446_v55 = vld [vmem:[%s16779_s2 + $0x2130] sm:$0xff]  ;;  %v15499_v62 = vcombine.low %v1718_v49, %v1726_v50 }
 0x65a   : > { %13184 = vmatprep.subr.bf16.mxu0 %v15308_v18  ;;  %v1454_v58 = vld [vmem:[%s16779_s2 + $0x2170] sm:$0xff] }
 0x65b   : > { %v1702_v59 = vld [vmem:[%s16779_s2 + $0x2930] sm:$0xff]  ;;  %v15228_v45 = vcombine.high %v1446_v55, %v1454_v58  ;;  %v15227_v37 = vcombine.low %v1446_v55, %v1454_v58 }
 0x65c   : > { %13172 = vmatpush2.bf16.msra.mxu1 %v15067_v41  ;;  %13131 = vmatmul.mubr.bf16.vlgmr.msra.gmra.mxu0 %v16240_v28  ;;  %v1710_v57 = vld [vmem:[%s16779_s2 + $0x2970] sm:$0xff] }
 0x65d   : > { %13227 = vmatprep.subr.bf16.mxu1 %v15564_v2  ;;  %13185 = vmatpush1.bf16.msra.mxu0 %v15307_v23  ;;  %v15484_v63 = vcombine.high %v1702_v59, %v1710_v57  ;;  %v1430_v1 = vld [vmem:[%s16779_s2 + $0x20b0] sm:$0xff]  ;;  %v15483_v5 = vcombine.low %v1702_v59, %v1710_v57  ;;  %v18561_v23 = vpop.f32.mrf.mxu1 }
 0x65e   : > { %13186 = vmatprep.subr.bf16.mxu0 %v15292_v61  ;;  %13216 = vmatprep.mubr.bf16.mxu0 %v16242_v20  ;;  %v1438_v51 = vld [vmem:[%s16779_s2 + $0x20f0] sm:$0xff] }
 0x65f   : > { %13174 = vmatmul.mubr.bf16.vlgmr.msra.gmra.mxu1 %v16241_v12  ;;  %v1686_v3 = vld [vmem:[%s16779_s2 + $0x28b0] sm:$0xff]  ;;  %v15212_v6 = vcombine.high %v1430_v1, %v1438_v51  ;;  %v15211_v11 = vcombine.low %v1430_v1, %v1438_v51  ;;  %v18567_v12 = vpop.f32.mrf.mxu1 }
 0x660   : > { %13228 = vmatpush1.bf16.msra.mxu1 %v15563_v25  ;;  %13259 = vmatprep.mubr.bf16.mxu1 %v16243_v42  ;;  %v1694_v4 = vld [vmem:[%s16779_s2 + $0x28f0] sm:$0xff] }
 0x661   : > { %13229 = vmatprep.subr.bf16.mxu1 %v15548_v17  ;;  %13187 = vmatpush1.bf16.msra.mxu0 %v15291_v56  ;;  %v15468_v7 = vcombine.high %v1686_v3, %v1694_v4  ;;  %v1414_v9 = vld [vmem:[%s16779_s2 + $0x2030] sm:$0xff]  ;;  %v15467_v14 = vcombine.low %v1686_v3, %v1694_v4  ;;  %v18573_v40 = vpop.f32.mrf.mxu1 }
 0x662   : > { %13188 = vmatprep.subr.bf16.mxu0 %v15276_v33  ;;  %v1422_v10 = vld [vmem:[%s16779_s2 + $0x2070] sm:$0xff] }
 0x663   : > { %v1670_v31 = vld [vmem:[%s16779_s2 + $0x2830] sm:$0xff]  ;;  %v15196_v15 = vcombine.high %v1414_v9, %v1422_v10  ;;  %v15195_v21 = vcombine.low %v1414_v9, %v1422_v10  ;;  %v18579_v48 = vpop.f32.mrf.mxu1 }
 0x664   : > { %13230 = vmatpush1.bf16.msra.mxu1 %v15547_v16  ;;  %v1678_v60 = vld [vmem:[%s16779_s2 + $0x2870] sm:$0xff] }
 0x665   : > { %13231 = vmatprep.subr.bf16.mxu1 %v15532_v35  ;;  %13189 = vmatpush1.bf16.msra.mxu0 %v15275_v43  ;;  %v15452_v13 = vcombine.high %v1670_v31, %v1678_v60  ;;  %v1654_v41 = vld [vmem:[%s16779_s2 + $0x27b0] sm:$0xff]  ;;  %v15451_v8 = vcombine.low %v1670_v31, %v1678_v60  ;;  %v18585_v57 = vpop.f32.mrf.mxu1 }
 0x666   : > { %13190 = vmatprep.subr.bf16.mxu0 %v15260_v46  ;;  %v1662_v18 = vld [vmem:[%s16779_s2 + $0x27f0] sm:$0xff]  ;;  %v12788_v46 = vpop.f32.mrf.mxu0 }
 0x667   : > { %v1910_v2 = vld [vmem:[%s16779_s2 + $0x2fb0] sm:$0xff]  ;;  %v15436_v24 = vcombine.high %v1654_v41, %v1662_v18  ;;  %v15435_v28 = vcombine.low %v1654_v41, %v1662_v18 }
 0x668   : > { %13232 = vmatpush1.bf16.msra.mxu1 %v15531_v44  ;;  %v1918_v19 = vld [vmem:[%s16779_s2 + $0x2ff0] sm:$0xff]  ;;  %v12790_v55 = vpop.f32.mrf.mxu0 }
 0x669   : > { %13233 = vmatprep.subr.bf16.mxu1 %v15516_v22  ;;  %13191 = vmatpush1.bf16.msra.mxu0 %v15259_v52  ;;  %v15692_v25 = vcombine.high %v1910_v2, %v1918_v19  ;;  %v1638_v61 = vld [vmem:[%s16779_s2 + $0x2730] sm:$0xff]  ;;  %v15691_v30 = vcombine.low %v1910_v2, %v1918_v19 }
 0x66a   : > { %13192 = vmatprep.subr.bf16.mxu0 %v15244_v47  ;;  %v1646_v17 = vld [vmem:[%s16779_s2 + $0x2770] sm:$0xff]  ;;  %v12792_v3 = vpop.f32.mrf.mxu0 }
 0x66b   : > { %v1894_v26 = vld [vmem:[%s16779_s2 + $0x2f30] sm:$0xff]  ;;  %v15420_v32 = vcombine.high %v1638_v61, %v1646_v17  ;;  %v15419_v39 = vcombine.low %v1638_v61, %v1646_v17 }
 0x66c   : > { %13234 = vmatpush1.bf16.msra.mxu1 %v15515_v53  ;;  %v1902_v27 = vld [vmem:[%s16779_s2 + $0x2f70] sm:$0xff] }
 0x66d   : > { %13235 = vmatprep.subr.bf16.mxu1 %v15500_v54  ;;  %13193 = vmatpush1.bf16.msra.mxu0 %v15243_v34  ;;  %v15676_v56 = vcombine.high %v1894_v26, %v1902_v27  ;;  %v1622_v16 = vld [vmem:[%s16779_s2 + $0x26b0] sm:$0xff]  ;;  %v15675_v20 = vcombine.low %v1894_v26, %v1902_v27  ;;  %v12789_v26 = vadd.f32 %v12788_v46, %v18555_v0 }
 0x66e   : > { %13194 = vmatprep.subr.bf16.mxu0 %v15228_v45  ;;  %v1630_v33 = vld [vmem:[%s16779_s2 + $0x26f0] sm:$0xff]  ;;  %v12793_v0 = vadd.f32 %v12792_v3, %v18567_v12  ;;  %v18623_v3 = vld [vmem:[%s16779_s2 + $0x2b8] sm:$0xff] }
 0x66f   : > { %v1878_v35 = vld [vmem:[%s16779_s2 + $0x2eb0] sm:$0xff]  ;;  %v15404_v36 = vcombine.high %v1622_v16, %v1630_v33  ;;  %v15403_v49 = vcombine.low %v1622_v16, %v1630_v33 }
 0x670   : > { %13236 = vmatpush1.bf16.msra.mxu1 %v15499_v62  ;;  %v1886_v38 = vld [vmem:[%s16779_s2 + $0x2ef0] sm:$0xff] }
 0x671   : > { %13237 = vmatprep.subr.bf16.mxu1 %v15484_v63  ;;  %13195 = vmatpush1.bf16.msra.mxu0 %v15227_v37  ;;  %v15660_v42 = vcombine.high %v1878_v35, %v1886_v38  ;;  %v1606_v43 = vld [vmem:[%s16779_s2 + $0x2630] sm:$0xff]  ;;  %v15659_v50 = vcombine.low %v1878_v35, %v1886_v38 }
 0x672   : > { %13196 = vmatprep.subr.bf16.mxu0 %v15212_v6  ;;  %v1614_v44 = vld [vmem:[%s16779_s2 + $0x2670] sm:$0xff] }
 0x673   : > { %v1862_v22 = vld [vmem:[%s16779_s2 + $0x2e30] sm:$0xff]  ;;  %v15388_v52 = vcombine.high %v1606_v43, %v1614_v44  ;;  %v15387_v34 = vcombine.low %v1606_v43, %v1614_v44 }
 0x674   : > { %13238 = vmatpush1.bf16.msra.mxu1 %v15483_v5  ;;  %v1870_v29 = vld [vmem:[%s16779_s2 + $0x2e70] sm:$0xff]  ;;  %v18591_v5 = vpop.f32.mrf.mxu1 }
 0x675   : > { %13239 = vmatprep.subr.bf16.mxu1 %v15468_v7  ;;  %13197 = vmatpush1.bf16.msra.mxu0 %v15211_v11  ;;  %v15644_v53 = vcombine.high %v1862_v22, %v1870_v29  ;;  %v1590_v47 = vld [vmem:[%s16779_s2 + $0x25b0] sm:$0xff]  ;;  %v15643_v62 = vcombine.low %v1862_v22, %v1870_v29  ;;  %v12794_v11 = vpop.f32.mrf.mxu0 }
 0x676   : > { %13198 = vmatprep.subr.bf16.mxu0 %v15196_v15  ;;  %v1598_v54 = vld [vmem:[%s16779_s2 + $0x25f0] sm:$0xff]  ;;  %v12795_v22 = vadd.f32 %v12794_v11, %v18573_v40  ;;  %v348_v11 = vld [vmem:[#allocation2 + $0xe8] sm:$0xff] }
 0x677   : > { %v1846_v58 = vld [vmem:[%s16779_s2 + $0x2db0] sm:$0xff]  ;;  %v15372_v45 = vcombine.high %v1590_v47, %v1598_v54  ;;  %v15371_v6 = vcombine.low %v1590_v47, %v1598_v54  ;;  %v12874_v18 = vpop.f32.mrf.mxu0  ;;  %v12836_v47 = vadd.f32 %v18591_v5, %v12793_v0 }
 0x678   : > { %13240 = vmatpush1.bf16.msra.mxu1 %v15467_v14  ;;  %v1854_v59 = vld [vmem:[%s16779_s2 + $0x2df0] sm:$0xff] }
 0x679   : > { %13241 = vmatprep.subr.bf16.mxu1 %v15452_v13  ;;  %13199 = vmatpush1.bf16.msra.mxu0 %v15195_v21  ;;  %v15628_v63 = vcombine.high %v1846_v58, %v1854_v59  ;;  %v1574_v1 = vld [vmem:[%s16779_s2 + $0x2530] sm:$0xff]  ;;  %v15627_v7 = vcombine.low %v1846_v58, %v1854_v59  ;;  %v12837_v13 = vpop.f32.mrf.mxu1 }
 0x67a   : > { %13200 = vmatprep.subr.bf16.mxu0 %v15436_v24  ;;  %v1582_v51 = vld [vmem:[%s16779_s2 + $0x2570] sm:$0xff] }
 0x67b   : > { %v1830_v4 = vld [vmem:[%s16779_s2 + $0x2d30] sm:$0xff]  ;;  %v15356_v9 = vcombine.high %v1574_v1, %v1582_v51  ;;  %v15355_v41 = vcombine.low %v1574_v1, %v1582_v51  ;;  %v12917_v21 = vpop.f32.mrf.mxu1 }
 0x67c   : > { %13242 = vmatpush1.bf16.msra.mxu1 %v15451_v8  ;;  %v1838_v37 = vld [vmem:[%s16779_s2 + $0x2d70] sm:$0xff] }
 0x67d   : > { %13243 = vmatprep.subr.bf16.mxu1 %v15692_v25  ;;  %13201 = vmatpush2.bf16.msra.mxu0 %v15435_v28  ;;  %v15612_v10 = vcombine.high %v1830_v4, %v1838_v37  ;;  %v1558_v31 = vld [vmem:[%s16779_s2 + $0x24b0] sm:$0xff]  ;;  %v15611_v2 = vcombine.low %v1830_v4, %v1838_v37  ;;  %v12876_v28 = vpop.f32.mrf.mxu0  ;;  %v12919_v16 = vpop.f32.mrf.mxu1  ;;  %v18626_v4 = vld [vmem:[%s16779_s2 + $0x2f8] sm:$0xff] }
 0x67e   : > { %13202 = vmatprep.subr.bf16.mxu0 %v15420_v32  ;;  %v1566_v60 = vld [vmem:[%s16779_s2 + $0x24f0] sm:$0xff] }
 0x67f   : > { %v1814_v14 = vld [vmem:[%s16779_s2 + $0x2cb0] sm:$0xff]  ;;  %v15340_v19 = vcombine.high %v1558_v31, %v1566_v60  ;;  %v15339_v27 = vcombine.low %v1558_v31, %v1566_v60  ;;  %v12878_v43 = vpop.f32.mrf.mxu0 }
 0x680   : > { %13244 = vmatpush2.bf16.msra.mxu1 %v15691_v30  ;;  %v1822_v15 = vld [vmem:[%s16779_s2 + $0x2cf0] sm:$0xff] }
 0x681   : > { %13245 = vmatprep.subr.bf16.mxu1 %v15676_v56  ;;  %13203 = vmatpush2.bf16.msra.mxu0 %v15419_v39  ;;  %v15596_v8 = vcombine.high %v1814_v14, %v1822_v15  ;;  %v1542_v24 = vld [vmem:[%s16779_s2 + $0x2430] sm:$0xff]  ;;  %v15595_v30 = vcombine.low %v1814_v14, %v1822_v15  ;;  %v12791_v56 = vadd.f32 %v12790_v55, %v18561_v23  ;;  %v503_v39 = vld [vmem:[%s16779_s2 + $0x3b8] sm:$0xff]  ;;  %v12880_v58 = vpop.f32.mrf.mxu0 }
 0x682   : > { %13204 = vmatprep.subr.bf16.mxu0 %v15404_v36  ;;  %v1550_v25 = vld [vmem:[%s16779_s2 + $0x2470] sm:$0xff]  ;;  %v12832_v36 = vadd.f32 %v18579_v48, %v12789_v26 }
 0x683   : > { %v1798_v61 = vld [vmem:[%s16779_s2 + $0x2c30] sm:$0xff]  ;;  %v15324_v32 = vcombine.high %v1542_v24, %v1550_v25  ;;  %v12834_v46 = vadd.f32 %v18585_v57, %v12791_v56 }
 0x684   : > { %13246 = vmatpush2.bf16.msra.mxu1 %v15675_v20  ;;  %v1806_v17 = vld [vmem:[%s16779_s2 + $0x2c70] sm:$0xff]  ;;  %v511_v20 = vld [vmem:[%s16779_s2 + $0x3f8] sm:$0xff]  ;;  %v12875_v29 = vadd.f32 %v12874_v18, %v12832_v36 }
 0x685   : > { %13247 = vmatprep.subr.bf16.mxu1 %v15660_v42  ;;  %13205 = vmatpush2.bf16.msra.mxu0 %v15403_v49  ;;  %v15580_v33 = vcombine.high %v1798_v61, %v1806_v17  ;;  %v2038_v35 = vld [vmem:[%s16779_s2 + $0x33b0] sm:$0xff]  ;;  %v15323_v42 = vcombine.low %v1542_v24, %v1550_v25  ;;  %v15579_v23 = vcombine.low %v1798_v61, %v1806_v17  ;;  %v12921_v49 = vpop.f32.mrf.mxu1  ;;  %v349_v61 = vld [vmem:[#allocation2 + $0xb8] sm:$0xff] }
 0x686   : > { %13206 = vmatprep.subr.bf16.mxu0 %v15388_v52  ;;  %v2046_v38 = vld [vmem:[%s16779_s2 + $0x33f0] sm:$0xff]  ;;  %v14286_v48 = vcombine.high %v503_v39, %v511_v20  ;;  %v487_v52 = vld [vmem:[%s16779_s2 + $0x338] sm:$0xff]  ;;  %v12877_v54 = vadd.f32 %v12876_v28, %v12834_v46  ;;  %v14285_v40 = vcombine.low %v503_v39, %v511_v20  ;;  %v14253_v20 = vcombine.low %v18623_v3, %v18626_v4 }
 0x687   : > { %v15820_v44 = vcombine.high %v2038_v35, %v2046_v38  ;;  %v2030_v12 = vld [vmem:[%s16779_s2 + $0x3370] sm:$0xff]  ;;  %v15819_v55 = vcombine.low %v2038_v35, %v2046_v38  ;;  %v463_v28 = vld [vmem:[%s16779_s2 + $0x278] sm:$0xff] }
 0x688   : > { %13248 = vmatpush2.bf16.msra.mxu1 %v15659_v50  ;;  %v2022_v50 = vld [vmem:[%s16779_s2 + $0x3330] sm:$0xff] }
 0x689   : > { %13249 = vmatprep.subr.bf16.mxu1 %v15644_v53  ;;  %13207 = vmatpush2.bf16.msra.mxu0 %v15387_v34  ;;  %v495_v53 = vld [vmem:[%s16779_s2 + $0x378] sm:$0xff]  ;;  %v15804_v59 = vcombine.high %v2022_v50, %v2030_v12  ;;  %v18617_v57 = vld [vmem:[%s16779_s2 + $0x32b0] sm:$0xff]  ;;  %v12838_v34 = vadd.f32 %v12837_v13, %v12795_v22  ;;  %v365_v22 = vld [vmem:[#allocation2 + $0x28] sm:$0xff] }
 0x68a   : > { %13208 = vmatprep.subr.bf16.mxu0 %v15372_v45  ;;  %v12879_v45 = vadd.f32 %v12878_v43, %v12836_v47  ;;  %v14270_v1 = vcombine.high %v487_v52, %v495_v53  ;;  %v18620_v51 = vld [vmem:[%s16779_s2 + $0x32f0] sm:$0xff]  ;;  %v14269_v15 = vcombine.low %v487_v52, %v495_v53 }
 0x68b   : > { %v16244_v5 = vld [vmem:[%s16771_s30 + $0x20] ss:$56 sps:$4 sm:$0xff]   ;;  %v15788_v13 = vcombine.high %v18617_v57, %v18620_v51  ;;  %v16246_v25 = vld [vmem:[%s16771_s30 + $0x34] ss:$56 sps:$4 sm:$0xff]   ;;  %v15787_v26 = vcombine.low %v18617_v57, %v18620_v51 }
 0x68c   : > { %13250 = vmatpush2.bf16.msra.mxu1 %v15643_v62  ;;  %v12918_v62 = vadd.f32 %v12917_v21, %v12875_v29  ;;  %v16245_v60 = vld [vmem:[%s16771_s30 + $0x28] ss:$56 sps:$4 sm:$0xff]   ;;  %v12922_v18 = vadd.f32 %v12921_v49, %v12879_v45 }
 0x68d   : > { %13251 = vmatprep.subr.bf16.mxu1 %v15628_v63  ;;  %13209 = vmatpush2.bf16.msra.mxu0 %v15371_v6  ;;  %v12923_v63 = vpop.f32.mrf.mxu1  ;;  %v15803_v6 = vcombine.low %v2022_v50, %v2030_v12  ;;  %v1998_v24 = vld [vmem:[%s16779_s2 + $0x3270] sm:$0xff]  ;;  %v439_v49 = vld [vmem:[%s16779_s2 + $0x1b8] sm:$0xff] }
 0x68e   : > { %13210 = vmatprep.subr.bf16.mxu0 %v15356_v9  ;;  %v12881_v9 = vadd.f32 %v12880_v58, %v12838_v34  ;;  %v364_v38 = vld [vmem:[#allocation2 + $0x10] sm:$0xff]  ;;  %v431_v57 = vld [vmem:[%s16779_s2 + $0x178] sm:$0xff] }
 0x68f   : > { %v1982_v46 = vld [vmem:[%s16779_s2 + $0x31f0] sm:$0xff] }
 0x690   : > { %13252 = vmatpush2.bf16.msra.mxu1 %v15627_v7  ;;  %v12920_v7 = vadd.f32 %v12919_v16, %v12877_v54  ;;  %v1958_v58 = vld [vmem:[%s16779_s2 + $0x3130] sm:$0xff] }
 0x691   : > { %13253 = vmatprep.subr.bf16.mxu1 %v15612_v10  ;;  %13211 = vmatpush2.bf16.msra.mxu0 %v15355_v41  ;;  %v14254_v41 = vcombine.high %v18623_v3, %v18626_v4  ;;  %v1950_v51 = vld [vmem:[%s16779_s2 + $0x30f0] sm:$0xff]  ;;  %v407_v3 = vld [vmem:[%s16779_s2 + $0xb8] sm:$0xff] }
 0x692   : > { %13212 = vmatprep.subr.bf16.mxu0 %v15340_v19  ;;  %v415_v4 = vld [vmem:[%s16779_s2 + $0xf8] sm:$0xff] }
 0x694   : > { %13254 = vmatpush2.bf16.msra.mxu1 %v15611_v2 }
 0x695   : > { %13255 = vmatprep.subr.bf16.mxu1 %v15596_v8  ;;  %13213 = vmatpush2.bf16.msra.mxu0 %v15339_v27  ;;  %v1990_v8 = vld [vmem:[%s16779_s2 + $0x3230] sm:$0xff]  ;;  %v455_v27 = vld [vmem:[%s16779_s2 + $0x238] sm:$0xff] }
 0x696   : > { %13214 = vmatprep.subr.bf16.mxu0 %v15324_v32  ;;  %v12924_v32 = vadd.f32 %v12923_v63, %v12881_v9  ;;  %v15772_v36 = vcombine.high %v1990_v8, %v1998_v24  ;;  %v15771_v52 = vcombine.low %v1990_v8, %v1998_v24  ;;  %v14237_v53 = vcombine.low %v455_v27, %v463_v28  ;;  %v1926_v9 = vld [vmem:[%s16779_s2 + $0x3030] sm:$0xff] }
 0x698   : > { %13256 = vmatpush2.bf16.msra.mxu1 %v15595_v30  ;;  %v16247_v30 = vld [vmem:[%s16771_s30 + $0x4] ss:$56 sps:$4 sm:$0xff]  }
 0x699   : > { %13257 = vmatprep.subr.bf16.mxu1 %v15580_v33  ;;  %13215 = vmatpush2.bf16.msra.mxu0 %v15323_v42 }
 0x69a   : > { %13270 = vmatprep.subr.bf16.mxu0 %v15820_v44  ;;  %v1974_v44 = vld [vmem:[%s16779_s2 + $0x31b0] sm:$0xff] }
 0x69b   : > { %v15756_v47 = vcombine.high %v1974_v44, %v1982_v46  ;;  %v15755_v34 = vcombine.low %v1974_v44, %v1982_v46  ;;  %v591_v44 = vld [vmem:[%s16779_s2 + $0x678] sm:$0xff] }
 0x69c   : > { %13258 = vmatpush2.bf16.msra.mxu1 %v15579_v23  ;;  %v12960_v37 = vpop.f32.mrf.mxu0  ;;  %13217 = vmatmul.mubr.bf16.vlgmr.msra.gmra.mxu0 %v16244_v5  ;;  %v14238_v23 = vcombine.high %v455_v27, %v463_v28  ;;  %v623_v27 = vld [vmem:[%s16779_s2 + $0x778] sm:$0xff] }
 0x69d   : > { %13313 = vmatprep.subr.bf16.mxu1 %v14286_v48  ;;  %v12961_v10 = vadd.f32 %v12960_v37, %v12918_v62  ;;  %13271 = vmatpush1.bf16.msra.mxu0 %v15819_v55  ;;  %v447_v48 = vld [vmem:[%s16779_s2 + $0x1f8] sm:$0xff] }
 0x69e   : > { %v12962_v14 = vpop.f32.mrf.mxu0  ;;  %13272 = vmatprep.subr.bf16.mxu0 %v15804_v59  ;;  %13302 = vmatprep.mubr.bf16.mxu0 %v16246_v25  ;;  %v14222_v55 = vcombine.high %v439_v49, %v447_v48  ;;  %v423_v59 = vld [vmem:[%s16779_s2 + $0x138] sm:$0xff]  ;;  %v14221_v62 = vcombine.low %v439_v49, %v447_v48  ;;  %v2102_v48 = vld [vmem:[%s16779_s2 + $0x35b0] sm:$0xff] }
 0x69f   : > { %v13003_v31 = vpop.f32.mrf.mxu1  ;;  %13260 = vmatmul.mubr.bf16.vlgmr.msra.gmra.mxu1 %v16245_v60  ;;  %v12963_v19 = vadd.f32 %v12962_v14, %v12920_v7  ;;  %v14206_v63 = vcombine.high %v423_v59, %v431_v57  ;;  %v14205_v5 = vcombine.low %v423_v59, %v431_v57  ;;  %v14190_v7 = vcombine.high %v407_v3, %v415_v4  ;;  %v399_v60 = vld [vmem:[%s16779_s2 + $0x78] sm:$0xff] }
 0x6a0   : > { %13314 = vmatpush1.bf16.msra.mxu1 %v14285_v40  ;;  %v13004_v2 = vadd.f32 %v13003_v31, %v12961_v10  ;;  %v12964_v17 = vpop.f32.mrf.mxu0  ;;  %13345 = vmatprep.mubr.bf16.mxu1 %v16247_v30  ;;  %v1966_v40 = vld [vmem:[%s16779_s2 + $0x3170] sm:$0xff]  ;;  %v391_v31 = vld [vmem:[%s16779_s2 + $0x38] sm:$0xff]  ;;  %v14189_v14 = vcombine.low %v407_v3, %v415_v4 }
 0x6a1   : > { %v13005_v21 = vpop.f32.mrf.mxu1  ;;  %13315 = vmatprep.subr.bf16.mxu1 %v14270_v1  ;;  %v12965_v33 = vadd.f32 %v12964_v17, %v12922_v18  ;;  %13273 = vmatpush1.bf16.msra.mxu0 %v15803_v6  ;;  %v15740_v45 = vcombine.high %v1958_v58, %v1966_v40  ;;  %v1942_v1 = vld [vmem:[%s16779_s2 + $0x30b0] sm:$0xff]  ;;  %v15739_v37 = vcombine.low %v1958_v58, %v1966_v40  ;;  %v551_v59 = vld [vmem:[%s16779_s2 + $0x538] sm:$0xff] }
 0x6a2   : > { %v13624_v56 = vadd.f32 %v13004_v2, %v348_v11  ;;  %v13006_v16 = vadd.f32 %v13005_v21, %v12963_v19  ;;  %v12966_v39 = vpop.f32.mrf.mxu0  ;;  %13274 = vmatprep.subr.bf16.mxu0 %v15788_v13  ;;  %v15724_v6 = vcombine.high %v1942_v1, %v1950_v51  ;;  %v1934_v10 = vld [vmem:[%s16779_s2 + $0x3070] sm:$0xff]  ;;  %v15723_v11 = vcombine.low %v1942_v1, %v1950_v51  ;;  %v631_v2 = vld [vmem:[%s16779_s2 + $0x7b8] sm:$0xff] }
 0x6a3   : > { %v13007_v35 = vpop.f32.mrf.mxu1  ;;  %v12967_v43 = vadd.f32 %v12966_v39, %v12924_v32  ;;  %v14174_v13 = vcombine.high %v391_v31, %v399_v60  ;;  %v2174_v18 = vld [vmem:[%s16779_s2 + $0x37f0] sm:$0xff]  ;;  %v639_v19 = vld [vmem:[%s16779_s2 + $0x7f8] sm:$0xff]  ;;  %v15707_v21 = vcombine.low %v1926_v9, %v1934_v10  ;;  %v14173_v8 = vcombine.low %v391_v31, %v399_v60 }
 0x6a4   : > { %13316 = vmatpush1.bf16.msra.mxu1 %v14269_v15  ;;  %13656 = vst [vmem:[#allocation2 + $0xe8] sm:$0xff] %v13624_v56  ;;  %v13625_v0 = vadd.f32 %v13006_v16, %v349_v61  ;;  %v13008_v42 = vadd.f32 %v13007_v35, %v12965_v33  ;;  %v15708_v15 = vcombine.high %v1926_v9, %v1934_v10  ;;  %v2150_v61 = vld [vmem:[%s16779_s2 + $0x3730] sm:$0xff]  ;;  %v599_v35 = vld [vmem:[%s16779_s2 + $0x6b8] sm:$0xff] }
 0x6a5   : > { %13317 = vmatprep.subr.bf16.mxu1 %v14254_v41  ;;  %v13009_v29 = vpop.f32.mrf.mxu1  ;;  %13275 = vmatpush1.bf16.msra.mxu0 %v15787_v26  ;;  %v2166_v41 = vld [vmem:[%s16779_s2 + $0x37b0] sm:$0xff]  ;;  %v14414_v25 = vcombine.high %v631_v2, %v639_v19  ;;  %v615_v26 = vld [vmem:[%s16779_s2 + $0x738] sm:$0xff]  ;;  %v14413_v30 = vcombine.low %v631_v2, %v639_v19 }
 0x6a6   : > { %13657 = vst [vmem:[#allocation2 + $0xb8] sm:$0xff] %v13625_v0  ;;  %v13640_v50 = vadd.f32 %v13008_v42, %v364_v38  ;;  %v13010_v12 = vadd.f32 %v13009_v29, %v12967_v43  ;;  %13276 = vmatprep.subr.bf16.mxu0 %v15772_v36  ;;  %v15948_v24 = vcombine.high %v2166_v41, %v2174_v18  ;;  %v2158_v17 = vld [vmem:[%s16779_s2 + $0x3770] sm:$0xff]  ;;  %v607_v38 = vld [vmem:[%s16779_s2 + $0x6f8] sm:$0xff] }
 0x6a7   : > { %v15947_v28 = vcombine.low %v2166_v41, %v2174_v18  ;;  %v15932_v32 = vcombine.high %v2150_v61, %v2158_v17  ;;  %v14398_v56 = vcombine.high %v615_v26, %v623_v27  ;;  %v2134_v16 = vld [vmem:[%s16779_s2 + $0x36b0] sm:$0xff]  ;;  %v15931_v39 = vcombine.low %v2150_v61, %v2158_v17  ;;  %v559_v57 = vld [vmem:[%s16779_s2 + $0x578] sm:$0xff] }
 0x6a8   : > { %13318 = vmatpush1.bf16.msra.mxu1 %v14253_v20  ;;  %13672 = vst [vmem:[#allocation2 + $0x10] sm:$0xff] %v13640_v50  ;;  %v13641_v54 = vadd.f32 %v13010_v12, %v365_v22  ;;  %v2142_v33 = vld [vmem:[%s16779_s2 + $0x36f0] sm:$0xff]  ;;  %v14397_v20 = vcombine.low %v615_v26, %v623_v27  ;;  %v14382_v0 = vcombine.high %v599_v35, %v607_v38  ;;  %v567_v12 = vld [vmem:[%s16779_s2 + $0x5b8] sm:$0xff] }
 0x6a9   : > { %13319 = vmatprep.subr.bf16.mxu1 %v14238_v23  ;;  %13277 = vmatpush1.bf16.msra.mxu0 %v15771_v52  ;;  %v15916_v36 = vcombine.high %v2134_v16, %v2142_v33  ;;  %v2118_v42 = vld [vmem:[%s16779_s2 + $0x3630] sm:$0xff]  ;;  %v583_v23 = vld [vmem:[%s16779_s2 + $0x638] sm:$0xff]  ;;  %v15915_v46 = vcombine.low %v2134_v16, %v2142_v33  ;;  %v14381_v22 = vcombine.low %v599_v35, %v607_v38 }
 0x6aa   : > { %13673 = vst [vmem:[#allocation2 + $0x28] sm:$0xff] %v13641_v54  ;;  %13278 = vmatprep.subr.bf16.mxu0 %v15756_v47  ;;  %v2126_v43 = vld [vmem:[%s16779_s2 + $0x3670] sm:$0xff]  ;;  %v14366_v49 = vcombine.high %v583_v23, %v591_v44  ;;  %v575_v52 = vld [vmem:[%s16779_s2 + $0x5f8] sm:$0xff]  ;;  %v14365_v47 = vcombine.low %v583_v23, %v591_v44 }
 0x6ab   : > { %v15900_v29 = vcombine.high %v2118_v42, %v2126_v43  ;;  %v2110_v50 = vld [vmem:[%s16779_s2 + $0x35f0] sm:$0xff]  ;;  %v535_v3 = vld [vmem:[%s16779_s2 + $0x4b8] sm:$0xff] }
 0x6ac   : > { %13320 = vmatpush1.bf16.msra.mxu1 %v14237_v53  ;;  %v15899_v53 = vcombine.low %v2118_v42, %v2126_v43  ;;  %v15884_v54 = vcombine.high %v2102_v48, %v2110_v50  ;;  %v2086_v58 = vld [vmem:[%s16779_s2 + $0x3530] sm:$0xff]  ;;  %v543_v4 = vld [vmem:[%s16779_s2 + $0x4f8] sm:$0xff] }
 0x6ad   : > { %13321 = vmatprep.subr.bf16.mxu1 %v14222_v55  ;;  %13279 = vmatpush1.bf16.msra.mxu0 %v15755_v34  ;;  %v14350_v55 = vcombine.high %v567_v12, %v575_v52  ;;  %v2094_v40 = vld [vmem:[%s16779_s2 + $0x3570] sm:$0xff]  ;;  %v15883_v34 = vcombine.low %v2102_v48, %v2110_v50  ;;  %v519_v31 = vld [vmem:[%s16779_s2 + $0x438] sm:$0xff] }
 0x6ae   : > { %13280 = vmatprep.subr.bf16.mxu0 %v15740_v45  ;;  %v15868_v45 = vcombine.high %v2086_v58, %v2094_v40  ;;  %v2070_v1 = vld [vmem:[%s16779_s2 + $0x34b0] sm:$0xff]  ;;  %v527_v60 = vld [vmem:[%s16779_s2 + $0x478] sm:$0xff] }
 0x6af   : > { %v2078_v51 = vld [vmem:[%s16779_s2 + $0x34f0] sm:$0xff]  ;;  %v759_v41 = vld [vmem:[%s16779_s2 + $0xbb8] sm:$0xff] }
 0x6b0   : > { %13322 = vmatpush1.bf16.msra.mxu1 %v14221_v62  ;;  %v14349_v62 = vcombine.low %v567_v12, %v575_v52  ;;  %v2054_v9 = vld [vmem:[%s16779_s2 + $0x3430] sm:$0xff]  ;;  %v767_v18 = vld [vmem:[%s16779_s2 + $0xbf8] sm:$0xff] }
 0x6b1   : > { %13323 = vmatprep.subr.bf16.mxu1 %v14206_v63  ;;  %13281 = vmatpush1.bf16.msra.mxu0 %v15739_v37  ;;  %v14334_v63 = vcombine.high %v551_v59, %v559_v57  ;;  %v15867_v37 = vcombine.low %v2086_v58, %v2094_v40  ;;  %v2062_v10 = vld [vmem:[%s16779_s2 + $0x3470] sm:$0xff]  ;;  %v1015_v2 = vld [vmem:[%s16779_s2 + $0x13b8] sm:$0xff] }
 0x6b2   : > { %13282 = vmatprep.subr.bf16.mxu0 %v15724_v6  ;;  %v15852_v6 = vcombine.high %v2070_v1, %v2078_v51  ;;  %v1023_v19 = vld [vmem:[%s16779_s2 + $0x13f8] sm:$0xff] }
 0x6b3   : > { %v743_v61 = vld [vmem:[%s16779_s2 + $0xb38] sm:$0xff] }
 0x6b4   : > { %13324 = vmatpush1.bf16.msra.mxu1 %v14205_v5  ;;  %v14333_v5 = vcombine.low %v551_v59, %v559_v57  ;;  %v751_v17 = vld [vmem:[%s16779_s2 + $0xb78] sm:$0xff] }
 0x6b5   : > { %13325 = vmatprep.subr.bf16.mxu1 %v14190_v7  ;;  %13283 = vmatpush1.bf16.msra.mxu0 %v15723_v11  ;;  %v14318_v7 = vcombine.high %v535_v3, %v543_v4  ;;  %v15851_v11 = vcombine.low %v2070_v1, %v2078_v51  ;;  %v999_v26 = vld [vmem:[%s16779_s2 + $0x1338] sm:$0xff] }
 0x6b6   : > { %13284 = vmatprep.subr.bf16.mxu0 %v15708_v15  ;;  %v15836_v15 = vcombine.high %v2054_v9, %v2062_v10  ;;  %v1007_v27 = vld [vmem:[%s16779_s2 + $0x1378] sm:$0xff] }
 0x6b7   : > { %v727_v16 = vld [vmem:[%s16779_s2 + $0xab8] sm:$0xff] }
 0x6b8   : > { %13326 = vmatpush1.bf16.msra.mxu1 %v14189_v14  ;;  %v14317_v14 = vcombine.low %v535_v3, %v543_v4  ;;  %v735_v33 = vld [vmem:[%s16779_s2 + $0xaf8] sm:$0xff] }
 0x6b9   : > { %13327 = vmatprep.subr.bf16.mxu1 %v14174_v13  ;;  %13285 = vmatpush1.bf16.msra.mxu0 %v15707_v21  ;;  %v14302_v13 = vcombine.high %v519_v31, %v527_v60  ;;  %v15835_v21 = vcombine.low %v2054_v9, %v2062_v10  ;;  %v16248_v35 = vld [vmem:[%s16771_s30 + $0x30] ss:$56 sps:$4 sm:$0xff]   ;;  %v14510_v42 = vcombine.high %v727_v16, %v735_v33 }
 0x6ba   : > { %13286 = vmatprep.subr.bf16.mxu0 %v15948_v24  ;;  %v14542_v24 = vcombine.high %v759_v41, %v767_v18  ;;  %v983_v38 = vld [vmem:[%s16779_s2 + $0x12b8] sm:$0xff]  ;;  %v14509_v48 = vcombine.low %v727_v16, %v735_v33 }
 0x6bb   : > { %v711_v23 = vld [vmem:[%s16779_s2 + $0xa38] sm:$0xff] }
 0x6bc   : > { %13328 = vmatpush1.bf16.msra.mxu1 %v14173_v8  ;;  %v14301_v8 = vcombine.low %v519_v31, %v527_v60  ;;  %v719_v44 = vld [vmem:[%s16779_s2 + $0xa78] sm:$0xff] }
 0x6bd   : > { %13329 = vmatprep.subr.bf16.mxu1 %v14414_v25  ;;  %13287 = vmatpush2.bf16.msra.mxu0 %v15947_v28  ;;  %v14798_v25 = vcombine.high %v1015_v2, %v1023_v19  ;;  %v14541_v28 = vcombine.low %v759_v41, %v767_v18  ;;  %v14494_v12 = vcombine.high %v711_v23, %v719_v44 }
 0x6be   : > { %13288 = vmatprep.subr.bf16.mxu0 %v15932_v32  ;;  %v14526_v32 = vcombine.high %v743_v61, %v751_v17  ;;  %v14493_v58 = vcombine.low %v711_v23, %v719_v44 }
 0x6c0   : > { %13330 = vmatpush2.bf16.msra.mxu1 %v14413_v30  ;;  %v14797_v30 = vcombine.low %v1015_v2, %v1023_v19 }
 0x6c1   : > { %13331 = vmatprep.subr.bf16.mxu1 %v14398_v56  ;;  %13289 = vmatpush2.bf16.msra.mxu0 %v15931_v39  ;;  %v14782_v56 = vcombine.high %v999_v26, %v1007_v27  ;;  %v991_v39 = vld [vmem:[%s16779_s2 + $0x12f8] sm:$0xff] }
 0x6c2   : > { %13290 = vmatprep.subr.bf16.mxu0 %v15916_v36  ;;  %v14525_v36 = vcombine.low %v743_v61, %v751_v17  ;;  %v14766_v43 = vcombine.high %v983_v38, %v991_v39  ;;  %v14765_v50 = vcombine.low %v983_v38, %v991_v39  ;;  %v855_v39 = vld [vmem:[%s16779_s2 + $0xeb8] sm:$0xff] }
 0x6c4   : > { %13332 = vmatpush2.bf16.msra.mxu1 %v14397_v20  ;;  %v16249_v20 = vld [vmem:[%s16771_s30] ss:$56 sps:$4 sm:$0xff]  }
 0x6c5   : > { %13333 = vmatprep.subr.bf16.mxu1 %v14382_v0  ;;  %13291 = vmatpush2.bf16.msra.mxu0 %v15915_v46  ;;  %v14781_v0 = vcombine.low %v999_v26, %v1007_v27  ;;  %v16250_v46 = vld [vmem:[%s16771_s30 + $0xc] ss:$56 sps:$4 sm:$0xff]  }
 0x6c6   : > { %13292 = vmatprep.subr.bf16.mxu0 %v15900_v29  ;;  %v975_v29 = vld [vmem:[%s16779_s2 + $0x1278] sm:$0xff] }
 0x6c8   : > { %13334 = vmatpush2.bf16.msra.mxu1 %v14381_v22  ;;  %v967_v22 = vld [vmem:[%s16779_s2 + $0x1238] sm:$0xff] }
 0x6c9   : > { %13335 = vmatprep.subr.bf16.mxu1 %v14366_v49  ;;  %13293 = vmatpush2.bf16.msra.mxu0 %v15899_v53  ;;  %v16251_v49 = vld [vmem:[%s16771_s30 + $0x14] ss:$56 sps:$4 sm:$0xff]   ;;  %v14750_v52 = vcombine.high %v967_v22, %v975_v29  ;;  %v14749_v40 = vcombine.low %v967_v22, %v975_v29 }
 0x6ca   : > { %13294 = vmatprep.subr.bf16.mxu0 %v15884_v54  ;;  %v695_v53 = vld [vmem:[%s16779_s2 + $0x9b8] sm:$0xff] }
 0x6cb   : > { %v951_v54 = vld [vmem:[%s16779_s2 + $0x11b8] sm:$0xff] }
 0x6cc   : > { %13336 = vmatpush2.bf16.msra.mxu1 %v14365_v47  ;;  %v703_v47 = vld [vmem:[%s16779_s2 + $0x9f8] sm:$0xff] }
 0x6cd   : > { %13337 = vmatprep.subr.bf16.mxu1 %v14350_v55  ;;  %13295 = vmatpush2.bf16.msra.mxu0 %v15883_v34  ;;  %v959_v55 = vld [vmem:[%s16779_s2 + $0x11f8] sm:$0xff]  ;;  %v14478_v59 = vcombine.high %v695_v53, %v703_v47  ;;  %v14477_v1 = vcombine.low %v695_v53, %v703_v47 }
 0x6ce   : > { %13296 = vmatprep.subr.bf16.mxu0 %v15868_v45  ;;  %v14734_v57 = vcombine.high %v951_v54, %v959_v55  ;;  %v679_v34 = vld [vmem:[%s16779_s2 + $0x938] sm:$0xff]  ;;  %v14733_v51 = vcombine.low %v951_v54, %v959_v55 }
 0x6cf   : > { %v935_v45 = vld [vmem:[%s16779_s2 + $0x1138] sm:$0xff] }
 0x6d0   : > { %13338 = vmatpush2.bf16.msra.mxu1 %v14349_v62  ;;  %v687_v62 = vld [vmem:[%s16779_s2 + $0x978] sm:$0xff] }
 0x6d1   : > { %13339 = vmatprep.subr.bf16.mxu1 %v14334_v63  ;;  %13297 = vmatpush2.bf16.msra.mxu0 %v15867_v37  ;;  %v943_v63 = vld [vmem:[%s16779_s2 + $0x1178] sm:$0xff]  ;;  %v14462_v3 = vcombine.high %v679_v34, %v687_v62  ;;  %v14461_v9 = vcombine.low %v679_v34, %v687_v62 }
 0x6d2   : > { %13298 = vmatprep.subr.bf16.mxu0 %v15852_v6  ;;  %v14718_v4 = vcombine.high %v935_v45, %v943_v63  ;;  %v663_v37 = vld [vmem:[%s16779_s2 + $0x8b8] sm:$0xff]  ;;  %v14717_v10 = vcombine.low %v935_v45, %v943_v63 }
 0x6d3   : > { %v919_v6 = vld [vmem:[%s16779_s2 + $0x10b8] sm:$0xff] }
 0x6d4   : > { %13340 = vmatpush2.bf16.msra.mxu1 %v14333_v5  ;;  %v671_v5 = vld [vmem:[%s16779_s2 + $0x8f8] sm:$0xff] }
 0x6d5   : > { %13341 = vmatprep.subr.bf16.mxu1 %v14318_v7  ;;  %13299 = vmatpush2.bf16.msra.mxu0 %v15851_v11  ;;  %v927_v7 = vld [vmem:[%s16779_s2 + $0x10f8] sm:$0xff]  ;;  %v14446_v31 = vcombine.high %v663_v37, %v671_v5  ;;  %v14445_v41 = vcombine.low %v663_v37, %v671_v5 }
 0x6d6   : > { %13300 = vmatprep.subr.bf16.mxu0 %v15836_v15  ;;  %v14702_v60 = vcombine.high %v919_v6, %v927_v7  ;;  %v647_v11 = vld [vmem:[%s16779_s2 + $0x838] sm:$0xff]  ;;  %v14701_v18 = vcombine.low %v919_v6, %v927_v7 }
 0x6d7   : > { %v903_v15 = vld [vmem:[%s16779_s2 + $0x1038] sm:$0xff] }
 0x6d8   : > { %13342 = vmatpush2.bf16.msra.mxu1 %v14317_v14  ;;  %v655_v14 = vld [vmem:[%s16779_s2 + $0x878] sm:$0xff] }
 0x6d9   : > { %13343 = vmatprep.subr.bf16.mxu1 %v14302_v13  ;;  %13301 = vmatpush2.bf16.msra.mxu0 %v15835_v21  ;;  %v911_v13 = vld [vmem:[%s16779_s2 + $0x1078] sm:$0xff]  ;;  %v14430_v2 = vcombine.high %v647_v11, %v655_v14  ;;  %v14429_v61 = vcombine.low %v647_v11, %v655_v14 }
 0x6da   : > { %13356 = vmatprep.subr.bf16.mxu0 %v14542_v24  ;;  %v14686_v19 = vcombine.high %v903_v15, %v911_v13  ;;  %v887_v21 = vld [vmem:[%s16779_s2 + $0xfb8] sm:$0xff]  ;;  %v14685_v17 = vcombine.low %v903_v15, %v911_v13 }
 0x6db   : > { %v1143_v24 = vld [vmem:[%s16779_s2 + $0x17b8] sm:$0xff] }
 0x6dc   : > { %13344 = vmatpush2.bf16.msra.mxu1 %v14301_v8  ;;  %13303 = vmatmul.mubr.bf16.vlgmr.msra.gmra.mxu0 %v16248_v35  ;;  %v895_v8 = vld [vmem:[%s16779_s2 + $0xff8] sm:$0xff] }
 0x6dd   : > { %13399 = vmatprep.subr.bf16.mxu1 %v14798_v25  ;;  %13357 = vmatpush1.bf16.msra.mxu0 %v14541_v28  ;;  %v1151_v25 = vld [vmem:[%s16779_s2 + $0x17f8] sm:$0xff]  ;;  %v14670_v26 = vcombine.high %v887_v21, %v895_v8  ;;  %v14669_v16 = vcombine.low %v887_v21, %v895_v8 }
 0x6de   : > { %13358 = vmatprep.subr.bf16.mxu0 %v14526_v32  ;;  %13388 = vmatprep.mubr.bf16.mxu0 %v16250_v46  ;;  %v14926_v27 = vcombine.high %v1143_v24, %v1151_v25  ;;  %v871_v28 = vld [vmem:[%s16779_s2 + $0xf38] sm:$0xff]  ;;  %v14925_v33 = vcombine.low %v1143_v24, %v1151_v25 }
 0x6df   : > { %13346 = vmatmul.mubr.bf16.vlgmr.msra.gmra.mxu1 %v16249_v20  ;;  %v1127_v32 = vld [vmem:[%s16779_s2 + $0x1738] sm:$0xff] }
 0x6e0   : > { %13400 = vmatpush1.bf16.msra.mxu1 %v14797_v30  ;;  %13431 = vmatprep.mubr.bf16.mxu1 %v16251_v49  ;;  %v879_v30 = vld [vmem:[%s16779_s2 + $0xf78] sm:$0xff] }
 0x6e1   : > { %13401 = vmatprep.subr.bf16.mxu1 %v14782_v56  ;;  %13359 = vmatpush1.bf16.msra.mxu0 %v14525_v36  ;;  %v1135_v56 = vld [vmem:[%s16779_s2 + $0x1778] sm:$0xff]  ;;  %v14654_v35 = vcombine.high %v871_v28, %v879_v30 }
 0x6e2   : > { %13360 = vmatprep.subr.bf16.mxu0 %v14510_v42  ;;  %v14910_v38 = vcombine.high %v1127_v32, %v1135_v56  ;;  %v863_v20 = vld [vmem:[%s16779_s2 + $0xef8] sm:$0xff]  ;;  %v14653_v42 = vcombine.low %v871_v28, %v879_v30 }
 0x6e3   : > { %v1111_v36 = vld [vmem:[%s16779_s2 + $0x16b8] sm:$0xff]  ;;  %v14638_v23 = vcombine.high %v855_v39, %v863_v20 }
 0x6e4   : > { %13402 = vmatpush1.bf16.msra.mxu1 %v14781_v0  ;;  %v1119_v0 = vld [vmem:[%s16779_s2 + $0x16f8] sm:$0xff] }
 0x6e5   : > { %13403 = vmatprep.subr.bf16.mxu1 %v14766_v43  ;;  %13361 = vmatpush1.bf16.msra.mxu0 %v14509_v48  ;;  %v14909_v43 = vcombine.low %v1127_v32, %v1135_v56  ;;  %v14894_v44 = vcombine.high %v1111_v36, %v1119_v0  ;;  %v839_v46 = vld [vmem:[%s16779_s2 + $0xe38] sm:$0xff]  ;;  %v14637_v48 = vcombine.low %v855_v39, %v863_v20 }
 0x6e6   : > { %13362 = vmatprep.subr.bf16.mxu0 %v14494_v12  ;;  %v847_v22 = vld [vmem:[%s16779_s2 + $0xe78] sm:$0xff] }
 0x6e7   : > { %v1095_v29 = vld [vmem:[%s16779_s2 + $0x1638] sm:$0xff]  ;;  %v14622_v12 = vcombine.high %v839_v46, %v847_v22 }
 0x6e8   : > { %13404 = vmatpush1.bf16.msra.mxu1 %v14765_v50  ;;  %v1103_v49 = vld [vmem:[%s16779_s2 + $0x1678] sm:$0xff]  ;;  %v14893_v50 = vcombine.low %v1111_v36, %v1119_v0 }
 0x6e9   : > { %13405 = vmatprep.subr.bf16.mxu1 %v14750_v52  ;;  %13363 = vmatpush1.bf16.msra.mxu0 %v14493_v58  ;;  %v14878_v52 = vcombine.high %v1095_v29, %v1103_v49  ;;  %v823_v53 = vld [vmem:[%s16779_s2 + $0xdb8] sm:$0xff]  ;;  %v14621_v58 = vcombine.low %v839_v46, %v847_v22 }
 0x6ea   : > { %13364 = vmatprep.subr.bf16.mxu0 %v14478_v59  ;;  %v831_v47 = vld [vmem:[%s16779_s2 + $0xdf8] sm:$0xff] }
 0x6eb   : > { %v1079_v54 = vld [vmem:[%s16779_s2 + $0x15b8] sm:$0xff]  ;;  %v14606_v59 = vcombine.high %v823_v53, %v831_v47 }
 0x6ec   : > { %13406 = vmatpush1.bf16.msra.mxu1 %v14749_v40  ;;  %v1087_v55 = vld [vmem:[%s16779_s2 + $0x15f8] sm:$0xff]  ;;  %v14877_v40 = vcombine.low %v1095_v29, %v1103_v49 }
 0x6ed   : > { %13407 = vmatprep.subr.bf16.mxu1 %v14734_v57  ;;  %13365 = vmatpush1.bf16.msra.mxu0 %v14477_v1  ;;  %v14862_v57 = vcombine.high %v1079_v54, %v1087_v55  ;;  %v807_v34 = vld [vmem:[%s16779_s2 + $0xd38] sm:$0xff]  ;;  %v14605_v1 = vcombine.low %v823_v53, %v831_v47 }
 0x6ee   : > { %13366 = vmatprep.subr.bf16.mxu0 %v14462_v3  ;;  %v815_v62 = vld [vmem:[%s16779_s2 + $0xd78] sm:$0xff] }
 0x6ef   : > { %v1063_v45 = vld [vmem:[%s16779_s2 + $0x1538] sm:$0xff]  ;;  %v14590_v3 = vcombine.high %v807_v34, %v815_v62 }
 0x6f0   : > { %13408 = vmatpush1.bf16.msra.mxu1 %v14733_v51  ;;  %v1071_v63 = vld [vmem:[%s16779_s2 + $0x1578] sm:$0xff]  ;;  %v14861_v51 = vcombine.low %v1079_v54, %v1087_v55 }
 0x6f1   : > { %13409 = vmatprep.subr.bf16.mxu1 %v14718_v4  ;;  %13367 = vmatpush1.bf16.msra.mxu0 %v14461_v9  ;;  %v14846_v4 = vcombine.high %v1063_v45, %v1071_v63  ;;  %v791_v37 = vld [vmem:[%s16779_s2 + $0xcb8] sm:$0xff]  ;;  %v14589_v9 = vcombine.low %v807_v34, %v815_v62 }
 0x6f2   : > { %13368 = vmatprep.subr.bf16.mxu0 %v14446_v31  ;;  %v799_v5 = vld [vmem:[%s16779_s2 + $0xcf8] sm:$0xff] }
 0x6f3   : > { %v1047_v6 = vld [vmem:[%s16779_s2 + $0x14b8] sm:$0xff]  ;;  %v14574_v31 = vcombine.high %v791_v37, %v799_v5 }
 0x6f4   : > { %13410 = vmatpush1.bf16.msra.mxu1 %v14717_v10  ;;  %v1055_v7 = vld [vmem:[%s16779_s2 + $0x14f8] sm:$0xff]  ;;  %v14845_v10 = vcombine.low %v1063_v45, %v1071_v63 }
 0x6f5   : > { %13411 = vmatprep.subr.bf16.mxu1 %v14702_v60  ;;  %13369 = vmatpush1.bf16.msra.mxu0 %v14445_v41  ;;  %v14830_v60 = vcombine.high %v1047_v6, %v1055_v7  ;;  %v775_v11 = vld [vmem:[%s16779_s2 + $0xc38] sm:$0xff]  ;;  %v14573_v41 = vcombine.low %v791_v37, %v799_v5 }
 0x6f6   : > { %13370 = vmatprep.subr.bf16.mxu0 %v14430_v2  ;;  %v783_v14 = vld [vmem:[%s16779_s2 + $0xc78] sm:$0xff] }
 0x6f7   : > { %v1031_v15 = vld [vmem:[%s16779_s2 + $0x1438] sm:$0xff]  ;;  %v14558_v2 = vcombine.high %v775_v11, %v783_v14 }
 0x6f8   : > { %13412 = vmatpush1.bf16.msra.mxu1 %v14701_v18  ;;  %v1039_v13 = vld [vmem:[%s16779_s2 + $0x1478] sm:$0xff]  ;;  %v14829_v18 = vcombine.low %v1047_v6, %v1055_v7 }
 0x6f9   : > { %13413 = vmatprep.subr.bf16.mxu1 %v14686_v19  ;;  %13371 = vmatpush1.bf16.msra.mxu0 %v14429_v61  ;;  %v14814_v19 = vcombine.high %v1031_v15, %v1039_v13  ;;  %v1271_v21 = vld [vmem:[%s16779_s2 + $0x1bb8] sm:$0xff]  ;;  %v14557_v61 = vcombine.low %v775_v11, %v783_v14 }
 0x6fa   : > { %13372 = vmatprep.subr.bf16.mxu0 %v14670_v26  ;;  %v1279_v8 = vld [vmem:[%s16779_s2 + $0x1bf8] sm:$0xff] }
 0x6fb   : > { %v1527_v24 = vld [vmem:[%s16779_s2 + $0x23b8] sm:$0xff]  ;;  %v15054_v26 = vcombine.high %v1271_v21, %v1279_v8 }
 0x6fc   : > { %13414 = vmatpush1.bf16.msra.mxu1 %v14685_v17  ;;  %v1535_v25 = vld [vmem:[%s16779_s2 + $0x23f8] sm:$0xff]  ;;  %v14813_v17 = vcombine.low %v1031_v15, %v1039_v13 }
 0x6fd   : > { %13415 = vmatprep.subr.bf16.mxu1 %v14926_v27  ;;  %13373 = vmatpush2.bf16.msra.mxu0 %v14669_v16  ;;  %v15310_v27 = vcombine.high %v1527_v24, %v1535_v25  ;;  %v1255_v28 = vld [vmem:[%s16779_s2 + $0x1b38] sm:$0xff]  ;;  %v15053_v16 = vcombine.low %v1271_v21, %v1279_v8 }
 0x6fe   : > { %13374 = vmatprep.subr.bf16.mxu0 %v14654_v35  ;;  %v1263_v30 = vld [vmem:[%s16779_s2 + $0x1b78] sm:$0xff] }
 0x6ff   : > { %v1511_v32 = vld [vmem:[%s16779_s2 + $0x2338] sm:$0xff]  ;;  %v15038_v35 = vcombine.high %v1255_v28, %v1263_v30 }
 0x700   : > { %13416 = vmatpush2.bf16.msra.mxu1 %v14925_v33  ;;  %v1519_v56 = vld [vmem:[%s16779_s2 + $0x2378] sm:$0xff]  ;;  %v15309_v33 = vcombine.low %v1527_v24, %v1535_v25 }
 0x701   : > { %13417 = vmatprep.subr.bf16.mxu1 %v14910_v38  ;;  %13375 = vmatpush2.bf16.msra.mxu0 %v14653_v42  ;;  %v15294_v38 = vcombine.high %v1511_v32, %v1519_v56  ;;  %v1239_v39 = vld [vmem:[%s16779_s2 + $0x1ab8] sm:$0xff] }
 0x702   : > { %13376 = vmatprep.subr.bf16.mxu0 %v14638_v23  ;;  %v1247_v20 = vld [vmem:[%s16779_s2 + $0x1af8] sm:$0xff]  ;;  %v15037_v23 = vcombine.low %v1255_v28, %v1263_v30 }
 0x703   : > { %v16252_v36 = vld [vmem:[%s16771_s30 + $0x8] ss:$56 sps:$4 sm:$0xff]   ;;  %v15022_v46 = vcombine.high %v1239_v39, %v1247_v20  ;;  %v15021_v53 = vcombine.low %v1239_v39, %v1247_v20 }
 0x704   : > { %13418 = vmatpush2.bf16.msra.mxu1 %v14909_v43  ;;  %v1495_v0 = vld [vmem:[%s16779_s2 + $0x22b8] sm:$0xff] }
 0x705   : > { %13419 = vmatprep.subr.bf16.mxu1 %v14894_v44  ;;  %13377 = vmatpush2.bf16.msra.mxu0 %v14637_v48  ;;  %v1503_v42 = vld [vmem:[%s16779_s2 + $0x22f8] sm:$0xff]  ;;  %v15293_v44 = vcombine.low %v1511_v32, %v1519_v56 }
 0x706   : > { %13378 = vmatprep.subr.bf16.mxu0 %v14622_v12  ;;  %v16253_v43 = vld [vmem:[%s16771_s30 + $0x10] ss:$56 sps:$4 sm:$0xff]   ;;  %v15278_v22 = vcombine.high %v1495_v0, %v1503_v42  ;;  %v16254_v48 = vld [vmem:[%s16771_s30 + $0x1c] ss:$56 sps:$4 sm:$0xff]   ;;  %v15277_v47 = vcombine.low %v1495_v0, %v1503_v42 }
 0x707   : > { %v1223_v29 = vld [vmem:[%s16779_s2 + $0x1a38] sm:$0xff] }
 0x708   : > { %13420 = vmatpush2.bf16.msra.mxu1 %v14893_v50  ;;  %v1231_v49 = vld [vmem:[%s16779_s2 + $0x1a78] sm:$0xff] }
 0x709   : > { %13421 = vmatprep.subr.bf16.mxu1 %v14878_v52  ;;  %13379 = vmatpush2.bf16.msra.mxu0 %v14621_v58  ;;  %v1479_v50 = vld [vmem:[%s16779_s2 + $0x2238] sm:$0xff]  ;;  %v15006_v54 = vcombine.high %v1223_v29, %v1231_v49  ;;  %v15005_v34 = vcombine.low %v1223_v29, %v1231_v49 }
 0x70a   : > { %13380 = vmatprep.subr.bf16.mxu0 %v14606_v59  ;;  %v1487_v12 = vld [vmem:[%s16779_s2 + $0x2278] sm:$0xff] }
 0x70b   : > { %v16255_v52 = vld [vmem:[%s16771_s30 + $0x24] ss:$56 sps:$4 sm:$0xff]   ;;  %v15262_v55 = vcombine.high %v1479_v50, %v1487_v12  ;;  %v15261_v62 = vcombine.low %v1479_v50, %v1487_v12 }
 0x70c   : > { %13422 = vmatpush2.bf16.msra.mxu1 %v14877_v40  ;;  %v1207_v58 = vld [vmem:[%s16779_s2 + $0x19b8] sm:$0xff] }
 0x70d   : > { %13423 = vmatprep.subr.bf16.mxu1 %v14862_v57  ;;  %13381 = vmatpush2.bf16.msra.mxu0 %v14605_v1  ;;  %v1215_v40 = vld [vmem:[%s16779_s2 + $0x19f8] sm:$0xff] }
 0x70e   : > { %13382 = vmatprep.subr.bf16.mxu0 %v14590_v3  ;;  %v1463_v59 = vld [vmem:[%s16779_s2 + $0x21b8] sm:$0xff]  ;;  %v14990_v45 = vcombine.high %v1207_v58, %v1215_v40  ;;  %v14989_v37 = vcombine.low %v1207_v58, %v1215_v40 }
 0x70f   : > { %v1471_v57 = vld [vmem:[%s16779_s2 + $0x21f8] sm:$0xff] }
 0x710   : > { %13424 = vmatpush2.bf16.msra.mxu1 %v14861_v51  ;;  %v15246_v63 = vcombine.high %v1463_v59, %v1471_v57  ;;  %v1191_v1 = vld [vmem:[%s16779_s2 + $0x1938] sm:$0xff]  ;;  %v15245_v5 = vcombine.low %v1463_v59, %v1471_v57 }
 0x711   : > { %13425 = vmatprep.subr.bf16.mxu1 %v14846_v4  ;;  %13383 = vmatpush2.bf16.msra.mxu0 %v14589_v9  ;;  %v1199_v51 = vld [vmem:[%s16779_s2 + $0x1978] sm:$0xff] }
 0x712   : > { %13384 = vmatprep.subr.bf16.mxu0 %v14574_v31  ;;  %v1447_v3 = vld [vmem:[%s16779_s2 + $0x2138] sm:$0xff]  ;;  %v14974_v6 = vcombine.high %v1191_v1, %v1199_v51  ;;  %v14973_v11 = vcombine.low %v1191_v1, %v1199_v51 }
 0x713   : > { %v1455_v4 = vld [vmem:[%s16779_s2 + $0x2178] sm:$0xff] }
 0x714   : > { %13426 = vmatpush2.bf16.msra.mxu1 %v14845_v10  ;;  %v15230_v7 = vcombine.high %v1447_v3, %v1455_v4  ;;  %v1175_v9 = vld [vmem:[%s16779_s2 + $0x18b8] sm:$0xff]  ;;  %v15229_v14 = vcombine.low %v1447_v3, %v1455_v4 }
 0x715   : > { %13427 = vmatprep.subr.bf16.mxu1 %v14830_v60  ;;  %13385 = vmatpush2.bf16.msra.mxu0 %v14573_v41  ;;  %v1183_v10 = vld [vmem:[%s16779_s2 + $0x18f8] sm:$0xff] }
 0x716   : > { %13386 = vmatprep.subr.bf16.mxu0 %v14558_v2  ;;  %v1431_v31 = vld [vmem:[%s16779_s2 + $0x20b8] sm:$0xff]  ;;  %v14958_v15 = vcombine.high %v1175_v9, %v1183_v10  ;;  %v14957_v21 = vcombine.low %v1175_v9, %v1183_v10 }
 0x717   : > { %v1439_v60 = vld [vmem:[%s16779_s2 + $0x20f8] sm:$0xff] }
 0x718   : > { %13428 = vmatpush2.bf16.msra.mxu1 %v14829_v18  ;;  %v15214_v13 = vcombine.high %v1431_v31, %v1439_v60  ;;  %v1159_v41 = vld [vmem:[%s16779_s2 + $0x1838] sm:$0xff]  ;;  %v15213_v8 = vcombine.low %v1431_v31, %v1439_v60 }
 0x719   : > { %13429 = vmatprep.subr.bf16.mxu1 %v14814_v19  ;;  %13387 = vmatpush2.bf16.msra.mxu0 %v14557_v61  ;;  %v1167_v18 = vld [vmem:[%s16779_s2 + $0x1878] sm:$0xff] }
 0x71a   : > { %13442 = vmatprep.subr.bf16.mxu0 %v15054_v26  ;;  %v1415_v2 = vld [vmem:[%s16779_s2 + $0x2038] sm:$0xff]  ;;  %v14942_v24 = vcombine.high %v1159_v41, %v1167_v18  ;;  %v14941_v28 = vcombine.low %v1159_v41, %v1167_v18 }
 0x71b   : > { %v1423_v19 = vld [vmem:[%s16779_s2 + $0x2078] sm:$0xff] }
 0x71c   : > { %13430 = vmatpush2.bf16.msra.mxu1 %v14813_v17  ;;  %13389 = vmatmul.mubr.bf16.vlgmr.msra.gmra.mxu0 %v16252_v36  ;;  %v15198_v25 = vcombine.high %v1415_v2, %v1423_v19  ;;  %v1399_v61 = vld [vmem:[%s16779_s2 + $0x1fb8] sm:$0xff]  ;;  %v15197_v30 = vcombine.low %v1415_v2, %v1423_v19 }
 0x71d   : > { %13485 = vmatprep.subr.bf16.mxu1 %v15310_v27  ;;  %13443 = vmatpush1.bf16.msra.mxu0 %v15053_v16  ;;  %v1407_v17 = vld [vmem:[%s16779_s2 + $0x1ff8] sm:$0xff] }
 0x71e   : > { %13444 = vmatprep.subr.bf16.mxu0 %v15038_v35  ;;  %13474 = vmatprep.mubr.bf16.mxu0 %v16254_v48  ;;  %v1655_v26 = vld [vmem:[%s16779_s2 + $0x27b8] sm:$0xff]  ;;  %v15182_v32 = vcombine.high %v1399_v61, %v1407_v17  ;;  %v15181_v39 = vcombine.low %v1399_v61, %v1407_v17 }
 0x71f   : > { %13432 = vmatmul.mubr.bf16.vlgmr.msra.gmra.mxu1 %v16253_v43  ;;  %v1663_v27 = vld [vmem:[%s16779_s2 + $0x27f8] sm:$0xff] }
 0x720   : > { %13486 = vmatpush1.bf16.msra.mxu1 %v15309_v33  ;;  %13517 = vmatprep.mubr.bf16.mxu1 %v16255_v52  ;;  %v15438_v56 = vcombine.high %v1655_v26, %v1663_v27  ;;  %v1383_v16 = vld [vmem:[%s16779_s2 + $0x1f38] sm:$0xff]  ;;  %v15437_v20 = vcombine.low %v1655_v26, %v1663_v27 }
 0x721   : > { %13487 = vmatprep.subr.bf16.mxu1 %v15294_v38  ;;  %13445 = vmatpush1.bf16.msra.mxu0 %v15037_v23  ;;  %v1391_v33 = vld [vmem:[%s16779_s2 + $0x1f78] sm:$0xff] }
 0x722   : > { %13446 = vmatprep.subr.bf16.mxu0 %v15022_v46  ;;  %v1639_v35 = vld [vmem:[%s16779_s2 + $0x2738] sm:$0xff]  ;;  %v15166_v36 = vcombine.high %v1383_v16, %v1391_v33  ;;  %v15165_v46 = vcombine.low %v1383_v16, %v1391_v33 }
 0x723   : > { %v1647_v38 = vld [vmem:[%s16779_s2 + $0x2778] sm:$0xff] }
 0x724   : > { %13488 = vmatpush1.bf16.msra.mxu1 %v15293_v44  ;;  %v15422_v0 = vcombine.high %v1639_v35, %v1647_v38  ;;  %v1367_v42 = vld [vmem:[%s16779_s2 + $0x1eb8] sm:$0xff] }
 0x725   : > { %13489 = vmatprep.subr.bf16.mxu1 %v15278_v22  ;;  %13447 = vmatpush1.bf16.msra.mxu0 %v15021_v53  ;;  %v1375_v43 = vld [vmem:[%s16779_s2 + $0x1ef8] sm:$0xff]  ;;  %v15421_v22 = vcombine.low %v1639_v35, %v1647_v38 }
 0x726   : > { %13448 = vmatprep.subr.bf16.mxu0 %v15006_v54  ;;  %v1623_v23 = vld [vmem:[%s16779_s2 + $0x26b8] sm:$0xff]  ;;  %v15150_v29 = vcombine.high %v1367_v42, %v1375_v43  ;;  %v15149_v53 = vcombine.low %v1367_v42, %v1375_v43 }
 0x727   : > { %v1631_v44 = vld [vmem:[%s16779_s2 + $0x26f8] sm:$0xff] }
 0x728   : > { %13490 = vmatpush1.bf16.msra.mxu1 %v15277_v47  ;;  %v15406_v49 = vcombine.high %v1623_v23, %v1631_v44  ;;  %v1351_v48 = vld [vmem:[%s16779_s2 + $0x1e38] sm:$0xff]  ;;  %v15405_v47 = vcombine.low %v1623_v23, %v1631_v44 }
 0x729   : > { %13491 = vmatprep.subr.bf16.mxu1 %v15262_v55  ;;  %13449 = vmatpush1.bf16.msra.mxu0 %v15005_v34  ;;  %v1359_v50 = vld [vmem:[%s16779_s2 + $0x1e78] sm:$0xff] }
 0x72a   : > { %13450 = vmatprep.subr.bf16.mxu0 %v14990_v45  ;;  %v1607_v12 = vld [vmem:[%s16779_s2 + $0x2638] sm:$0xff]  ;;  %v15134_v54 = vcombine.high %v1351_v48, %v1359_v50  ;;  %v15133_v34 = vcombine.low %v1351_v48, %v1359_v50 }
 0x72b   : > { %v1615_v52 = vld [vmem:[%s16779_s2 + $0x2678] sm:$0xff] }
 0x72c   : > { %13492 = vmatpush1.bf16.msra.mxu1 %v15261_v62  ;;  %v15390_v55 = vcombine.high %v1607_v12, %v1615_v52  ;;  %v1335_v58 = vld [vmem:[%s16779_s2 + $0x1db8] sm:$0xff]  ;;  %v15389_v62 = vcombine.low %v1607_v12, %v1615_v52 }
 0x72d   : > { %13493 = vmatprep.subr.bf16.mxu1 %v15246_v63  ;;  %13451 = vmatpush1.bf16.msra.mxu0 %v14989_v37  ;;  %v1343_v40 = vld [vmem:[%s16779_s2 + $0x1df8] sm:$0xff] }
 0x72e   : > { %13452 = vmatprep.subr.bf16.mxu0 %v14974_v6  ;;  %v1591_v59 = vld [vmem:[%s16779_s2 + $0x25b8] sm:$0xff]  ;;  %v15118_v45 = vcombine.high %v1335_v58, %v1343_v40  ;;  %v15117_v37 = vcombine.low %v1335_v58, %v1343_v40 }
 0x72f   : > { %v1599_v57 = vld [vmem:[%s16779_s2 + $0x25f8] sm:$0xff] }
 0x730   : > { %13494 = vmatpush1.bf16.msra.mxu1 %v15245_v5  ;;  %v15374_v63 = vcombine.high %v1591_v59, %v1599_v57  ;;  %v1319_v1 = vld [vmem:[%s16779_s2 + $0x1d38] sm:$0xff]  ;;  %v15373_v5 = vcombine.low %v1591_v59, %v1599_v57 }
 0x731   : > { %13495 = vmatprep.subr.bf16.mxu1 %v15230_v7  ;;  %13453 = vmatpush1.bf16.msra.mxu0 %v14973_v11  ;;  %v1327_v51 = vld [vmem:[%s16779_s2 + $0x1d78] sm:$0xff] }
 0x732   : > { %13454 = vmatprep.subr.bf16.mxu0 %v14958_v15  ;;  %v1575_v3 = vld [vmem:[%s16779_s2 + $0x2538] sm:$0xff]  ;;  %v15102_v6 = vcombine.high %v1319_v1, %v1327_v51  ;;  %v15101_v11 = vcombine.low %v1319_v1, %v1327_v51 }
 0x733   : > { %v1583_v4 = vld [vmem:[%s16779_s2 + $0x2578] sm:$0xff] }
 0x734   : > { %13496 = vmatpush1.bf16.msra.mxu1 %v15229_v14  ;;  %v15358_v7 = vcombine.high %v1575_v3, %v1583_v4  ;;  %v1303_v9 = vld [vmem:[%s16779_s2 + $0x1cb8] sm:$0xff]  ;;  %v15357_v14 = vcombine.low %v1575_v3, %v1583_v4 }
 0x735   : > { %13497 = vmatprep.subr.bf16.mxu1 %v15214_v13  ;;  %13455 = vmatpush1.bf16.msra.mxu0 %v14957_v21  ;;  %v1311_v10 = vld [vmem:[%s16779_s2 + $0x1cf8] sm:$0xff] }
 0x736   : > { %13456 = vmatprep.subr.bf16.mxu0 %v14942_v24  ;;  %v1559_v31 = vld [vmem:[%s16779_s2 + $0x24b8] sm:$0xff]  ;;  %v15086_v15 = vcombine.high %v1303_v9, %v1311_v10  ;;  %v15085_v21 = vcombine.low %v1303_v9, %v1311_v10 }
 0x737   : > { %v1567_v60 = vld [vmem:[%s16779_s2 + $0x24f8] sm:$0xff] }
 0x738   : > { %13498 = vmatpush1.bf16.msra.mxu1 %v15213_v8  ;;  %v15342_v13 = vcombine.high %v1559_v31, %v1567_v60  ;;  %v1287_v41 = vld [vmem:[%s16779_s2 + $0x1c38] sm:$0xff]  ;;  %v15341_v8 = vcombine.low %v1559_v31, %v1567_v60 }
 0x739   : > { %13499 = vmatprep.subr.bf16.mxu1 %v15198_v25  ;;  %13457 = vmatpush1.bf16.msra.mxu0 %v14941_v28  ;;  %v1295_v18 = vld [vmem:[%s16779_s2 + $0x1c78] sm:$0xff] }
 0x73a   : > { %13458 = vmatprep.subr.bf16.mxu0 %v15182_v32  ;;  %v1543_v2 = vld [vmem:[%s16779_s2 + $0x2438] sm:$0xff]  ;;  %v15070_v24 = vcombine.high %v1287_v41, %v1295_v18  ;;  %v15069_v28 = vcombine.low %v1287_v41, %v1295_v18 }
 0x73b   : > { %v1551_v19 = vld [vmem:[%s16779_s2 + $0x2478] sm:$0xff] }
 0x73c   : > { %13500 = vmatpush1.bf16.msra.mxu1 %v15197_v30  ;;  %v15326_v25 = vcombine.high %v1543_v2, %v1551_v19  ;;  %v1783_v61 = vld [vmem:[%s16779_s2 + $0x2bb8] sm:$0xff]  ;;  %v15325_v30 = vcombine.low %v1543_v2, %v1551_v19 }
 0x73d   : > { %13501 = vmatprep.subr.bf16.mxu1 %v15438_v56  ;;  %13459 = vmatpush2.bf16.msra.mxu0 %v15181_v39  ;;  %v1791_v17 = vld [vmem:[%s16779_s2 + $0x2bf8] sm:$0xff] }
 0x73e   : > { %13460 = vmatprep.subr.bf16.mxu0 %v15166_v36  ;;  %v2039_v26 = vld [vmem:[%s16779_s2 + $0x33b8] sm:$0xff]  ;;  %v15566_v32 = vcombine.high %v1783_v61, %v1791_v17  ;;  %v15565_v39 = vcombine.low %v1783_v61, %v1791_v17  ;;  %v18864_v17 = vpop.f32.mrf.mxu0 }
 0x73f   : > { %v2047_v27 = vld [vmem:[%s16779_s2 + $0x33f8] sm:$0xff] }
 0x740   : > { %13502 = vmatpush2.bf16.msra.mxu1 %v15437_v20  ;;  %v15822_v56 = vcombine.high %v2039_v26, %v2047_v27  ;;  %v1767_v16 = vld [vmem:[%s16779_s2 + $0x2b38] sm:$0xff]  ;;  %v15821_v20 = vcombine.low %v2039_v26, %v2047_v27 }
 0x741   : > { %13503 = vmatprep.subr.bf16.mxu1 %v15422_v0  ;;  %13461 = vmatpush2.bf16.msra.mxu0 %v15165_v46  ;;  %v1775_v33 = vld [vmem:[%s16779_s2 + $0x2b78] sm:$0xff] }
 0x742   : > { %13462 = vmatprep.subr.bf16.mxu0 %v15150_v29  ;;  %v2023_v35 = vld [vmem:[%s16779_s2 + $0x3338] sm:$0xff]  ;;  %v15550_v36 = vcombine.high %v1767_v16, %v1775_v33  ;;  %v15549_v29 = vcombine.low %v1767_v16, %v1775_v33 }
 0x743   : > { %v2031_v38 = vld [vmem:[%s16779_s2 + $0x3378] sm:$0xff] }
 0x744   : > { %13504 = vmatpush2.bf16.msra.mxu1 %v15421_v22  ;;  %v15806_v0 = vcombine.high %v2023_v35, %v2031_v38  ;;  %v1751_v42 = vld [vmem:[%s16779_s2 + $0x2ab8] sm:$0xff] }
 0x745   : > { %13505 = vmatprep.subr.bf16.mxu1 %v15406_v49  ;;  %13463 = vmatpush2.bf16.msra.mxu0 %v15149_v53  ;;  %v1759_v43 = vld [vmem:[%s16779_s2 + $0x2af8] sm:$0xff]  ;;  %v15805_v49 = vcombine.low %v2023_v35, %v2031_v38  ;;  %v18870_v35 = vpop.f32.mrf.mxu0 }
 0x746   : > { %13464 = vmatprep.subr.bf16.mxu0 %v15134_v54  ;;  %v16256_v23 = vld [vmem:[%s16771_s30 + $0x18] ss:$56 sps:$4 sm:$0xff]   ;;  %v15534_v48 = vcombine.high %v1751_v42, %v1759_v43  ;;  %v16258_v53 = vld [vmem:[%s16771_s30 + $0x2c] ss:$56 sps:$4 sm:$0xff]   ;;  %v15533_v58 = vcombine.low %v1751_v42, %v1759_v43  ;;  %v18874_v42 = vpop.f32.mrf.mxu1 }
 0x747   : > { %v2007_v44 = vld [vmem:[%s16779_s2 + $0x32b8] sm:$0xff] }
 0x748   : > { %13506 = vmatpush2.bf16.msra.mxu1 %v15405_v47  ;;  %v2015_v46 = vld [vmem:[%s16779_s2 + $0x32f8] sm:$0xff] }
 0x749   : > { %13507 = vmatprep.subr.bf16.mxu1 %v15390_v55  ;;  %13465 = vmatpush2.bf16.msra.mxu0 %v15133_v34  ;;  %v16257_v22 = vld [vmem:[%s16771_s30 + $0x20] ss:$56 sps:$4 sm:$0xff]   ;;  %v15790_v50 = vcombine.high %v2007_v44, %v2015_v46  ;;  %v16259_v55 = vld [vmem:[%s16771_s30 + $0x34] ss:$56 sps:$4 sm:$0xff]   ;;  %v15789_v40 = vcombine.low %v2007_v44, %v2015_v46  ;;  %v18878_v46 = vpop.f32.mrf.mxu0 }
 0x74a   : > { %13466 = vmatprep.subr.bf16.mxu0 %v15118_v45  ;;  %v1735_v12 = vld [vmem:[%s16779_s2 + $0x2a38] sm:$0xff] }
 0x74b   : > { %v1743_v52 = vld [vmem:[%s16779_s2 + $0x2a78] sm:$0xff] }
 0x74c   : > { %13508 = vmatpush2.bf16.msra.mxu1 %v15389_v62  ;;  %v1991_v47 = vld [vmem:[%s16779_s2 + $0x3238] sm:$0xff]  ;;  %v15518_v59 = vcombine.high %v1735_v12, %v1743_v52  ;;  %v15517_v1 = vcombine.low %v1735_v12, %v1743_v52  ;;  %v18882_v12 = vpop.f32.mrf.mxu1 }
 0x74d   : > { %13509 = vmatprep.subr.bf16.mxu1 %v15374_v63  ;;  %13467 = vmatpush2.bf16.msra.mxu0 %v15117_v37  ;;  %v1999_v54 = vld [vmem:[%s16779_s2 + $0x3278] sm:$0xff] }
 0x74e   : > { %13468 = vmatprep.subr.bf16.mxu0 %v15102_v6  ;;  %v15774_v57 = vcombine.high %v1991_v47, %v1999_v54  ;;  %v1719_v34 = vld [vmem:[%s16779_s2 + $0x29b8] sm:$0xff]  ;;  %v15773_v51 = vcombine.low %v1991_v47, %v1999_v54  ;;  %v18886_v54 = vpop.f32.mrf.mxu0 }
 0x74f   : > { %v1727_v62 = vld [vmem:[%s16779_s2 + $0x29f8] sm:$0xff] }
 0x750   : > { %13510 = vmatpush2.bf16.msra.mxu1 %v15373_v5  ;;  %v1975_v45 = vld [vmem:[%s16779_s2 + $0x31b8] sm:$0xff]  ;;  %v15502_v3 = vcombine.high %v1719_v34, %v1727_v62  ;;  %v15501_v9 = vcombine.low %v1719_v34, %v1727_v62  ;;  %v18890_v34 = vpop.f32.mrf.mxu1  ;;  %v13132_v62 = vpop.f32.mrf.mxu0 }
 0x751   : > { %13511 = vmatprep.subr.bf16.mxu1 %v15358_v7  ;;  %13469 = vmatpush2.bf16.msra.mxu0 %v15101_v11  ;;  %v1983_v63 = vld [vmem:[%s16779_s2 + $0x31f8] sm:$0xff] }
 0x752   : > { %13470 = vmatprep.subr.bf16.mxu0 %v15086_v15  ;;  %v15758_v4 = vcombine.high %v1975_v45, %v1983_v63  ;;  %v1703_v37 = vld [vmem:[%s16779_s2 + $0x2938] sm:$0xff]  ;;  %v15757_v10 = vcombine.low %v1975_v45, %v1983_v63 }
 0x753   : > { %v1711_v5 = vld [vmem:[%s16779_s2 + $0x2978] sm:$0xff] }
 0x754   : > { %13512 = vmatpush2.bf16.msra.mxu1 %v15357_v14  ;;  %v1959_v6 = vld [vmem:[%s16779_s2 + $0x3138] sm:$0xff]  ;;  %v15486_v31 = vcombine.high %v1703_v37, %v1711_v5  ;;  %v15485_v41 = vcombine.low %v1703_v37, %v1711_v5 }
 0x755   : > { %13513 = vmatprep.subr.bf16.mxu1 %v15342_v13  ;;  %13471 = vmatpush2.bf16.msra.mxu0 %v15085_v21  ;;  %v1967_v7 = vld [vmem:[%s16779_s2 + $0x3178] sm:$0xff] }
 0x756   : > { %13472 = vmatprep.subr.bf16.mxu0 %v15070_v24  ;;  %v15742_v60 = vcombine.high %v1959_v6, %v1967_v7  ;;  %v1687_v11 = vld [vmem:[%s16779_s2 + $0x28b8] sm:$0xff]  ;;  %v15741_v18 = vcombine.low %v1959_v6, %v1967_v7  ;;  %v13095_v6 = vpop.f32.mrf.mxu1  ;;  %v13134_v7 = vpop.f32.mrf.mxu0 }
 0x757   : > { %v1695_v14 = vld [vmem:[%s16779_s2 + $0x28f8] sm:$0xff] }
 0x758   : > { %13514 = vmatpush2.bf16.msra.mxu1 %v15341_v8  ;;  %v1943_v15 = vld [vmem:[%s16779_s2 + $0x30b8] sm:$0xff]  ;;  %v15470_v2 = vcombine.high %v1687_v11, %v1695_v14  ;;  %v15469_v61 = vcombine.low %v1687_v11, %v1695_v14 }
 0x759   : > { %13515 = vmatprep.subr.bf16.mxu1 %v15326_v25  ;;  %13473 = vmatpush2.bf16.msra.mxu0 %v15069_v28  ;;  %v1951_v13 = vld [vmem:[%s16779_s2 + $0x30f8] sm:$0xff] }
 0x75a   : > { %13528 = vmatprep.subr.bf16.mxu0 %v15566_v32  ;;  %v15726_v19 = vcombine.high %v1943_v15, %v1951_v13  ;;  %v1671_v21 = vld [vmem:[%s16779_s2 + $0x2838] sm:$0xff]  ;;  %v15725_v26 = vcombine.low %v1943_v15, %v1951_v13 }
 0x75b   : > { %v1679_v8 = vld [vmem:[%s16779_s2 + $0x2878] sm:$0xff] }
 0x75c   : > { %13516 = vmatpush2.bf16.msra.mxu1 %v15325_v30  ;;  %13475 = vmatmul.mubr.bf16.vlgmr.msra.gmra.mxu0 %v16256_v23  ;;  %v1927_v24 = vld [vmem:[%s16779_s2 + $0x3038] sm:$0xff]  ;;  %v15454_v27 = vcombine.high %v1671_v21, %v1679_v8  ;;  %v15453_v33 = vcombine.low %v1671_v21, %v1679_v8 }
 0x75d   : > { %13571 = vmatprep.subr.bf16.mxu1 %v15822_v56  ;;  %13529 = vmatpush1.bf16.msra.mxu0 %v15565_v39  ;;  %v1935_v25 = vld [vmem:[%s16779_s2 + $0x3078] sm:$0xff] }
 0x75e   : > { %13530 = vmatprep.subr.bf16.mxu0 %v15550_v36  ;;  %13560 = vmatprep.mubr.bf16.mxu0 %v16258_v53  ;;  %v15710_v28 = vcombine.high %v1927_v24, %v1935_v25  ;;  %v1911_v30 = vld [vmem:[%s16779_s2 + $0x2fb8] sm:$0xff]  ;;  %v15709_v38 = vcombine.low %v1927_v24, %v1935_v25 }
 0x75f   : > { %13518 = vmatmul.mubr.bf16.vlgmr.msra.gmra.mxu1 %v16257_v22  ;;  %v1919_v32 = vld [vmem:[%s16779_s2 + $0x2ff8] sm:$0xff] }
 0x760   : > { %13572 = vmatpush1.bf16.msra.mxu1 %v15821_v20  ;;  %13603 = vmatprep.mubr.bf16.mxu1 %v16259_v55  ;;  %v2167_v56 = vld [vmem:[%s16779_s2 + $0x37b8] sm:$0xff]  ;;  %v15694_v39 = vcombine.high %v1911_v30, %v1919_v32  ;;  %v15693_v44 = vcombine.low %v1911_v30, %v1919_v32 }
 0x761   : > { %13573 = vmatprep.subr.bf16.mxu1 %v15806_v0  ;;  %13531 = vmatpush1.bf16.msra.mxu0 %v15549_v29  ;;  %v2175_v16 = vld [vmem:[%s16779_s2 + $0x37f8] sm:$0xff] }
 0x762   : > { %13532 = vmatprep.subr.bf16.mxu0 %v15534_v48  ;;  %v15950_v20 = vcombine.high %v2167_v56, %v2175_v16  ;;  %v1895_v36 = vld [vmem:[%s16779_s2 + $0x2f38] sm:$0xff]  ;;  %v15949_v22 = vcombine.low %v2167_v56, %v2175_v16 }
 0x763   : > { %v1903_v0 = vld [vmem:[%s16779_s2 + $0x2f78] sm:$0xff] }
 0x764   : > { %13574 = vmatpush1.bf16.msra.mxu1 %v15805_v49  ;;  %v2151_v43 = vld [vmem:[%s16779_s2 + $0x3738] sm:$0xff]  ;;  %v15678_v29 = vcombine.high %v1895_v36, %v1903_v0  ;;  %v15677_v47 = vcombine.low %v1895_v36, %v1903_v0 }
 0x765   : > { %13575 = vmatprep.subr.bf16.mxu1 %v15790_v50  ;;  %13533 = vmatpush1.bf16.msra.mxu0 %v15533_v58  ;;  %v2159_v23 = vld [vmem:[%s16779_s2 + $0x3778] sm:$0xff] }
 0x766   : > { %13534 = vmatprep.subr.bf16.mxu0 %v15518_v59  ;;  %v15934_v49 = vcombine.high %v2151_v43, %v2159_v23  ;;  %v1879_v48 = vld [vmem:[%s16779_s2 + $0x2eb8] sm:$0xff]  ;;  %v15933_v55 = vcombine.low %v2151_v43, %v2159_v23 }
 0x767   : > { %v1887_v50 = vld [vmem:[%s16779_s2 + $0x2ef8] sm:$0xff] }
 0x768   : > { %13576 = vmatpush1.bf16.msra.mxu1 %v15789_v40  ;;  %v2135_v52 = vld [vmem:[%s16779_s2 + $0x36b8] sm:$0xff]  ;;  %v15662_v58 = vcombine.high %v1879_v48, %v1887_v50 }
 0x769   : > { %13577 = vmatprep.subr.bf16.mxu1 %v15774_v57  ;;  %13535 = vmatpush1.bf16.msra.mxu0 %v15517_v1  ;;  %v2143_v53 = vld [vmem:[%s16779_s2 + $0x36f8] sm:$0xff]  ;;  %v15661_v1 = vcombine.low %v1879_v48, %v1887_v50 }
 0x76a   : > { %13536 = vmatprep.subr.bf16.mxu0 %v15502_v3  ;;  %v15918_v40 = vcombine.high %v2135_v52, %v2143_v53  ;;  %v1863_v59 = vld [vmem:[%s16779_s2 + $0x2e38] sm:$0xff] }
 0x76b   : > { %v1871_v57 = vld [vmem:[%s16779_s2 + $0x2e78] sm:$0xff] }
 0x76c   : > { %13578 = vmatpush1.bf16.msra.mxu1 %v15773_v51  ;;  %v2119_v45 = vld [vmem:[%s16779_s2 + $0x3638] sm:$0xff]  ;;  %v15917_v51 = vcombine.low %v2135_v52, %v2143_v53  ;;  %v15646_v3 = vcombine.high %v1863_v59, %v1871_v57 }
 0x76d   : > { %13579 = vmatprep.subr.bf16.mxu1 %v15758_v4  ;;  %13537 = vmatpush1.bf16.msra.mxu0 %v15501_v9  ;;  %v2127_v63 = vld [vmem:[%s16779_s2 + $0x3678] sm:$0xff] }
 0x76e   : > { %13538 = vmatprep.subr.bf16.mxu0 %v15486_v31  ;;  %v15902_v4 = vcombine.high %v2119_v45, %v2127_v63  ;;  %v1847_v37 = vld [vmem:[%s16779_s2 + $0x2db8] sm:$0xff]  ;;  %v15645_v31 = vcombine.low %v1863_v59, %v1871_v57  ;;  %v15901_v11 = vcombine.low %v2119_v45, %v2127_v63 }
 0x76f   : > { %v1855_v5 = vld [vmem:[%s16779_s2 + $0x2df8] sm:$0xff] }
 0x770   : > { %13580 = vmatpush1.bf16.msra.mxu1 %v15757_v10  ;;  %v2103_v9 = vld [vmem:[%s16779_s2 + $0x35b8] sm:$0xff]  ;;  %v15630_v14 = vcombine.high %v1847_v37, %v1855_v5  ;;  %v15629_v21 = vcombine.low %v1847_v37, %v1855_v5  ;;  %v350_v5 = vld [vmem:[#allocation2 + $0x60] sm:$0xff] }
 0x771   : > { %13581 = vmatprep.subr.bf16.mxu1 %v15742_v60  ;;  %13539 = vmatpush1.bf16.msra.mxu0 %v15485_v41  ;;  %v2111_v10 = vld [vmem:[%s16779_s2 + $0x35f8] sm:$0xff]  ;;  %v13175_v60 = vpop.f32.mrf.mxu1 }
 0x772   : > { %13540 = vmatprep.subr.bf16.mxu0 %v15470_v2  ;;  %v15886_v15 = vcombine.high %v2103_v9, %v2111_v10  ;;  %v1831_v13 = vld [vmem:[%s16779_s2 + $0x2d38] sm:$0xff]  ;;  %v15885_v24 = vcombine.low %v2103_v9, %v2111_v10 }
 0x773   : > { %v1839_v41 = vld [vmem:[%s16779_s2 + $0x2d78] sm:$0xff]  ;;  %v13177_v8 = vpop.f32.mrf.mxu1 }
 0x774   : > { %13582 = vmatpush1.bf16.msra.mxu1 %v15741_v18  ;;  %v13136_v18 = vpop.f32.mrf.mxu0  ;;  %v2087_v2 = vld [vmem:[%s16779_s2 + $0x3538] sm:$0xff]  ;;  %v15614_v25 = vcombine.high %v1831_v13, %v1839_v41  ;;  %v15613_v56 = vcombine.low %v1831_v13, %v1839_v41 }
 0x775   : > { %13583 = vmatprep.subr.bf16.mxu1 %v15726_v19  ;;  %13541 = vmatpush1.bf16.msra.mxu0 %v15469_v61  ;;  %v2095_v19 = vld [vmem:[%s16779_s2 + $0x3578] sm:$0xff]  ;;  %v13179_v16 = vpop.f32.mrf.mxu1 }
 0x776   : > { %13542 = vmatprep.subr.bf16.mxu0 %v15454_v27  ;;  %v15870_v61 = vcombine.high %v2087_v2, %v2095_v19  ;;  %v1823_v27 = vld [vmem:[%s16779_s2 + $0x2cf8] sm:$0xff] }
 0x777   : > { %v2071_v30 = vld [vmem:[%s16779_s2 + $0x34b8] sm:$0xff]  ;;  %v13181_v48 = vpop.f32.mrf.mxu1 }
 0x778   : > { %13584 = vmatpush1.bf16.msra.mxu1 %v15725_v26  ;;  %v1815_v26 = vld [vmem:[%s16779_s2 + $0x2cb8] sm:$0xff] }
 0x779   : > { %13585 = vmatprep.subr.bf16.mxu1 %v15710_v28  ;;  %13543 = vmatpush1.bf16.msra.mxu0 %v15453_v33  ;;  %v13138_v28 = vpop.f32.mrf.mxu0  ;;  %v2079_v32 = vld [vmem:[%s16779_s2 + $0x34f8] sm:$0xff] }
 0x77a   : > { %13544 = vmatprep.subr.bf16.mxu0 %v15694_v39  ;;  %v15598_v39 = vcombine.high %v1815_v26, %v1823_v27  ;;  %v15854_v36 = vcombine.high %v2071_v30, %v2079_v32  ;;  %v1799_v0 = vld [vmem:[%s16779_s2 + $0x2c38] sm:$0xff]  ;;  %v15853_v52 = vcombine.low %v2071_v30, %v2079_v32 }
 0x77b   : > { %v13218_v33 = vpop.f32.mrf.mxu0  ;;  %v1807_v43 = vld [vmem:[%s16779_s2 + $0x2c78] sm:$0xff] }
 0x77c   : > { %13586 = vmatpush1.bf16.msra.mxu1 %v15709_v38  ;;  %v15869_v38 = vcombine.low %v2087_v2, %v2095_v19  ;;  %v2055_v23 = vld [vmem:[%s16779_s2 + $0x3438] sm:$0xff]  ;;  %v15582_v53 = vcombine.high %v1799_v0, %v1807_v43  ;;  %v366_v2 = vld [vmem:[#allocation2 + $0xa0] sm:$0xff] }
 0x77d   : > { %13587 = vmatprep.subr.bf16.mxu1 %v15950_v20  ;;  %13545 = vmatpush2.bf16.msra.mxu0 %v15693_v44  ;;  %v13090_v20 = vadd.f32 %v18874_v42, %v18864_v17  ;;  %v2063_v44 = vld [vmem:[%s16779_s2 + $0x3478] sm:$0xff]  ;;  %v13220_v50 = vpop.f32.mrf.mxu0  ;;  %v13094_v17 = vadd.f32 %v18890_v34, %v18878_v46 }
 0x77e   : > { %13546 = vmatprep.subr.bf16.mxu0 %v15678_v29  ;;  %v15837_v57 = vcombine.low %v2055_v23, %v2063_v44 }
 0x77f   : > { %v13133_v29 = vadd.f32 %v13132_v62, %v13090_v20  ;;  %v13222_v59 = vpop.f32.mrf.mxu0 }
 0x780   : > { %13588 = vmatpush2.bf16.msra.mxu1 %v15949_v22  ;;  %v13092_v22 = vadd.f32 %v18882_v12, %v18870_v35  ;;  %v13137_v35 = vadd.f32 %v13136_v18, %v13094_v17  ;;  %v15581_v12 = vcombine.low %v1799_v0, %v1807_v43 }
 0x781   : > { %13589 = vmatprep.subr.bf16.mxu1 %v15934_v49  ;;  %13547 = vmatpush2.bf16.msra.mxu0 %v15677_v47  ;;  %v15597_v49 = vcombine.low %v1815_v26, %v1823_v27  ;;  %v15838_v47 = vcombine.high %v2055_v23, %v2063_v44 }
 0x782   : > { %13548 = vmatprep.subr.bf16.mxu0 %v15662_v58  ;;  %v13135_v42 = vadd.f32 %v13134_v7, %v13092_v22  ;;  %v13096_v58 = vadd.f32 %v13095_v6, %v18886_v54  ;;  %v13180_v34 = vadd.f32 %v13179_v16, %v13137_v35  ;;  %v16260_v7 = vld [vmem:[%s16771_s30 + $0x28] ss:$56 sps:$4 sm:$0xff]  }
 0x784   : > { %13590 = vmatpush2.bf16.msra.mxu1 %v15933_v55  ;;  %v13261_v55 = vpop.f32.mrf.mxu1  ;;  %v13178_v62 = vadd.f32 %v13177_v8, %v13135_v42  ;;  %v13139_v45 = vadd.f32 %v13138_v28, %v13096_v58 }
 0x785   : > { %13591 = vmatprep.subr.bf16.mxu1 %v15918_v40  ;;  %13549 = vmatpush2.bf16.msra.mxu0 %v15661_v1  ;;  %v13176_v40 = vadd.f32 %v13175_v60, %v13133_v29  ;;  %v16261_v60 = vld [vmem:[%s16771_s30 + $0x30] ss:$56 sps:$4 sm:$0xff]  }
 0x786   : > { %13550 = vmatprep.subr.bf16.mxu0 %v15646_v3  ;;  %v13263_v46 = vpop.f32.mrf.mxu1  ;;  %v13221_v1 = vadd.f32 %v13220_v50, %v13178_v62  ;;  %v13182_v54 = vadd.f32 %v13181_v48, %v13139_v45 }
 0x787   : > { %v13219_v63 = vadd.f32 %v13218_v33, %v13176_v40 }
 0x788   : > { %13592 = vmatpush2.bf16.msra.mxu1 %v15917_v51  ;;  %v13224_v51 = vpop.f32.mrf.mxu0  ;;  %v13265_v37 = vpop.f32.mrf.mxu1  ;;  %v13264_v9 = vadd.f32 %v13263_v46, %v13221_v1 }
 0x789   : > { %13593 = vmatprep.subr.bf16.mxu1 %v15902_v4  ;;  %13551 = vmatpush2.bf16.msra.mxu0 %v15645_v31  ;;  %v13262_v3 = vadd.f32 %v13261_v55, %v13219_v63  ;;  %v13223_v4 = vadd.f32 %v13222_v59, %v13180_v34  ;;  %v13225_v10 = vadd.f32 %v13224_v51, %v13182_v54  ;;  %v352_v54 = vld [vmem:[#allocation2 + $0x8] sm:$0xff] }
 0x78a   : > { %13552 = vmatprep.subr.bf16.mxu0 %v15630_v14  ;;  %v13267_v18 = vpop.f32.mrf.mxu1 }
 0x78c   : > { %13594 = vmatpush2.bf16.msra.mxu1 %v15901_v11  ;;  %v351_v11 = vld [vmem:[#allocation2 + $0xf0] sm:$0xff] }
 0x78d   : > { %13595 = vmatprep.subr.bf16.mxu1 %v15886_v15  ;;  %13553 = vmatpush2.bf16.msra.mxu0 %v15629_v21  ;;  %v13266_v15 = vadd.f32 %v13265_v37, %v13223_v4  ;;  %v13268_v21 = vadd.f32 %v13267_v18, %v13225_v10 }
 0x78e   : > { %13554 = vmatprep.subr.bf16.mxu0 %v15614_v25  ;;  %v367_v25 = vld [vmem:[#allocation2 + $0xf8] sm:$0xff] }
 0x790   : > { %13596 = vmatpush2.bf16.msra.mxu1 %v15885_v24 }
 0x791   : > { %13597 = vmatprep.subr.bf16.mxu1 %v15870_v61  ;;  %13555 = vmatpush2.bf16.msra.mxu0 %v15613_v56 }
 0x792   : > { %13556 = vmatprep.subr.bf16.mxu0 %v15598_v39 }
 0x794   : > { %13598 = vmatpush2.bf16.msra.mxu1 %v15869_v38 }
 0x795   : > { %13599 = vmatprep.subr.bf16.mxu1 %v15854_v36  ;;  %13557 = vmatpush2.bf16.msra.mxu0 %v15597_v49 }
 0x796   : > { %13558 = vmatprep.subr.bf16.mxu0 %v15582_v53 }
 0x798   : > { %13600 = vmatpush2.bf16.msra.mxu1 %v15853_v52 }
 0x799   : > { %13601 = vmatprep.subr.bf16.mxu1 %v15838_v47  ;;  %13559 = vmatpush2.bf16.msra.mxu0 %v15581_v12 }
 0x79c   : > { %13602 = vmatpush2.bf16.msra.mxu1 %v15837_v57  ;;  %v13304_v6 = vpop.f32.mrf.mxu0  ;;  %13561 = vmatmul.mubr.bf16.vlgmr.msra.gmra.mxu0 %v16260_v7  ;;  %v353_v7 = vld [vmem:[#allocation2 + $0x78] sm:$0xff] }
 0x79d   : > { %v13305_v31 = vadd.f32 %v13304_v6, %v13262_v3 }
 0x79e   : > { %v13306_v14 = vpop.f32.mrf.mxu0 }
 0x79f   : > { %13604 = vmatmul.mubr.bf16.vlgmr.msra.gmra.mxu1 %v16261_v60  ;;  %v13626_v13 = vadd.f32 %v13305_v31, %v350_v5  ;;  %v13307_v41 = vadd.f32 %v13306_v14, %v13264_v9  ;;  %v13347_v30 = vpop.f32.mrf.mxu1 }
 0x7a0   : > { %v13308_v19 = vpop.f32.mrf.mxu0 }
 0x7a1   : > { %13658 = vst [vmem:[#allocation2 + $0x60] sm:$0xff] %v13626_v13  ;;  %v13627_v8 = vadd.f32 %v13307_v41, %v351_v11  ;;  %v13309_v24 = vadd.f32 %v13308_v19, %v13266_v15  ;;  %v13349_v32 = vpop.f32.mrf.mxu1  ;;  %v368_v15 = vld [vmem:[#allocation2 + $0x20] sm:$0xff]  ;;  %v369_v19 = vld [vmem:[#allocation2 + $0x98] sm:$0xff] }
 0x7a2   : > { %v13310_v61 = vpop.f32.mrf.mxu0 }
 0x7a3   : > { %13659 = vst [vmem:[#allocation2 + $0xf0] sm:$0xff] %v13627_v8  ;;  %v13642_v26 = vadd.f32 %v13309_v24, %v366_v2  ;;  %v13311_v27 = vadd.f32 %v13310_v61, %v13268_v21  ;;  %v13351_v56 = vpop.f32.mrf.mxu1 }
 0x7a5   : > { %13674 = vst [vmem:[#allocation2 + $0xa0] sm:$0xff] %v13642_v26  ;;  %v13643_v28 = vadd.f32 %v13311_v27, %v367_v25  ;;  %v13353_v16 = vpop.f32.mrf.mxu1 }
 0x7a7   : > { %13675 = vst [vmem:[#allocation2 + $0xf8] sm:$0xff] %v13643_v28 }
 0x7dc   : > { %v13390_v33 = vpop.f32.mrf.mxu0 }
 0x7dd   : > { %v13391_v29 = vadd.f32 %v13390_v33, %v13347_v30 }
 0x7de   : > { %v13392_v39 = vpop.f32.mrf.mxu0 }
 0x7df   : > { %v13433_v38 = vpop.f32.mrf.mxu1  ;;  %v13393_v48 = vadd.f32 %v13392_v39, %v13349_v32 }
 0x7e0   : > { %v13394_v36 = vpop.f32.mrf.mxu0  ;;  %v13434_v52 = vadd.f32 %v13433_v38, %v13391_v29 }
 0x7e1   : > { %v13435_v20 = vpop.f32.mrf.mxu1  ;;  %v13395_v53 = vadd.f32 %v13394_v36, %v13351_v56 }
 0x7e2   : > { %v13396_v43 = vpop.f32.mrf.mxu0  ;;  %v13436_v42 = vadd.f32 %v13435_v20, %v13393_v48 }
 0x7e3   : > { %v13437_v0 = vpop.f32.mrf.mxu1  ;;  %v13397_v47 = vadd.f32 %v13396_v43, %v13353_v16 }
 0x7e4   : > { %v13438_v40 = vadd.f32 %v13437_v0, %v13395_v53 }
 0x7e5   : > { %v13439_v23 = vpop.f32.mrf.mxu1 }
 0x7e6   : > { %v13440_v59 = vadd.f32 %v13439_v23, %v13397_v47 }
 0x81c   : > { %v13476_v44 = vpop.f32.mrf.mxu0 }
 0x81d   : > { %v13477_v55 = vadd.f32 %v13476_v44, %v13434_v52 }
 0x81e   : > { %v13478_v49 = vpop.f32.mrf.mxu0 }
 0x81f   : > { %v13519_v22 = vpop.f32.mrf.mxu1  ;;  %v13479_v35 = vadd.f32 %v13478_v49, %v13436_v42 }
 0x820   : > { %v13480_v17 = vpop.f32.mrf.mxu0  ;;  %v13520_v57 = vadd.f32 %v13519_v22, %v13477_v55 }
 0x821   : > { %v13521_v50 = vpop.f32.mrf.mxu1  ;;  %v13481_v62 = vadd.f32 %v13480_v17, %v13438_v40 }
 0x822   : > { %v13482_v12 = vpop.f32.mrf.mxu0  ;;  %v13522_v46 = vadd.f32 %v13521_v50, %v13479_v35 }
 0x823   : > { %v13523_v58 = vpop.f32.mrf.mxu1  ;;  %v13483_v34 = vadd.f32 %v13482_v12, %v13440_v59 }
 0x824   : > { %v13524_v4 = vadd.f32 %v13523_v58, %v13481_v62 }
 0x825   : > { %v13525_v45 = vpop.f32.mrf.mxu1 }
 0x826   : > { %v13526_v10 = vadd.f32 %v13525_v45, %v13483_v34 }
 0x85c   : > { %v13562_v63 = vpop.f32.mrf.mxu0 }
 0x85d   : > { %v13563_v1 = vadd.f32 %v13562_v63, %v13520_v57 }
 0x85e   : > { %v13564_v3 = vpop.f32.mrf.mxu0 }
 0x85f   : > { %v13605_v51 = vpop.f32.mrf.mxu1  ;;  %v13565_v5 = vadd.f32 %v13564_v3, %v13522_v46 }
 0x860   : > { %v13606_v37 = vadd.f32 %v13605_v51, %v13563_v1  ;;  %v13566_v9 = vpop.f32.mrf.mxu0 }
 0x861   : > { %v13607_v6 = vpop.f32.mrf.mxu1  ;;  %v13567_v11 = vadd.f32 %v13566_v9, %v13524_v4 }
 0x862   : > { %v13628_v31 = vadd.f32 %v13606_v37, %v352_v54  ;;  %v13608_v60 = vadd.f32 %v13607_v6, %v13565_v5  ;;  %v13568_v13 = vpop.f32.mrf.mxu0 }
 0x863   : > { %v13609_v14 = vpop.f32.mrf.mxu1  ;;  %v13569_v2 = vadd.f32 %v13568_v13, %v13526_v10 }
 0x864   : > { %13660 = vst [vmem:[#allocation2 + $0x8] sm:$0xff] %v13628_v31  ;;  %v13629_v41 = vadd.f32 %v13608_v60, %v353_v7  ;;  %v13610_v18 = vadd.f32 %v13609_v14, %v13567_v11 }
 0x865   : > { %v13611_v21 = vpop.f32.mrf.mxu1 }
 0x866   : > { %13661 = vst [vmem:[#allocation2 + $0x78] sm:$0xff] %v13629_v41  ;;  %v13644_v8 = vadd.f32 %v13610_v18, %v368_v15  ;;  %v13612_v24 = vadd.f32 %v13611_v21, %v13569_v2  ;;  %13681 = sbr.rel (%p15951_p8) target bundleno = 2190 (0x88e), region = 52 }
 0x868   : > { %13676 = vst [vmem:[#allocation2 + $0x20] sm:$0xff] %v13644_v8  ;;  %v13645_v25 = vadd.f32 %v13612_v24, %v369_v19 }
 0x86a   : > { %13677 = vst [vmem:[#allocation2 + $0x98] sm:$0xff] %v13645_v25 }
 0x86b   : > { %v13718_v61 = vlaneseq  ;;  %v13682_v27 = vld [vmem:[#allocation2 + $0xb0] sm:$0xff]  ;;  %v13683_v30 = vld [vmem:[#allocation2] sm:$0xff]  ;;  %v13684_v16 = vld [vmem:[#allocation2 + $0xd8] sm:$0xff] }
 0x86c   : > { %v13714_v28 = vld [vmem:[%s16789_s29] sm:$0xff]  ;;  %v13685_v39 = vld [vmem:[#allocation2 + $0x18] sm:$0xff]  ;;  %v13687_v48 = vld [vmem:[#allocation2 + $0x68] sm:$0xff] }
 0x86d   : > { %v18920_v26 = vshrl.u32 %v13718_v61, 7  ;;  %v13686_v20 = vld [vmem:[#allocation2 + $0x50] sm:$0xff]  ;;  %v13689_v52 = vld [vmem:[#allocation2 + $0x48] sm:$0xff]  ;;  %v13690_v37 = vld [vmem:[#allocation2 + $0x80] sm:$0xff] }
 0x86e   : > { %v13688_v50 = vld [vmem:[#allocation2 + $0x30] sm:$0xff]  ;;  %v13715_v45 = vld [vmem:[%s16789_s29 + $0x8] sm:$0xff]  ;;  %v13694_v41 = vld [vmem:[#allocation2 + $0x60] sm:$0xff] }
 0x86f   : > { %v13720_v32 = vsub.s32 0, %v18920_v26  ;;  %v13724_v56 = vsub.s32 1, %v18920_v26  ;;  %v13728_v33 = vsub.s32 2, %v18920_v26  ;;  %v13732_v38 = vsub.s32 3, %v18920_v26  ;;  %v13691_v5 = vld [vmem:[#allocation2 + $0x88] sm:$0xff]  ;;  %v13693_v60 = vld [vmem:[#allocation2 + $0xb8] sm:$0xff] }
 0x870   : > { %v13736_v36 = vsub.s32 4, %v18920_v26  ;;  %v13740_v0 = vsub.s32 5, %v18920_v26  ;;  %v13744_v43 = vsub.s32 6, %v18920_v26  ;;  %v13748_v23 = vsub.s32 7, %v18920_v26  ;;  %v13692_v31 = vld [vmem:[#allocation2 + $0xe8] sm:$0xff]  ;;  %v13695_v18 = vld [vmem:[#allocation2 + $0xf0] sm:$0xff] }
 0x871   : > { %v18931_v44 = vrot.slane %v13714_v28, %v13720_v32  ;;  %v18933_v22 = vrot.slane %v13714_v28, %v13724_v56  ;;  %v18935_v29 = vrot.slane %v13714_v28, %v13728_v33  ;;  %v18937_v49 = vrot.slane %v13714_v28, %v13732_v38  ;;  %v13696_v24 = vld [vmem:[#allocation2 + $0x8] sm:$0xff]  ;;  %v13697_v25 = vld [vmem:[#allocation2 + $0x78] sm:$0xff] }
 0x872   : > { %v18939_v53 = vrot.slane %v13714_v28, %v13736_v36  ;;  %v18941_v17 = vrot.slane %v13714_v28, %v13740_v0  ;;  %v18943_v42 = vrot.slane %v13714_v28, %v13744_v43  ;;  %v18945_v47 = vrot.slane %v13714_v28, %v13748_v23 }
 0x873   : > { %v13798_v55 = vadd.f32 %v18931_v44, %v13682_v27  ;;  %v13799_v58 = vadd.f32 %v18933_v22, %v13683_v30  ;;  %v13800_v40 = vadd.f32 %v18935_v29, %v13684_v16  ;;  %v13801_v35 = vadd.f32 %v18937_v49, %v13685_v39  ;;  %v13698_v30 = vld [vmem:[#allocation2 + $0x38] sm:$0xff] }
 0x874   : > { %v13802_v12 = vadd.f32 %v18939_v53, %v13686_v20  ;;  %v13803_v59 = vadd.f32 %v18941_v17, %v13687_v48  ;;  %v13804_v57 = vadd.f32 %v18943_v42, %v13688_v50  ;;  %v13805_v62 = vadd.f32 %v18945_v47, %v13689_v52  ;;  %v13700_v48 = vld [vmem:[#allocation2 + $0x40] sm:$0xff] }
 0x875   : > { %v13830_v63 = vmax.f32 %v13798_v55, 0.0  ;;  %v13831_v46 = vmax.f32 %v13799_v58, 0.0  ;;  %v13832_v34 = vmax.f32 %v13800_v40, 0.0  ;;  %v13833_v1 = vmax.f32 %v13801_v35, 0.0  ;;  %v13702_v58 = vld [vmem:[#allocation2 + $0xe0] sm:$0xff]  ;;  %v13703_v40 = vld [vmem:[#allocation2 + $0x90] sm:$0xff] }
 0x876   : > { %v13834_v51 = vmax.f32 %v13802_v12, 0.0  ;;  %v13835_v54 = vmax.f32 %v13803_v59, 0.0  ;;  %v13836_v3 = vmax.f32 %v13804_v57, 0.0  ;;  %v13837_v4 = vmax.f32 %v13805_v62, 0.0  ;;  %v13704_v62 = vld [vmem:[#allocation2 + $0x70] sm:$0xff] }
 0x877   : > { %v15976_v6 = vpack.c.bf16 %v13831_v46, %v13830_v63  ;;  %v15977_v7 = vpack.c.bf16 %v13833_v1, %v13832_v34  ;;  %v18956_v9 = vrot.slane %v13715_v45, %v13720_v32  ;;  %v18958_v10 = vrot.slane %v13715_v45, %v13724_v56 }
 0x878   : > { %v15978_v11 = vpack.c.bf16 %v13835_v54, %v13834_v51  ;;  %v15979_v14 = vpack.c.bf16 %v13837_v4, %v13836_v3  ;;  %v18960_v15 = vrot.slane %v13715_v45, %v13728_v33  ;;  %v18962_v13 = vrot.slane %v13715_v45, %v13732_v38  ;;  %v13699_v38 = vld [vmem:[#allocation2 + $0x58] sm:$0xff]  ;;  %v13706_v51 = vld [vmem:[#allocation2 + $0xa8] sm:$0xff] }
 0x879   : > { %13958 = vst [vmem:[%s16796_s5] sm:$0xff] %v15976_v6  ;;  %13959 = vst [vmem:[%s16796_s5 + $0x8] sm:$0xff] %v15977_v7  ;;  %v13806_v2 = vadd.f32 %v18956_v9, %v13690_v37  ;;  %v13807_v19 = vadd.f32 %v18958_v10, %v13691_v5  ;;  %v18968_v21 = vrot.slane %v13715_v45, %v13736_v36  ;;  %v13707_v37 = vld [vmem:[#allocation2 + $0xd0] sm:$0xff] }
 0x87a   : > { %v18970_v8 = vrot.slane %v13715_v45, %v13740_v0  ;;  %13960 = vst [vmem:[%s16796_s5 + $0x10] sm:$0xff] %v15978_v11  ;;  %13961 = vst [vmem:[%s16796_s5 + $0x18] sm:$0xff] %v15979_v14  ;;  %v13808_v61 = vadd.f32 %v18960_v15, %v13692_v31  ;;  %v13809_v26 = vadd.f32 %v18962_v13, %v13693_v60  ;;  %v13709_v31 = vld [vmem:[#allocation2 + $0x28] sm:$0xff]  ;;  %v13710_v14 = vld [vmem:[#allocation2 + $0xa0] sm:$0xff] }
 0x87b   : > { %v18976_v27 = vrot.slane %v13715_v45, %v13744_v43  ;;  %v18978_v28 = vrot.slane %v13715_v45, %v13748_v23  ;;  %v13838_v32 = vmax.f32 %v13806_v2, 0.0  ;;  %v13839_v56 = vmax.f32 %v13807_v19, 0.0  ;;  %v13701_v43 = vld [vmem:[#allocation2 + $0xc8] sm:$0xff]  ;;  %v13705_v45 = vld [vmem:[#allocation2 + $0xc0] sm:$0xff] }
 0x87c   : > { %v13810_v16 = vadd.f32 %v18968_v21, %v13694_v41  ;;  %v13811_v33 = vadd.f32 %v18970_v8, %v13695_v18  ;;  %v13840_v39 = vmax.f32 %v13808_v61, 0.0  ;;  %v13841_v20 = vmax.f32 %v13809_v26, 0.0  ;;  %v13712_v19 = vld [vmem:[#allocation2 + $0x20] sm:$0xff] }
 0x87d   : > { %v13812_v36 = vadd.f32 %v18976_v27, %v13696_v24  ;;  %v13813_v0 = vadd.f32 %v18978_v28, %v13697_v25  ;;  %v15980_v50 = vpack.c.bf16 %v13839_v56, %v13838_v32  ;;  %v13814_v55 = vadd.f32 %v18931_v44, %v13698_v30 }
 0x87e   : > { %v13842_v23 = vmax.f32 %v13810_v16, 0.0  ;;  %v13843_v52 = vmax.f32 %v13811_v33, 0.0  ;;  %v15981_v35 = vpack.c.bf16 %v13841_v20, %v13840_v39  ;;  %v13815_v57 = vadd.f32 %v18933_v22, %v13699_v38 }
 0x87f   : > { %v13844_v12 = vmax.f32 %v13812_v36, 0.0  ;;  %v13845_v59 = vmax.f32 %v13813_v0, 0.0  ;;  %13962 = vst [vmem:[%s16796_s5 + $0x20] sm:$0xff] %v15980_v50  ;;  %v13846_v46 = vmax.f32 %v13814_v55, 0.0  ;;  %v13816_v34 = vadd.f32 %v18935_v29, %v13700_v48  ;;  %v13708_v29 = vld [vmem:[#allocation2 + $0x10] sm:$0xff] }
 0x880   : > { %v15982_v63 = vpack.c.bf16 %v13843_v52, %v13842_v23  ;;  %v13817_v1 = vadd.f32 %v18937_v49, %v13701_v43  ;;  %13963 = vst [vmem:[%s16796_s5 + $0x28] sm:$0xff] %v15981_v35  ;;  %v13847_v54 = vmax.f32 %v13815_v57, 0.0  ;;  %v13818_v3 = vadd.f32 %v18939_v53, %v13702_v58 }
 0x881   : > { %v15983_v44 = vpack.c.bf16 %v13845_v59, %v13844_v12  ;;  %v13819_v4 = vadd.f32 %v18941_v17, %v13703_v40  ;;  %v13848_v22 = vmax.f32 %v13816_v34, 0.0  ;;  %v13820_v6 = vadd.f32 %v18943_v42, %v13704_v62  ;;  %v13711_v17 = vld [vmem:[#allocation2 + $0xf8] sm:$0xff] }
 0x882   : > { %13964 = vst [vmem:[%s16796_s5 + $0x30] sm:$0xff] %v15982_v63  ;;  %v13849_v5 = vmax.f32 %v13817_v1, 0.0  ;;  %v13821_v7 = vadd.f32 %v18945_v47, %v13705_v45  ;;  %v15984_v49 = vpack.c.bf16 %v13847_v54, %v13846_v46  ;;  %v13850_v60 = vmax.f32 %v13818_v3, 0.0  ;;  %v13713_v47 = vld [vmem:[#allocation2 + $0x98] sm:$0xff] }
 0x883   : > { %13965 = vst [vmem:[%s16796_s5 + $0x38] sm:$0xff] %v15983_v44  ;;  %v13851_v11 = vmax.f32 %v13819_v4, 0.0  ;;  %v13822_v53 = vadd.f32 %v18956_v9, %v13706_v51  ;;  %v13852_v18 = vmax.f32 %v13820_v6, 0.0  ;;  %v13823_v42 = vadd.f32 %v18958_v10, %v13707_v37 }
 0x884   : > { %v15985_v41 = vpack.c.bf16 %v13849_v5, %v13848_v22  ;;  %v13853_v2 = vmax.f32 %v13821_v7, 0.0  ;;  %13966 = vst [vmem:[%s16796_s5 + $0x40] sm:$0xff] %v15984_v49  ;;  %v13824_v61 = vadd.f32 %v18960_v15, %v13708_v29  ;;  %v13825_v26 = vadd.f32 %v18962_v13, %v13709_v31 }
 0x885   : > { %v15986_v24 = vpack.c.bf16 %v13851_v11, %v13850_v60  ;;  %v13854_v25 = vmax.f32 %v13822_v53, 0.0  ;;  %v13855_v30 = vmax.f32 %v13823_v42, 0.0  ;;  %v13826_v32 = vadd.f32 %v18968_v21, %v13710_v14 }
 0x886   : > { %13967 = vst [vmem:[%s16796_s5 + $0x48] sm:$0xff] %v15985_v41  ;;  %v15987_v9 = vpack.c.bf16 %v13853_v2, %v13852_v18  ;;  %v13827_v56 = vadd.f32 %v18970_v8, %v13711_v17  ;;  %v13856_v10 = vmax.f32 %v13824_v61, 0.0  ;;  %v13857_v16 = vmax.f32 %v13825_v26, 0.0 }
 0x887   : > { %13968 = vst [vmem:[%s16796_s5 + $0x50] sm:$0xff] %v15986_v24  ;;  %v13828_v33 = vadd.f32 %v18976_v27, %v13712_v19  ;;  %v13829_v15 = vadd.f32 %v18978_v28, %v13713_v47  ;;  %v15988_v13 = vpack.c.bf16 %v13855_v30, %v13854_v25  ;;  %v13858_v38 = vmax.f32 %v13826_v32, 0.0 }
 0x888   : > { %13969 = vst [vmem:[%s16796_s5 + $0x58] sm:$0xff] %v15987_v9  ;;  %v13859_v39 = vmax.f32 %v13827_v56, 0.0  ;;  %v15989_v20 = vpack.c.bf16 %v13857_v16, %v13856_v10 }
 0x889   : > { %v13860_v36 = vmax.f32 %v13828_v33, 0.0  ;;  %v13861_v0 = vmax.f32 %v13829_v15, 0.0  ;;  %13970 = vst [vmem:[%s16796_s5 + $0x60] sm:$0xff] %v15988_v13 }
 0x88a   : > { %v15990_v21 = vpack.c.bf16 %v13859_v39, %v13858_v38  ;;  %13971 = vst [vmem:[%s16796_s5 + $0x68] sm:$0xff] %v15989_v20 }
 0x88b   : > { %v15991_v8 = vpack.c.bf16 %v13861_v0, %v13860_v36 }
 0x88c   : > { %13972 = vst [vmem:[%s16796_s5 + $0x70] sm:$0xff] %v15990_v21 }
 0x88d   : > { %13973 = vst [vmem:[%s16796_s5 + $0x78] sm:$0xff] %v15991_v8 }
 0x88e PF: > { %s19140_s18 = sld [smem:[#allocation16_spill]]  ;;  %s13991_s28 = sshll.u32 %s16796_s5, 4  ;;  %s19019_s28 = int_to_ptr.vmem [resolvable:$true] %s13991_s28 }
 0x88f   : > { %s19141_s15 = sld [smem:[#allocation24_spill]]  ;;  %s13975_s21 = scalar_lea.sflag [#allocation5], %s16786_s6 }
 0x890   : > { %s16346_s4 = scalar_lea.vmem %s19019_s28, 2048  ;;  %p19143_p0 = scmp.ne.s32.totalorder %s19132_s3, 0 }
 0x891   : > { %p16347_p7 = scmp.ne.s32.totalorder %s19019_s28, %s16346_s4  ;;  %s16510_s26 = smov [#allocation9]  }
 0x892   : > { %s16350_s2 = sshll.u32 %s16510_s26, 4  ;;  %s16351_s2 = int_to_ptr.vmem [resolvable:$false] %s16350_s2 }
 0x893   : > { %p16348_p12 = pnand %p16347_p7, %p19143_p0  ;;  %s16352_s17 = scalar_lea.vmem %s16351_s2, 4096 }
 0x894   : > { %s15992_s7 = sshll.u32 %s19140_s18, 10  ;;  %p16353_p5 = scmp.lt.s32.totalorder %s19019_s28, %s16351_s2 }
 0x895   : > { %s19142_s10 = smov %s19141_s15  ;;  %s19016_s30 = scalar_lea.hbm %s19141_s15, %s15992_s7 }
 0x896   : > { %p16349_p2 = pneg %p16348_p12  ;;  %p16354_p3 = scmp.lt.s32.totalorder %s16352_s17, %s16346_s4 }
 0x898   : > { %p16355_p10 = por %p16354_p3, %p16353_p5 }
 0x89a   : > { %p16356_p4 = pnand %p16355_p10, %p16349_p2 }
 0x89c   : > { %16359 = shalt.err (!%p16356_p4)
}
 0x89d   : > { %s16360_s29 = scalar_lea.hbm %s19016_s30, 2048  ;;  %s16364_s11 = scalar_lea.hbm %s19142_s10, 4096 }
 0x89e   : > { %p16361_p11 = scmp.ne.s32.totalorder %s19016_s30, %s16360_s29  ;;  %p16365_p6 = scmp.lt.s32.totalorder %s19016_s30, %s19142_s10 }
 0x89f   : > { %p16366_p9 = scmp.lt.s32.totalorder %s16364_s11, %s16360_s29 }
 0x8a0   : > { %p16362_p13 = pnand %p16361_p11, %p19143_p0 }
 0x8a1   : > { %p16367_p8 = por %p16366_p9, %p16365_p6 }
 0x8a2   : > { %p16363_p1 = pneg %p16362_p13 }
 0x8a4   : > { %p16368_p7 = pnand %p16367_p8, %p16363_p1 }
 0x8a6   : > { %16371 = shalt.err (!%p16368_p7)
}
 0x8a7   : > { %s16511_s7 = smov 1024   ;;  %s16512_s0 = smov 2048  }
 0x8a8   : > { %s16513_s23 = smov 64  }
 0x8a9   : > { %16003 = dma.vmem_to_hbm [thread:$0]  (%p19143_p0), %s19019_s28, 2048, %s19016_s30, %s13975_s21, %s16511_s7, %s16512_s0, %s16513_s23  }
 0x8aa PF: > { %p16020_p12 = scmp.ge.s32.totalorder %s16498_s25, 2  ;;  %s14006_s15 = sand.u32 1, %s16446_s12  }
 0x8ab   : > { %p19144_p2 = scmp.ne.s32.totalorder %s19134_s1, 0  ;;  %s14007_s4 = scalar_lea.sflag [#allocation5], %s14006_s15 }
 0x8ad   : > { %p16016_p5 = pnand %p16020_p12, %p19144_p2 }
 0x8af   : > { %p16017_p3 = pneg %p16016_p5 }
 0x8b1   : > { %16441 = dma.done.wait (%p16017_p3), %s14007_s4, 2048  }
 0x8b2   : > { %16443 = vsyncadd (%p16017_p3), %s14007_s4, 4294965248  ;;  %s22_s25 = sadd.s32 1, %s16498_s25   ;;  %s19146_s3 = sld [smem:[#allocation14_spill]] }
 0x8b3   : > { %p19049_p10 = scmp.ge.s32.totalorder %s22_s25, 30   ;;  %s19147_s1 = sld [smem:[#allocation19_spill]] }
 0x8b4   : > { %s19148_s21 = sld [smem:[#allocation17_spill]]  ;;  %s19151_s12 = smov %s16450_s13 }
 0x8b5   : > { %s19149_s23 = sld [smem:[#allocation18_spill]]  ;;  %s19152_s13 = smov %s16454_s14 }
 0x8b6   : > { %s19150_s6 = sld [smem:[#allocation20_spill]]  ;;  %s19153_s14 = smov %s16736_s8 }
 0x8b7   : > { %s19154_s15 = smov %s16462_s16  ;;  %s19156_s17 = smov %s19169_s27 }
 0x8b8   : > { %s19155_s16 = smov %s19146_s3  ;;  %s19157_s18 = smov %s16474_s19 }
 0x8b9   : > { %s19158_s19 = smov %s16478_s20  ;;  %s19159_s20 = smov %s19147_s1 }
 0x8ba   : > { %s19160_s22 = smov %s16494_s24  ;;  %21 = sbr.rel (!%p19049_p10) target bundleno = 17 (0x11), region = 109 }
 0x8bc   : > { %s19161_s24 = smov %s19150_s6 }
 0x8bf   :  { %14012 = vsyncpa [#allocation4], 1 }
 0x8c0   :  { %14014 = vsyncpa [#allocation4 + $0x1], 1 }
 0x8c1   :  { %14015 = vsyncpa [#allocation7], 1 }
 0x8c2   :  { %14017 = vsyncpa [#allocation7 + $0x1], 1 }
 0x8c3   :  { %14018 = vsyncpa [#allocation5], 1 }
 0x8c4   :  { %14020 = vsyncpa [#allocation5 + $0x1], 1 }

</bundles_post_ra>
